<compile_context>
chip_gen: v7x
topology: tpu7x:2x2x1
jax: 0.10.0
libtpu: 0.0.40
codegen_flags: <defaults>
</compile_context>

<pallas_src>
import functools

import numpy as np
import jax
import jax.numpy as jnp
from jax.experimental import pallas as pl
from jax.experimental.pallas import tpu as pltpu


CONV_CFG = [
    # (cin, cout, kernel, padding)
    (1, 4, 5, 1),
    (4, 8, 5, 1),
    (8, 16, 3, 0),
    (16, 32, 3, 0),
    (32, 64, 2, 0),
]
SPATIAL = 11     # input side; conv stack ends at 2x2x2x64 = 512 (matches view(-1, 512))
BATCH = 2
CONV_DTYPE = jnp.bfloat16   # conv weights + matmul LHS; accumulation stays f32


def _round_up(x, m):
    return ((x + m - 1) // m) * m


# ----------------------------------------------------------------------------
# Static per-layer geometry
# ----------------------------------------------------------------------------
def _layer_meta():
    metas = []
    side = SPATIAL
    pads = [cfg[3] for cfg in CONV_CFG] + [0]
    for idx, (cin, cout, k, pad) in enumerate(CONV_CFG):
        d_out = side + 2 * pad - k + 1
        lin, lout = side * side * cin, d_out * d_out * cout
        metas.append(dict(
            k=k, pad=pad, side_in=side, d_out=d_out,
            r_in=side + 2 * pad,               # stored input depth rows (D-padded)
            r_out=d_out + 2 * pads[idx + 1],   # stored output depth rows (pre-padded for next conv)
            off=pads[idx + 1],                 # first real output depth row
            lin=lin, lout=lout,
            lin_p=_round_up(lin, 128), lout_p=_round_up(lout, 128)))
        side = d_out
    assert metas[-1]["d_out"] == 2 and metas[-1]["lout"] == 256  # 2 rows * 256 = 512
    return metas


# ----------------------------------------------------------------------------
# One-time host-side weight prepacking
# ----------------------------------------------------------------------------
def _conv_toeplitz(w, side_in, pad):
    """(Cout,Cin,k,k,k) torch weight -> (k, Hin*Win*Cin, Hout*Wout*Cout) block-
    Toeplitz matrices (one per depth tap kd), with H/W zero-padding folded in."""
    w = np.asarray(w, np.float32)
    co, ci, k = w.shape[0], w.shape[1], w.shape[2]
    side_out = side_in + 2 * pad - k + 1
    off = np.arange(side_in)[:, None] - np.arange(side_out)[None, :] + pad
    mask = (off >= 0) & (off < k)
    idx = np.clip(off, 0, k - 1)
    wt = np.transpose(w, (2, 3, 4, 1, 0))            # (kd, kh, kw, ci, co)
    t = wt[:, idx][:, :, :, idx]                     # (kd, Hi, Ho, Wi, Wo, ci, co)
    t = t * mask[None, :, :, None, None, None, None]
    t = t * mask[None, None, None, :, :, None, None]
    t = np.transpose(t, (0, 1, 3, 5, 2, 4, 6))       # (kd, hi, wi, ci, ho, wo, co)
    return t.reshape(k, side_in * side_in * ci, side_out * side_out * co)


def prepare_weights(params, metas):
    """Returns (conv_B, conv_bias, lin).  conv_B[i] is the k-tap-fused,
    lane-padded, bf16 block-Toeplitz slab of shape (k*lin_p, lout_p)."""
    conv_B, conv_bias = [], []
    for li, (meta, (cin, cout, k, pad)) in enumerate(zip(metas, CONV_CFG), 1):
        b = _conv_toeplitz(params[f"conv{li}_w"], meta["side_in"], pad)
        bp = np.zeros((k, meta["lin_p"], meta["lout_p"]), np.float32)
        bp[:, :meta["lin"], :meta["lout"]] = b
        # Fuse the k depth taps into a single K = k*lin_p matmul operand.
        bp = bp.reshape(k * meta["lin_p"], meta["lout_p"])
        conv_B.append(jnp.asarray(bp, CONV_DTYPE))
        brow = np.zeros((1, meta["lout_p"]), np.float32)
        brow[0, :meta["lout"]] = np.tile(np.asarray(params[f"conv{li}_b"]),
                                         meta["d_out"] * meta["d_out"])
        conv_bias.append(jnp.asarray(brow))
    # linear1: absorb torch's channel-major view(-1, 512) of the NCDHW conv5
    # output into weights permuted to the kernel's (d ; h,w,c) activation layout.
    w1 = np.asarray(params["linear1_w"], np.float32).reshape(128, 64, 2, 2, 2)
    w1p = np.transpose(w1, (2, 3, 4, 1, 0)).reshape(2, 2 * 2 * 64, 128)
    b1 = np.asarray(params["linear1_b"], np.float32).reshape(1, 128)
    # linear2: pad its single output column out to a full 128-lane tile.
    w2p = np.zeros((128, 128), np.float32)
    w2p[:, 0] = np.asarray(params["linear2_w"], np.float32)[0]
    b2 = np.zeros((1, 128), np.float32)
    b2[0, 0] = float(np.asarray(params["linear2_b"])[0])
    lin = [jnp.asarray(w1p), jnp.asarray(b1), jnp.asarray(w2p), jnp.asarray(b2)]
    return conv_B, conv_bias, lin


# ----------------------------------------------------------------------------
# Fused Pallas kernel
# ----------------------------------------------------------------------------
def _make_kernel(batch, metas):
    n_conv = len(metas)
    n = batch

    def kernel(*refs):
        it = iter(refs)
        x_ref = next(it)
        conv_B = [next(it) for _ in range(n_conv)]    # [0] in VMEM, [1:] raw HBM refs
        conv_b = [next(it) for _ in range(n_conv)]
        w1_ref, b1_ref, w2_ref, b2_ref = (next(it) for _ in range(4))
        o_ref = next(it)
        acts = [next(it) for _ in range(n_conv)]      # f32 activation buffers
        lhss = [next(it) for _ in range(n_conv)]      # bf16 gathered-LHS buffers
        wbufs = [next(it) for _ in range(n_conv - 1)]  # VMEM staging for conv2..5 weights
        sem = next(it)

        # Kick off HBM->VMEM streaming of the later conv weight slabs so their
        # DMA overlaps the earlier layers' compute.
        copies = []
        for i in range(n_conv - 1):
            cp = pltpu.make_async_copy(conv_B[i + 1], wbufs[i], sem.at[i])
            cp.start()
            copies.append(cp)

        x_in = x_ref
        for li, m in enumerate(metas):
            if li == 0:
                w_ref = conv_B[0]
            else:
                copies[li - 1].wait()
                w_ref = wbufs[li - 1]
            lhs = lhss[li]
            y = acts[li]
            rows = m["d_out"] * n

            # Gather the k shifted depth windows side by side (bf16 cast here):
            # rows are depth-major/sample-minor, so one contiguous slice per tap
            # covers the whole batch.
            for kd in range(m["k"]):
                lhs[:, kd * m["lin_p"]:(kd + 1) * m["lin_p"]] = (
                    x_in[kd * n:(kd + m["d_out"]) * n, :].astype(CONV_DTYPE))

            acc = jnp.dot(lhs[...], w_ref[...],
                          preferred_element_type=jnp.float32)
            dst = m["off"] * n
            y[dst:dst + rows, :] = jnp.maximum(acc + conv_b[li][...], 0.0)

            # Zero only the depth-padding rows the next layer reads (conv1 only;
            # conv2..5 have r_out == d_out).  Padded lanes inside real rows are
            # produced as exact zeros by the matmul (B's padded columns are 0).
            if m["off"] > 0:
                bot = dst + rows
                tot = m["r_out"] * n
                y[0:dst, :] = jnp.zeros((dst, m["lout_p"]), jnp.float32)
                y[bot:tot, :] = jnp.zeros((tot - bot, m["lout_p"]), jnp.float32)
            x_in = y

        # Batched linear head: conv5 output is 2 depth rows per sample
        # (depth-major), columns (h,w,c) already matched to the permuted w1.
        z = b1_ref[...] + jnp.dot(x_in[0:n, :], w1_ref[0],
                                  preferred_element_type=jnp.float32)
        z = z + jnp.dot(x_in[n:2 * n, :], w1_ref[1],
                        preferred_element_type=jnp.float32)
        z = jnp.maximum(z, 0.0)
        out = jnp.dot(z, w2_ref[...],
                      preferred_element_type=jnp.float32) + b2_ref[...]
        o_ref[...] = 1.0 / (1.0 + jnp.exp(-out))      # lane-dense (N,128) store

    return kernel


def em3d_forward(x_ncdhw, conv_B, conv_bias, lin, *, metas):
    n, c, d, h, w = x_ncdhw.shape
    m0 = metas[0]
    n_conv = len(metas)
    pad0 = m0["pad"]

    # Physical D-padding + depth-major / sample-minor flatten: row = depth*N + n,
    # columns = (h, w, c) with c fastest; lane-pad columns to lin_p.
    xp = jnp.pad(x_ncdhw, ((0, 0), (0, 0), (pad0, pad0), (0, 0), (0, 0)))
    x2d = jnp.transpose(xp, (2, 0, 3, 4, 1)).reshape(m0["r_in"] * n, h * w * c)
    x2d = jnp.pad(x2d, ((0, 0), (0, m0["lin_p"] - h * w * c)))

    flops = sum(2 * (m["d_out"] * n) * (m["k"] * m["lin_p"]) * m["lout_p"]
                for m in metas) + 2 * n * (2 * 256 * 128 + 128 * 128)
    bytes_in = (x2d.size * x2d.dtype.itemsize
                + sum(int(np.prod(a.shape)) * a.dtype.itemsize
                      for a in list(conv_B) + list(conv_bias) + list(lin)))
    cost = pl.CostEstimate(flops=int(flops), transcendentals=int(n * 128),
                           bytes_accessed=int(bytes_in + n * 128 * 4))

    vmem_space = pltpu.MemorySpace.VMEM
    in_specs = ([pl.BlockSpec(memory_space=vmem_space)]            # x2d
                + [pl.BlockSpec(memory_space=vmem_space)]          # conv1 weights
                + [pl.BlockSpec(memory_space=pl.ANY)] * (n_conv - 1)   # conv2..5 weights (HBM)
                + [pl.BlockSpec(memory_space=vmem_space)] * n_conv     # conv biases
                + [pl.BlockSpec(memory_space=vmem_space)] * 4)         # linear head

    scratch_shapes = (
        [pltpu.VMEM((m["r_out"] * n, m["lout_p"]), jnp.float32) for m in metas]
        + [pltpu.VMEM((m["d_out"] * n, m["k"] * m["lin_p"]), CONV_DTYPE)
           for m in metas]
        + [pltpu.VMEM(conv_B[i].shape, CONV_DTYPE) for i in range(1, n_conv)]
        + [pltpu.SemaphoreType.DMA((n_conv - 1,))]
    )

    out = pl.pallas_call(
        _make_kernel(n, metas),
        out_shape=jax.ShapeDtypeStruct((n, 128), jnp.float32),
        in_specs=in_specs,
        out_specs=pl.BlockSpec(memory_space=vmem_space),
        scratch_shapes=scratch_shapes,
        compiler_params=pltpu.CompilerParams(
            vmem_limit_bytes=24 * 1024 * 1024),   # actual footprint ~6 MB
        cost_estimate=cost,
    )(x2d, *conv_B, *conv_bias, *lin)
    return out[:, :1]


# ----------------------------------------------------------------------------
# Deterministic synthetic parameters + pure-JAX reference
# ----------------------------------------------------------------------------
def init_params(key):
    params = {}
    keys = jax.random.split(key, 2 * len(CONV_CFG) + 4)
    ki = 0
    for li, (cin, cout, k, _) in enumerate(CONV_CFG, start=1):
        scale = 1.0 / np.sqrt(cin * k ** 3)
        params[f"conv{li}_w"] = scale * jax.random.normal(
            keys[ki], (cout, cin, k, k, k), jnp.float32); ki += 1
        params[f"conv{li}_b"] = scale * jax.random.normal(
            keys[ki], (cout,), jnp.float32); ki += 1
    params["linear1_w"] = (1.0 / np.sqrt(512)) * jax.random.normal(
        keys[ki], (128, 512), jnp.float32); ki += 1
    params["linear1_b"] = (1.0 / np.sqrt(512)) * jax.random.normal(
        keys[ki], (128,), jnp.float32); ki += 1
    params["linear2_w"] = (1.0 / np.sqrt(128)) * jax.random.normal(
        keys[ki], (1, 128), jnp.float32); ki += 1
    params["linear2_b"] = (1.0 / np.sqrt(128)) * jax.random.normal(
        keys[ki], (1,), jnp.float32); ki += 1
    return params


def ref_forward(x, params):
    y = x
    for li, (cin, cout, k, pad) in enumerate(CONV_CFG, 1):
        wgt = params[f"conv{li}_w"]
        b = params[f"conv{li}_b"]
        y = jax.lax.conv_general_dilated(
            y, wgt, window_strides=(1, 1, 1), padding=[(pad, pad)] * 3,
            dimension_numbers=("NCDHW", "OIDHW", "NCDHW"),
            precision=jax.lax.Precision.HIGHEST)
        y = jnp.maximum(y + b[None, :, None, None, None], 0.0)
    v = y.reshape(y.shape[0], -1)                     # == torch x.view(-1, 512)
    z = jnp.maximum(
        jnp.dot(v, params["linear1_w"].T,
                precision=jax.lax.Precision.HIGHEST) + params["linear1_b"], 0.0)
    o = jnp.dot(z, params["linear2_w"].T,
                precision=jax.lax.Precision.HIGHEST) + params["linear2_b"]
    return jax.nn.sigmoid(o)


if __name__ == "__main__":
    key = jax.random.PRNGKey(0)
    pkey, xkey = jax.random.split(key)
    params = init_params(pkey)

    metas = _layer_meta()
    conv_B, conv_bias, lin = prepare_weights(params, metas)   # one-time prepack

    # Spatial extent 11 so the conv stack ends at 2x2x2x64 == 512.
    x = jax.random.normal(xkey, (BATCH, 1, SPATIAL, SPATIAL, SPATIAL),
                          jnp.float32)

    fwd = jax.jit(functools.partial(em3d_forward, metas=metas))
    out = jax.block_until_ready(fwd(x, conv_B, conv_bias, lin))
    assert out.shape == (BATCH, 1)

    ref = ref_forward(x, params)
    # Tolerance sized for bf16 conv weights/activations vs. the f32 reference
    # (measured error is O(1e-3) on the sigmoid output; layout/semantics bugs
    # would be O(0.1+)).
    np.testing.assert_allclose(np.asarray(out), np.asarray(ref),
                               rtol=3e-2, atol=3e-2)
    print("KERNEL_OK")
</pallas_src>

<mosaic_0001>
module attributes {stable_mosaic.version = 11 : i64} {
  func.func @kernel(%arg0: memref<26x128xf32, #tpu.memory_space<vmem>>, %arg1: memref<640x384xbf16, #tpu.memory_space<vmem>>, %arg2: memref<1920x512xbf16, #tpu.memory_space<any>>, %arg3: memref<1536x512xbf16, #tpu.memory_space<any>>, %arg4: memref<1536x384xbf16, #tpu.memory_space<any>>, %arg5: memref<768x256xbf16, #tpu.memory_space<any>>, %arg6: memref<1x384xf32, #tpu.memory_space<vmem>>, %arg7: memref<1x512xf32, #tpu.memory_space<vmem>>, %arg8: memref<1x512xf32, #tpu.memory_space<vmem>>, %arg9: memref<1x384xf32, #tpu.memory_space<vmem>>, %arg10: memref<1x256xf32, #tpu.memory_space<vmem>>, %arg11: memref<2x256x128xf32, #tpu.memory_space<vmem>>, %arg12: memref<1x128xf32, #tpu.memory_space<vmem>>, %arg13: memref<128x128xf32, #tpu.memory_space<vmem>>, %arg14: memref<1x128xf32, #tpu.memory_space<vmem>>, %arg15: memref<2x128xf32, #tpu.memory_space<vmem>>, %arg16: memref<22x384xf32, #tpu.memory_space<vmem>>, %arg17: memref<14x512xf32, #tpu.memory_space<vmem>>, %arg18: memref<10x512xf32, #tpu.memory_space<vmem>>, %arg19: memref<6x384xf32, #tpu.memory_space<vmem>>, %arg20: memref<4x256xf32, #tpu.memory_space<vmem>>, %arg21: memref<18x640xbf16, #tpu.memory_space<vmem>>, %arg22: memref<14x1920xbf16, #tpu.memory_space<vmem>>, %arg23: memref<10x1536xbf16, #tpu.memory_space<vmem>>, %arg24: memref<6x1536xbf16, #tpu.memory_space<vmem>>, %arg25: memref<4x768xbf16, #tpu.memory_space<vmem>>, %arg26: memref<1920x512xbf16, #tpu.memory_space<vmem>>, %arg27: memref<1536x512xbf16, #tpu.memory_space<vmem>>, %arg28: memref<1536x384xbf16, #tpu.memory_space<vmem>>, %arg29: memref<768x256xbf16, #tpu.memory_space<vmem>>, %arg30: memref<4x!tpu.dma_semaphore, #tpu.memory_space<semaphore_mem>>) attributes {dimension_semantics = [], scalar_prefetch = 0 : i64, scratch_operands = 15 : i64, tpu.core_type = #tpu.core_type<tc>} {
    %c0_i32 = arith.constant 0 : i32
    %0 = tpu.memref_slice %arg30[%c0_i32] : memref<4x!tpu.dma_semaphore, #tpu.memory_space<semaphore_mem>> -> memref<1x!tpu.dma_semaphore, #tpu.memory_space<semaphore_mem>>
    %1 = tpu.memref_squeeze %0 : memref<1x!tpu.dma_semaphore, #tpu.memory_space<semaphore_mem>> -> memref<!tpu.dma_semaphore, #tpu.memory_space<semaphore_mem>>
    tpu.enqueue_dma source(%arg2 : memref<1920x512xbf16, #tpu.memory_space<any>>) target(%arg26 : memref<1920x512xbf16, #tpu.memory_space<vmem>>) target_semaphore(%1 : memref<!tpu.dma_semaphore, #tpu.memory_space<semaphore_mem>>)
    %c1_i32 = arith.constant 1 : i32
    %2 = tpu.memref_slice %arg30[%c1_i32] : memref<4x!tpu.dma_semaphore, #tpu.memory_space<semaphore_mem>> -> memref<1x!tpu.dma_semaphore, #tpu.memory_space<semaphore_mem>>
    %3 = tpu.memref_squeeze %2 : memref<1x!tpu.dma_semaphore, #tpu.memory_space<semaphore_mem>> -> memref<!tpu.dma_semaphore, #tpu.memory_space<semaphore_mem>>
    tpu.enqueue_dma source(%arg3 : memref<1536x512xbf16, #tpu.memory_space<any>>) target(%arg27 : memref<1536x512xbf16, #tpu.memory_space<vmem>>) target_semaphore(%3 : memref<!tpu.dma_semaphore, #tpu.memory_space<semaphore_mem>>)
    %c2_i32 = arith.constant 2 : i32
    %4 = tpu.memref_slice %arg30[%c2_i32] : memref<4x!tpu.dma_semaphore, #tpu.memory_space<semaphore_mem>> -> memref<1x!tpu.dma_semaphore, #tpu.memory_space<semaphore_mem>>
    %5 = tpu.memref_squeeze %4 : memref<1x!tpu.dma_semaphore, #tpu.memory_space<semaphore_mem>> -> memref<!tpu.dma_semaphore, #tpu.memory_space<semaphore_mem>>
    tpu.enqueue_dma source(%arg4 : memref<1536x384xbf16, #tpu.memory_space<any>>) target(%arg28 : memref<1536x384xbf16, #tpu.memory_space<vmem>>) target_semaphore(%5 : memref<!tpu.dma_semaphore, #tpu.memory_space<semaphore_mem>>)
    %c3_i32 = arith.constant 3 : i32
    %6 = tpu.memref_slice %arg30[%c3_i32] : memref<4x!tpu.dma_semaphore, #tpu.memory_space<semaphore_mem>> -> memref<1x!tpu.dma_semaphore, #tpu.memory_space<semaphore_mem>>
    %7 = tpu.memref_squeeze %6 : memref<1x!tpu.dma_semaphore, #tpu.memory_space<semaphore_mem>> -> memref<!tpu.dma_semaphore, #tpu.memory_space<semaphore_mem>>
    tpu.enqueue_dma source(%arg5 : memref<768x256xbf16, #tpu.memory_space<any>>) target(%arg29 : memref<768x256xbf16, #tpu.memory_space<vmem>>) target_semaphore(%7 : memref<!tpu.dma_semaphore, #tpu.memory_space<semaphore_mem>>)
    %c0 = arith.constant 0 : index
    %c0_0 = arith.constant 0 : index
    %8 = vector.load %arg0[%c0, %c0_0] : memref<26x128xf32, #tpu.memory_space<vmem>>, vector<18x128xf32>
    %9 = arith.truncf %8 : vector<18x128xf32> to vector<18x128xbf16>
    %c0_1 = arith.constant 0 : index
    %c0_2 = arith.constant 0 : index
    %10 = vector.load %arg21[%c0_1, %c0_2] : memref<18x640xbf16, #tpu.memory_space<vmem>>, vector<18x128xbf16>
    tpu.vector_store %arg21[%c0_1, %c0_2], %9 {strides = array<i32>} : memref<18x640xbf16, #tpu.memory_space<vmem>>, vector<18x128xbf16>,
    %c2 = arith.constant 2 : index
    %c0_3 = arith.constant 0 : index
    %11 = vector.load %arg0[%c2, %c0_3] : memref<26x128xf32, #tpu.memory_space<vmem>>, vector<18x128xf32>
    %12 = arith.truncf %11 : vector<18x128xf32> to vector<18x128xbf16>
    %c0_4 = arith.constant 0 : index
    %c128 = arith.constant 128 : index
    %13 = vector.load %arg21[%c0_4, %c128] : memref<18x640xbf16, #tpu.memory_space<vmem>>, vector<18x128xbf16>
    tpu.vector_store %arg21[%c0_4, %c128], %12 {strides = array<i32>} : memref<18x640xbf16, #tpu.memory_space<vmem>>, vector<18x128xbf16>,
    %c4 = arith.constant 4 : index
    %c0_5 = arith.constant 0 : index
    %14 = vector.load %arg0[%c4, %c0_5] : memref<26x128xf32, #tpu.memory_space<vmem>>, vector<18x128xf32>
    %15 = arith.truncf %14 : vector<18x128xf32> to vector<18x128xbf16>
    %c0_6 = arith.constant 0 : index
    %c256 = arith.constant 256 : index
    %16 = vector.load %arg21[%c0_6, %c256] : memref<18x640xbf16, #tpu.memory_space<vmem>>, vector<18x128xbf16>
    tpu.vector_store %arg21[%c0_6, %c256], %15 {strides = array<i32>} : memref<18x640xbf16, #tpu.memory_space<vmem>>, vector<18x128xbf16>,
    %c6 = arith.constant 6 : index
    %c0_7 = arith.constant 0 : index
    %17 = vector.load %arg0[%c6, %c0_7] : memref<26x128xf32, #tpu.memory_space<vmem>>, vector<18x128xf32>
    %18 = arith.truncf %17 : vector<18x128xf32> to vector<18x128xbf16>
    %c0_8 = arith.constant 0 : index
    %c384 = arith.constant 384 : index
    %19 = vector.load %arg21[%c0_8, %c384] : memref<18x640xbf16, #tpu.memory_space<vmem>>, vector<18x128xbf16>
    tpu.vector_store %arg21[%c0_8, %c384], %18 {strides = array<i32>} : memref<18x640xbf16, #tpu.memory_space<vmem>>, vector<18x128xbf16>,
    %c8 = arith.constant 8 : index
    %c0_9 = arith.constant 0 : index
    %20 = vector.load %arg0[%c8, %c0_9] : memref<26x128xf32, #tpu.memory_space<vmem>>, vector<18x128xf32>
    %21 = arith.truncf %20 : vector<18x128xf32> to vector<18x128xbf16>
    %c0_10 = arith.constant 0 : index
    %c512 = arith.constant 512 : index
    %22 = vector.load %arg21[%c0_10, %c512] : memref<18x640xbf16, #tpu.memory_space<vmem>>, vector<18x128xbf16>
    tpu.vector_store %arg21[%c0_10, %c512], %21 {strides = array<i32>} : memref<18x640xbf16, #tpu.memory_space<vmem>>, vector<18x128xbf16>,
    %c0_11 = arith.constant 0 : index
    %c0_12 = arith.constant 0 : index
    %23 = vector.load %arg21[%c0_11, %c0_12] : memref<18x640xbf16, #tpu.memory_space<vmem>>, vector<18x640xbf16>
    %c0_13 = arith.constant 0 : index
    %c0_14 = arith.constant 0 : index
    %24 = vector.load %arg1[%c0_13, %c0_14] : memref<640x384xbf16, #tpu.memory_space<vmem>>, vector<640x384xbf16>
    %cst = arith.constant dense<0.000000e+00> : vector<18x384xf32>
    %25 = tpu.matmul %23, %24, %cst {dimension_numbers = #tpu.dot_dimension_numbers<[1], [0], [0], [1], [0, 0, 1, 1], [], []>} : vector<18x640xbf16>, vector<640x384xbf16>, vector<18x384xf32> -> vector<18x384xf32>
    %c0_15 = arith.constant 0 : index
    %c0_16 = arith.constant 0 : index
    %26 = vector.load %arg6[%c0_15, %c0_16] : memref<1x384xf32, #tpu.memory_space<vmem>>, vector<1x384xf32>
    %27 = vector.broadcast %26 : vector<1x384xf32> to vector<18x384xf32>
    %28 = arith.addf %25, %27 : vector<18x384xf32>
    %cst_17 = arith.constant 0.000000e+00 : f32
    %29 = vector.broadcast %cst_17 : f32 to vector<18x384xf32>
    %30 = arith.maximumf %28, %29 : vector<18x384xf32>
    %c2_18 = arith.constant 2 : index
    %c0_19 = arith.constant 0 : index
    %31 = vector.load %arg16[%c2_18, %c0_19] : memref<22x384xf32, #tpu.memory_space<vmem>>, vector<18x384xf32>
    tpu.vector_store %arg16[%c2_18, %c0_19], %30 {strides = array<i32>} : memref<22x384xf32, #tpu.memory_space<vmem>>, vector<18x384xf32>,
    %cst_20 = arith.constant 0.000000e+00 : f32
    %32 = vector.broadcast %cst_20 : f32 to vector<2x384xf32>
    %c0_21 = arith.constant 0 : index
    %c0_22 = arith.constant 0 : index
    %33 = vector.load %arg16[%c0_21, %c0_22] : memref<22x384xf32, #tpu.memory_space<vmem>>, vector<2x384xf32>
    tpu.vector_store %arg16[%c0_21, %c0_22], %32 {strides = array<i32>} : memref<22x384xf32, #tpu.memory_space<vmem>>, vector<2x384xf32>,
    %cst_23 = arith.constant 0.000000e+00 : f32
    %34 = vector.broadcast %cst_23 : f32 to vector<2x384xf32>
    %c20 = arith.constant 20 : index
    %c0_24 = arith.constant 0 : index
    %35 = vector.load %arg16[%c20, %c0_24] : memref<22x384xf32, #tpu.memory_space<vmem>>, vector<2x384xf32>
    tpu.vector_store %arg16[%c20, %c0_24], %34 {strides = array<i32>} : memref<22x384xf32, #tpu.memory_space<vmem>>, vector<2x384xf32>,
    %c0_i32_25 = arith.constant 0 : i32
    %36 = tpu.memref_slice %arg30[%c0_i32_25] : memref<4x!tpu.dma_semaphore, #tpu.memory_space<semaphore_mem>> -> memref<1x!tpu.dma_semaphore, #tpu.memory_space<semaphore_mem>>
    %37 = tpu.memref_squeeze %36 : memref<1x!tpu.dma_semaphore, #tpu.memory_space<semaphore_mem>> -> memref<!tpu.dma_semaphore, #tpu.memory_space<semaphore_mem>>
    tpu.wait_dma2 semaphore(%37 : memref<!tpu.dma_semaphore, #tpu.memory_space<semaphore_mem>>) src(%arg2 : memref<1920x512xbf16, #tpu.memory_space<any>>) dst(%arg26 : memref<1920x512xbf16, #tpu.memory_space<vmem>>)
    %c0_26 = arith.constant 0 : index
    %c0_27 = arith.constant 0 : index
    %38 = vector.load %arg16[%c0_26, %c0_27] : memref<22x384xf32, #tpu.memory_space<vmem>>, vector<14x384xf32>
    %39 = arith.truncf %38 : vector<14x384xf32> to vector<14x384xbf16>
    %c0_28 = arith.constant 0 : index
    %c0_29 = arith.constant 0 : index
    %40 = vector.load %arg22[%c0_28, %c0_29] : memref<14x1920xbf16, #tpu.memory_space<vmem>>, vector<14x384xbf16>
    tpu.vector_store %arg22[%c0_28, %c0_29], %39 {strides = array<i32>} : memref<14x1920xbf16, #tpu.memory_space<vmem>>, vector<14x384xbf16>,
    %c2_30 = arith.constant 2 : index
    %c0_31 = arith.constant 0 : index
    %41 = vector.load %arg16[%c2_30, %c0_31] : memref<22x384xf32, #tpu.memory_space<vmem>>, vector<14x384xf32>
    %42 = arith.truncf %41 : vector<14x384xf32> to vector<14x384xbf16>
    %c0_32 = arith.constant 0 : index
    %c384_33 = arith.constant 384 : index
    %43 = vector.load %arg22[%c0_32, %c384_33] : memref<14x1920xbf16, #tpu.memory_space<vmem>>, vector<14x384xbf16>
    tpu.vector_store %arg22[%c0_32, %c384_33], %42 {strides = array<i32>} : memref<14x1920xbf16, #tpu.memory_space<vmem>>, vector<14x384xbf16>,
    %c4_34 = arith.constant 4 : index
    %c0_35 = arith.constant 0 : index
    %44 = vector.load %arg16[%c4_34, %c0_35] : memref<22x384xf32, #tpu.memory_space<vmem>>, vector<14x384xf32>
    %45 = arith.truncf %44 : vector<14x384xf32> to vector<14x384xbf16>
    %c0_36 = arith.constant 0 : index
    %c768 = arith.constant 768 : index
    %46 = vector.load %arg22[%c0_36, %c768] : memref<14x1920xbf16, #tpu.memory_space<vmem>>, vector<14x384xbf16>
    tpu.vector_store %arg22[%c0_36, %c768], %45 {strides = array<i32>} : memref<14x1920xbf16, #tpu.memory_space<vmem>>, vector<14x384xbf16>,
    %c6_37 = arith.constant 6 : index
    %c0_38 = arith.constant 0 : index
    %47 = vector.load %arg16[%c6_37, %c0_38] : memref<22x384xf32, #tpu.memory_space<vmem>>, vector<14x384xf32>
    %48 = arith.truncf %47 : vector<14x384xf32> to vector<14x384xbf16>
    %c0_39 = arith.constant 0 : index
    %c1152 = arith.constant 1152 : index
    %49 = vector.load %arg22[%c0_39, %c1152] : memref<14x1920xbf16, #tpu.memory_space<vmem>>, vector<14x384xbf16>
    tpu.vector_store %arg22[%c0_39, %c1152], %48 {strides = array<i32>} : memref<14x1920xbf16, #tpu.memory_space<vmem>>, vector<14x384xbf16>,
    %c8_40 = arith.constant 8 : index
    %c0_41 = arith.constant 0 : index
    %50 = vector.load %arg16[%c8_40, %c0_41] : memref<22x384xf32, #tpu.memory_space<vmem>>, vector<14x384xf32>
    %51 = arith.truncf %50 : vector<14x384xf32> to vector<14x384xbf16>
    %c0_42 = arith.constant 0 : index
    %c1536 = arith.constant 1536 : index
    %52 = vector.load %arg22[%c0_42, %c1536] : memref<14x1920xbf16, #tpu.memory_space<vmem>>, vector<14x384xbf16>
    tpu.vector_store %arg22[%c0_42, %c1536], %51 {strides = array<i32>} : memref<14x1920xbf16, #tpu.memory_space<vmem>>, vector<14x384xbf16>,
    %c0_43 = arith.constant 0 : index
    %c0_44 = arith.constant 0 : index
    %53 = vector.load %arg22[%c0_43, %c0_44] : memref<14x1920xbf16, #tpu.memory_space<vmem>>, vector<14x1920xbf16>
    %c0_45 = arith.constant 0 : index
    %c0_46 = arith.constant 0 : index
    %54 = vector.load %arg26[%c0_45, %c0_46] : memref<1920x512xbf16, #tpu.memory_space<vmem>>, vector<1920x512xbf16>
    %cst_47 = arith.constant dense<0.000000e+00> : vector<14x512xf32>
    %55 = tpu.matmul %53, %54, %cst_47 {dimension_numbers = #tpu.dot_dimension_numbers<[1], [0], [0], [1], [0, 0, 1, 1], [], []>} : vector<14x1920xbf16>, vector<1920x512xbf16>, vector<14x512xf32> -> vector<14x512xf32>
    %c0_48 = arith.constant 0 : index
    %c0_49 = arith.constant 0 : index
    %56 = vector.load %arg7[%c0_48, %c0_49] : memref<1x512xf32, #tpu.memory_space<vmem>>, vector<1x512xf32>
    %57 = vector.broadcast %56 : vector<1x512xf32> to vector<14x512xf32>
    %58 = arith.addf %55, %57 : vector<14x512xf32>
    %cst_50 = arith.constant 0.000000e+00 : f32
    %59 = vector.broadcast %cst_50 : f32 to vector<14x512xf32>
    %60 = arith.maximumf %58, %59 : vector<14x512xf32>
    %c0_51 = arith.constant 0 : index
    %c0_52 = arith.constant 0 : index
    %61 = vector.load %arg17[%c0_51, %c0_52] : memref<14x512xf32, #tpu.memory_space<vmem>>, vector<14x512xf32>
    tpu.vector_store %arg17[%c0_51, %c0_52], %60 {strides = array<i32>} : memref<14x512xf32, #tpu.memory_space<vmem>>, vector<14x512xf32>,
    %c1_i32_53 = arith.constant 1 : i32
    %62 = tpu.memref_slice %arg30[%c1_i32_53] : memref<4x!tpu.dma_semaphore, #tpu.memory_space<semaphore_mem>> -> memref<1x!tpu.dma_semaphore, #tpu.memory_space<semaphore_mem>>
    %63 = tpu.memref_squeeze %62 : memref<1x!tpu.dma_semaphore, #tpu.memory_space<semaphore_mem>> -> memref<!tpu.dma_semaphore, #tpu.memory_space<semaphore_mem>>
    tpu.wait_dma2 semaphore(%63 : memref<!tpu.dma_semaphore, #tpu.memory_space<semaphore_mem>>) src(%arg3 : memref<1536x512xbf16, #tpu.memory_space<any>>) dst(%arg27 : memref<1536x512xbf16, #tpu.memory_space<vmem>>)
    %c0_54 = arith.constant 0 : index
    %c0_55 = arith.constant 0 : index
    %64 = vector.load %arg17[%c0_54, %c0_55] : memref<14x512xf32, #tpu.memory_space<vmem>>, vector<10x512xf32>
    %65 = arith.truncf %64 : vector<10x512xf32> to vector<10x512xbf16>
    %c0_56 = arith.constant 0 : index
    %c0_57 = arith.constant 0 : index
    %66 = vector.load %arg23[%c0_56, %c0_57] : memref<10x1536xbf16, #tpu.memory_space<vmem>>, vector<10x512xbf16>
    tpu.vector_store %arg23[%c0_56, %c0_57], %65 {strides = array<i32>} : memref<10x1536xbf16, #tpu.memory_space<vmem>>, vector<10x512xbf16>,
    %c2_58 = arith.constant 2 : index
    %c0_59 = arith.constant 0 : index
    %67 = vector.load %arg17[%c2_58, %c0_59] : memref<14x512xf32, #tpu.memory_space<vmem>>, vector<10x512xf32>
    %68 = arith.truncf %67 : vector<10x512xf32> to vector<10x512xbf16>
    %c0_60 = arith.constant 0 : index
    %c512_61 = arith.constant 512 : index
    %69 = vector.load %arg23[%c0_60, %c512_61] : memref<10x1536xbf16, #tpu.memory_space<vmem>>, vector<10x512xbf16>
    tpu.vector_store %arg23[%c0_60, %c512_61], %68 {strides = array<i32>} : memref<10x1536xbf16, #tpu.memory_space<vmem>>, vector<10x512xbf16>,
    %c4_62 = arith.constant 4 : index
    %c0_63 = arith.constant 0 : index
    %70 = vector.load %arg17[%c4_62, %c0_63] : memref<14x512xf32, #tpu.memory_space<vmem>>, vector<10x512xf32>
    %71 = arith.truncf %70 : vector<10x512xf32> to vector<10x512xbf16>
    %c0_64 = arith.constant 0 : index
    %c1024 = arith.constant 1024 : index
    %72 = vector.load %arg23[%c0_64, %c1024] : memref<10x1536xbf16, #tpu.memory_space<vmem>>, vector<10x512xbf16>
    tpu.vector_store %arg23[%c0_64, %c1024], %71 {strides = array<i32>} : memref<10x1536xbf16, #tpu.memory_space<vmem>>, vector<10x512xbf16>,
    %c0_65 = arith.constant 0 : index
    %c0_66 = arith.constant 0 : index
    %73 = vector.load %arg23[%c0_65, %c0_66] : memref<10x1536xbf16, #tpu.memory_space<vmem>>, vector<10x1536xbf16>
    %c0_67 = arith.constant 0 : index
    %c0_68 = arith.constant 0 : index
    %74 = vector.load %arg27[%c0_67, %c0_68] : memref<1536x512xbf16, #tpu.memory_space<vmem>>, vector<1536x512xbf16>
    %cst_69 = arith.constant dense<0.000000e+00> : vector<10x512xf32>
    %75 = tpu.matmul %73, %74, %cst_69 {dimension_numbers = #tpu.dot_dimension_numbers<[1], [0], [0], [1], [0, 0, 1, 1], [], []>} : vector<10x1536xbf16>, vector<1536x512xbf16>, vector<10x512xf32> -> vector<10x512xf32>
    %c0_70 = arith.constant 0 : index
    %c0_71 = arith.constant 0 : index
    %76 = vector.load %arg8[%c0_70, %c0_71] : memref<1x512xf32, #tpu.memory_space<vmem>>, vector<1x512xf32>
    %77 = vector.broadcast %76 : vector<1x512xf32> to vector<10x512xf32>
    %78 = arith.addf %75, %77 : vector<10x512xf32>
    %cst_72 = arith.constant 0.000000e+00 : f32
    %79 = vector.broadcast %cst_72 : f32 to vector<10x512xf32>
    %80 = arith.maximumf %78, %79 : vector<10x512xf32>
    %c0_73 = arith.constant 0 : index
    %c0_74 = arith.constant 0 : index
    %81 = vector.load %arg18[%c0_73, %c0_74] : memref<10x512xf32, #tpu.memory_space<vmem>>, vector<10x512xf32>
    tpu.vector_store %arg18[%c0_73, %c0_74], %80 {strides = array<i32>} : memref<10x512xf32, #tpu.memory_space<vmem>>, vector<10x512xf32>,
    %c2_i32_75 = arith.constant 2 : i32
    %82 = tpu.memref_slice %arg30[%c2_i32_75] : memref<4x!tpu.dma_semaphore, #tpu.memory_space<semaphore_mem>> -> memref<1x!tpu.dma_semaphore, #tpu.memory_space<semaphore_mem>>
    %83 = tpu.memref_squeeze %82 : memref<1x!tpu.dma_semaphore, #tpu.memory_space<semaphore_mem>> -> memref<!tpu.dma_semaphore, #tpu.memory_space<semaphore_mem>>
    tpu.wait_dma2 semaphore(%83 : memref<!tpu.dma_semaphore, #tpu.memory_space<semaphore_mem>>) src(%arg4 : memref<1536x384xbf16, #tpu.memory_space<any>>) dst(%arg28 : memref<1536x384xbf16, #tpu.memory_space<vmem>>)
    %c0_76 = arith.constant 0 : index
    %c0_77 = arith.constant 0 : index
    %84 = vector.load %arg18[%c0_76, %c0_77] : memref<10x512xf32, #tpu.memory_space<vmem>>, vector<6x512xf32>
    %85 = arith.truncf %84 : vector<6x512xf32> to vector<6x512xbf16>
    %c0_78 = arith.constant 0 : index
    %c0_79 = arith.constant 0 : index
    %86 = vector.load %arg24[%c0_78, %c0_79] : memref<6x1536xbf16, #tpu.memory_space<vmem>>, vector<6x512xbf16>
    tpu.vector_store %arg24[%c0_78, %c0_79], %85 {strides = array<i32>} : memref<6x1536xbf16, #tpu.memory_space<vmem>>, vector<6x512xbf16>,
    %c2_80 = arith.constant 2 : index
    %c0_81 = arith.constant 0 : index
    %87 = vector.load %arg18[%c2_80, %c0_81] : memref<10x512xf32, #tpu.memory_space<vmem>>, vector<6x512xf32>
    %88 = arith.truncf %87 : vector<6x512xf32> to vector<6x512xbf16>
    %c0_82 = arith.constant 0 : index
    %c512_83 = arith.constant 512 : index
    %89 = vector.load %arg24[%c0_82, %c512_83] : memref<6x1536xbf16, #tpu.memory_space<vmem>>, vector<6x512xbf16>
    tpu.vector_store %arg24[%c0_82, %c512_83], %88 {strides = array<i32>} : memref<6x1536xbf16, #tpu.memory_space<vmem>>, vector<6x512xbf16>,
    %c4_84 = arith.constant 4 : index
    %c0_85 = arith.constant 0 : index
    %90 = vector.load %arg18[%c4_84, %c0_85] : memref<10x512xf32, #tpu.memory_space<vmem>>, vector<6x512xf32>
    %91 = arith.truncf %90 : vector<6x512xf32> to vector<6x512xbf16>
    %c0_86 = arith.constant 0 : index
    %c1024_87 = arith.constant 1024 : index
    %92 = vector.load %arg24[%c0_86, %c1024_87] : memref<6x1536xbf16, #tpu.memory_space<vmem>>, vector<6x512xbf16>
    tpu.vector_store %arg24[%c0_86, %c1024_87], %91 {strides = array<i32>} : memref<6x1536xbf16, #tpu.memory_space<vmem>>, vector<6x512xbf16>,
    %c0_88 = arith.constant 0 : index
    %c0_89 = arith.constant 0 : index
    %93 = vector.load %arg24[%c0_88, %c0_89] : memref<6x1536xbf16, #tpu.memory_space<vmem>>, vector<6x1536xbf16>
    %c0_90 = arith.constant 0 : index
    %c0_91 = arith.constant 0 : index
    %94 = vector.load %arg28[%c0_90, %c0_91] : memref<1536x384xbf16, #tpu.memory_space<vmem>>, vector<1536x384xbf16>
    %cst_92 = arith.constant dense<0.000000e+00> : vector<6x384xf32>
    %95 = tpu.matmul %93, %94, %cst_92 {dimension_numbers = #tpu.dot_dimension_numbers<[1], [0], [0], [1], [0, 0, 1, 1], [], []>} : vector<6x1536xbf16>, vector<1536x384xbf16>, vector<6x384xf32> -> vector<6x384xf32>
    %c0_93 = arith.constant 0 : index
    %c0_94 = arith.constant 0 : index
    %96 = vector.load %arg9[%c0_93, %c0_94] : memref<1x384xf32, #tpu.memory_space<vmem>>, vector<1x384xf32>
    %97 = vector.broadcast %96 : vector<1x384xf32> to vector<6x384xf32>
    %98 = arith.addf %95, %97 : vector<6x384xf32>
    %cst_95 = arith.constant 0.000000e+00 : f32
    %99 = vector.broadcast %cst_95 : f32 to vector<6x384xf32>
    %100 = arith.maximumf %98, %99 : vector<6x384xf32>
    %c0_96 = arith.constant 0 : index
    %c0_97 = arith.constant 0 : index
    %101 = vector.load %arg19[%c0_96, %c0_97] : memref<6x384xf32, #tpu.memory_space<vmem>>, vector<6x384xf32>
    tpu.vector_store %arg19[%c0_96, %c0_97], %100 {strides = array<i32>} : memref<6x384xf32, #tpu.memory_space<vmem>>, vector<6x384xf32>,
    %c3_i32_98 = arith.constant 3 : i32
    %102 = tpu.memref_slice %arg30[%c3_i32_98] : memref<4x!tpu.dma_semaphore, #tpu.memory_space<semaphore_mem>> -> memref<1x!tpu.dma_semaphore, #tpu.memory_space<semaphore_mem>>
    %103 = tpu.memref_squeeze %102 : memref<1x!tpu.dma_semaphore, #tpu.memory_space<semaphore_mem>> -> memref<!tpu.dma_semaphore, #tpu.memory_space<semaphore_mem>>
    tpu.wait_dma2 semaphore(%103 : memref<!tpu.dma_semaphore, #tpu.memory_space<semaphore_mem>>) src(%arg5 : memref<768x256xbf16, #tpu.memory_space<any>>) dst(%arg29 : memref<768x256xbf16, #tpu.memory_space<vmem>>)
    %c0_99 = arith.constant 0 : index
    %c0_100 = arith.constant 0 : index
    %104 = vector.load %arg19[%c0_99, %c0_100] : memref<6x384xf32, #tpu.memory_space<vmem>>, vector<4x384xf32>
    %105 = arith.truncf %104 : vector<4x384xf32> to vector<4x384xbf16>
    %c0_101 = arith.constant 0 : index
    %c0_102 = arith.constant 0 : index
    %106 = vector.load %arg25[%c0_101, %c0_102] : memref<4x768xbf16, #tpu.memory_space<vmem>>, vector<4x384xbf16>
    tpu.vector_store %arg25[%c0_101, %c0_102], %105 {strides = array<i32>} : memref<4x768xbf16, #tpu.memory_space<vmem>>, vector<4x384xbf16>,
    %c2_103 = arith.constant 2 : index
    %c0_104 = arith.constant 0 : index
    %107 = vector.load %arg19[%c2_103, %c0_104] : memref<6x384xf32, #tpu.memory_space<vmem>>, vector<4x384xf32>
    %108 = arith.truncf %107 : vector<4x384xf32> to vector<4x384xbf16>
    %c0_105 = arith.constant 0 : index
    %c384_106 = arith.constant 384 : index
    %109 = vector.load %arg25[%c0_105, %c384_106] : memref<4x768xbf16, #tpu.memory_space<vmem>>, vector<4x384xbf16>
    tpu.vector_store %arg25[%c0_105, %c384_106], %108 {strides = array<i32>} : memref<4x768xbf16, #tpu.memory_space<vmem>>, vector<4x384xbf16>,
    %c0_107 = arith.constant 0 : index
    %c0_108 = arith.constant 0 : index
    %110 = vector.load %arg25[%c0_107, %c0_108] : memref<4x768xbf16, #tpu.memory_space<vmem>>, vector<4x768xbf16>
    %c0_109 = arith.constant 0 : index
    %c0_110 = arith.constant 0 : index
    %111 = vector.load %arg29[%c0_109, %c0_110] : memref<768x256xbf16, #tpu.memory_space<vmem>>, vector<768x256xbf16>
    %cst_111 = arith.constant dense<0.000000e+00> : vector<4x256xf32>
    %112 = tpu.matmul %110, %111, %cst_111 {dimension_numbers = #tpu.dot_dimension_numbers<[1], [0], [0], [1], [0, 0, 1, 1], [], []>} : vector<4x768xbf16>, vector<768x256xbf16>, vector<4x256xf32> -> vector<4x256xf32>
    %c0_112 = arith.constant 0 : index
    %c0_113 = arith.constant 0 : index
    %113 = vector.load %arg10[%c0_112, %c0_113] : memref<1x256xf32, #tpu.memory_space<vmem>>, vector<1x256xf32>
    %114 = vector.broadcast %113 : vector<1x256xf32> to vector<4x256xf32>
    %115 = arith.addf %112, %114 : vector<4x256xf32>
    %cst_114 = arith.constant 0.000000e+00 : f32
    %116 = vector.broadcast %cst_114 : f32 to vector<4x256xf32>
    %117 = arith.maximumf %115, %116 : vector<4x256xf32>
    %c0_115 = arith.constant 0 : index
    %c0_116 = arith.constant 0 : index
    %118 = vector.load %arg20[%c0_115, %c0_116] : memref<4x256xf32, #tpu.memory_space<vmem>>, vector<4x256xf32>
    tpu.vector_store %arg20[%c0_115, %c0_116], %117 {strides = array<i32>} : memref<4x256xf32, #tpu.memory_space<vmem>>, vector<4x256xf32>,
    %c0_117 = arith.constant 0 : index
    %c0_118 = arith.constant 0 : index
    %119 = vector.load %arg12[%c0_117, %c0_118] : memref<1x128xf32, #tpu.memory_space<vmem>>, vector<1x128xf32>
    %c0_119 = arith.constant 0 : index
    %c0_120 = arith.constant 0 : index
    %120 = vector.load %arg20[%c0_119, %c0_120] : memref<4x256xf32, #tpu.memory_space<vmem>>, vector<2x256xf32>
    %c0_121 = arith.constant 0 : index
    %c0_122 = arith.constant 0 : index
    %c0_123 = arith.constant 0 : index
    %121 = vector.load %arg11[%c0_121, %c0_122, %c0_123] : memref<2x256x128xf32, #tpu.memory_space<vmem>>, vector<1x256x128xf32>
    %122 = vector.shape_cast %121 : vector<1x256x128xf32> to vector<256x128xf32>
    %cst_124 = arith.constant dense<0.000000e+00> : vector<2x128xf32>
    %123 = tpu.matmul %120, %122, %cst_124 {dimension_numbers = #tpu.dot_dimension_numbers<[1], [0], [0], [1], [0, 0, 1, 1], [], []>} : vector<2x256xf32>, vector<256x128xf32>, vector<2x128xf32> -> vector<2x128xf32>
    %124 = vector.broadcast %119 : vector<1x128xf32> to vector<2x128xf32>
    %125 = arith.addf %124, %123 : vector<2x128xf32>
    %c2_125 = arith.constant 2 : index
    %c0_126 = arith.constant 0 : index
    %126 = vector.load %arg20[%c2_125, %c0_126] : memref<4x256xf32, #tpu.memory_space<vmem>>, vector<2x256xf32>
    %c1 = arith.constant 1 : index
    %c0_127 = arith.constant 0 : index
    %c0_128 = arith.constant 0 : index
    %127 = vector.load %arg11[%c1, %c0_127, %c0_128] : memref<2x256x128xf32, #tpu.memory_space<vmem>>, vector<1x256x128xf32>
    %128 = vector.shape_cast %127 : vector<1x256x128xf32> to vector<256x128xf32>
    %cst_129 = arith.constant dense<0.000000e+00> : vector<2x128xf32>
    %129 = tpu.matmul %126, %128, %cst_129 {dimension_numbers = #tpu.dot_dimension_numbers<[1], [0], [0], [1], [0, 0, 1, 1], [], []>} : vector<2x256xf32>, vector<256x128xf32>, vector<2x128xf32> -> vector<2x128xf32>
    %130 = arith.addf %125, %129 : vector<2x128xf32>
    %cst_130 = arith.constant 0.000000e+00 : f32
    %131 = vector.broadcast %cst_130 : f32 to vector<2x128xf32>
    %132 = arith.maximumf %130, %131 : vector<2x128xf32>
    %c0_131 = arith.constant 0 : index
    %c0_132 = arith.constant 0 : index
    %133 = vector.load %arg13[%c0_131, %c0_132] : memref<128x128xf32, #tpu.memory_space<vmem>>, vector<128x128xf32>
    %cst_133 = arith.constant dense<0.000000e+00> : vector<2x128xf32>
    %134 = tpu.matmul %132, %133, %cst_133 {dimension_numbers = #tpu.dot_dimension_numbers<[1], [0], [0], [1], [0, 0, 1, 1], [], []>} : vector<2x128xf32>, vector<128x128xf32>, vector<2x128xf32> -> vector<2x128xf32>
    %c0_134 = arith.constant 0 : index
    %c0_135 = arith.constant 0 : index
    %135 = vector.load %arg14[%c0_134, %c0_135] : memref<1x128xf32, #tpu.memory_space<vmem>>, vector<1x128xf32>
    %136 = vector.broadcast %135 : vector<1x128xf32> to vector<2x128xf32>
    %137 = arith.addf %134, %136 : vector<2x128xf32>
    %cst_136 = arith.constant 0.000000e+00 : f32
    %138 = vector.broadcast %cst_136 : f32 to vector<2x128xf32>
    %139 = arith.subf %138, %137 : vector<2x128xf32>
    %140 = math.exp %139 : vector<2x128xf32>
    %cst_137 = arith.constant 1.000000e+00 : f32
    %141 = vector.broadcast %cst_137 : f32 to vector<2x128xf32>
    %142 = arith.addf %141, %140 : vector<2x128xf32>
    %cst_138 = arith.constant 1.000000e+00 : f32
    %143 = vector.broadcast %cst_138 : f32 to vector<2x128xf32>
    %144 = arith.divf %143, %142 : vector<2x128xf32>
    %c0_139 = arith.constant 0 : index
    %c0_140 = arith.constant 0 : index
    %145 = vector.load %arg15[%c0_139, %c0_140] : memref<2x128xf32, #tpu.memory_space<vmem>>, vector<2x128xf32>
    tpu.vector_store %arg15[%c0_139, %c0_140], %144 {strides = array<i32>} : memref<2x128xf32, #tpu.memory_space<vmem>>, vector<2x128xf32>,
    return
  }
}

</mosaic_0001>

<bundles_post_ra>
// kernel: em3d_forward.1
= control target key start
LH: loop header
LB: loop body
LE: loop exit
PB: predicated region body
PF: predicated region fallthrough
CT: control target
= control target key end

     0   :  { %20 = vsyncpa [#allocation18], 0  ;;  %s7969_s0 = inlined_call_operand.vmem [shape: f32[26,128], index: 0, kind: input, shape index: {}]   ;;  %s7970_s1 = inlined_call_operand.hbm [shape: bf16[640,384], index: 1, kind: input, shape index: {}]   ;;  %s7971_s2 = inlined_call_operand.hbm [shape: bf16[1920,512], index: 2, kind: input, shape index: {}]   ;;  %s7972_s3 = inlined_call_operand.hbm [shape: bf16[1536,512], index: 3, kind: input, shape index: {}]   ;;  %s7973_s4 = inlined_call_operand.hbm [shape: bf16[1536,384], index: 4, kind: input, shape index: {}]   ;;  %s7974_s5 = inlined_call_operand.hbm [shape: bf16[768,256], index: 5, kind: input, shape index: {}]   ;;  %s7975_s6 = inlined_call_operand.hbm [shape: f32[1,384], index: 6, kind: input, shape index: {}]   ;;  %s7976_s7 = inlined_call_operand.hbm [shape: f32[1,512], index: 7, kind: input, shape index: {}]   ;;  %s7977_s8 = inlined_call_operand.hbm [shape: f32[1,512], index: 8, kind: input, shape index: {}]   ;;  %s7978_s9 = inlined_call_operand.hbm [shape: f32[1,384], index: 9, kind: input, shape index: {}]   ;;  %s7979_s10 = inlined_call_operand.hbm [shape: f32[1,256], index: 10, kind: input, shape index: {}]   ;;  %s7980_s11 = inlined_call_operand.hbm [shape: f32[2,256,128], index: 11, kind: input, shape index: {}]   ;;  %s7981_s12 = inlined_call_operand.hbm [shape: f32[1,128], index: 12, kind: input, shape index: {}]   ;;  %s7982_s13 = inlined_call_operand.hbm [shape: f32[128,128], index: 13, kind: input, shape index: {}]   ;;  %s7983_s14 = inlined_call_operand.hbm [shape: f32[1,128], index: 14, kind: input, shape index: {}]   ;;  %s7984_s15 = inlined_call_operand.vmem [shape: f32[2,128], index: 15, kind: output, shape index: {}]  }
   0x1   :  { %21 = vsyncpa [#allocation20], 0 }
   0x2   :  { %22 = vsyncpa [#allocation23], 0 }
   0x3   :  { %23 = vsyncpa [#allocation26], 0 }
   0x4   :  { %24 = vsyncpa [#allocation29], 0 }
   0x5   :  { %25 = vsyncpa [#allocation32], 0  ;;  %s7329_s18 = smov [#allocation19]   ;;  %s7330_s20 = smov [#allocation22]  }
   0x6   :  { %s46_s19 = sshll.u32 %s7329_s18, 4  ;;  %s66_s21 = sshll.u32 %s7330_s20, 4  ;;  %s47_s19 = int_to_ptr.vmem [resolvable:$true] %s46_s19  ;;  %s67_s21 = int_to_ptr.vmem [resolvable:$true] %s66_s21 }
   0x7   :  { %s7089_s24 = scalar_lea.hbm %s7975_s6, 48 }
   0x8   :  { %p7090_p0 = scmp.ne.s32.totalorder %s7975_s6, %s7089_s24  ;;  %p7093_p1 = scmp.lt.u32.totalorder %s7089_s24, %s7975_s6 }
   0xa   :  { %p7095_p2 = pnand %p7093_p1, %p7090_p0 }
   0xc   :  { %7098 = shalt.err (!%p7095_p2)
}
   0xd   :  { %s7099_s29 = scalar_lea.vmem %s47_s19, 48  ;;  %s7103_s30 = scalar_lea.vmem %s47_s19, 64 }
   0xe   :  { %p7100_p3 = scmp.ne.s32.totalorder %s47_s19, %s7099_s29  ;;  %p7104_p4 = scmp.lt.s32.totalorder %s47_s19, %s47_s19 }
   0xf   :  { %p7105_p5 = scmp.lt.s32.totalorder %s7103_s30, %s7099_s29 }
  0x11   :  { %p7106_p6 = por %p7105_p5, %p7104_p4 }
  0x13   :  { %p7107_p7 = pnand %p7106_p6, %p7100_p3 }
  0x15   :  { %7110 = shalt.err (!%p7107_p7)
}
  0x16   :  { %49 = dma.hbm_to_vmem [thread:$0]  %s7975_s6, 48, %s47_s19, [#allocation20]  }
  0x17   :  { %s7111_s22 = scalar_lea.hbm %s7977_s8, 64 }
  0x18   :  { %p7112_p8 = scmp.ne.s32.totalorder %s7977_s8, %s7111_s22  ;;  %p7115_p9 = scmp.lt.u32.totalorder %s7111_s22, %s7977_s8 }
  0x1a   :  { %p7117_p10 = pnand %p7115_p9, %p7112_p8 }
  0x1c   :  { %7120 = shalt.err (!%p7117_p10)
}
  0x1d   :  { %s7121_s27 = scalar_lea.vmem %s67_s21, 64  ;;  %p7126_p12 = scmp.lt.s32.totalorder %s67_s21, %s67_s21 }
  0x1e   :  { %p7122_p11 = scmp.ne.s32.totalorder %s67_s21, %s7121_s27  ;;  %p7127_p13 = scmp.lt.s32.totalorder %s7121_s27, %s7121_s27 }
  0x20   :  { %p7128_p0 = por %p7127_p13, %p7126_p12 }
  0x22   :  { %p7129_p1 = pnand %p7128_p0, %p7122_p11 }
  0x24   :  { %7132 = shalt.err (!%p7129_p1)
}
  0x25   :  { %69 = dma.hbm_to_vmem [thread:$0]  %s7977_s8, 64, %s67_s21, [#allocation23]  }
  0x26   :  { %s7331_s28 = smov [#allocation25]   ;;  %s7332_s30 = smov [#allocation28]  }
  0x27   :  { %s86_s29 = sshll.u32 %s7331_s28, 4  ;;  %s108_s16 = sshll.u32 %s7332_s30, 4  ;;  %s87_s29 = int_to_ptr.vmem [resolvable:$true] %s86_s29  ;;  %s109_s16 = int_to_ptr.vmem [resolvable:$true] %s108_s16 }
  0x28   :  { %s7133_s20 = scalar_lea.hbm %s7979_s10, 32 }
  0x29   :  { %p7134_p2 = scmp.ne.s32.totalorder %s7979_s10, %s7133_s20  ;;  %p7137_p3 = scmp.lt.u32.totalorder %s7133_s20, %s7979_s10 }
  0x2b   :  { %p7139_p4 = pnand %p7137_p3, %p7134_p2 }
  0x2d   :  { %7142 = shalt.err (!%p7139_p4)
}
  0x2e   :  { %s7143_s8 = scalar_lea.vmem %s87_s29, 32  ;;  %p7148_p6 = scmp.lt.s32.totalorder %s87_s29, %s87_s29 }
  0x2f   :  { %p7144_p5 = scmp.ne.s32.totalorder %s87_s29, %s7143_s8  ;;  %p7149_p7 = scmp.lt.s32.totalorder %s7143_s8, %s7143_s8 }
  0x31   :  { %p7150_p8 = por %p7149_p7, %p7148_p6 }
  0x33   :  { %p7151_p9 = pnand %p7150_p8, %p7144_p5 }
  0x35   :  { %7154 = shalt.err (!%p7151_p9)
}
  0x36   :  { %89 = dma.hbm_to_vmem [thread:$0]  %s7979_s10, 32, %s87_s29, [#allocation26]  }
  0x37   :  { %s7155_s19 = scalar_lea.hbm %s7981_s12, 16 }
  0x38   :  { %p7156_p10 = scmp.ne.s32.totalorder %s7981_s12, %s7155_s19  ;;  %p7159_p11 = scmp.lt.u32.totalorder %s7155_s19, %s7981_s12 }
  0x3a   :  { %p7161_p12 = pnand %p7159_p11, %p7156_p10 }
  0x3c   :  { %7164 = shalt.err (!%p7161_p12)
}
  0x3d   :  { %s7165_s20 = scalar_lea.vmem %s109_s16, 16  ;;  %s7169_s22 = scalar_lea.vmem %s109_s16, 32 }
  0x3e   :  { %p7166_p13 = scmp.ne.s32.totalorder %s109_s16, %s7165_s20  ;;  %p7170_p0 = scmp.lt.s32.totalorder %s109_s16, %s109_s16 }
  0x3f   :  { %p7171_p1 = scmp.lt.s32.totalorder %s7169_s22, %s7165_s20 }
  0x41   :  { %p7172_p2 = por %p7171_p1, %p7170_p0 }
  0x43   :  { %p7173_p3 = pnand %p7172_p2, %p7166_p13 }
  0x45   :  { %7176 = shalt.err (!%p7173_p3)
}
  0x46   :  { %111 = dma.hbm_to_vmem [thread:$0]  %s7981_s12, 16, %s109_s16, [#allocation29]  }
  0x47   :  { %s7333_s23 = smov [#allocation17]   ;;  %s7177_s21 = scalar_lea.hbm %s7970_s1, 15360 }
  0x48   :  { %s33_s24 = sshll.u32 %s7333_s23, 4  ;;  %p7178_p4 = scmp.ne.s32.totalorder %s7970_s1, %s7177_s21  ;;  %s34_s24 = int_to_ptr.vmem [resolvable:$true] %s33_s24 }
  0x49   :  { %p7181_p5 = scmp.lt.u32.totalorder %s7177_s21, %s7970_s1 }
  0x4b   :  { %p7183_p6 = pnand %p7181_p5, %p7178_p4 }
  0x4d   :  { %7186 = shalt.err (!%p7183_p6)
}
  0x4e   :  { %s7187_s28 = scalar_lea.vmem %s34_s24, 15360  ;;  %p7192_p8 = scmp.lt.s32.totalorder %s34_s24, %s34_s24 }
  0x4f   :  { %p7188_p7 = scmp.ne.s32.totalorder %s34_s24, %s7187_s28  ;;  %p7193_p9 = scmp.lt.s32.totalorder %s7187_s28, %s7187_s28 }
  0x51   :  { %p7194_p10 = por %p7193_p9, %p7192_p8 }
  0x53   :  { %p7195_p11 = pnand %p7194_p10, %p7188_p7 }
  0x55   :  { %7198 = shalt.err (!%p7195_p11)
}
  0x56   :  { %s7334_s12 = smov 192   ;;  %s7335_s16 = smov 12  }
  0x57   :  { %39 = dma.hbm_to_vmem [thread:$0]  %s7970_s1, 15360, %s34_s24, [#allocation18], %s7334_s12, %s7334_s12, %s7335_s16  }
  0x58   :  { %s7336_s18 = smov [#allocation21]   ;;  %s7337_s22 = smov [#allocation24]  }
  0x59   :  { %s56_s20 = sshll.u32 %s7336_s18, 4  ;;  %s76_s10 = sshll.u32 %s7337_s22, 4  ;;  %s57_s20 = int_to_ptr.vmem [resolvable:$true] %s56_s20  ;;  %s77_s10 = int_to_ptr.vmem [resolvable:$true] %s76_s10 }
  0x5a   :  { %s7199_s25 = scalar_lea.hbm %s7976_s7, 64 }
  0x5b   :  { %p7200_p12 = scmp.ne.s32.totalorder %s7976_s7, %s7199_s25  ;;  %p7203_p13 = scmp.lt.u32.totalorder %s7199_s25, %s7976_s7 }
  0x5d   :  { %p7205_p0 = pnand %p7203_p13, %p7200_p12 }
  0x5f   :  { %7208 = shalt.err (!%p7205_p0)
}
  0x60   :  { %s7209_s1 = scalar_lea.vmem %s57_s20, 64  ;;  %p7214_p2 = scmp.lt.s32.totalorder %s57_s20, %s57_s20 }
  0x61   :  { %p7210_p1 = scmp.ne.s32.totalorder %s57_s20, %s7209_s1  ;;  %p7215_p3 = scmp.lt.s32.totalorder %s7209_s1, %s7209_s1 }
  0x63   :  { %p7216_p4 = por %p7215_p3, %p7214_p2 }
  0x65   :  { %p7217_p5 = pnand %p7216_p4, %p7210_p1 }
  0x67   :  { %7220 = shalt.err (!%p7217_p5)
}
  0x68   :  { %59 = dma.hbm_to_vmem [thread:$0]  %s7976_s7, 64, %s57_s20, [#allocation20]  }
  0x69   :  { %s7221_s16 = scalar_lea.hbm %s7978_s9, 48 }
  0x6a   :  { %p7222_p6 = scmp.ne.s32.totalorder %s7978_s9, %s7221_s16  ;;  %p7225_p7 = scmp.lt.u32.totalorder %s7221_s16, %s7978_s9 }
  0x6c   :  { %p7227_p8 = pnand %p7225_p7, %p7222_p6 }
  0x6e   :  { %7230 = shalt.err (!%p7227_p8)
}
  0x6f   :  { %s7231_s29 = scalar_lea.vmem %s77_s10, 48  ;;  %s7235_s23 = scalar_lea.vmem %s77_s10, 64 }
  0x70   :  { %p7232_p9 = scmp.ne.s32.totalorder %s77_s10, %s7231_s29  ;;  %p7236_p10 = scmp.lt.s32.totalorder %s77_s10, %s77_s10 }
  0x71   :  { %p7237_p11 = scmp.lt.s32.totalorder %s7235_s23, %s7231_s29 }
  0x73   :  { %p7238_p12 = por %p7237_p11, %p7236_p10 }
  0x75   :  { %p7239_p13 = pnand %p7238_p12, %p7232_p9 }
  0x77   :  { %7242 = shalt.err (!%p7239_p13)
}
  0x78   :  { %79 = dma.hbm_to_vmem [thread:$0]  %s7978_s9, 48, %s77_s10, [#allocation23]  }
  0x79   :  { %s7338_s25 = smov [#allocation27]   ;;  %s7243_s27 = scalar_lea.hbm %s7980_s11, 8192 }
  0x7a   :  { %s95_s8 = sshll.u32 %s7338_s25, 4  ;;  %p7244_p0 = scmp.ne.s32.totalorder %s7980_s11, %s7243_s27  ;;  %s96_s8 = int_to_ptr.vmem [resolvable:$true] %s95_s8 }
  0x7b   :  { %p7247_p1 = scmp.lt.u32.totalorder %s7243_s27, %s7980_s11 }
  0x7d   :  { %p7249_p2 = pnand %p7247_p1, %p7244_p0 }
  0x7f   :  { %7252 = shalt.err (!%p7249_p2)
}
  0x80   :  { %s7253_s28 = scalar_lea.vmem %s96_s8, 8192  ;;  %p7258_p4 = scmp.lt.s32.totalorder %s96_s8, %s96_s8 }
  0x81   :  { %p7254_p3 = scmp.ne.s32.totalorder %s96_s8, %s7253_s28  ;;  %p7259_p5 = scmp.lt.s32.totalorder %s7253_s28, %s7253_s28 }
  0x83   :  { %p7260_p6 = por %p7259_p5, %p7258_p4 }
  0x85   :  { %p7261_p7 = pnand %p7260_p6, %p7254_p3 }
  0x87   :  { %7264 = shalt.err (!%p7261_p7)
}
  0x88   :  { %s7339_s9 = smov 128   ;;  %s7340_s10 = smov 8  }
  0x89   :  { %101 = dma.hbm_to_vmem [thread:$0]  %s7980_s11, 8192, %s96_s8, [#allocation26], %s7339_s9, %s7339_s9, %s7340_s10  }
  0x8a   :  { %s7341_s17 = smov [#allocation30]   ;;  %s7342_s22 = smov [#allocation31]  }
  0x8b   :  { %s117_s18 = sshll.u32 %s7341_s17, 4  ;;  %s130_s29 = sshll.u32 %s7342_s22, 4  ;;  %s118_s18 = int_to_ptr.vmem [resolvable:$true] %s117_s18  ;;  %s131_s29 = int_to_ptr.vmem [resolvable:$true] %s130_s29 }
  0x8c   :  { %s7265_s20 = scalar_lea.hbm %s7982_s13, 2048 }
  0x8d   :  { %p7266_p8 = scmp.ne.s32.totalorder %s7982_s13, %s7265_s20  ;;  %p7269_p9 = scmp.lt.u32.totalorder %s7265_s20, %s7982_s13 }
  0x8f   :  { %p7271_p10 = pnand %p7269_p9, %p7266_p8 }
  0x91   :  { %7274 = shalt.err (!%p7271_p10)
}
  0x92   :  { %s7275_s11 = scalar_lea.vmem %s118_s18, 2048  ;;  %p7280_p12 = scmp.lt.s32.totalorder %s118_s18, %s118_s18 }
  0x93   :  { %p7276_p11 = scmp.ne.s32.totalorder %s118_s18, %s7275_s11  ;;  %p7281_p13 = scmp.lt.s32.totalorder %s7275_s11, %s7275_s11 }
  0x95   :  { %p7282_p0 = por %p7281_p13, %p7280_p12 }
  0x97   :  { %p7283_p1 = pnand %p7282_p0, %p7276_p11 }
  0x99   :  { %7286 = shalt.err (!%p7283_p1)
}
  0x9a   :  { %123 = dma.hbm_to_vmem [thread:$0]  %s7982_s13, 2048, %s118_s18, [#allocation29], %s7339_s9, %s7339_s9, %s7340_s10  }
  0x9b   :  { %s7287_s19 = scalar_lea.hbm %s7983_s14, 16 }
  0x9c   :  { %p7288_p2 = scmp.ne.s32.totalorder %s7983_s14, %s7287_s19  ;;  %p7291_p3 = scmp.lt.u32.totalorder %s7287_s19, %s7983_s14 }
  0x9e   :  { %p7293_p4 = pnand %p7291_p3, %p7288_p2 }
  0xa0   :  { %7296 = shalt.err (!%p7293_p4)
}
  0xa1   :  { %s7297_s22 = scalar_lea.vmem %s131_s29, 16  ;;  %s7301_s23 = scalar_lea.vmem %s131_s29, 32 }
  0xa2   :  { %p7298_p5 = scmp.ne.s32.totalorder %s131_s29, %s7297_s22  ;;  %p7302_p6 = scmp.lt.s32.totalorder %s131_s29, %s131_s29 }
  0xa3   :  { %p7303_p7 = scmp.lt.s32.totalorder %s7301_s23, %s7297_s22 }
  0xa5   :  { %p7304_p8 = por %p7303_p7, %p7302_p6 }
  0xa7   :  { %p7305_p9 = pnand %p7304_p8, %p7298_p5 }
  0xa9   :  { %7308 = shalt.err (!%p7305_p9)
}
  0xaa   :  { %133 = dma.hbm_to_vmem [thread:$0]  %s7983_s14, 16, %s131_s29, [#allocation32]  }
  0xab   :  { %7309 = dma.done.wait [#allocation18], 15360  }
  0xac   :  { %7310 = vsyncadd [#allocation18], 4294951936 }
  0xad   :  { %7311 = dma.done.wait [#allocation20], 112  }
  0xae   :  { %7312 = vsyncadd [#allocation20], 4294967184 }
  0xaf   :  { %7313 = dma.done.wait [#allocation23], 112  }
  0xb0   :  { %7314 = vsyncadd [#allocation23], 4294967184 }
  0xb1   :  { %7315 = dma.done.wait [#allocation26], 8224  }
  0xb2   :  { %7316 = vsyncadd [#allocation26], 4294959072 }
  0xb3   :  { %7317 = dma.done.wait [#allocation29], 2064  }
  0xb4   :  { %7318 = vsyncadd [#allocation29], 4294965232 }
  0xb5   :  { %7319 = dma.done.wait [#allocation32], 16  }
  0xb6   :  { %7320 = vsyncadd [#allocation32], 4294967280  ;;  %s169_s18 = sld [smem:[#allocation0]]   ;;  %s7343_s7 = smov 4   ;;  %v7362_v0 = vmov 0.0   ;;  %vm1585_vm0 = vcmask 1041408  }
  0xb7   :  { %185 = sst [smem:[#allocation34 + $0x2]] %s7343_s7  ;;  %s7344_s20 = smov 64  }
  0xb8   :  { %187 = sst [smem:[#allocation34 + $0x3]] %s7344_s20  ;;  %s7345_s14 = smov 2  }
  0xb9   :  { %189 = sst [smem:[#allocation34 + $0x4]] %s7339_s9  ;;  %s7346_s29 = smov [#allocation12]  }
  0xba   :  { %191 = sst [smem:[#allocation34 + $0x5]] %s7345_s14  ;;  %s177_s25 = sshll.u32 %s7346_s29, 4  ;;  %s178_s25 = int_to_ptr.vmem [resolvable:$true] %s177_s25 }
  0xbb   :  { %195 = sst [smem:[#allocation34 + $0x7]] %s7344_s20  ;;  %s7347_s26 = smov 512  }
  0xbc   :  { %197 = sst [smem:[#allocation34 + $0x8]] %s7343_s7  ;;  %s5934_s21 = sshll.u32 %s169_s18, 26 }
  0xbd   :  { %181 = sst [smem:[#allocation34]] %s7347_s26  ;;  %s7579_s27 = sadd.s32 134217728, %s5934_s21 }
  0xbe   :  { %183 = sst [smem:[#allocation34 + $0x1]] %s7347_s26  ;;  %s7348_s11 = smov 256  }
  0xbf   :  { %193 = sst [smem:[#allocation34 + $0x6]] %s7348_s11  ;;  %s7349_s8 = smov [#allocation16]  }
  0xc0   :  { %s7350_s1 = smov [#allocation33]   ;;  %s7351_s19 = smov [#allocation13]  }
  0xc1   :  { %199 = dma.general %s7971_s2, 61440, %s178_s25, %s7349_s8, %s7350_s1, [#allocation34], %s7579_s27, 0  }
  0xc2   :  { %216 = sst [smem:[#allocation36]] %s7347_s26  ;;  %s212_s28 = sshll.u32 %s7351_s19, 4  ;;  %s213_s28 = int_to_ptr.vmem [resolvable:$true] %s212_s28 }
  0xc3   :  { %218 = sst [smem:[#allocation36 + $0x1]] %s7347_s26  ;;  %s7352_s2 = smov [#allocation16 + $0x1]  }
  0xc4   :  { %220 = sst [smem:[#allocation36 + $0x2]] %s7343_s7  ;;  %s7353_s16 = smov [#allocation35]  }
  0xc5   :  { %222 = sst [smem:[#allocation36 + $0x3]] %s7344_s20  ;;  %s7354_s22 = smov 384  }
  0xc6   :  { %224 = sst [smem:[#allocation36 + $0x4]] %s7339_s9  ;;  %s7355_s23 = smov [#allocation14]  }
  0xc7   :  { %226 = sst [smem:[#allocation36 + $0x5]] %s7345_s14  ;;  %s247_s13 = sshll.u32 %s7355_s23, 4  ;;  %s248_s13 = int_to_ptr.vmem [resolvable:$true] %s247_s13 }
  0xc8   :  { %228 = sst [smem:[#allocation36 + $0x6]] %s7348_s11  ;;  %s7356_s10 = smov 3  }
  0xc9   :  { %230 = sst [smem:[#allocation36 + $0x7]] %s7344_s20  ;;  %s7358_s18 = smov [#allocation37]  }
  0xca   :  { %232 = sst [smem:[#allocation36 + $0x8]] %s7343_s7  ;;  %s7359_s21 = smov [#allocation15]  }
  0xcb   :  { %234 = dma.general %s7972_s3, 49152, %s213_s28, %s7352_s2, %s7353_s16, [#allocation36], %s7579_s27, 0  }
  0xcc   :  { %251 = sst [smem:[#allocation38]] %s7354_s22  ;;  %s7357_s3 = smov [#allocation16 + $0x2]  }
  0xcd   :  { %253 = sst [smem:[#allocation38 + $0x1]] %s7354_s22  ;;  %s282_s26 = sshll.u32 %s7359_s21, 4  ;;  %s283_s26 = int_to_ptr.vmem [resolvable:$true] %s282_s26 }
  0xce   :  { %255 = sst [smem:[#allocation38 + $0x2]] %s7356_s10 }
  0xcf   :  { %257 = sst [smem:[#allocation38 + $0x3]] %s7344_s20 }
  0xd0   :  { %259 = sst [smem:[#allocation38 + $0x4]] %s7339_s9 }
  0xd1   :  { %261 = sst [smem:[#allocation38 + $0x5]] %s7345_s14 }
  0xd2   :  { %263 = sst [smem:[#allocation38 + $0x6]] %s7334_s12  ;;  %s7361_s12 = smov [#allocation39]  }
  0xd3   :  { %265 = sst [smem:[#allocation38 + $0x7]] %s7344_s20 }
  0xd4   :  { %267 = sst [smem:[#allocation38 + $0x8]] %s7343_s7 }
  0xd5   :  { %269 = dma.general %s7973_s4, 36864, %s248_s13, %s7357_s3, %s7358_s18, [#allocation38], %s7579_s27, 0  }
  0xd6   :  { %286 = sst [smem:[#allocation40]] %s7348_s11  ;;  %s7360_s4 = smov [#allocation16 + $0x3]  }
  0xd7   :  { %288 = sst [smem:[#allocation40 + $0x1]] %s7348_s11 }
  0xd8   :  { %290 = sst [smem:[#allocation40 + $0x2]] %s7345_s14 }
  0xd9   :  { %292 = sst [smem:[#allocation40 + $0x3]] %s7344_s20 }
  0xda   :  { %294 = sst [smem:[#allocation40 + $0x4]] %s7339_s9 }
  0xdb   :  { %296 = sst [smem:[#allocation40 + $0x5]] %s7345_s14 }
  0xdc   :  { %298 = sst [smem:[#allocation40 + $0x6]] %s7339_s9 }
  0xdd   :  { %300 = sst [smem:[#allocation40 + $0x7]] %s7344_s20 }
  0xde   :  { %302 = sst [smem:[#allocation40 + $0x8]] %s7343_s7 }
  0xdf   :  { %304 = dma.general %s7974_s5, 12288, %s283_s26, %s7360_s4, %s7361_s12, [#allocation40], %s7579_s27, 0  }
  0xe0   :  { %1619 = vst [vmem:[#allocation2] sm:$0x3] %v7362_v0  ;;  %1620 = vst [vmem:[#allocation2 + $0x8] sm:$0x3] %v7362_v0  ;;  %v6885_v1 = vld [vmem:[#allocation17 + $0x4] ss:$12 sps:$4 sm:$0xff]  }
  0xe1   :  { %1621 = vst [vmem:[#allocation2 + $0x10] sm:$0x3] %v7362_v0  ;;  %1622 = vst [vmem:[#allocation2 + $0x30] sm:$0x30] %v7362_v0  ;;  %v6887_v2 = vld [vmem:[#allocation17] ss:$12 sps:$4 sm:$0xff]   ;;  %1270 = vmatprep.subr.bf16.mxu0 %v6885_v1 }
  0xe2   :  { %1623 = vst [vmem:[#allocation2 + $0x38] sm:$0x30] %v7362_v0  ;;  %1624 = vst [vmem:[#allocation2 + $0x40] sm:$0x30] %v7362_v0  ;;  %v6888_v3 = vld [vmem:[#allocation17 + $0x1c] ss:$12 sps:$4 sm:$0xff]   ;;  %1271 = vmatpush1.bf16.msra.mxu0 %v6887_v2 }
  0xe3   :  { %v6890_v4 = vld [vmem:[#allocation17 + $0x18] ss:$12 sps:$4 sm:$0xff]   ;;  %v6891_v5 = vld [vmem:[#allocation17 + $0x34] ss:$12 sps:$4 sm:$0xff]   ;;  %1272 = vmatprep.subr.bf16.mxu0 %v6888_v3  ;;  %v6893_v8 = vld [vmem:[#allocation17 + $0x30] ss:$12 sps:$4 sm:$0xff]  }
  0xe4   :  { %v6894_v6 = vld [vmem:[#allocation17 + $0xc8] ss:$12 sps:$4 sm:$0xff]   ;;  %v6896_v9 = vld [vmem:[#allocation17 + $0x4c] ss:$12 sps:$4 sm:$0xff]   ;;  %v6901_v13 = vld [vmem:[#allocation17 + $0x64] ss:$12 sps:$4 sm:$0xff]  }
  0xe5   :  { %v6895_v7 = vld [vmem:[#allocation17 + $0x8] ss:$12 sps:$4 sm:$0xff]   ;;  %6253 = vmatprep.subr.bf16.mxu1 %v6894_v6  ;;  %v6899_v10 = vld [vmem:[#allocation17 + $0xe0] ss:$12 sps:$4 sm:$0xff]   ;;  %v6904_v14 = vld [vmem:[#allocation17 + $0xf8] ss:$12 sps:$4 sm:$0xff]  }
  0xe6   :  { %1273 = vmatpush1.bf16.msra.mxu0 %v6890_v4  ;;  %6254 = vmatpush3.bf16.msra.mxu1 %v6895_v7  ;;  %v6900_v11 = vld [vmem:[#allocation17 + $0x20] ss:$12 sps:$4 sm:$0xff]   ;;  %v6898_v12 = vld [vmem:[#allocation17 + $0x48] ss:$12 sps:$4 sm:$0xff]   ;;  %v6905_v15 = vld [vmem:[#allocation17 + $0x38] ss:$12 sps:$4 sm:$0xff]  }
  0xe7   :  { %1274 = vmatprep.subr.bf16.mxu0 %v6891_v5  ;;  %6255 = vmatprep.subr.bf16.mxu1 %v6899_v10  ;;  %v6903_v16 = vld [vmem:[#allocation17 + $0x60] ss:$12 sps:$4 sm:$0xff]   ;;  %v6909_v17 = vld [vmem:[#allocation17 + $0x110] ss:$12 sps:$4 sm:$0xff]   ;;  %v6908_v20 = vld [vmem:[#allocation17 + $0x78] ss:$12 sps:$4 sm:$0xff]  }
  0xe8   :  { %v6910_v18 = vld [vmem:[#allocation17 + $0x50] ss:$12 sps:$4 sm:$0xff]   ;;  %v6914_v21 = vld [vmem:[#allocation17 + $0x128] ss:$12 sps:$4 sm:$0xff]   ;;  %v6919_v24 = vld [vmem:[#allocation17 + $0x140] ss:$12 sps:$4 sm:$0xff]  }
  0xe9   :  { %v6906_v19 = vld [vmem:[#allocation17 + $0x7c] ss:$12 sps:$4 sm:$0xff]   ;;  %v6911_v23 = vld [vmem:[#allocation17 + $0x94] ss:$12 sps:$4 sm:$0xff]   ;;  %v6916_v26 = vld [vmem:[#allocation17 + $0xac] ss:$12 sps:$4 sm:$0xff]  }
  0xea   :  { %1275 = vmatpush1.bf16.msra.mxu0 %v6893_v8  ;;  %6256 = vmatpush3.bf16.msra.mxu1 %v6900_v11  ;;  %v6915_v22 = vld [vmem:[#allocation17 + $0x68] ss:$12 sps:$4 sm:$0xff]   ;;  %v6913_v25 = vld [vmem:[#allocation17 + $0x90] ss:$12 sps:$4 sm:$0xff]   ;;  %v6920_v27 = vld [vmem:[#allocation17 + $0x80] ss:$12 sps:$4 sm:$0xff]  }
  0xeb   :  { %1276 = vmatprep.subr.bf16.mxu0 %v6896_v9  ;;  %6257 = vmatprep.subr.bf16.mxu1 %v6904_v14  ;;  %v6924_v28 = vld [vmem:[#allocation17 + $0x158] ss:$12 sps:$4 sm:$0xff]   ;;  %v6918_v29 = vld [vmem:[#allocation17 + $0xa8] ss:$12 sps:$4 sm:$0xff]   ;;  %v6929_v32 = vld [vmem:[#allocation17 + $0x170] ss:$12 sps:$4 sm:$0xff]  }
  0xec   :  { %v6921_v30 = vld [vmem:[#allocation17 + $0xc4] ss:$12 sps:$4 sm:$0xff]   ;;  %v6923_v33 = vld [vmem:[#allocation17 + $0xc0] ss:$12 sps:$4 sm:$0xff]   ;;  %v6926_v34 = vld [vmem:[#allocation17 + $0xdc] ss:$12 sps:$4 sm:$0xff]  }
  0xed   :  { %v6925_v31 = vld [vmem:[#allocation17 + $0x98] ss:$12 sps:$4 sm:$0xff]   ;;  %v6930_v35 = vld [vmem:[#allocation17 + $0xb0] ss:$12 sps:$4 sm:$0xff]   ;;  %v305_v36 = vld [vmem:[%s7969_s0] sm:$0xff] }
  0xee   :  { %1277 = vmatpush1.bf16.msra.mxu0 %v6898_v12  ;;  %6258 = vmatpush3.bf16.msra.mxu1 %v6905_v15  ;;  %v306_v37 = vld [vmem:[%s7969_s0 + $0x8] sm:$0xff]  ;;  %v6194_v38 = vpack.c.bf16 %v305_v36, %v305_v36  ;;  %v6928_v45 = vld [vmem:[#allocation17 + $0xd8] ss:$12 sps:$4 sm:$0xff]   ;;  %v6942_v53 = vld [vmem:[#allocation17 + $0x260] ss:$12 sps:$4 sm:$0xff]  }
  0xef   :  { %1278 = vmatprep.subr.bf16.mxu0 %v6901_v13  ;;  %6259 = vmatprep.subr.bf16.mxu1 %v6909_v17  ;;  %v324_v39 = vld [vmem:[%s7969_s0 + $0x2] sm:$0xff]  ;;  %v325_v40 = vld [vmem:[%s7969_s0 + $0xa] sm:$0xff]  ;;  %v6195_v41 = vpack.c.bf16 %v306_v37, %v306_v37  ;;  %v326_v2 = vld [vmem:[%s7969_s0 + $0x12] sm:$0x3] }
  0xf0   :  { %v6197_v42 = vpack.c.bf16 %v324_v39, %v324_v39  ;;  %v6198_v43 = vpack.c.bf16 %v325_v40, %v325_v40  ;;  %v6937_v44 = vld [vmem:[#allocation17 + $0x248] ss:$12 sps:$4 sm:$0xff]   ;;  %321 = vst [vmem:[#allocation7] sm:$0xf] %v6194_v38  ;;  %v6933_v47 = vld [vmem:[#allocation17 + $0xf0] ss:$12 sps:$4 sm:$0xff]   ;;  %v6199_v5 = vpack.c.bf16 %v326_v2, %v326_v2 }
  0xf1   :  { %322 = vst [vmem:[#allocation7 + $0x14] sm:$0xf] %v6195_v41  ;;  %397 = vst [vmem:[#allocation7 + $0x10] sm:$0xf] %v6195_v41  ;;  %v6931_v46 = vld [vmem:[#allocation17 + $0xf4] ss:$12 sps:$4 sm:$0xff]  }
  0xf2   :  { %1279 = vmatpush1.bf16.msra.mxu0 %v6903_v16  ;;  %6260 = vmatpush3.bf16.msra.mxu1 %v6910_v18  ;;  %340 = vst [vmem:[#allocation7 + $0x4] sm:$0xf] %v6197_v42  ;;  %341 = vst [vmem:[#allocation7 + $0x18] sm:$0xf] %v6198_v43  ;;  %v6938_v48 = vld [vmem:[#allocation17 + $0x188] ss:$12 sps:$4 sm:$0xff]  }
  0xf3   :  { %1280 = vmatprep.subr.bf16.mxu0 %v6906_v19  ;;  %6261 = vmatprep.subr.bf16.mxu1 %v6914_v21  ;;  %v6939_v49 = vld [vmem:[#allocation17 + $0x10c] ss:$12 sps:$4 sm:$0xff]   ;;  %v6941_v52 = vld [vmem:[#allocation17 + $0x108] ss:$12 sps:$4 sm:$0xff]   ;;  %v6944_v54 = vld [vmem:[#allocation17 + $0x124] ss:$12 sps:$4 sm:$0xff]  }
  0xf4   :  { %v6943_v55 = vld [vmem:[#allocation17 + $0x1a0] ss:$12 sps:$4 sm:$0xff]   ;;  %v6947_v57 = vld [vmem:[#allocation17 + $0x278] ss:$12 sps:$4 sm:$0xff]   ;;  %v6949_v58 = vld [vmem:[#allocation17 + $0x13c] ss:$12 sps:$4 sm:$0xff]  }
  0xf5   :  { %v6946_v56 = vld [vmem:[#allocation17 + $0x120] ss:$12 sps:$4 sm:$0xff]   ;;  %v6948_v59 = vld [vmem:[#allocation17 + $0x1b8] ss:$12 sps:$4 sm:$0xff]   ;;  %v6952_v61 = vld [vmem:[#allocation17 + $0x290] ss:$12 sps:$4 sm:$0xff]  }
  0xf6   :  { %1281 = vmatpush1.bf16.msra.mxu0 %v6908_v20  ;;  %6262 = vmatpush3.bf16.msra.mxu1 %v6915_v22  ;;  %v6951_v60 = vld [vmem:[#allocation17 + $0x138] ss:$12 sps:$4 sm:$0xff]   ;;  %v6954_v62 = vld [vmem:[#allocation17 + $0x154] ss:$12 sps:$4 sm:$0xff]   ;;  %v6953_v63 = vld [vmem:[#allocation17 + $0x1d0] ss:$12 sps:$4 sm:$0xff]  }
  0xf7   :  { %1282 = vmatprep.subr.bf16.mxu0 %v6911_v23  ;;  %6263 = vmatprep.subr.bf16.mxu1 %v6919_v24  ;;  %v307_v1 = vld [vmem:[%s7969_s0 + $0x10] sm:$0x3]  ;;  %v6956_v3 = vld [vmem:[#allocation17 + $0x150] ss:$12 sps:$4 sm:$0xff]   ;;  %v6957_v6 = vld [vmem:[#allocation17 + $0x2a8] ss:$12 sps:$4 sm:$0xff]  }
  0xf8   :  { %v7638_v50 = vld [vmem:[#allocation7] ss:$20 sps:$4 sm:$0xff]   ;;  %v6196_v4 = vpack.c.bf16 %v307_v1, %v307_v1  ;;  %v6959_v7 = vld [vmem:[#allocation17 + $0x16c] ss:$12 sps:$4 sm:$0xff]   ;;  %342 = vst [vmem:[#allocation7 + $0x2c] sm:$0x1] %v6199_v5 }
  0xf9   :  { %v6936_v51 = vld [vmem:[#allocation7 + $0x4] ss:$20 sps:$4 sm:$0xff]   ;;  %v6962_v10 = vld [vmem:[#allocation17 + $0x2c0] ss:$12 sps:$4 sm:$0xff]   ;;  %v6966_v12 = vld [vmem:[#allocation17 + $0x184] ss:$12 sps:$4 sm:$0xff]  }
  0xfa   :  { %1283 = vmatpush1.bf16.msra.mxu0 %v6913_v25  ;;  %6264 = vmatpush3.bf16.msra.mxu1 %v6920_v27  ;;  %323 = vst [vmem:[#allocation7 + $0x28] sm:$0x1] %v6196_v4  ;;  %v6958_v8 = vld [vmem:[#allocation17 + $0x1e8] ss:$12 sps:$4 sm:$0xff]   ;;  %v6963_v11 = vld [vmem:[#allocation17 + $0x200] ss:$12 sps:$4 sm:$0xff]  }
  0xfb   :  { %1284 = vmatprep.subr.bf16.mxu0 %v6916_v26  ;;  %6265 = vmatprep.subr.bf16.mxu1 %v6924_v28  ;;  %v6961_v9 = vld [vmem:[#allocation17 + $0x168] ss:$12 sps:$4 sm:$0xff]   ;;  %v343_v13 = vld [vmem:[%s7969_s0 + $0x4] sm:$0xff]  ;;  %v6968_v24 = vld [vmem:[#allocation17 + $0x2d8] ss:$12 sps:$4 sm:$0xff]  }
  0xfc   :  { %1455 = vmatprep.mubr.bf16.mxu1 %v6936_v51  ;;  %1302 = vmatprep.mubr.bf16.mxu0 %v6936_v51  ;;  %v344_v14 = vld [vmem:[%s7969_s0 + $0xc] sm:$0xff]  ;;  %v6200_v15 = vpack.c.bf16 %v343_v13, %v343_v13  ;;  %v6964_v18 = vld [vmem:[#allocation17 + $0x180] ss:$12 sps:$4 sm:$0xff]   ;;  %v6973_v26 = vld [vmem:[#allocation17 + $0x19c] ss:$12 sps:$4 sm:$0xff]  }
  0xfd   :  { %v362_v16 = vld [vmem:[%s7969_s0 + $0x6] sm:$0xff]  ;;  %v363_v17 = vld [vmem:[%s7969_s0 + $0xe] sm:$0xff]  ;;  %v6201_v19 = vpack.c.bf16 %v344_v14, %v344_v14  ;;  %v364_v43 = vld [vmem:[%s7969_s0 + $0x16] sm:$0x3] }
  0xfe   :  { %1285 = vmatpush1.bf16.msra.mxu0 %v6918_v29  ;;  %6266 = vmatpush3.bf16.msra.mxu1 %v6925_v31  ;;  %v6203_v20 = vpack.c.bf16 %v362_v16, %v362_v16  ;;  %v6204_v21 = vpack.c.bf16 %v363_v17, %v363_v17  ;;  %359 = vst [vmem:[#allocation7 + $0x8] sm:$0xf] %v6200_v15  ;;  %v6970_v27 = vld [vmem:[#allocation17 + $0x218] ss:$12 sps:$4 sm:$0xff]   ;;  %v6974_v29 = vld [vmem:[#allocation17 + $0x2f0] ss:$12 sps:$4 sm:$0xff]  }
  0xff   :  { %1286 = vmatprep.subr.bf16.mxu0 %v6921_v30  ;;  %6267 = vmatprep.subr.bf16.mxu1 %v6929_v32  ;;  %360 = vst [vmem:[#allocation7 + $0x1c] sm:$0xf] %v6201_v19  ;;  %v6971_v28 = vld [vmem:[#allocation17 + $0x198] ss:$12 sps:$4 sm:$0xff]   ;;  %v6978_v30 = vld [vmem:[#allocation17 + $0x1b4] ss:$12 sps:$4 sm:$0xff]  }
 0x100   :  { %378 = vst [vmem:[#allocation7 + $0xc] sm:$0xf] %v6203_v20  ;;  %379 = vst [vmem:[#allocation7 + $0x20] sm:$0xf] %v6204_v21  ;;  %v6975_v31 = vld [vmem:[#allocation17 + $0x230] ss:$12 sps:$4 sm:$0xff]  }
 0x101   :  { %v406_v22 = vld [vmem:[#allocation7 + $0x28] sm:$0x11]  ;;  %v6983_v37 = vld [vmem:[#allocation17 + $0x1c8] ss:$12 sps:$4 sm:$0xff]   ;;  %v6986_v38 = vld [vmem:[#allocation17 + $0x320] ss:$12 sps:$4 sm:$0xff]  }
 0x102   :  { %1287 = vmatpush1.bf16.msra.mxu0 %v6923_v33  ;;  %6268 = vmatpush3.bf16.msra.mxu1 %v6930_v35  ;;  %v5963_v23 = vcombine.high %v406_v22, %v406_v22  ;;  %v5962_v25 = vcombine.low %v406_v22, %v406_v22  ;;  %v6976_v32 = vld [vmem:[#allocation17 + $0x1b0] ss:$12 sps:$4 sm:$0xff]   ;;  %v6982_v33 = vld [vmem:[#allocation17 + $0x308] ss:$12 sps:$4 sm:$0xff]   ;;  %v6985_v35 = vld [vmem:[#allocation17 + $0x1cc] ss:$12 sps:$4 sm:$0xff]  }
 0x103   :  { %1288 = vmatprep.subr.bf16.mxu0 %v6926_v34  ;;  %6281 = vmatprep.subr.bf16.mxu1 %v6937_v44  ;;  %v6989_v39 = vld [vmem:[#allocation17 + $0x1e4] ss:$12 sps:$4 sm:$0xff]   ;;  %v6987_v40 = vld [vmem:[#allocation17 + $0x1e0] ss:$12 sps:$4 sm:$0xff]   ;;  %v345_v41 = vld [vmem:[%s7969_s0 + $0x14] sm:$0x3] }
 0x104   :  { %v6202_v42 = vpack.c.bf16 %v345_v41, %v345_v41  ;;  %v6990_v44 = vld [vmem:[#allocation17 + $0x338] ss:$12 sps:$4 sm:$0xff]   ;;  %v6997_v51 = vld [vmem:[#allocation17 + $0x214] ss:$12 sps:$4 sm:$0xff]   ;;  %v7012_v5 = vld [vmem:[#allocation17 + $0x3b0] ss:$12 sps:$4 sm:$0xff]  }
 0x105   :  { %1456 = vmatmul.mubr.bf16.vlgmr.msra.gmra.mrb[0].mxu1 %v7638_v50  ;;  %v7003_v1 = vld [vmem:[#allocation17 + $0x240] ss:$12 sps:$4 sm:$0xff]   ;;  %v7008_v2 = vld [vmem:[#allocation17 + $0x398] ss:$12 sps:$4 sm:$0xff]   ;;  %v7026_v13 = vld [vmem:[#allocation17 + $0x2bc] ss:$12 sps:$4 sm:$0xff]  }
 0x106   :  { %1289 = vmatpush1.bf16.msra.mxu0 %v6928_v45  ;;  %6282 = vmatpush3.bf16.msra.mxu1 %v6938_v48  ;;  %v7660_v36 = vld [vmem:[#allocation7 + $0x8] ss:$20 sps:$4 sm:$0xff]   ;;  %v6205_v45 = vpack.c.bf16 %v364_v43, %v364_v43  ;;  %361 = vst [vmem:[#allocation7 + $0x30] sm:$0x1] %v6202_v42  ;;  %v6994_v48 = vld [vmem:[#allocation17 + $0x350] ss:$12 sps:$4 sm:$0xff]   ;;  %v571_v42 = vlaneseq }
 0x107   :  { %1290 = vmatprep.subr.bf16.mxu0 %v6931_v46  ;;  %6283 = vmatprep.subr.bf16.mxu1 %v6942_v53  ;;  %v6981_v34 = vld [vmem:[#allocation7 + $0xc] ss:$20 sps:$4 sm:$0xff]   ;;  %v7009_v4 = vld [vmem:[#allocation17 + $0x258] ss:$12 sps:$4 sm:$0xff]   ;;  %v7029_v15 = vld [vmem:[#allocation17 + $0x2d4] ss:$12 sps:$4 sm:$0xff]  }
 0x108   :  { %1463 = vmatprep.mubr.bf16.mxu1 %v5963_v23  ;;  %v6993_v46 = vld [vmem:[#allocation17 + $0x1fc] ss:$12 sps:$4 sm:$0xff]   ;;  %380 = vst [vmem:[#allocation7 + $0x34] sm:$0x1] %v6205_v45  ;;  %v7024_v14 = vld [vmem:[#allocation17 + $0x2b8] ss:$12 sps:$4 sm:$0xff]  }
 0x109   :  { %v7027_v16 = vld [vmem:[#allocation17 + $0x2d0] ss:$12 sps:$4 sm:$0xff]   ;;  %v7032_v17 = vld [vmem:[#allocation17 + $0x2ec] ss:$12 sps:$4 sm:$0xff]   ;;  %v7686_v43 = vshrl.u32 %v571_v42, 7 }
 0x10a   :  { %1291 = vmatpush1.bf16.msra.mxu0 %v6933_v47  ;;  %6284 = vmatpush3.bf16.msra.mxu1 %v6943_v55  ;;  %v6991_v47 = vld [vmem:[#allocation17 + $0x1f8] ss:$12 sps:$4 sm:$0xff]   ;;  %v6998_v55 = vld [vmem:[#allocation17 + $0x368] ss:$12 sps:$4 sm:$0xff]   ;;  %v7033_v20 = vld [vmem:[#allocation17 + $0x300] ss:$12 sps:$4 sm:$0xff]  }
 0x10b   :  { %1292 = vmatprep.subr.bf16.mxu0 %v6939_v49  ;;  %6285 = vmatprep.subr.bf16.mxu1 %v6947_v57  ;;  %v382_v49 = vld [vmem:[%s7969_s0 + $0x10] sm:$0xff]  ;;  %v7035_v19 = vld [vmem:[#allocation17 + $0x304] ss:$12 sps:$4 sm:$0xff]   ;;  %v7689_v45 = vsub.s32 2, %v7686_v43 }
 0x10c   :  { %v7038_v21 = vld [vmem:[#allocation17 + $0x31c] ss:$12 sps:$4 sm:$0xff]   ;;  %v7036_v22 = vld [vmem:[#allocation17 + $0x318] ss:$12 sps:$4 sm:$0xff]  }
 0x10d   :  { %1464 = vmatmul.mubr.bf16.gmra.mrb[4].mxu1 %v5962_v25 }
 0x10e   :  { %1293 = vmatpush1.bf16.msra.mxu0 %v6941_v52  ;;  %6286 = vmatpush3.bf16.msra.mxu1 %v6948_v59  ;;  %v6207_v52 = vpack.c.bf16 %v382_v49, %v382_v49 }
 0x10f   :  { %1294 = vmatprep.subr.bf16.mxu0 %v6944_v54  ;;  %6287 = vmatprep.subr.bf16.mxu1 %v6952_v61  ;;  %v6995_v54 = vld [vmem:[#allocation17 + $0x210] ss:$12 sps:$4 sm:$0xff]   ;;  %v407_v57 = vld [vmem:[#allocation7 + $0x30] sm:$0x11] }
 0x110   :  { %1503 = vmatprep.mubr.bf16.mxu1 %v6981_v34  ;;  %398 = vst [vmem:[#allocation7 + $0x24] sm:$0xf] %v6207_v52  ;;  %v7675_v59 = vcombine.low %v407_v57, %v407_v57  ;;  %v7002_v61 = vld [vmem:[#allocation17 + $0x380] ss:$12 sps:$4 sm:$0xff]  }
 0x112   :  { %1295 = vmatpush1.bf16.msra.mxu0 %v6946_v56  ;;  %6288 = vmatpush3.bf16.msra.mxu1 %v6953_v63  ;;  %v7001_v56 = vld [vmem:[#allocation17 + $0x22c] ss:$12 sps:$4 sm:$0xff]  }
 0x113   :  { %1296 = vmatprep.subr.bf16.mxu0 %v6949_v58  ;;  %6289 = vmatprep.subr.bf16.mxu1 %v6957_v6  ;;  %v5965_v58 = vcombine.high %v407_v57, %v407_v57  ;;  %v7015_v6 = vld [vmem:[#allocation17 + $0x274] ss:$12 sps:$4 sm:$0xff]  }
 0x116   :  { %1297 = vmatpush1.bf16.msra.mxu0 %v6951_v60  ;;  %6290 = vmatpush3.bf16.msra.mxu1 %v6958_v8  ;;  %v6999_v60 = vld [vmem:[#allocation17 + $0x228] ss:$12 sps:$4 sm:$0xff]   ;;  %v7020_v8 = vld [vmem:[#allocation17 + $0x28c] ss:$12 sps:$4 sm:$0xff]  }
 0x117   :  { %1298 = vmatprep.subr.bf16.mxu0 %v6954_v62  ;;  %6291 = vmatprep.subr.bf16.mxu1 %v6962_v10  ;;  %v7005_v62 = vld [vmem:[#allocation17 + $0x244] ss:$12 sps:$4 sm:$0xff]   ;;  %v7678_v63 = vld [vmem:[#allocation7 + $0x10] ss:$20 sps:$4 sm:$0xff]  }
 0x118   :  { %v7018_v10 = vld [vmem:[#allocation17 + $0x288] ss:$12 sps:$4 sm:$0xff]  }
 0x11a   :  { %1299 = vmatpush1.bf16.msra.mxu0 %v6956_v3  ;;  %6292 = vmatpush3.bf16.msra.mxu1 %v6963_v11  ;;  %v7011_v3 = vld [vmem:[#allocation17 + $0x25c] ss:$12 sps:$4 sm:$0xff]   ;;  %v7023_v11 = vld [vmem:[#allocation17 + $0x2a4] ss:$12 sps:$4 sm:$0xff]  }
 0x11b   :  { %1300 = vmatprep.subr.bf16.mxu0 %v6959_v7  ;;  %6293 = vmatprep.subr.bf16.mxu1 %v6968_v24  ;;  %v7013_v7 = vld [vmem:[#allocation17 + $0x270] ss:$12 sps:$4 sm:$0xff]  }
 0x11c   :  { %v7039_v24 = vld [vmem:[#allocation17 + $0x330] ss:$12 sps:$4 sm:$0xff]  }
 0x11e   :  { %1301 = vmatpush1.bf16.msra.mxu0 %v6961_v9  ;;  %6294 = vmatpush3.bf16.msra.mxu1 %v6970_v27  ;;  %v7363_v27 = vmov 0  }
 0x11f   :  { %1321 = vmatprep.subr.bf16.mxu0 %v6966_v12  ;;  %6295 = vmatprep.subr.bf16.mxu1 %v6974_v29  ;;  %v7021_v12 = vld [vmem:[#allocation17 + $0x2a0] ss:$12 sps:$4 sm:$0xff]  }
 0x120   :  { %v7045_v29 = vld [vmem:[#allocation17 + $0x360] ss:$12 sps:$4 sm:$0xff]  }
 0x121   :  { %1303 = vmatmul.mubr.bf16.vlgmr.msra.gmra.mrb[0].mxu0 %v7638_v50  ;;  %v383_v50 = vld [vmem:[%s7969_s0 + $0x18] sm:$0x3] }
 0x122   :  { %1322 = vmatpush1.bf16.msra.mxu0 %v6964_v18  ;;  %1312 = vmatprep.mubr.bf16.mxu0 %v5963_v23  ;;  %v6208_v53 = vpack.c.bf16 %v383_v50, %v383_v50  ;;  %v7030_v18 = vld [vmem:[#allocation17 + $0x2e8] ss:$12 sps:$4 sm:$0xff]  }
 0x123   :  { %1323 = vmatprep.subr.bf16.mxu0 %v6973_v26  ;;  %6296 = vmatpush3.bf16.msra.mxu1 %v6975_v31  ;;  %v7041_v23 = vld [vmem:[#allocation17 + $0x334] ss:$12 sps:$4 sm:$0xff]   ;;  %v7048_v31 = vld [vmem:[#allocation17 + $0x378] ss:$12 sps:$4 sm:$0xff]  }
 0x124   :  { %6538 = vmatprep.subr.bf16.mxu1 %v6982_v33  ;;  %399 = vst [vmem:[#allocation7 + $0x38] sm:$0x1] %v6208_v53  ;;  %v7042_v26 = vld [vmem:[#allocation17 + $0x348] ss:$12 sps:$4 sm:$0xff]  }
 0x126   :  { %1324 = vmatpush1.bf16.msra.mxu0 %v6971_v28  ;;  %1504 = vmatmul.mubr.bf16.vlgmr.msra.gmra.mrb[8].mxu1 %v7660_v36  ;;  %v7047_v28 = vld [vmem:[#allocation17 + $0x364] ss:$12 sps:$4 sm:$0xff]  }
 0x127   :  { %1325 = vmatprep.subr.bf16.mxu0 %v6978_v30  ;;  %6539 = vmatpush3.bf16.msra.mxu1 %v6982_v33  ;;  %v7050_v30 = vld [vmem:[#allocation17 + $0x37c] ss:$12 sps:$4 sm:$0xff]  }
 0x128   :  { %6540 = vmatprep.subr.bf16.mxu1 %v6986_v38  ;;  %1511 = vmatprep.mubr.bf16.mxu1 %v5965_v58  ;;  %v7051_v33 = vld [vmem:[#allocation17 + $0x390] ss:$12 sps:$4 sm:$0xff]  }
 0x129   :  { %1313 = vmatmul.mubr.bf16.gmra.mrb[4].mxu0 %v5962_v25  ;;  %v7044_v25 = vld [vmem:[#allocation17 + $0x34c] ss:$12 sps:$4 sm:$0xff]  }
 0x12a   :  { %1326 = vmatpush1.bf16.msra.mxu0 %v6976_v32  ;;  %1353 = vmatprep.mubr.bf16.mxu0 %v6981_v34  ;;  %v7053_v32 = vld [vmem:[#allocation17 + $0x394] ss:$12 sps:$4 sm:$0xff]   ;;  %v7056_v34 = vld [vmem:[#allocation17 + $0x3ac] ss:$12 sps:$4 sm:$0xff]  }
 0x12b   :  { %1327 = vmatprep.subr.bf16.mxu0 %v6985_v35  ;;  %6541 = vmatpush3.bf16.msra.mxu1 %v6986_v38  ;;  %v7017_v9 = vld [vmem:[#allocation7 + $0x38] ss:$0 sps:$4 sm:$0x11]  }
 0x12c   :  { %6542 = vmatprep.subr.bf16.mxu1 %v6990_v44  ;;  %v7054_v35 = vld [vmem:[#allocation17 + $0x3a8] ss:$12 sps:$4 sm:$0xff]  }
 0x12e   :  { %1328 = vmatpush1.bf16.msra.mxu0 %v6983_v37  ;;  %1512 = vmatmul.mubr.bf16.gmra.mrb[12].mxu1 %v7675_v59 }
 0x12f   :  { %1329 = vmatprep.subr.bf16.mxu0 %v6989_v39  ;;  %6543 = vmatpush3.bf16.msra.mxu1 %v6990_v44 }
 0x130   :  { %6544 = vmatprep.subr.bf16.mxu1 %v6994_v48  ;;  %6554 = vmatprep.mubr.bf16.mxu1 %v7678_v63 }
 0x132   :  { %1330 = vmatpush1.bf16.msra.mxu0 %v6987_v40 }
 0x133   :  { %1331 = vmatprep.subr.bf16.mxu0 %v6993_v46  ;;  %6545 = vmatpush3.bf16.msra.mxu1 %v6994_v48 }
 0x134   :  { %6546 = vmatprep.subr.bf16.mxu1 %v6998_v55 }
 0x136   :  { %1332 = vmatpush1.bf16.msra.mxu0 %v6991_v47  ;;  %v569_v47 = vld [vmem:[#allocation19] sm:$0x7] }
 0x137   :  { %1333 = vmatprep.subr.bf16.mxu0 %v6997_v51  ;;  %6547 = vmatpush3.bf16.msra.mxu1 %v6998_v55  ;;  %v582_v51 = vrot.slane %v569_v47, %v7689_v45 }
 0x138   :  { %6548 = vmatprep.subr.bf16.mxu1 %v7002_v61 }
 0x13a   :  { %1334 = vmatpush1.bf16.msra.mxu0 %v6995_v54 }
 0x13b   :  { %1335 = vmatprep.subr.bf16.mxu0 %v7001_v56  ;;  %6549 = vmatpush3.bf16.msra.mxu1 %v7002_v61 }
 0x13c   :  { %6550 = vmatprep.subr.bf16.mxu1 %v7008_v2 }
 0x13e   :  { %1336 = vmatpush1.bf16.msra.mxu0 %v6999_v60 }
 0x13f   :  { %1337 = vmatprep.subr.bf16.mxu0 %v7005_v62  ;;  %6551 = vmatpush3.bf16.msra.mxu1 %v7008_v2 }
 0x140   :  { %6552 = vmatprep.subr.bf16.mxu1 %v7012_v5 }
 0x142   :  { %1338 = vmatpush1.bf16.msra.mxu0 %v7003_v1 }
 0x143   :  { %1339 = vmatprep.subr.bf16.mxu0 %v7011_v3  ;;  %6553 = vmatpush3.bf16.msra.mxu1 %v7012_v5 }
 0x146   :  { %1340 = vmatpush1.bf16.msra.mxu0 %v7009_v4  ;;  %6555 = vmatmul.mubr.bf16.vlgmr.msra.gmra.mrb[16].mxu1 %v7017_v9 }
 0x147   :  { %1341 = vmatprep.subr.bf16.mxu0 %v7015_v6 }
 0x14a   :  { %1342 = vmatpush1.bf16.msra.mxu0 %v7013_v7 }
 0x14b   :  { %1343 = vmatprep.subr.bf16.mxu0 %v7020_v8 }
 0x14e   :  { %1344 = vmatpush1.bf16.msra.mxu0 %v7018_v10 }
 0x14f   :  { %1345 = vmatprep.subr.bf16.mxu0 %v7023_v11 }
 0x152   :  { %1346 = vmatpush1.bf16.msra.mxu0 %v7021_v12 }
 0x153   :  { %1347 = vmatprep.subr.bf16.mxu0 %v7026_v13 }
 0x156   :  { %1348 = vmatpush1.bf16.msra.mxu0 %v7024_v14 }
 0x157   :  { %1349 = vmatprep.subr.bf16.mxu0 %v7029_v15 }
 0x15a   :  { %1350 = vmatpush1.bf16.msra.mxu0 %v7027_v16 }
 0x15b   :  { %1351 = vmatprep.subr.bf16.mxu0 %v7032_v17 }
 0x15e   :  { %1352 = vmatpush1.bf16.msra.mxu0 %v7030_v18 }
 0x15f   :  { %1372 = vmatprep.subr.bf16.mxu0 %v7035_v19 }
 0x161   :  { %1354 = vmatmul.mubr.bf16.vlgmr.msra.gmra.mrb[0].mxu0 %v7660_v36 }
 0x162   :  { %1373 = vmatpush1.bf16.msra.mxu0 %v7033_v20  ;;  %1363 = vmatprep.mubr.bf16.mxu0 %v5965_v58 }
 0x163   :  { %1374 = vmatprep.subr.bf16.mxu0 %v7038_v21  ;;  %v7695_v21 = vsub.s32 0, %v7686_v43 }
 0x166   :  { %1375 = vmatpush1.bf16.msra.mxu0 %v7036_v22  ;;  %v7698_v22 = vsub.s32 1, %v7686_v43 }
 0x167   :  { %1376 = vmatprep.subr.bf16.mxu0 %v7041_v23  ;;  %v574_v23 = vrot.slane %v569_v47, %v7695_v21 }
 0x169   :  { %1364 = vmatmul.mubr.bf16.gmra.mrb[4].mxu0 %v7675_v59 }
 0x16a   :  { %1377 = vmatpush1.bf16.msra.mxu0 %v7039_v24  ;;  %1404 = vmatprep.mubr.bf16.mxu0 %v7363_v27  ;;  %v578_v24 = vrot.slane %v569_v47, %v7698_v22 }
 0x16b   :  { %1378 = vmatprep.subr.bf16.mxu0 %v7044_v25 }
 0x16e   :  { %1379 = vmatpush1.bf16.msra.mxu0 %v7042_v26 }
 0x16f   :  { %1380 = vmatprep.subr.bf16.mxu0 %v7047_v28 }
 0x172   :  { %1381 = vmatpush1.bf16.msra.mxu0 %v7045_v29 }
 0x173   :  { %1382 = vmatprep.subr.bf16.mxu0 %v7050_v30 }
 0x176   :  { %1383 = vmatpush1.bf16.msra.mxu0 %v7048_v31 }
 0x177   :  { %1384 = vmatprep.subr.bf16.mxu0 %v7053_v32 }
 0x17a   :  { %1385 = vmatpush1.bf16.msra.mxu0 %v7051_v33 }
 0x17b   :  { %1386 = vmatprep.subr.bf16.mxu0 %v7056_v34 }
 0x17e   :  { %1387 = vmatpush1.bf16.msra.mxu0 %v7054_v35 }
 0x181   :  { %1405 = vmatmul.mubr.bf16.vlgmr.msra.gmra.mrb[0].mxu0 %v7678_v63 }
 0x182   :  { %1414 = vmatprep.mubr.bf16.mxu0 %v7363_v27 }
 0x189   :  { %1415 = vmatmul.mubr.bf16.gmra.mrb[4].mxu0 %v7017_v9 }
 0x1d8   :  { %v6269_v36 = vpop.f32.mrb[0].mxu1 }
 0x1d9   :  { %v6270_v37 = vpop.f32.mrb[1].mxu1 }
 0x1da   :  { %v6271_v38 = vadd.f32 %v6270_v37, %v6269_v36  ;;  %v6272_v39 = vpop.f32.mrb[2].mxu1 }
 0x1db   :  { %v6273_v40 = vpop.f32.mrb[3].mxu1 }
 0x1dc   :  { %v6274_v41 = vadd.f32 %v6273_v40, %v6272_v39  ;;  %v1458_v52 = vadd.f32 %v6271_v38, %v582_v51 }
 0x1de   :  { %v1461_v55 = vadd.f32 %v6274_v41, %v582_v51 }
 0x1e0   :  { %v6275_v44 = vpop.f32.mrb[4].mxu1 }
 0x1e1   :  { %v6276_v46 = vpop.f32.mrb[5].mxu1 }
 0x1e2   :  { %v6277_v48 = vadd.f32 %v6276_v46, %v6275_v44  ;;  %v6278_v49 = vpop.f32.mrb[6].mxu1 }
 0x1e3   :  { %v6279_v50 = vpop.f32.mrb[7].mxu1 }
 0x1e4   :  { %v1466_v62 = vadd.f32 %v6277_v48, %v582_v51 }
 0x1f9   :  { %v6297_v53 = vpop.f32.mrb[8].mxu1 }
 0x1fa   :  { %v6298_v54 = vpop.f32.mrb[9].mxu1 }
 0x1fb   :  { %v6299_v56 = vadd.f32 %v6298_v54, %v6297_v53  ;;  %v6300_v57 = vpop.f32.mrb[10].mxu1 }
 0x1fc   :  { %v6301_v58 = vpop.f32.mrb[11].mxu1 }
 0x1fd   :  { %v6302_v59 = vadd.f32 %v6301_v58, %v6300_v57  ;;  %v1506_v60 = vadd.f32 %v6299_v56, %v1458_v52 }
 0x1ff   :  { %v1509_v61 = vadd.f32 %v6302_v59, %v1461_v55 }
 0x201   :  { %v6303_v63 = vpop.f32.mrb[12].mxu1 }
 0x202   :  { %v6304_v1 = vpop.f32.mrb[13].mxu1 }
 0x203   :  { %v6305_v2 = vadd.f32 %v6304_v1, %v6303_v63  ;;  %v6306_v3 = vpop.f32.mrb[14].mxu1 }
 0x204   :  { %v6307_v4 = vpop.f32.mrb[15].mxu1 }
 0x205   :  { %v1514_v5 = vadd.f32 %v6305_v2, %v1466_v62 }
 0x219   :  { %v6556_v6 = vpop.f32.mrb[16].mxu1 }
 0x21a   :  { %v1562_v7 = vadd.f32 %v6556_v6, %v1514_v5  ;;  %v1553_v8 = vpop.f32.mrb[17].mxu1 }
 0x21b   :  { %v1554_v9 = vadd.f32 %v1553_v8, %v1506_v60  ;;  %v6557_v10 = vpop.f32.mrb[18].mxu1 }
 0x21c   :  { %v1575_v11 = vmax.f32 %v1562_v7, 0.0  ;;  %v1556_v12 = vpop.f32.mrb[19].mxu1 }
 0x21d   :  { %v1569_v13 = vmax.f32 %v1554_v9, 0.0  ;;  %v1557_v14 = vadd.f32 %v1556_v12, %v1509_v61 }
 0x21e   :  { %v1599_v15 = vrot.slane %v1575_v11, 6 }
 0x21f   :  { %v1588_v16 = vrot.slane %v1569_v13, 6  ;;  %v1572_v17 = vmax.f32 %v1557_v14, 0.0 }
 0x221   :  { %1612 = vst [vmem:[#allocation2 + $0x10] sm:$0xfc] %v1588_v16  ;;  %v1593_v18 = vrot.slane %v1572_v17, 6 }
 0x223   :  { %v1594_v19 = vsel %vm1585_vm0, %v1588_v16, %v1593_v18  ;;  %v1600_v20 = vsel %vm1585_vm0, %v1593_v18, %v1599_v15 }
 0x224   :  { %1615 = vst [vmem:[#allocation2 + $0x28] sm:$0xff] %v1594_v19  ;;  %1618 = vst [vmem:[#allocation2 + $0x40] sm:$0xf] %v1600_v20 }
 0x254   :  { %v1406_v25 = vpop.f32.mrb[0].mxu0 }
 0x255   :  { %v6681_v26 = vadd.f32 %v1406_v25, %v574_v23  ;;  %v1408_v28 = vpop.f32.mrb[1].mxu0 }
 0x256   :  { %v6682_v29 = vadd.f32 %v1408_v28, %v578_v24  ;;  %v1410_v30 = vpop.f32.mrb[2].mxu0 }
 0x257   :  { %v1567_v31 = vmax.f32 %v6681_v26, 0.0  ;;  %v6683_v32 = vadd.f32 %v1410_v30, %v574_v23  ;;  %v1412_v33 = vpop.f32.mrb[3].mxu0 }
 0x258   :  { %v1568_v34 = vmax.f32 %v6682_v29, 0.0  ;;  %v6684_v35 = vadd.f32 %v1412_v33, %v578_v24 }
 0x259   :  { %v1586_v36 = vrot.slane %v1567_v31, 6  ;;  %v1570_v37 = vmax.f32 %v6683_v32, 0.0 }
 0x25a   :  { %v1587_v38 = vrot.slane %v1568_v34, 6  ;;  %v1571_v39 = vmax.f32 %v6684_v35, 0.0 }
 0x25b   :  { %1610 = vst [vmem:[#allocation2] sm:$0xfc] %v1586_v36  ;;  %v1589_v40 = vrot.slane %v1570_v37, 6 }
 0x25c   :  { %1611 = vst [vmem:[#allocation2 + $0x8] sm:$0xfc] %v1587_v38  ;;  %v1591_v41 = vrot.slane %v1571_v39, 6  ;;  %v1416_v42 = vpop.f32.mrb[4].mxu0 }
 0x25d   :  { %v1590_v44 = vsel %vm1585_vm0, %v1586_v36, %v1589_v40  ;;  %v6685_v46 = vadd.f32 %v1416_v42, %v574_v23  ;;  %v1418_v47 = vpop.f32.mrb[5].mxu0 }
 0x25e   :  { %1613 = vst [vmem:[#allocation2 + $0x18] sm:$0xff] %v1590_v44  ;;  %v1592_v48 = vsel %vm1585_vm0, %v1587_v38, %v1591_v41  ;;  %v6686_v49 = vadd.f32 %v1418_v47, %v578_v24  ;;  %v1420_v50 = vpop.f32.mrb[6].mxu0 }
 0x25f   :  { %1614 = vst [vmem:[#allocation2 + $0x20] sm:$0xff] %v1592_v48  ;;  %v1573_v51 = vmax.f32 %v6685_v46, 0.0  ;;  %v1421_v52 = vpop.f32.mrb[7].mxu0 }
 0x260   :  { %v1574_v53 = vmax.f32 %v6686_v49, 0.0 }
 0x261   :  { %v1595_v54 = vrot.slane %v1573_v51, 6 }
 0x262   :  { %v1597_v55 = vrot.slane %v1574_v53, 6 }
 0x263   :  { %v1596_v56 = vsel %vm1585_vm0, %v1589_v40, %v1595_v54 }
 0x264   :  { %1616 = vst [vmem:[#allocation2 + $0x30] sm:$0xf] %v1596_v56  ;;  %v1598_v57 = vsel %vm1585_vm0, %v1591_v41, %v1597_v55 }
 0x265   :  { %1617 = vst [vmem:[#allocation2 + $0x38] sm:$0xf] %v1598_v57 }
 0x266   :  { %7321 = dma.done.wait [#allocation16], 61440 }
 0x267   :  { %7322 = vsyncadd [#allocation16], 4294905856  ;;  %v1871_v58 = vld [vmem:[#allocation12 + $0x8] sm:$0xff]  ;;  %v1873_v59 = vld [vmem:[#allocation12 + $0x18] sm:$0xff]  ;;  %vm1681_vm1 = vcmask 1042432   ;;  %vm1682_vm2 = vcmask 1046532  }
 0x268   :  { %v1870_v60 = vld [vmem:[#allocation12] sm:$0xff]  ;;  %2448 = vmatprep.subr.bf16.mxu1 %v1871_v58  ;;  %2792 = vmatprep.subr.bf16.mxu0 %v1873_v59  ;;  %v1872_v61 = vld [vmem:[#allocation12 + $0x10] sm:$0xff]  ;;  %v1875_v62 = vld [vmem:[#allocation12 + $0x28] sm:$0xff]  ;;  %vm1739_vm4 = vcmask 1045508   ;;  %vm1799_vm6 = vcmask 1040384   ;;  %vm1800_vm7 = vcmask 1044484  }
 0x269   :  { %v1877_v63 = vld [vmem:[#allocation12 + $0x38] sm:$0xff]  ;;  %2449 = vmatpush1.bf16.msra.mxu1 %v1870_v60  ;;  %2793 = vmatpush1.bf16.msra.mxu0 %v1872_v61  ;;  %v1874_v1 = vld [vmem:[#allocation12 + $0x20] sm:$0xff]  ;;  %v1876_v2 = vld [vmem:[#allocation12 + $0x30] sm:$0xff] }
 0x26a   :  { %2450 = vmatprep.subr.bf16.mxu1 %v1875_v62  ;;  %2794 = vmatprep.subr.bf16.mxu0 %v1877_v63  ;;  %v1879_v3 = vld [vmem:[#allocation12 + $0x48] sm:$0xff]  ;;  %v1881_v4 = vld [vmem:[#allocation12 + $0x58] sm:$0xff]  ;;  %v1878_v5 = vld [vmem:[#allocation12 + $0x40] sm:$0xff] }
 0x26b   :  { %v1880_v6 = vld [vmem:[#allocation12 + $0x50] sm:$0xff]  ;;  %v1883_v7 = vld [vmem:[#allocation12 + $0x68] sm:$0xff]  ;;  %v1885_v8 = vld [vmem:[#allocation12 + $0x78] sm:$0xff] }
 0x26c   :  { %v1882_v9 = vld [vmem:[#allocation12 + $0x60] sm:$0xff]  ;;  %v1884_v10 = vld [vmem:[#allocation12 + $0x70] sm:$0xff]  ;;  %v1887_v11 = vld [vmem:[#allocation12 + $0x88] sm:$0xff] }
 0x26d   :  { %2451 = vmatpush1.bf16.msra.mxu1 %v1874_v1  ;;  %2795 = vmatpush1.bf16.msra.mxu0 %v1876_v2  ;;  %v1889_v12 = vld [vmem:[#allocation12 + $0x98] sm:$0xff]  ;;  %v1886_v13 = vld [vmem:[#allocation12 + $0x80] sm:$0xff]  ;;  %v1888_v14 = vld [vmem:[#allocation12 + $0x90] sm:$0xff] }
 0x26e   :  { %2452 = vmatprep.subr.bf16.mxu1 %v1879_v3  ;;  %2796 = vmatprep.subr.bf16.mxu0 %v1881_v4  ;;  %v1891_v15 = vld [vmem:[#allocation12 + $0xa8] sm:$0xff]  ;;  %v1893_v16 = vld [vmem:[#allocation12 + $0xb8] sm:$0xff]  ;;  %v1890_v17 = vld [vmem:[#allocation12 + $0xa0] sm:$0xff] }
 0x26f   :  { %v1892_v18 = vld [vmem:[#allocation12 + $0xb0] sm:$0xff]  ;;  %v1895_v19 = vld [vmem:[#allocation12 + $0xc8] sm:$0xff]  ;;  %v1897_v20 = vld [vmem:[#allocation12 + $0xd8] sm:$0xff] }
 0x270   :  { %v1629_v23 = vld [vmem:[#allocation2] sm:$0xff]  ;;  %v1630_v24 = vld [vmem:[#allocation2 + $0x8] sm:$0xff]  ;;  %v1632_v25 = vld [vmem:[#allocation2 + $0x18] sm:$0x3f] }
 0x271   :  { %2453 = vmatpush1.bf16.msra.mxu1 %v1878_v5  ;;  %2797 = vmatpush1.bf16.msra.mxu0 %v1880_v6  ;;  %v1633_v26 = vld [vmem:[#allocation2 + $0x20] sm:$0x3f]  ;;  %v7706_v28 = vpack.c.bf16 %v1630_v24, %v1629_v23  ;;  %v1894_v29 = vld [vmem:[#allocation12 + $0xc0] sm:$0xff]  ;;  %v1896_v30 = vld [vmem:[#allocation12 + $0xd0] sm:$0xff] }
 0x272   :  { %2454 = vmatprep.subr.bf16.mxu1 %v1883_v7  ;;  %2798 = vmatprep.subr.bf16.mxu0 %v1885_v8  ;;  %v6211_v31 = vpack.c.bf16 %v1633_v26, %v1632_v25  ;;  %v1899_v32 = vld [vmem:[#allocation12 + $0xe8] sm:$0xff]  ;;  %v1901_v33 = vld [vmem:[#allocation12 + $0xf8] sm:$0xff]  ;;  %v1898_v34 = vld [vmem:[#allocation12 + $0xe0] sm:$0xff] }
 0x273   :  { %v1900_v35 = vld [vmem:[#allocation12 + $0xf0] sm:$0xff]  ;;  %v1903_v36 = vld [vmem:[#allocation12 + $0x108] sm:$0xff]  ;;  %v1905_v37 = vld [vmem:[#allocation12 + $0x118] sm:$0xff] }
 0x274   :  { %1657 = vst [vmem:[#allocation8 + $0x3c] sm:$0x77] %v6211_v31  ;;  %v1902_v38 = vld [vmem:[#allocation12 + $0x100] sm:$0xff]  ;;  %v1904_v39 = vld [vmem:[#allocation12 + $0x110] sm:$0xff]  ;;  %v1907_v40 = vld [vmem:[#allocation12 + $0x128] sm:$0xff] }
 0x275   :  { %2455 = vmatpush1.bf16.msra.mxu1 %v1882_v9  ;;  %2799 = vmatpush1.bf16.msra.mxu0 %v1884_v10  ;;  %v1909_v41 = vld [vmem:[#allocation12 + $0x138] sm:$0xff]  ;;  %v1906_v46 = vld [vmem:[#allocation12 + $0x120] sm:$0xff]  ;;  %v1908_v47 = vld [vmem:[#allocation12 + $0x130] sm:$0xff] }
 0x276   :  { %2456 = vmatprep.subr.bf16.mxu1 %v1887_v11  ;;  %2800 = vmatprep.subr.bf16.mxu0 %v1889_v12  ;;  %v1911_v48 = vld [vmem:[#allocation12 + $0x148] sm:$0xff]  ;;  %v1913_v49 = vld [vmem:[#allocation12 + $0x158] sm:$0xff]  ;;  %v1910_v50 = vld [vmem:[#allocation12 + $0x140] sm:$0xff] }
 0x277   :  { %v1912_v51 = vld [vmem:[#allocation12 + $0x150] sm:$0xff]  ;;  %v1915_v52 = vld [vmem:[#allocation12 + $0x168] sm:$0xff]  ;;  %v1917_v53 = vld [vmem:[#allocation12 + $0x178] sm:$0xff] }
 0x278   :  { %v1914_v54 = vld [vmem:[#allocation12 + $0x160] sm:$0xff]  ;;  %v1916_v55 = vld [vmem:[#allocation12 + $0x170] sm:$0xff]  ;;  %v1919_v56 = vld [vmem:[#allocation12 + $0x188] sm:$0xff] }
 0x279   :  { %2457 = vmatpush1.bf16.msra.mxu1 %v1886_v13  ;;  %2801 = vmatpush1.bf16.msra.mxu0 %v1888_v14  ;;  %v1921_v57 = vld [vmem:[#allocation12 + $0x198] sm:$0xff]  ;;  %v1634_v59 = vld [vmem:[#allocation2 + $0x28] sm:$0x3f]  ;;  %v1659_v62 = vld [vmem:[#allocation2] sm:$0xfc] }
 0x27a   :  { %2458 = vmatprep.subr.bf16.mxu1 %v1891_v15  ;;  %2802 = vmatprep.subr.bf16.mxu0 %v1893_v16  ;;  %v1631_v58 = vld [vmem:[#allocation2 + $0x10] sm:$0xff]  ;;  %v6212_v61 = vpack.c.bf16 %v1634_v59, %v1634_v59  ;;  %v1660_v63 = vld [vmem:[#allocation2 + $0x8] sm:$0xfc]  ;;  %v1662_v1 = vld [vmem:[#allocation2 + $0x18] sm:$0xff] }
 0x27b   :  { %v7708_v42 = vld [vmem:[#allocation8 + $0x3c] sm:$0x77]  ;;  %v6210_v60 = vpack.c.bf16 %v1631_v58, %v1631_v58  ;;  %v6213_v3 = vpack.c.bf16 %v1660_v63, %v1659_v62  ;;  %v1918_v4 = vld [vmem:[#allocation12 + $0x180] sm:$0xff]  ;;  %v1920_v5 = vld [vmem:[#allocation12 + $0x190] sm:$0xff] }
 0x27c   :  { %v6118_v44 = vcombine.high %v7706_v28, %v7708_v42  ;;  %v1663_v2 = vld [vmem:[#allocation2 + $0x20] sm:$0xff]  ;;  %1658 = vst [vmem:[#allocation8 + $0x44] sm:$0x7] %v6212_v61  ;;  %v1925_v8 = vld [vmem:[#allocation12 + $0x1b8] sm:$0xff]  ;;  %vm7715_vm3 = vmor %vm1681_vm1, %vm1682_vm2 }
 0x27d   :  { %2459 = vmatpush1.bf16.msra.mxu1 %v1890_v17  ;;  %2803 = vmatpush1.bf16.msra.mxu0 %v1892_v18  ;;  %1656 = vst [vmem:[#allocation8 + $0x8] sm:$0xf] %v6210_v60  ;;  %v7712_v6 = vpack.c.bf16 %v1663_v2, %v1662_v1  ;;  %v1923_v7 = vld [vmem:[#allocation12 + $0x1a8] sm:$0xff]  ;;  %v6095_v10 = vrot.slane %v6213_v3, 9  ;;  %v1922_v12 = vld [vmem:[#allocation12 + $0x1a0] sm:$0xff]  ;;  %v1924_v13 = vld [vmem:[#allocation12 + $0x1b0] sm:$0xff] }
 0x27e   :  { %2460 = vmatprep.subr.bf16.mxu1 %v1895_v19  ;;  %2804 = vmatprep.subr.bf16.mxu0 %v1897_v20  ;;  %v1927_v16 = vld [vmem:[#allocation12 + $0x1c8] sm:$0xff]  ;;  %v1929_v17 = vld [vmem:[#allocation12 + $0x1d8] sm:$0xff]  ;;  %v1926_v18 = vld [vmem:[#allocation12 + $0x1c0] sm:$0xff] }
 0x27f   :  { %2480 = vmatprep.mubr.bf16.mxu1 %v6118_v44  ;;  %2824 = vmatprep.mubr.bf16.mxu0 %v6118_v44  ;;  %v1686_v11 = vrot.slane %v7712_v6, 5  ;;  %v1928_v19 = vld [vmem:[#allocation12 + $0x1d0] sm:$0xff]  ;;  %v1931_v20 = vld [vmem:[#allocation12 + $0x1e8] sm:$0xff]  ;;  %v1933_v23 = vld [vmem:[#allocation12 + $0x1f8] sm:$0xff] }
 0x280   :  { %v1930_v24 = vld [vmem:[#allocation12 + $0x1e0] sm:$0xff]  ;;  %v1932_v25 = vld [vmem:[#allocation12 + $0x1f0] sm:$0xff]  ;;  %v1935_v26 = vld [vmem:[#allocation12 + $0x208] sm:$0xff] }
 0x281   :  { %2461 = vmatpush1.bf16.msra.mxu1 %v1894_v29  ;;  %2805 = vmatpush1.bf16.msra.mxu0 %v1896_v30  ;;  %v1687_v14 = vsel %vm7715_vm3, %v6095_v10, %v1686_v11  ;;  %v1692_v15 = vrot.slane %v1686_v11, 4  ;;  %v1937_v29 = vld [vmem:[#allocation12 + $0x218] sm:$0xff]  ;;  %v6117_v30 = vcombine.low %v7706_v28, %v7708_v42  ;;  %v1934_v31 = vld [vmem:[#allocation12 + $0x200] sm:$0xff]  ;;  %v1952_v58 = vld [vmem:[#allocation12 + $0x290] sm:$0xff] }
 0x282   :  { %2462 = vmatprep.subr.bf16.mxu1 %v1899_v32  ;;  %2806 = vmatprep.subr.bf16.mxu0 %v1901_v33  ;;  %1698 = vst [vmem:[#allocation8 + $0xc] sm:$0xff] %v1687_v14  ;;  %v1936_v32 = vld [vmem:[#allocation12 + $0x210] sm:$0xff]  ;;  %v1939_v33 = vld [vmem:[#allocation12 + $0x228] sm:$0xff]  ;;  %v1661_v28 = vld [vmem:[#allocation2 + $0x10] sm:$0xfc] }
 0x283   :  { %1700 = vst [vmem:[#allocation8 + $0x48] sm:$0x77] %v1692_v15  ;;  %v1942_v44 = vld [vmem:[#allocation12 + $0x240] sm:$0xff]  ;;  %v1955_v59 = vld [vmem:[#allocation12 + $0x2a8] sm:$0xff]  ;;  %v1957_v60 = vld [vmem:[#allocation12 + $0x2b8] sm:$0xff] }
 0x284   :  { %v1954_v61 = vld [vmem:[#allocation12 + $0x2a0] sm:$0xff]  ;;  %v1956_v62 = vld [vmem:[#allocation12 + $0x2b0] sm:$0xff]  ;;  %v1959_v63 = vld [vmem:[#allocation12 + $0x2c8] sm:$0xff] }
 0x285   :  { %2463 = vmatpush1.bf16.msra.mxu1 %v1898_v34  ;;  %2807 = vmatpush1.bf16.msra.mxu0 %v1900_v35  ;;  %v1941_v34 = vld [vmem:[#allocation12 + $0x238] sm:$0xff]  ;;  %v1958_v2 = vld [vmem:[#allocation12 + $0x2c0] sm:$0xff]  ;;  %v1960_v3 = vld [vmem:[#allocation12 + $0x2d0] sm:$0xff] }
 0x286   :  { %2464 = vmatprep.subr.bf16.mxu1 %v1903_v36  ;;  %2808 = vmatprep.subr.bf16.mxu0 %v1905_v37  ;;  %v1938_v36 = vld [vmem:[#allocation12 + $0x220] sm:$0xff]  ;;  %v1940_v37 = vld [vmem:[#allocation12 + $0x230] sm:$0xff]  ;;  %v1961_v1 = vld [vmem:[#allocation12 + $0x2d8] sm:$0xff] }
 0x287   :  { %v1967_v10 = vld [vmem:[#allocation12 + $0x308] sm:$0xff]  ;;  %v1969_v11 = vld [vmem:[#allocation12 + $0x318] sm:$0xff]  ;;  %vm7731_vm5 = vmor %vm1585_vm0, %vm1739_vm4 }
 0x288   :  { %v1971_v14 = vld [vmem:[#allocation12 + $0x328] sm:$0xff]  ;;  %v1973_v15 = vld [vmem:[#allocation12 + $0x338] sm:$0xff]  ;;  %vm7749_vm8 = vmor %vm1799_vm6, %vm1800_vm7 }
 0x289   :  { %2465 = vmatpush1.bf16.msra.mxu1 %v1902_v38  ;;  %2809 = vmatpush1.bf16.msra.mxu0 %v1904_v39  ;;  %v1943_v38 = vld [vmem:[#allocation12 + $0x248] sm:$0xff]  ;;  %v1945_v39 = vld [vmem:[#allocation12 + $0x258] sm:$0xff] }
 0x28a   :  { %2466 = vmatprep.subr.bf16.mxu1 %v1907_v40  ;;  %2810 = vmatprep.subr.bf16.mxu0 %v1909_v41  ;;  %v7059_v35 = vld [vmem:[#allocation8 + $0xc] ss:$60 sps:$4 sm:$0x7f]   ;;  %v6214_v41 = vpack.c.bf16 %v1661_v28, %v1661_v28  ;;  %v1986_v28 = vld [vmem:[#allocation12 + $0x3a0] sm:$0xff] }
 0x28b   :  { %v1664_v40 = vld [vmem:[#allocation2 + $0x28] sm:$0xff] }
 0x28c   :  { %v7724_v42 = vpack.c.bf16 %v1664_v40, %v1664_v40  ;;  %v1988_v40 = vld [vmem:[#allocation12 + $0x3b0] sm:$0xff] }
 0x28d   :  { %2467 = vmatpush1.bf16.msra.mxu1 %v1906_v46  ;;  %2811 = vmatpush1.bf16.msra.mxu0 %v1908_v47  ;;  %v1944_v46 = vld [vmem:[#allocation12 + $0x250] sm:$0xff]  ;;  %v1947_v47 = vld [vmem:[#allocation12 + $0x268] sm:$0xff] }
 0x28e   :  { %2468 = vmatprep.subr.bf16.mxu1 %v1911_v48  ;;  %2812 = vmatprep.subr.bf16.mxu0 %v1913_v49  ;;  %v1949_v48 = vld [vmem:[#allocation12 + $0x278] sm:$0xff]  ;;  %v6096_v49 = vrot.slane %v6214_v41, 9  ;;  %v1991_v41 = vld [vmem:[#allocation12 + $0x3c8] sm:$0xff] }
 0x291   :  { %2469 = vmatpush1.bf16.msra.mxu1 %v1910_v50  ;;  %2813 = vmatpush1.bf16.msra.mxu0 %v1912_v51  ;;  %v1690_v50 = vrot.slane %v7724_v42, 5 }
 0x292   :  { %2470 = vmatprep.subr.bf16.mxu1 %v1915_v52  ;;  %2814 = vmatprep.subr.bf16.mxu0 %v1917_v53  ;;  %v1946_v53 = vld [vmem:[#allocation12 + $0x260] sm:$0xff] }
 0x293   :  { %v1691_v51 = vsel %vm7715_vm3, %v6096_v49, %v1690_v50  ;;  %v1693_v52 = vrot.slane %v1690_v50, 4  ;;  %v1990_v50 = vld [vmem:[#allocation12 + $0x3c0] sm:$0xff] }
 0x294   :  { %1699 = vst [vmem:[#allocation8 + $0x14] sm:$0xf] %v1691_v51  ;;  %v1992_v51 = vld [vmem:[#allocation12 + $0x3d0] sm:$0xff] }
 0x295   :  { %2471 = vmatpush1.bf16.msra.mxu1 %v1914_v54  ;;  %2815 = vmatpush1.bf16.msra.mxu0 %v1916_v55  ;;  %v1948_v54 = vld [vmem:[#allocation12 + $0x270] sm:$0xff]  ;;  %v1951_v55 = vld [vmem:[#allocation12 + $0x288] sm:$0xff]  ;;  %1701 = vst [vmem:[#allocation8 + $0x50] sm:$0x7] %v1693_v52 }
 0x296   :  { %2472 = vmatprep.subr.bf16.mxu1 %v1919_v56  ;;  %2816 = vmatprep.subr.bf16.mxu0 %v1921_v57  ;;  %v1953_v56 = vld [vmem:[#allocation12 + $0x298] sm:$0xff]  ;;  %v1950_v57 = vld [vmem:[#allocation12 + $0x280] sm:$0xff]  ;;  %v1995_v52 = vld [vmem:[#allocation12 + $0x3e8] sm:$0xff] }
 0x299   :  { %2473 = vmatpush1.bf16.msra.mxu1 %v1918_v4  ;;  %2817 = vmatpush1.bf16.msra.mxu0 %v1920_v5  ;;  %v1963_v4 = vld [vmem:[#allocation12 + $0x2e8] sm:$0xff]  ;;  %v1965_v5 = vld [vmem:[#allocation12 + $0x2f8] sm:$0xff] }
 0x29a   :  { %2474 = vmatprep.subr.bf16.mxu1 %v1923_v7  ;;  %2818 = vmatprep.subr.bf16.mxu0 %v1925_v8  ;;  %v1962_v7 = vld [vmem:[#allocation12 + $0x2e0] sm:$0xff]  ;;  %v1964_v8 = vld [vmem:[#allocation12 + $0x2f0] sm:$0xff] }
 0x29d   :  { %2475 = vmatpush1.bf16.msra.mxu1 %v1922_v12  ;;  %2819 = vmatpush1.bf16.msra.mxu0 %v1924_v13  ;;  %v1966_v12 = vld [vmem:[#allocation12 + $0x300] sm:$0xff]  ;;  %v1968_v13 = vld [vmem:[#allocation12 + $0x310] sm:$0xff] }
 0x29e   :  { %2476 = vmatprep.subr.bf16.mxu1 %v1927_v16  ;;  %2820 = vmatprep.subr.bf16.mxu0 %v1929_v17  ;;  %v1970_v16 = vld [vmem:[#allocation12 + $0x320] sm:$0xff]  ;;  %v1972_v17 = vld [vmem:[#allocation12 + $0x330] sm:$0xff] }
 0x2a1   :  { %2477 = vmatpush1.bf16.msra.mxu1 %v1926_v18  ;;  %2821 = vmatpush1.bf16.msra.mxu0 %v1928_v19  ;;  %v1975_v18 = vld [vmem:[#allocation12 + $0x348] sm:$0xff]  ;;  %v1977_v19 = vld [vmem:[#allocation12 + $0x358] sm:$0xff] }
 0x2a2   :  { %2478 = vmatprep.subr.bf16.mxu1 %v1931_v20  ;;  %2822 = vmatprep.subr.bf16.mxu0 %v1933_v23  ;;  %v1974_v20 = vld [vmem:[#allocation12 + $0x340] sm:$0xff]  ;;  %v1976_v23 = vld [vmem:[#allocation12 + $0x350] sm:$0xff] }
 0x2a5   :  { %2479 = vmatpush1.bf16.msra.mxu1 %v1930_v24  ;;  %2823 = vmatpush1.bf16.msra.mxu0 %v1932_v25  ;;  %v1979_v24 = vld [vmem:[#allocation12 + $0x368] sm:$0xff]  ;;  %v1981_v25 = vld [vmem:[#allocation12 + $0x378] sm:$0xff] }
 0x2a6   :  { %2491 = vmatprep.subr.bf16.mxu1 %v1935_v26  ;;  %2835 = vmatprep.subr.bf16.mxu0 %v1937_v29  ;;  %v1978_v26 = vld [vmem:[#allocation12 + $0x360] sm:$0xff]  ;;  %v1980_v29 = vld [vmem:[#allocation12 + $0x370] sm:$0xff] }
 0x2a8   :  { %2481 = vmatmul.mubr.bf16.vlgmr.msra.gmra.mrb[20].mxu1 %v6117_v30  ;;  %2825 = vmatmul.mubr.bf16.vlgmr.msra.gmra.mrb[8].mxu0 %v6117_v30  ;;  %v1983_v30 = vld [vmem:[#allocation12 + $0x388] sm:$0xff] }
 0x2a9   :  { %2492 = vmatpush1.bf16.msra.mxu1 %v1934_v31  ;;  %2836 = vmatpush1.bf16.msra.mxu0 %v1936_v32  ;;  %v1985_v31 = vld [vmem:[#allocation12 + $0x398] sm:$0xff]  ;;  %v1982_v32 = vld [vmem:[#allocation12 + $0x380] sm:$0xff] }
 0x2aa   :  { %2493 = vmatprep.subr.bf16.mxu1 %v1939_v33  ;;  %2837 = vmatprep.subr.bf16.mxu0 %v1941_v34  ;;  %v1984_v33 = vld [vmem:[#allocation12 + $0x390] sm:$0xff]  ;;  %v1987_v34 = vld [vmem:[#allocation12 + $0x3a8] sm:$0xff] }
 0x2ab   :  { %2523 = vmatprep.mubr.bf16.mxu1 %v7059_v35  ;;  %2867 = vmatprep.mubr.bf16.mxu0 %v7059_v35  ;;  %v1989_v35 = vld [vmem:[#allocation12 + $0x3b8] sm:$0xff] }
 0x2ad   :  { %2494 = vmatpush1.bf16.msra.mxu1 %v1938_v36  ;;  %2838 = vmatpush1.bf16.msra.mxu0 %v1940_v37  ;;  %v1708_v36 = vld [vmem:[#allocation2 + $0x30] sm:$0x3]  ;;  %v1709_v37 = vld [vmem:[#allocation2 + $0x38] sm:$0x3] }
 0x2ae   :  { %2495 = vmatprep.subr.bf16.mxu1 %v1943_v38  ;;  %2839 = vmatprep.subr.bf16.mxu0 %v1945_v39  ;;  %v6221_v38 = vpack.c.bf16 %v1709_v37, %v1708_v36  ;;  %v1743_v39 = vrot.slane %v7712_v6, 6  ;;  %v2026_v36 = vld [vmem:[#allocation12 + $0x4e0] sm:$0xff]  ;;  %v2028_v37 = vld [vmem:[#allocation12 + $0x4f0] sm:$0xff] }
 0x2b1   :  { %2496 = vmatpush1.bf16.msra.mxu1 %v1942_v44  ;;  %2840 = vmatpush1.bf16.msra.mxu0 %v1944_v46  ;;  %v1993_v44 = vld [vmem:[#allocation12 + $0x3d8] sm:$0xff]  ;;  %v1749_v46 = vrot.slane %v1743_v39, 4 }
 0x2b2   :  { %2497 = vmatprep.subr.bf16.mxu1 %v1947_v47  ;;  %2841 = vmatprep.subr.bf16.mxu0 %v1949_v48  ;;  %v1750_v47 = vrot.slane %v6221_v38, 6  ;;  %v2031_v38 = vld [vmem:[#allocation12 + $0x508] sm:$0xff] }
 0x2b4   :  { %v1751_v49 = vsel %vm7731_vm5, %v1749_v46, %v1750_v47  ;;  %v2034_v46 = vld [vmem:[#allocation12 + $0x520] sm:$0xff]  ;;  %v2036_v47 = vld [vmem:[#allocation12 + $0x530] sm:$0xff] }
 0x2b5   :  { %2498 = vmatpush1.bf16.msra.mxu1 %v1946_v53  ;;  %2842 = vmatpush1.bf16.msra.mxu0 %v1948_v54  ;;  %1761 = vst [vmem:[#allocation8 + $0x54] sm:$0x77] %v1751_v49  ;;  %v1997_v53 = vld [vmem:[#allocation12 + $0x3f8] sm:$0xff]  ;;  %v1702_v54 = vld [vmem:[#allocation2] sm:$0xf0] }
 0x2b6   :  { %2499 = vmatprep.subr.bf16.mxu1 %v1951_v55  ;;  %2843 = vmatprep.subr.bf16.mxu0 %v1953_v56  ;;  %v1703_v55 = vld [vmem:[#allocation2 + $0x8] sm:$0xf0]  ;;  %v2039_v49 = vld [vmem:[#allocation12 + $0x548] sm:$0xff] }
 0x2b7   :  { %v6217_v56 = vpack.c.bf16 %v1703_v55, %v1702_v54  ;;  %v2045_v54 = vld [vmem:[#allocation12 + $0x578] sm:$0xff]  ;;  %v2042_v55 = vld [vmem:[#allocation12 + $0x560] sm:$0xff] }
 0x2b9   :  { %2500 = vmatpush1.bf16.msra.mxu1 %v1950_v57  ;;  %2844 = vmatpush1.bf16.msra.mxu0 %v1952_v58  ;;  %v1994_v57 = vld [vmem:[#allocation12 + $0x3e0] sm:$0xff]  ;;  %v1996_v58 = vld [vmem:[#allocation12 + $0x3f0] sm:$0xff] }
 0x2ba   :  { %2501 = vmatprep.subr.bf16.mxu1 %v1955_v59  ;;  %2845 = vmatprep.subr.bf16.mxu0 %v1957_v60  ;;  %v1999_v59 = vld [vmem:[#allocation12 + $0x408] sm:$0xff]  ;;  %v2001_v60 = vld [vmem:[#allocation12 + $0x418] sm:$0xff] }
 0x2bd   :  { %2502 = vmatpush1.bf16.msra.mxu1 %v1954_v61  ;;  %2846 = vmatpush1.bf16.msra.mxu0 %v1956_v62  ;;  %v6103_v61 = vrot.slane %v6217_v56, 10  ;;  %v7057_v62 = vld [vmem:[#allocation8 + $0x8] ss:$60 sps:$4 sm:$0x7f]  }
 0x2be   :  { %2503 = vmatprep.subr.bf16.mxu1 %v1959_v63  ;;  %2847 = vmatprep.subr.bf16.mxu0 %v1961_v1  ;;  %v1998_v1 = vld [vmem:[#allocation12 + $0x400] sm:$0xff]  ;;  %v2044_v56 = vld [vmem:[#allocation12 + $0x570] sm:$0xff] }
 0x2bf   :  { %v7739_v63 = vsel %vm7731_vm5, %v6103_v61, %v1743_v39  ;;  %v2033_v39 = vld [vmem:[#allocation12 + $0x518] sm:$0xff]  ;;  %v2051_v61 = vld [vmem:[#allocation12 + $0x5a8] sm:$0xff] }
 0x2c1   :  { %2504 = vmatpush1.bf16.msra.mxu1 %v1958_v2  ;;  %2848 = vmatpush1.bf16.msra.mxu0 %v1960_v3  ;;  %v2000_v2 = vld [vmem:[#allocation12 + $0x410] sm:$0xff]  ;;  %v2003_v3 = vld [vmem:[#allocation12 + $0x428] sm:$0xff] }
 0x2c2   :  { %2505 = vmatprep.subr.bf16.mxu1 %v1963_v4  ;;  %2849 = vmatprep.subr.bf16.mxu0 %v1965_v5  ;;  %v2005_v4 = vld [vmem:[#allocation12 + $0x438] sm:$0xff] }
 0x2c3   :  { %v7062_v5 = vld [vmem:[#allocation8 + $0x14] ss:$60 sps:$4 sm:$0x7f]  }
 0x2c5   :  { %2506 = vmatpush1.bf16.msra.mxu1 %v1962_v7  ;;  %2850 = vmatpush1.bf16.msra.mxu0 %v1964_v8  ;;  %v2002_v7 = vld [vmem:[#allocation12 + $0x420] sm:$0xff]  ;;  %v2004_v8 = vld [vmem:[#allocation12 + $0x430] sm:$0xff] }
 0x2c6   :  { %2507 = vmatprep.subr.bf16.mxu1 %v1967_v10  ;;  %2851 = vmatprep.subr.bf16.mxu0 %v1969_v11  ;;  %v2007_v10 = vld [vmem:[#allocation12 + $0x448] sm:$0xff]  ;;  %v2009_v11 = vld [vmem:[#allocation12 + $0x458] sm:$0xff] }
 0x2c9   :  { %2508 = vmatpush1.bf16.msra.mxu1 %v1966_v12  ;;  %2852 = vmatpush1.bf16.msra.mxu0 %v1968_v13  ;;  %v2006_v12 = vld [vmem:[#allocation12 + $0x440] sm:$0xff]  ;;  %v2008_v13 = vld [vmem:[#allocation12 + $0x450] sm:$0xff] }
 0x2ca   :  { %2509 = vmatprep.subr.bf16.mxu1 %v1971_v14  ;;  %2853 = vmatprep.subr.bf16.mxu0 %v1973_v15  ;;  %v2011_v14 = vld [vmem:[#allocation12 + $0x468] sm:$0xff]  ;;  %v2013_v15 = vld [vmem:[#allocation12 + $0x478] sm:$0xff] }
 0x2cd   :  { %2510 = vmatpush1.bf16.msra.mxu1 %v1970_v16  ;;  %2854 = vmatpush1.bf16.msra.mxu0 %v1972_v17  ;;  %v2010_v16 = vld [vmem:[#allocation12 + $0x460] sm:$0xff]  ;;  %v2012_v17 = vld [vmem:[#allocation12 + $0x470] sm:$0xff] }
 0x2ce   :  { %2511 = vmatprep.subr.bf16.mxu1 %v1975_v18  ;;  %2855 = vmatprep.subr.bf16.mxu0 %v1977_v19  ;;  %v2015_v18 = vld [vmem:[#allocation12 + $0x488] sm:$0xff]  ;;  %v2017_v19 = vld [vmem:[#allocation12 + $0x498] sm:$0xff] }
 0x2d1   :  { %2512 = vmatpush1.bf16.msra.mxu1 %v1974_v20  ;;  %2856 = vmatpush1.bf16.msra.mxu0 %v1976_v23  ;;  %v2014_v20 = vld [vmem:[#allocation12 + $0x480] sm:$0xff]  ;;  %v2016_v23 = vld [vmem:[#allocation12 + $0x490] sm:$0xff] }
 0x2d2   :  { %2513 = vmatprep.subr.bf16.mxu1 %v1979_v24  ;;  %2857 = vmatprep.subr.bf16.mxu0 %v1981_v25  ;;  %v2019_v24 = vld [vmem:[#allocation12 + $0x4a8] sm:$0xff]  ;;  %v2021_v25 = vld [vmem:[#allocation12 + $0x4b8] sm:$0xff] }
 0x2d5   :  { %2514 = vmatpush1.bf16.msra.mxu1 %v1978_v26  ;;  %2858 = vmatpush1.bf16.msra.mxu0 %v1980_v29  ;;  %v2018_v26 = vld [vmem:[#allocation12 + $0x4a0] sm:$0xff]  ;;  %v2020_v29 = vld [vmem:[#allocation12 + $0x4b0] sm:$0xff] }
 0x2d6   :  { %2515 = vmatprep.subr.bf16.mxu1 %v1983_v30  ;;  %2859 = vmatprep.subr.bf16.mxu0 %v1985_v31  ;;  %v2023_v30 = vld [vmem:[#allocation12 + $0x4c8] sm:$0xff]  ;;  %v2025_v31 = vld [vmem:[#allocation12 + $0x4d8] sm:$0xff] }
 0x2d9   :  { %2516 = vmatpush1.bf16.msra.mxu1 %v1982_v32  ;;  %2860 = vmatpush1.bf16.msra.mxu0 %v1984_v33  ;;  %v2022_v32 = vld [vmem:[#allocation12 + $0x4c0] sm:$0xff]  ;;  %v2024_v33 = vld [vmem:[#allocation12 + $0x4d0] sm:$0xff] }
 0x2da   :  { %2517 = vmatprep.subr.bf16.mxu1 %v1987_v34  ;;  %2861 = vmatprep.subr.bf16.mxu0 %v1989_v35  ;;  %v2027_v34 = vld [vmem:[#allocation12 + $0x4e8] sm:$0xff]  ;;  %v2029_v35 = vld [vmem:[#allocation12 + $0x4f8] sm:$0xff] }
 0x2dd   :  { %2518 = vmatpush1.bf16.msra.mxu1 %v1986_v28  ;;  %2862 = vmatpush1.bf16.msra.mxu0 %v1988_v40  ;;  %v2030_v28 = vld [vmem:[#allocation12 + $0x500] sm:$0xff]  ;;  %v2032_v40 = vld [vmem:[#allocation12 + $0x510] sm:$0xff] }
 0x2de   :  { %2519 = vmatprep.subr.bf16.mxu1 %v1991_v41  ;;  %2863 = vmatprep.subr.bf16.mxu0 %v1993_v44  ;;  %v2035_v41 = vld [vmem:[#allocation12 + $0x528] sm:$0xff]  ;;  %v2037_v44 = vld [vmem:[#allocation12 + $0x538] sm:$0xff] }
 0x2e1   :  { %2520 = vmatpush1.bf16.msra.mxu1 %v1990_v50  ;;  %2864 = vmatpush1.bf16.msra.mxu0 %v1992_v51  ;;  %v2041_v50 = vld [vmem:[#allocation12 + $0x558] sm:$0xff]  ;;  %v2038_v51 = vld [vmem:[#allocation12 + $0x540] sm:$0xff] }
 0x2e2   :  { %2521 = vmatprep.subr.bf16.mxu1 %v1995_v52  ;;  %2865 = vmatprep.subr.bf16.mxu0 %v1997_v53  ;;  %v2040_v52 = vld [vmem:[#allocation12 + $0x550] sm:$0xff]  ;;  %v2043_v53 = vld [vmem:[#allocation12 + $0x568] sm:$0xff] }
 0x2e5   :  { %2522 = vmatpush1.bf16.msra.mxu1 %v1994_v57  ;;  %2866 = vmatpush1.bf16.msra.mxu0 %v1996_v58  ;;  %v2047_v57 = vld [vmem:[#allocation12 + $0x588] sm:$0xff]  ;;  %v2049_v58 = vld [vmem:[#allocation12 + $0x598] sm:$0xff] }
 0x2e6   :  { %2534 = vmatprep.subr.bf16.mxu1 %v1999_v59  ;;  %2878 = vmatprep.subr.bf16.mxu0 %v2001_v60  ;;  %v2046_v59 = vld [vmem:[#allocation12 + $0x580] sm:$0xff]  ;;  %v2048_v60 = vld [vmem:[#allocation12 + $0x590] sm:$0xff] }
 0x2e8   :  { %2524 = vmatmul.mubr.bf16.vlgmr.msra.gmra.mrb[20].mxu1 %v7057_v62  ;;  %2868 = vmatmul.mubr.bf16.vlgmr.msra.gmra.mrb[8].mxu0 %v7057_v62  ;;  %v2053_v62 = vld [vmem:[#allocation12 + $0x5b8] sm:$0xff] }
 0x2e9   :  { %2535 = vmatpush1.bf16.msra.mxu1 %v1998_v1  ;;  %2879 = vmatpush1.bf16.msra.mxu0 %v2000_v2  ;;  %v2050_v1 = vld [vmem:[#allocation12 + $0x5a0] sm:$0xff]  ;;  %v2052_v2 = vld [vmem:[#allocation12 + $0x5b0] sm:$0xff] }
 0x2ea   :  { %2536 = vmatprep.subr.bf16.mxu1 %v2003_v3  ;;  %2880 = vmatprep.subr.bf16.mxu0 %v2005_v4  ;;  %v1704_v3 = vld [vmem:[#allocation2 + $0x10] sm:$0xf0]  ;;  %v1710_v4 = vld [vmem:[#allocation2 + $0x40] sm:$0x3] }
 0x2eb   :  { %2566 = vmatprep.mubr.bf16.mxu1 %v7062_v5  ;;  %2910 = vmatprep.mubr.bf16.mxu0 %v7062_v5  ;;  %v2055_v5 = vld [vmem:[#allocation12 + $0x5c8] sm:$0xff] }
 0x2ed   :  { %2537 = vmatpush1.bf16.msra.mxu1 %v2002_v7  ;;  %2881 = vmatpush1.bf16.msra.mxu0 %v2004_v8  ;;  %v2057_v7 = vld [vmem:[#allocation12 + $0x5d8] sm:$0xff]  ;;  %v6218_v8 = vpack.c.bf16 %v1704_v3, %v1704_v3  ;;  %v2083_v3 = vld [vmem:[#allocation12 + $0x6a8] sm:$0xff] }
 0x2ee   :  { %2538 = vmatprep.subr.bf16.mxu1 %v2007_v10  ;;  %2882 = vmatprep.subr.bf16.mxu0 %v2009_v11  ;;  %v6222_v10 = vpack.c.bf16 %v1710_v4, %v1710_v4  ;;  %v1747_v11 = vrot.slane %v7724_v42, 6  ;;  %v2085_v4 = vld [vmem:[#allocation12 + $0x6b8] sm:$0xff] }
 0x2f1   :  { %2539 = vmatpush1.bf16.msra.mxu1 %v2006_v12  ;;  %2883 = vmatpush1.bf16.msra.mxu0 %v2008_v13  ;;  %v1763_v12 = vld [vmem:[#allocation2] sm:$0xc0]  ;;  %v1804_v13 = vrot.slane %v7712_v6, 7 }
 0x2f2   :  { %2540 = vmatprep.subr.bf16.mxu1 %v2011_v14  ;;  %2884 = vmatprep.subr.bf16.mxu0 %v2013_v15  ;;  %v1764_v14 = vld [vmem:[#allocation2 + $0x8] sm:$0xc0]  ;;  %v1769_v15 = vld [vmem:[#allocation2 + $0x30] sm:$0xf] }
 0x2f5   :  { %2541 = vmatpush1.bf16.msra.mxu1 %v2010_v16  ;;  %2885 = vmatpush1.bf16.msra.mxu0 %v2012_v17  ;;  %v1770_v16 = vld [vmem:[#allocation2 + $0x38] sm:$0xf]  ;;  %v6104_v17 = vrot.slane %v6218_v8, 10  ;;  %v2087_v8 = vld [vmem:[#allocation12 + $0x6c8] sm:$0xff] }
 0x2f6   :  { %2542 = vmatprep.subr.bf16.mxu1 %v2015_v18  ;;  %2886 = vmatprep.subr.bf16.mxu0 %v2017_v19  ;;  %v1752_v18 = vrot.slane %v1747_v11, 4  ;;  %v1753_v19 = vrot.slane %v6222_v10, 6  ;;  %v2089_v10 = vld [vmem:[#allocation12 + $0x6d8] sm:$0xff] }
 0x2f7   :  { %v1748_v6 = vsel %vm7731_vm5, %v6104_v17, %v1747_v11  ;;  %v2086_v11 = vld [vmem:[#allocation12 + $0x6c0] sm:$0xff]  ;;  %v2095_v17 = vld [vmem:[#allocation12 + $0x708] sm:$0xff] }
 0x2f8   :  { %1760 = vst [vmem:[#allocation8 + $0x20] sm:$0xf] %v1748_v6  ;;  %v2103_v6 = vld [vmem:[#allocation12 + $0x748] sm:$0xff] }
 0x2f9   :  { %2543 = vmatpush1.bf16.msra.mxu1 %v2014_v20  ;;  %2887 = vmatpush1.bf16.msra.mxu0 %v2016_v23  ;;  %v6223_v20 = vpack.c.bf16 %v1764_v14, %v1763_v12  ;;  %v6227_v23 = vpack.c.bf16 %v1770_v16, %v1769_v15  ;;  %v2088_v12 = vld [vmem:[#allocation12 + $0x6d0] sm:$0xff]  ;;  %v2093_v14 = vld [vmem:[#allocation12 + $0x6f8] sm:$0xff]  ;;  %v2090_v15 = vld [vmem:[#allocation12 + $0x6e0] sm:$0xff] }
 0x2fa   :  { %2544 = vmatprep.subr.bf16.mxu1 %v2019_v24  ;;  %2888 = vmatprep.subr.bf16.mxu0 %v2021_v25  ;;  %v1810_v24 = vrot.slane %v1804_v13, 4  ;;  %v2054_v25 = vld [vmem:[#allocation12 + $0x5c0] sm:$0xff]  ;;  %v2092_v16 = vld [vmem:[#allocation12 + $0x6f0] sm:$0xff] }
 0x2fd   :  { %2545 = vmatpush1.bf16.msra.mxu1 %v2018_v26  ;;  %2889 = vmatpush1.bf16.msra.mxu0 %v2020_v29  ;;  %v2056_v26 = vld [vmem:[#allocation12 + $0x5d0] sm:$0xff]  ;;  %v1754_v29 = vsel %vm7731_vm5, %v1752_v18, %v1753_v19  ;;  %v2097_v18 = vld [vmem:[#allocation12 + $0x718] sm:$0xff]  ;;  %v2094_v19 = vld [vmem:[#allocation12 + $0x700] sm:$0xff] }
 0x2fe   :  { %2546 = vmatprep.subr.bf16.mxu1 %v2023_v30  ;;  %2890 = vmatprep.subr.bf16.mxu0 %v2025_v31  ;;  %v6111_v31 = vrot.slane %v6223_v20, 11  ;;  %1762 = vst [vmem:[#allocation8 + $0x5c] sm:$0x7] %v1754_v29  ;;  %v2096_v20 = vld [vmem:[#allocation12 + $0x710] sm:$0xff]  ;;  %v2105_v29 = vld [vmem:[#allocation12 + $0x758] sm:$0xff] }
 0x2ff   :  { %v2128_v30 = vld [vmem:[#allocation12 + $0x810] sm:$0xff] }
 0x301   :  { %2547 = vmatpush1.bf16.msra.mxu1 %v2022_v32  ;;  %2891 = vmatpush1.bf16.msra.mxu0 %v2024_v33  ;;  %v2059_v32 = vld [vmem:[#allocation12 + $0x5e8] sm:$0xff]  ;;  %v2061_v33 = vld [vmem:[#allocation12 + $0x5f8] sm:$0xff] }
 0x302   :  { %2548 = vmatprep.subr.bf16.mxu1 %v2027_v34  ;;  %2892 = vmatprep.subr.bf16.mxu0 %v2029_v35  ;;  %v1811_v34 = vrot.slane %v6227_v23, 7  ;;  %v1805_v35 = vsel %vm7749_vm8, %v6111_v31, %v1804_v13  ;;  %v2091_v13 = vld [vmem:[#allocation12 + $0x6e8] sm:$0xff]  ;;  %v2102_v31 = vld [vmem:[#allocation12 + $0x740] sm:$0xff] }
 0x303   :  { %1820 = vst [vmem:[#allocation8 + $0x24] sm:$0xff] %v1805_v35  ;;  %v2099_v23 = vld [vmem:[#allocation12 + $0x728] sm:$0xff]  ;;  %v2106_v35 = vld [vmem:[#allocation12 + $0x760] sm:$0xff] }
 0x305   :  { %2549 = vmatpush1.bf16.msra.mxu1 %v2026_v36  ;;  %2893 = vmatpush1.bf16.msra.mxu0 %v2028_v37  ;;  %v1812_v36 = vsel %vm7749_vm8, %v1810_v24, %v1811_v34  ;;  %v2058_v37 = vld [vmem:[#allocation12 + $0x5e0] sm:$0xff]  ;;  %v2101_v24 = vld [vmem:[#allocation12 + $0x738] sm:$0xff] }
 0x306   :  { %2550 = vmatprep.subr.bf16.mxu1 %v2031_v38  ;;  %2894 = vmatprep.subr.bf16.mxu0 %v2033_v39  ;;  %v2060_v38 = vld [vmem:[#allocation12 + $0x5f0] sm:$0xff]  ;;  %1822 = vst [vmem:[#allocation8 + $0x60] sm:$0x77] %v1812_v36  ;;  %v2063_v39 = vld [vmem:[#allocation12 + $0x608] sm:$0xff]  ;;  %v2109_v34 = vld [vmem:[#allocation12 + $0x778] sm:$0xff] }
 0x307   :  { %v2108_v36 = vld [vmem:[#allocation12 + $0x770] sm:$0xff] }
 0x309   :  { %2551 = vmatpush1.bf16.msra.mxu1 %v2030_v28  ;;  %2895 = vmatpush1.bf16.msra.mxu0 %v2032_v40  ;;  %v2065_v28 = vld [vmem:[#allocation12 + $0x618] sm:$0xff] }
 0x30a   :  { %2552 = vmatprep.subr.bf16.mxu1 %v2035_v41  ;;  %2896 = vmatprep.subr.bf16.mxu0 %v2037_v44  ;;  %v7060_v40 = vld [vmem:[#allocation8 + $0x10] ss:$60 sps:$4 sm:$0x7f]   ;;  %v7757_v41 = vld [vmem:[#allocation8 + $0x54] sm:$0x77] }
 0x30b   :  { %v2062_v44 = vld [vmem:[#allocation12 + $0x600] sm:$0xff] }
 0x30d   :  { %2553 = vmatpush1.bf16.msra.mxu1 %v2034_v46  ;;  %2897 = vmatpush1.bf16.msra.mxu0 %v2036_v47  ;;  %v2064_v46 = vld [vmem:[#allocation12 + $0x610] sm:$0xff]  ;;  %v2067_v47 = vld [vmem:[#allocation12 + $0x628] sm:$0xff] }
 0x30e   :  { %2554 = vmatprep.subr.bf16.mxu1 %v2039_v49  ;;  %2898 = vmatprep.subr.bf16.mxu0 %v2041_v50  ;;  %v2069_v49 = vld [vmem:[#allocation12 + $0x638] sm:$0xff]  ;;  %v6124_v50 = vcombine.high %v7739_v63, %v7757_v41 }
 0x311   :  { %2555 = vmatpush1.bf16.msra.mxu1 %v2038_v51  ;;  %2899 = vmatpush1.bf16.msra.mxu0 %v2040_v52  ;;  %v2066_v51 = vld [vmem:[#allocation12 + $0x620] sm:$0xff]  ;;  %v2068_v52 = vld [vmem:[#allocation12 + $0x630] sm:$0xff] }
 0x312   :  { %2556 = vmatprep.subr.bf16.mxu1 %v2043_v53  ;;  %2900 = vmatprep.subr.bf16.mxu0 %v2045_v54  ;;  %v2071_v53 = vld [vmem:[#allocation12 + $0x648] sm:$0xff]  ;;  %v2073_v54 = vld [vmem:[#allocation12 + $0x658] sm:$0xff] }
 0x315   :  { %2557 = vmatpush1.bf16.msra.mxu1 %v2042_v55  ;;  %2901 = vmatpush1.bf16.msra.mxu0 %v2044_v56  ;;  %v2070_v55 = vld [vmem:[#allocation12 + $0x640] sm:$0xff]  ;;  %v2072_v56 = vld [vmem:[#allocation12 + $0x650] sm:$0xff] }
 0x316   :  { %2558 = vmatprep.subr.bf16.mxu1 %v2047_v57  ;;  %2902 = vmatprep.subr.bf16.mxu0 %v2049_v58  ;;  %v2075_v57 = vld [vmem:[#allocation12 + $0x668] sm:$0xff]  ;;  %v2077_v58 = vld [vmem:[#allocation12 + $0x678] sm:$0xff] }
 0x319   :  { %2559 = vmatpush1.bf16.msra.mxu1 %v2046_v59  ;;  %2903 = vmatpush1.bf16.msra.mxu0 %v2048_v60  ;;  %v2074_v59 = vld [vmem:[#allocation12 + $0x660] sm:$0xff]  ;;  %v2076_v60 = vld [vmem:[#allocation12 + $0x670] sm:$0xff] }
 0x31a   :  { %2560 = vmatprep.subr.bf16.mxu1 %v2051_v61  ;;  %2904 = vmatprep.subr.bf16.mxu0 %v2053_v62  ;;  %v2079_v61 = vld [vmem:[#allocation12 + $0x688] sm:$0xff]  ;;  %v2081_v62 = vld [vmem:[#allocation12 + $0x698] sm:$0xff] }
 0x31d   :  { %2561 = vmatpush1.bf16.msra.mxu1 %v2050_v1  ;;  %2905 = vmatpush1.bf16.msra.mxu0 %v2052_v2  ;;  %v2078_v1 = vld [vmem:[#allocation12 + $0x680] sm:$0xff]  ;;  %v2080_v2 = vld [vmem:[#allocation12 + $0x690] sm:$0xff] }
 0x31e   :  { %2562 = vmatprep.subr.bf16.mxu1 %v2055_v5  ;;  %2906 = vmatprep.subr.bf16.mxu0 %v2057_v7  ;;  %v2082_v5 = vld [vmem:[#allocation12 + $0x6a0] sm:$0xff]  ;;  %v2084_v7 = vld [vmem:[#allocation12 + $0x6b0] sm:$0xff] }
 0x321   :  { %2563 = vmatpush1.bf16.msra.mxu1 %v2054_v25  ;;  %2907 = vmatpush1.bf16.msra.mxu0 %v2056_v26  ;;  %v2098_v25 = vld [vmem:[#allocation12 + $0x720] sm:$0xff]  ;;  %v2100_v26 = vld [vmem:[#allocation12 + $0x730] sm:$0xff] }
 0x322   :  { %2564 = vmatprep.subr.bf16.mxu1 %v2059_v32  ;;  %2908 = vmatprep.subr.bf16.mxu0 %v2061_v33  ;;  %v2104_v32 = vld [vmem:[#allocation12 + $0x750] sm:$0xff]  ;;  %v2107_v33 = vld [vmem:[#allocation12 + $0x768] sm:$0xff] }
 0x325   :  { %2565 = vmatpush1.bf16.msra.mxu1 %v2058_v37  ;;  %2909 = vmatpush1.bf16.msra.mxu0 %v2060_v38  ;;  %v2111_v37 = vld [vmem:[#allocation12 + $0x788] sm:$0xff]  ;;  %v2113_v38 = vld [vmem:[#allocation12 + $0x798] sm:$0xff] }
 0x326   :  { %2577 = vmatprep.subr.bf16.mxu1 %v2063_v39  ;;  %2921 = vmatprep.subr.bf16.mxu0 %v2065_v28  ;;  %v2110_v39 = vld [vmem:[#allocation12 + $0x780] sm:$0xff]  ;;  %v2112_v28 = vld [vmem:[#allocation12 + $0x790] sm:$0xff] }
 0x328   :  { %2567 = vmatmul.mubr.bf16.vlgmr.msra.gmra.mrb[20].mxu1 %v7060_v40  ;;  %2911 = vmatmul.mubr.bf16.vlgmr.msra.gmra.mrb[8].mxu0 %v7060_v40  ;;  %v2115_v40 = vld [vmem:[#allocation12 + $0x7a8] sm:$0xff] }
 0x329   :  { %2578 = vmatpush1.bf16.msra.mxu1 %v2062_v44  ;;  %2922 = vmatpush1.bf16.msra.mxu0 %v2064_v46  ;;  %v2117_v44 = vld [vmem:[#allocation12 + $0x7b8] sm:$0xff] }
 0x32a   :  { %2579 = vmatprep.subr.bf16.mxu1 %v2067_v47  ;;  %2923 = vmatprep.subr.bf16.mxu0 %v2069_v49  ;;  %v1765_v46 = vld [vmem:[#allocation2 + $0x10] sm:$0xc0]  ;;  %v1771_v47 = vld [vmem:[#allocation2 + $0x40] sm:$0xf]  ;;  %v2114_v49 = vld [vmem:[#allocation12 + $0x7a0] sm:$0xff] }
 0x32b   :  { %2609 = vmatprep.mubr.bf16.mxu1 %v6124_v50  ;;  %2953 = vmatprep.mubr.bf16.mxu0 %v6124_v50  ;;  %v2116_v50 = vld [vmem:[#allocation12 + $0x7b0] sm:$0xff] }
 0x32d   :  { %2580 = vmatpush1.bf16.msra.mxu1 %v2066_v51  ;;  %2924 = vmatpush1.bf16.msra.mxu0 %v2068_v52  ;;  %v6224_v51 = vpack.c.bf16 %v1765_v46, %v1765_v46  ;;  %v6228_v52 = vpack.c.bf16 %v1771_v47, %v1771_v47  ;;  %v2158_v46 = vld [vmem:[#allocation12 + $0x900] sm:$0xff]  ;;  %v2160_v47 = vld [vmem:[#allocation12 + $0x910] sm:$0xff] }
 0x32e   :  { %2581 = vmatprep.subr.bf16.mxu1 %v2071_v53  ;;  %2925 = vmatprep.subr.bf16.mxu0 %v2073_v54  ;;  %v1808_v53 = vrot.slane %v7724_v42, 7  ;;  %v2119_v54 = vld [vmem:[#allocation12 + $0x7c8] sm:$0xff]  ;;  %v2122_v42 = vld [vmem:[#allocation12 + $0x7e0] sm:$0xff] }
 0x331   :  { %2582 = vmatpush1.bf16.msra.mxu1 %v2070_v55  ;;  %2926 = vmatpush1.bf16.msra.mxu0 %v2072_v56  ;;  %v2121_v55 = vld [vmem:[#allocation12 + $0x7d8] sm:$0xff]  ;;  %v6112_v56 = vrot.slane %v6224_v51, 11  ;;  %v2162_v51 = vld [vmem:[#allocation12 + $0x920] sm:$0xff] }
 0x332   :  { %2583 = vmatprep.subr.bf16.mxu1 %v2075_v57  ;;  %2927 = vmatprep.subr.bf16.mxu0 %v2077_v58  ;;  %v1813_v57 = vrot.slane %v1808_v53, 4  ;;  %v1814_v58 = vrot.slane %v6228_v52, 7  ;;  %v2164_v52 = vld [vmem:[#allocation12 + $0x930] sm:$0xff] }
 0x335   :  { %2584 = vmatpush1.bf16.msra.mxu1 %v2074_v59  ;;  %2928 = vmatpush1.bf16.msra.mxu0 %v2076_v60  ;;  %v2118_v59 = vld [vmem:[#allocation12 + $0x7c0] sm:$0xff]  ;;  %v2120_v60 = vld [vmem:[#allocation12 + $0x7d0] sm:$0xff] }
 0x336   :  { %2585 = vmatprep.subr.bf16.mxu1 %v2079_v61  ;;  %2929 = vmatprep.subr.bf16.mxu0 %v2081_v62  ;;  %v1809_v61 = vsel %vm7749_vm8, %v6112_v56, %v1808_v53  ;;  %v1815_v62 = vsel %vm7749_vm8, %v1813_v57, %v1814_v58  ;;  %v2167_v53 = vld [vmem:[#allocation12 + $0x948] sm:$0xff]  ;;  %v2168_v56 = vld [vmem:[#allocation12 + $0x950] sm:$0xff]  ;;  %v2173_v58 = vld [vmem:[#allocation12 + $0x978] sm:$0xff] }
 0x337   :  { %1821 = vst [vmem:[#allocation8 + $0x2c] sm:$0xf] %v1809_v61  ;;  %1823 = vst [vmem:[#allocation8 + $0x68] sm:$0x7] %v1815_v62  ;;  %v2171_v57 = vld [vmem:[#allocation12 + $0x968] sm:$0xff]  ;;  %v2177_v62 = vld [vmem:[#allocation12 + $0x998] sm:$0xff] }
 0x338   :  { %v2175_v61 = vld [vmem:[#allocation12 + $0x988] sm:$0xff] }
 0x339   :  { %2586 = vmatpush1.bf16.msra.mxu1 %v2078_v1  ;;  %2930 = vmatpush1.bf16.msra.mxu0 %v2080_v2  ;;  %v2123_v1 = vld [vmem:[#allocation12 + $0x7e8] sm:$0xff]  ;;  %v2125_v2 = vld [vmem:[#allocation12 + $0x7f8] sm:$0xff] }
 0x33a   :  { %2587 = vmatprep.subr.bf16.mxu1 %v2083_v3  ;;  %2931 = vmatprep.subr.bf16.mxu0 %v2085_v4  ;;  %v2124_v3 = vld [vmem:[#allocation12 + $0x7f0] sm:$0xff]  ;;  %v2127_v4 = vld [vmem:[#allocation12 + $0x808] sm:$0xff] }
 0x33d   :  { %2588 = vmatpush1.bf16.msra.mxu1 %v2082_v5  ;;  %2932 = vmatpush1.bf16.msra.mxu0 %v2084_v7  ;;  %v2129_v5 = vld [vmem:[#allocation12 + $0x818] sm:$0xff]  ;;  %v6123_v7 = vcombine.low %v7739_v63, %v7757_v41  ;;  %v2134_v63 = vld [vmem:[#allocation12 + $0x840] sm:$0xff]  ;;  %v2136_v41 = vld [vmem:[#allocation12 + $0x850] sm:$0xff] }
 0x33e   :  { %2589 = vmatprep.subr.bf16.mxu1 %v2087_v8  ;;  %2933 = vmatprep.subr.bf16.mxu0 %v2089_v10  ;;  %v2126_v8 = vld [vmem:[#allocation12 + $0x800] sm:$0xff]  ;;  %v2131_v10 = vld [vmem:[#allocation12 + $0x828] sm:$0xff] }
 0x341   :  { %2590 = vmatpush1.bf16.msra.mxu1 %v2086_v11  ;;  %2934 = vmatpush1.bf16.msra.mxu0 %v2088_v12  ;;  %v2133_v11 = vld [vmem:[#allocation12 + $0x838] sm:$0xff]  ;;  %v7065_v12 = vld [vmem:[#allocation8 + $0x24] ss:$60 sps:$4 sm:$0x7f]  }
 0x342   :  { %2591 = vmatprep.subr.bf16.mxu1 %v2091_v13  ;;  %2935 = vmatprep.subr.bf16.mxu0 %v2093_v14  ;;  %v2130_v13 = vld [vmem:[#allocation12 + $0x820] sm:$0xff]  ;;  %v2132_v14 = vld [vmem:[#allocation12 + $0x830] sm:$0xff] }
 0x345   :  { %2592 = vmatpush1.bf16.msra.mxu1 %v2090_v15  ;;  %2936 = vmatpush1.bf16.msra.mxu0 %v2092_v16  ;;  %v2135_v15 = vld [vmem:[#allocation12 + $0x848] sm:$0xff]  ;;  %v2137_v16 = vld [vmem:[#allocation12 + $0x858] sm:$0xff] }
 0x346   :  { %2593 = vmatprep.subr.bf16.mxu1 %v2095_v17  ;;  %2937 = vmatprep.subr.bf16.mxu0 %v2097_v18  ;;  %v2139_v17 = vld [vmem:[#allocation12 + $0x868] sm:$0xff]  ;;  %v2141_v18 = vld [vmem:[#allocation12 + $0x878] sm:$0xff] }
 0x349   :  { %2594 = vmatpush1.bf16.msra.mxu1 %v2094_v19  ;;  %2938 = vmatpush1.bf16.msra.mxu0 %v2096_v20  ;;  %v2138_v19 = vld [vmem:[#allocation12 + $0x860] sm:$0xff]  ;;  %v2140_v20 = vld [vmem:[#allocation12 + $0x870] sm:$0xff] }
 0x34a   :  { %2595 = vmatprep.subr.bf16.mxu1 %v2099_v23  ;;  %2939 = vmatprep.subr.bf16.mxu0 %v2101_v24  ;;  %v2143_v23 = vld [vmem:[#allocation12 + $0x888] sm:$0xff]  ;;  %v2145_v24 = vld [vmem:[#allocation12 + $0x898] sm:$0xff] }
 0x34d   :  { %2596 = vmatpush1.bf16.msra.mxu1 %v2098_v25  ;;  %2940 = vmatpush1.bf16.msra.mxu0 %v2100_v26  ;;  %v2142_v25 = vld [vmem:[#allocation12 + $0x880] sm:$0xff]  ;;  %v2144_v26 = vld [vmem:[#allocation12 + $0x890] sm:$0xff] }
 0x34e   :  { %2597 = vmatprep.subr.bf16.mxu1 %v2103_v6  ;;  %2941 = vmatprep.subr.bf16.mxu0 %v2105_v29  ;;  %v2147_v6 = vld [vmem:[#allocation12 + $0x8a8] sm:$0xff]  ;;  %v2149_v29 = vld [vmem:[#allocation12 + $0x8b8] sm:$0xff] }
 0x351   :  { %2598 = vmatpush1.bf16.msra.mxu1 %v2102_v31  ;;  %2942 = vmatpush1.bf16.msra.mxu0 %v2104_v32  ;;  %v2146_v31 = vld [vmem:[#allocation12 + $0x8a0] sm:$0xff]  ;;  %v2148_v32 = vld [vmem:[#allocation12 + $0x8b0] sm:$0xff] }
 0x352   :  { %2599 = vmatprep.subr.bf16.mxu1 %v2107_v33  ;;  %2943 = vmatprep.subr.bf16.mxu0 %v2109_v34  ;;  %v2151_v33 = vld [vmem:[#allocation12 + $0x8c8] sm:$0xff]  ;;  %v2153_v34 = vld [vmem:[#allocation12 + $0x8d8] sm:$0xff] }
 0x355   :  { %2600 = vmatpush1.bf16.msra.mxu1 %v2106_v35  ;;  %2944 = vmatpush1.bf16.msra.mxu0 %v2108_v36  ;;  %v2150_v35 = vld [vmem:[#allocation12 + $0x8c0] sm:$0xff]  ;;  %v2152_v36 = vld [vmem:[#allocation12 + $0x8d0] sm:$0xff] }
 0x356   :  { %2601 = vmatprep.subr.bf16.mxu1 %v2111_v37  ;;  %2945 = vmatprep.subr.bf16.mxu0 %v2113_v38  ;;  %v2155_v37 = vld [vmem:[#allocation12 + $0x8e8] sm:$0xff]  ;;  %v2157_v38 = vld [vmem:[#allocation12 + $0x8f8] sm:$0xff] }
 0x359   :  { %2602 = vmatpush1.bf16.msra.mxu1 %v2110_v39  ;;  %2946 = vmatpush1.bf16.msra.mxu0 %v2112_v28  ;;  %v2154_v39 = vld [vmem:[#allocation12 + $0x8e0] sm:$0xff]  ;;  %v2156_v28 = vld [vmem:[#allocation12 + $0x8f0] sm:$0xff] }
 0x35a   :  { %2603 = vmatprep.subr.bf16.mxu1 %v2115_v40  ;;  %2947 = vmatprep.subr.bf16.mxu0 %v2117_v44  ;;  %v2159_v40 = vld [vmem:[#allocation12 + $0x908] sm:$0xff]  ;;  %v2161_v44 = vld [vmem:[#allocation12 + $0x918] sm:$0xff] }
 0x35d   :  { %2604 = vmatpush1.bf16.msra.mxu1 %v2114_v49  ;;  %2948 = vmatpush1.bf16.msra.mxu0 %v2116_v50  ;;  %v2163_v49 = vld [vmem:[#allocation12 + $0x928] sm:$0xff]  ;;  %v2165_v50 = vld [vmem:[#allocation12 + $0x938] sm:$0xff] }
 0x35e   :  { %2605 = vmatprep.subr.bf16.mxu1 %v2119_v54  ;;  %2949 = vmatprep.subr.bf16.mxu0 %v2121_v55  ;;  %v2169_v54 = vld [vmem:[#allocation12 + $0x958] sm:$0xff]  ;;  %v2166_v55 = vld [vmem:[#allocation12 + $0x940] sm:$0xff] }
 0x361   :  { %2606 = vmatpush1.bf16.msra.mxu1 %v2118_v59  ;;  %2950 = vmatpush1.bf16.msra.mxu0 %v2120_v60  ;;  %v2170_v59 = vld [vmem:[#allocation12 + $0x960] sm:$0xff]  ;;  %v2172_v60 = vld [vmem:[#allocation12 + $0x970] sm:$0xff] }
 0x362   :  { %2607 = vmatprep.subr.bf16.mxu1 %v2123_v1  ;;  %2951 = vmatprep.subr.bf16.mxu0 %v2125_v2  ;;  %v2174_v1 = vld [vmem:[#allocation12 + $0x980] sm:$0xff]  ;;  %v2176_v2 = vld [vmem:[#allocation12 + $0x990] sm:$0xff] }
 0x365   :  { %2608 = vmatpush1.bf16.msra.mxu1 %v2122_v42  ;;  %2952 = vmatpush1.bf16.msra.mxu0 %v2124_v3  ;;  %v2179_v42 = vld [vmem:[#allocation12 + $0x9a8] sm:$0xff]  ;;  %v2181_v3 = vld [vmem:[#allocation12 + $0x9b8] sm:$0xff] }
 0x366   :  { %2620 = vmatprep.subr.bf16.mxu1 %v2127_v4  ;;  %2964 = vmatprep.subr.bf16.mxu0 %v2129_v5  ;;  %v2178_v4 = vld [vmem:[#allocation12 + $0x9a0] sm:$0xff]  ;;  %v2180_v5 = vld [vmem:[#allocation12 + $0x9b0] sm:$0xff] }
 0x368   :  { %2610 = vmatmul.mubr.bf16.vlgmr.msra.gmra.mrb[20].mxu1 %v6123_v7  ;;  %2954 = vmatmul.mubr.bf16.vlgmr.msra.gmra.mrb[8].mxu0 %v6123_v7  ;;  %v2183_v7 = vld [vmem:[#allocation12 + $0x9c8] sm:$0xff] }
 0x369   :  { %2621 = vmatpush1.bf16.msra.mxu1 %v2126_v8  ;;  %2965 = vmatpush1.bf16.msra.mxu0 %v2128_v30  ;;  %v2185_v8 = vld [vmem:[#allocation12 + $0x9d8] sm:$0xff] }
 0x36a   :  { %2622 = vmatprep.subr.bf16.mxu1 %v2131_v10  ;;  %2966 = vmatprep.subr.bf16.mxu0 %v2133_v11  ;;  %v1827_v30 = vld [vmem:[#allocation2 + $0x30] sm:$0x3f]  ;;  %v1828_v10 = vld [vmem:[#allocation2 + $0x38] sm:$0x3f] }
 0x36b   :  { %2652 = vmatprep.mubr.bf16.mxu1 %v7065_v12  ;;  %2996 = vmatprep.mubr.bf16.mxu0 %v7065_v12  ;;  %v6231_v11 = vpack.c.bf16 %v1828_v10, %v1827_v30  ;;  %v2182_v12 = vld [vmem:[#allocation12 + $0x9c0] sm:$0xff]  ;;  %v2228_v10 = vld [vmem:[#allocation12 + $0xb30] sm:$0xff] }
 0x36c   :  { %v2226_v30 = vld [vmem:[#allocation12 + $0xb20] sm:$0xff] }
 0x36d   :  { %2623 = vmatpush1.bf16.msra.mxu1 %v2130_v13  ;;  %2967 = vmatpush1.bf16.msra.mxu0 %v2132_v14  ;;  %v2184_v13 = vld [vmem:[#allocation12 + $0x9d0] sm:$0xff]  ;;  %1852 = vst [vmem:[#allocation8 + $0x6c] sm:$0x77] %v6231_v11  ;;  %v2187_v14 = vld [vmem:[#allocation12 + $0x9e8] sm:$0xff] }
 0x36e   :  { %2624 = vmatprep.subr.bf16.mxu1 %v2135_v15  ;;  %2968 = vmatprep.subr.bf16.mxu0 %v2137_v16  ;;  %v2189_v15 = vld [vmem:[#allocation12 + $0x9f8] sm:$0xff]  ;;  %v2186_v16 = vld [vmem:[#allocation12 + $0x9e0] sm:$0xff]  ;;  %v2231_v11 = vld [vmem:[#allocation12 + $0xb48] sm:$0xff] }
 0x371   :  { %2625 = vmatpush1.bf16.msra.mxu1 %v2134_v63  ;;  %2969 = vmatpush1.bf16.msra.mxu0 %v2136_v41  ;;  %v2188_v63 = vld [vmem:[#allocation12 + $0x9f0] sm:$0xff]  ;;  %v2191_v41 = vld [vmem:[#allocation12 + $0xa08] sm:$0xff] }
 0x372   :  { %2626 = vmatprep.subr.bf16.mxu1 %v2139_v17  ;;  %2970 = vmatprep.subr.bf16.mxu0 %v2141_v18  ;;  %v2193_v17 = vld [vmem:[#allocation12 + $0xa18] sm:$0xff]  ;;  %v1824_v18 = vld [vmem:[#allocation2 + $0x18] sm:$0xff] }
 0x375   :  { %2627 = vmatpush1.bf16.msra.mxu1 %v2138_v19  ;;  %2971 = vmatpush1.bf16.msra.mxu0 %v2140_v20  ;;  %v1825_v19 = vld [vmem:[#allocation2 + $0x20] sm:$0xff] }
 0x376   :  { %2628 = vmatprep.subr.bf16.mxu1 %v2143_v23  ;;  %2972 = vmatprep.subr.bf16.mxu0 %v2145_v24  ;;  %v7063_v20 = vld [vmem:[#allocation8 + $0x20] ss:$60 sps:$4 sm:$0x7f]   ;;  %v7768_v23 = vpack.c.bf16 %v1825_v19, %v1824_v18  ;;  %v2190_v24 = vld [vmem:[#allocation12 + $0xa00] sm:$0xff]  ;;  %v2241_v18 = vld [vmem:[#allocation12 + $0xb98] sm:$0xff] }
 0x377   :  { %v2238_v19 = vld [vmem:[#allocation12 + $0xb80] sm:$0xff] }
 0x379   :  { %2629 = vmatpush1.bf16.msra.mxu1 %v2142_v25  ;;  %2973 = vmatpush1.bf16.msra.mxu0 %v2144_v26  ;;  %v2192_v25 = vld [vmem:[#allocation12 + $0xa10] sm:$0xff]  ;;  %v2195_v26 = vld [vmem:[#allocation12 + $0xa28] sm:$0xff] }
 0x37a   :  { %2630 = vmatprep.subr.bf16.mxu1 %v2147_v6  ;;  %2974 = vmatprep.subr.bf16.mxu0 %v2149_v29  ;;  %v2197_v6 = vld [vmem:[#allocation12 + $0xa38] sm:$0xff] }
 0x37b   :  { %v7068_v29 = vld [vmem:[#allocation8 + $0x2c] ss:$60 sps:$4 sm:$0x7f]  }
 0x37d   :  { %2631 = vmatpush1.bf16.msra.mxu1 %v2146_v31  ;;  %2975 = vmatpush1.bf16.msra.mxu0 %v2148_v32  ;;  %v2194_v31 = vld [vmem:[#allocation12 + $0xa20] sm:$0xff]  ;;  %v2196_v32 = vld [vmem:[#allocation12 + $0xa30] sm:$0xff] }
 0x37e   :  { %2632 = vmatprep.subr.bf16.mxu1 %v2151_v33  ;;  %2976 = vmatprep.subr.bf16.mxu0 %v2153_v34  ;;  %v2199_v33 = vld [vmem:[#allocation12 + $0xa48] sm:$0xff]  ;;  %v2201_v34 = vld [vmem:[#allocation12 + $0xa58] sm:$0xff] }
 0x381   :  { %2633 = vmatpush1.bf16.msra.mxu1 %v2150_v35  ;;  %2977 = vmatpush1.bf16.msra.mxu0 %v2152_v36  ;;  %v2198_v35 = vld [vmem:[#allocation12 + $0xa40] sm:$0xff]  ;;  %v2200_v36 = vld [vmem:[#allocation12 + $0xa50] sm:$0xff] }
 0x382   :  { %2634 = vmatprep.subr.bf16.mxu1 %v2155_v37  ;;  %2978 = vmatprep.subr.bf16.mxu0 %v2157_v38  ;;  %v2203_v37 = vld [vmem:[#allocation12 + $0xa68] sm:$0xff]  ;;  %v2205_v38 = vld [vmem:[#allocation12 + $0xa78] sm:$0xff] }
 0x385   :  { %2635 = vmatpush1.bf16.msra.mxu1 %v2154_v39  ;;  %2979 = vmatpush1.bf16.msra.mxu0 %v2156_v28  ;;  %v2202_v39 = vld [vmem:[#allocation12 + $0xa60] sm:$0xff]  ;;  %v2204_v28 = vld [vmem:[#allocation12 + $0xa70] sm:$0xff] }
 0x386   :  { %2636 = vmatprep.subr.bf16.mxu1 %v2159_v40  ;;  %2980 = vmatprep.subr.bf16.mxu0 %v2161_v44  ;;  %v2207_v40 = vld [vmem:[#allocation12 + $0xa88] sm:$0xff]  ;;  %v2209_v44 = vld [vmem:[#allocation12 + $0xa98] sm:$0xff] }
 0x389   :  { %2637 = vmatpush1.bf16.msra.mxu1 %v2158_v46  ;;  %2981 = vmatpush1.bf16.msra.mxu0 %v2160_v47  ;;  %v2206_v46 = vld [vmem:[#allocation12 + $0xa80] sm:$0xff]  ;;  %v2208_v47 = vld [vmem:[#allocation12 + $0xa90] sm:$0xff] }
 0x38a   :  { %2638 = vmatprep.subr.bf16.mxu1 %v2163_v49  ;;  %2982 = vmatprep.subr.bf16.mxu0 %v2165_v50  ;;  %v2211_v49 = vld [vmem:[#allocation12 + $0xaa8] sm:$0xff]  ;;  %v2213_v50 = vld [vmem:[#allocation12 + $0xab8] sm:$0xff] }
 0x38d   :  { %2639 = vmatpush1.bf16.msra.mxu1 %v2162_v51  ;;  %2983 = vmatpush1.bf16.msra.mxu0 %v2164_v52  ;;  %v2210_v51 = vld [vmem:[#allocation12 + $0xaa0] sm:$0xff]  ;;  %v2212_v52 = vld [vmem:[#allocation12 + $0xab0] sm:$0xff] }
 0x38e   :  { %2640 = vmatprep.subr.bf16.mxu1 %v2167_v53  ;;  %2984 = vmatprep.subr.bf16.mxu0 %v2169_v54  ;;  %v2215_v53 = vld [vmem:[#allocation12 + $0xac8] sm:$0xff]  ;;  %v2217_v54 = vld [vmem:[#allocation12 + $0xad8] sm:$0xff] }
 0x391   :  { %2641 = vmatpush1.bf16.msra.mxu1 %v2166_v55  ;;  %2985 = vmatpush1.bf16.msra.mxu0 %v2168_v56  ;;  %v1826_v55 = vld [vmem:[#allocation2 + $0x28] sm:$0xff]  ;;  %v1829_v56 = vld [vmem:[#allocation2 + $0x40] sm:$0x3f] }
 0x392   :  { %2642 = vmatprep.subr.bf16.mxu1 %v2171_v57  ;;  %2986 = vmatprep.subr.bf16.mxu0 %v2173_v58  ;;  %v6230_v57 = vpack.c.bf16 %v1826_v55, %v1826_v55  ;;  %v6232_v58 = vpack.c.bf16 %v1829_v56, %v1829_v56  ;;  %v2262_v55 = vld [vmem:[#allocation12 + $0xc40] sm:$0xff]  ;;  %v2264_v56 = vld [vmem:[#allocation12 + $0xc50] sm:$0xff] }
 0x394   :  { %1851 = vst [vmem:[#allocation8 + $0x38] sm:$0xf] %v6230_v57  ;;  %1853 = vst [vmem:[#allocation8 + $0x74] sm:$0x7] %v6232_v58  ;;  %v2267_v57 = vld [vmem:[#allocation12 + $0xc68] sm:$0xff]  ;;  %v2269_v58 = vld [vmem:[#allocation12 + $0xc78] sm:$0xff] }
 0x395   :  { %2643 = vmatpush1.bf16.msra.mxu1 %v2170_v59  ;;  %2987 = vmatpush1.bf16.msra.mxu0 %v2172_v60  ;;  %v2214_v59 = vld [vmem:[#allocation12 + $0xac0] sm:$0xff]  ;;  %v2216_v60 = vld [vmem:[#allocation12 + $0xad0] sm:$0xff] }
 0x396   :  { %2644 = vmatprep.subr.bf16.mxu1 %v2175_v61  ;;  %2988 = vmatprep.subr.bf16.mxu0 %v2177_v62  ;;  %v2219_v61 = vld [vmem:[#allocation12 + $0xae8] sm:$0xff]  ;;  %v2221_v62 = vld [vmem:[#allocation12 + $0xaf8] sm:$0xff] }
 0x399   :  { %2645 = vmatpush1.bf16.msra.mxu1 %v2174_v1  ;;  %2989 = vmatpush1.bf16.msra.mxu0 %v2176_v2  ;;  %v2218_v1 = vld [vmem:[#allocation12 + $0xae0] sm:$0xff]  ;;  %v2220_v2 = vld [vmem:[#allocation12 + $0xaf0] sm:$0xff] }
 0x39a   :  { %2646 = vmatprep.subr.bf16.mxu1 %v2179_v42  ;;  %2990 = vmatprep.subr.bf16.mxu0 %v2181_v3  ;;  %v2223_v42 = vld [vmem:[#allocation12 + $0xb08] sm:$0xff]  ;;  %v2225_v3 = vld [vmem:[#allocation12 + $0xb18] sm:$0xff] }
 0x39d   :  { %2647 = vmatpush1.bf16.msra.mxu1 %v2178_v4  ;;  %2991 = vmatpush1.bf16.msra.mxu0 %v2180_v5  ;;  %v2222_v4 = vld [vmem:[#allocation12 + $0xb00] sm:$0xff]  ;;  %v2224_v5 = vld [vmem:[#allocation12 + $0xb10] sm:$0xff] }
 0x39e   :  { %2648 = vmatprep.subr.bf16.mxu1 %v2183_v7  ;;  %2992 = vmatprep.subr.bf16.mxu0 %v2185_v8  ;;  %v2227_v7 = vld [vmem:[#allocation12 + $0xb28] sm:$0xff]  ;;  %v2229_v8 = vld [vmem:[#allocation12 + $0xb38] sm:$0xff] }
 0x3a1   :  { %2649 = vmatpush1.bf16.msra.mxu1 %v2182_v12  ;;  %2993 = vmatpush1.bf16.msra.mxu0 %v2184_v13  ;;  %v2233_v12 = vld [vmem:[#allocation12 + $0xb58] sm:$0xff]  ;;  %v2230_v13 = vld [vmem:[#allocation12 + $0xb40] sm:$0xff] }
 0x3a2   :  { %2650 = vmatprep.subr.bf16.mxu1 %v2187_v14  ;;  %2994 = vmatprep.subr.bf16.mxu0 %v2189_v15  ;;  %v2232_v14 = vld [vmem:[#allocation12 + $0xb50] sm:$0xff]  ;;  %v2235_v15 = vld [vmem:[#allocation12 + $0xb68] sm:$0xff] }
 0x3a5   :  { %2651 = vmatpush1.bf16.msra.mxu1 %v2186_v16  ;;  %2995 = vmatpush1.bf16.msra.mxu0 %v2188_v63  ;;  %v2237_v16 = vld [vmem:[#allocation12 + $0xb78] sm:$0xff]  ;;  %v2234_v63 = vld [vmem:[#allocation12 + $0xb60] sm:$0xff] }
 0x3a6   :  { %2663 = vmatprep.subr.bf16.mxu1 %v2191_v41  ;;  %3007 = vmatprep.subr.bf16.mxu0 %v2193_v17  ;;  %v2236_v41 = vld [vmem:[#allocation12 + $0xb70] sm:$0xff]  ;;  %v2239_v17 = vld [vmem:[#allocation12 + $0xb88] sm:$0xff] }
 0x3a8   :  { %2653 = vmatmul.mubr.bf16.vlgmr.msra.gmra.mrb[20].mxu1 %v7063_v20  ;;  %2997 = vmatmul.mubr.bf16.vlgmr.msra.gmra.mrb[8].mxu0 %v7063_v20  ;;  %v2240_v20 = vld [vmem:[#allocation12 + $0xb90] sm:$0xff] }
 0x3a9   :  { %2664 = vmatpush1.bf16.msra.mxu1 %v2190_v24  ;;  %3008 = vmatpush1.bf16.msra.mxu0 %v2192_v25  ;;  %v2243_v24 = vld [vmem:[#allocation12 + $0xba8] sm:$0xff]  ;;  %v2245_v25 = vld [vmem:[#allocation12 + $0xbb8] sm:$0xff] }
 0x3aa   :  { %2665 = vmatprep.subr.bf16.mxu1 %v2195_v26  ;;  %3009 = vmatprep.subr.bf16.mxu0 %v2197_v6  ;;  %v2242_v26 = vld [vmem:[#allocation12 + $0xba0] sm:$0xff]  ;;  %v2244_v6 = vld [vmem:[#allocation12 + $0xbb0] sm:$0xff] }
 0x3ab   :  { %2695 = vmatprep.mubr.bf16.mxu1 %v7068_v29  ;;  %3039 = vmatprep.mubr.bf16.mxu0 %v7068_v29  ;;  %v2247_v29 = vld [vmem:[#allocation12 + $0xbc8] sm:$0xff] }
 0x3ad   :  { %2666 = vmatpush1.bf16.msra.mxu1 %v2194_v31  ;;  %3010 = vmatpush1.bf16.msra.mxu0 %v2196_v32  ;;  %v2249_v31 = vld [vmem:[#allocation12 + $0xbd8] sm:$0xff]  ;;  %v2246_v32 = vld [vmem:[#allocation12 + $0xbc0] sm:$0xff] }
 0x3ae   :  { %2667 = vmatprep.subr.bf16.mxu1 %v2199_v33  ;;  %3011 = vmatprep.subr.bf16.mxu0 %v2201_v34  ;;  %v2248_v33 = vld [vmem:[#allocation12 + $0xbd0] sm:$0xff]  ;;  %v2251_v34 = vld [vmem:[#allocation12 + $0xbe8] sm:$0xff] }
 0x3b1   :  { %2668 = vmatpush1.bf16.msra.mxu1 %v2198_v35  ;;  %3012 = vmatpush1.bf16.msra.mxu0 %v2200_v36  ;;  %v2253_v35 = vld [vmem:[#allocation12 + $0xbf8] sm:$0xff]  ;;  %v2250_v36 = vld [vmem:[#allocation12 + $0xbe0] sm:$0xff] }
 0x3b2   :  { %2669 = vmatprep.subr.bf16.mxu1 %v2203_v37  ;;  %3013 = vmatprep.subr.bf16.mxu0 %v2205_v38  ;;  %v2252_v37 = vld [vmem:[#allocation12 + $0xbf0] sm:$0xff]  ;;  %v2255_v38 = vld [vmem:[#allocation12 + $0xc08] sm:$0xff] }
 0x3b5   :  { %2670 = vmatpush1.bf16.msra.mxu1 %v2202_v39  ;;  %3014 = vmatpush1.bf16.msra.mxu0 %v2204_v28  ;;  %v2257_v39 = vld [vmem:[#allocation12 + $0xc18] sm:$0xff]  ;;  %v7066_v28 = vld [vmem:[#allocation8 + $0x28] ss:$60 sps:$4 sm:$0x7f]  }
 0x3b6   :  { %2671 = vmatprep.subr.bf16.mxu1 %v2207_v40  ;;  %3015 = vmatprep.subr.bf16.mxu0 %v2209_v44  ;;  %v7770_v40 = vld [vmem:[#allocation8 + $0x6c] sm:$0x77]  ;;  %v2254_v44 = vld [vmem:[#allocation12 + $0xc00] sm:$0xff] }
 0x3b9   :  { %2672 = vmatpush1.bf16.msra.mxu1 %v2206_v46  ;;  %3016 = vmatpush1.bf16.msra.mxu0 %v2208_v47  ;;  %v2256_v46 = vld [vmem:[#allocation12 + $0xc10] sm:$0xff]  ;;  %v2259_v47 = vld [vmem:[#allocation12 + $0xc28] sm:$0xff] }
 0x3ba   :  { %2673 = vmatprep.subr.bf16.mxu1 %v2211_v49  ;;  %3017 = vmatprep.subr.bf16.mxu0 %v2213_v50  ;;  %v2261_v49 = vld [vmem:[#allocation12 + $0xc38] sm:$0xff]  ;;  %v6130_v50 = vcombine.high %v7768_v23, %v7770_v40 }
 0x3bd   :  { %2674 = vmatpush1.bf16.msra.mxu1 %v2210_v51  ;;  %3018 = vmatpush1.bf16.msra.mxu0 %v2212_v52  ;;  %v2258_v51 = vld [vmem:[#allocation12 + $0xc20] sm:$0xff]  ;;  %v2260_v52 = vld [vmem:[#allocation12 + $0xc30] sm:$0xff] }
 0x3be   :  { %2675 = vmatprep.subr.bf16.mxu1 %v2215_v53  ;;  %3019 = vmatprep.subr.bf16.mxu0 %v2217_v54  ;;  %v2263_v53 = vld [vmem:[#allocation12 + $0xc48] sm:$0xff]  ;;  %v2265_v54 = vld [vmem:[#allocation12 + $0xc58] sm:$0xff] }
 0x3c1   :  { %2676 = vmatpush1.bf16.msra.mxu1 %v2214_v59  ;;  %3020 = vmatpush1.bf16.msra.mxu0 %v2216_v60  ;;  %v2266_v59 = vld [vmem:[#allocation12 + $0xc60] sm:$0xff]  ;;  %v2268_v60 = vld [vmem:[#allocation12 + $0xc70] sm:$0xff] }
 0x3c2   :  { %2677 = vmatprep.subr.bf16.mxu1 %v2219_v61  ;;  %3021 = vmatprep.subr.bf16.mxu0 %v2221_v62  ;;  %v2271_v61 = vld [vmem:[#allocation12 + $0xc88] sm:$0xff]  ;;  %v2273_v62 = vld [vmem:[#allocation12 + $0xc98] sm:$0xff] }
 0x3c5   :  { %2678 = vmatpush1.bf16.msra.mxu1 %v2218_v1  ;;  %3022 = vmatpush1.bf16.msra.mxu0 %v2220_v2  ;;  %v2270_v1 = vld [vmem:[#allocation12 + $0xc80] sm:$0xff]  ;;  %v2272_v2 = vld [vmem:[#allocation12 + $0xc90] sm:$0xff] }
 0x3c6   :  { %2679 = vmatprep.subr.bf16.mxu1 %v2223_v42  ;;  %3023 = vmatprep.subr.bf16.mxu0 %v2225_v3  ;;  %v2275_v42 = vld [vmem:[#allocation12 + $0xca8] sm:$0xff]  ;;  %v2277_v3 = vld [vmem:[#allocation12 + $0xcb8] sm:$0xff] }
 0x3c9   :  { %2680 = vmatpush1.bf16.msra.mxu1 %v2222_v4  ;;  %3024 = vmatpush1.bf16.msra.mxu0 %v2224_v5  ;;  %v2274_v4 = vld [vmem:[#allocation12 + $0xca0] sm:$0xff]  ;;  %v2276_v5 = vld [vmem:[#allocation12 + $0xcb0] sm:$0xff] }
 0x3ca   :  { %2681 = vmatprep.subr.bf16.mxu1 %v2227_v7  ;;  %3025 = vmatprep.subr.bf16.mxu0 %v2229_v8  ;;  %v2279_v7 = vld [vmem:[#allocation12 + $0xcc8] sm:$0xff]  ;;  %v2281_v8 = vld [vmem:[#allocation12 + $0xcd8] sm:$0xff] }
 0x3cd   :  { %2682 = vmatpush1.bf16.msra.mxu1 %v2226_v30  ;;  %3026 = vmatpush1.bf16.msra.mxu0 %v2228_v10  ;;  %v2278_v30 = vld [vmem:[#allocation12 + $0xcc0] sm:$0xff]  ;;  %v2280_v10 = vld [vmem:[#allocation12 + $0xcd0] sm:$0xff] }
 0x3ce   :  { %2683 = vmatprep.subr.bf16.mxu1 %v2231_v11  ;;  %3027 = vmatprep.subr.bf16.mxu0 %v2233_v12  ;;  %v2283_v11 = vld [vmem:[#allocation12 + $0xce8] sm:$0xff]  ;;  %v2285_v12 = vld [vmem:[#allocation12 + $0xcf8] sm:$0xff] }
 0x3d1   :  { %2684 = vmatpush1.bf16.msra.mxu1 %v2230_v13  ;;  %3028 = vmatpush1.bf16.msra.mxu0 %v2232_v14  ;;  %v2282_v13 = vld [vmem:[#allocation12 + $0xce0] sm:$0xff]  ;;  %v2284_v14 = vld [vmem:[#allocation12 + $0xcf0] sm:$0xff] }
 0x3d2   :  { %2685 = vmatprep.subr.bf16.mxu1 %v2235_v15  ;;  %3029 = vmatprep.subr.bf16.mxu0 %v2237_v16  ;;  %v2287_v15 = vld [vmem:[#allocation12 + $0xd08] sm:$0xff]  ;;  %v2289_v16 = vld [vmem:[#allocation12 + $0xd18] sm:$0xff] }
 0x3d5   :  { %2686 = vmatpush1.bf16.msra.mxu1 %v2234_v63  ;;  %3030 = vmatpush1.bf16.msra.mxu0 %v2236_v41  ;;  %v2286_v63 = vld [vmem:[#allocation12 + $0xd00] sm:$0xff]  ;;  %v2288_v41 = vld [vmem:[#allocation12 + $0xd10] sm:$0xff] }
 0x3d6   :  { %2687 = vmatprep.subr.bf16.mxu1 %v2239_v17  ;;  %3031 = vmatprep.subr.bf16.mxu0 %v2241_v18  ;;  %v2291_v17 = vld [vmem:[#allocation12 + $0xd28] sm:$0xff]  ;;  %v2293_v18 = vld [vmem:[#allocation12 + $0xd38] sm:$0xff] }
 0x3d9   :  { %2688 = vmatpush1.bf16.msra.mxu1 %v2238_v19  ;;  %3032 = vmatpush1.bf16.msra.mxu0 %v2240_v20  ;;  %v2290_v19 = vld [vmem:[#allocation12 + $0xd20] sm:$0xff]  ;;  %v2292_v20 = vld [vmem:[#allocation12 + $0xd30] sm:$0xff] }
 0x3da   :  { %2689 = vmatprep.subr.bf16.mxu1 %v2243_v24  ;;  %3033 = vmatprep.subr.bf16.mxu0 %v2245_v25  ;;  %v2295_v24 = vld [vmem:[#allocation12 + $0xd48] sm:$0xff]  ;;  %v2297_v25 = vld [vmem:[#allocation12 + $0xd58] sm:$0xff] }
 0x3dd   :  { %2690 = vmatpush1.bf16.msra.mxu1 %v2242_v26  ;;  %3034 = vmatpush1.bf16.msra.mxu0 %v2244_v6  ;;  %v2294_v26 = vld [vmem:[#allocation12 + $0xd40] sm:$0xff]  ;;  %v2296_v6 = vld [vmem:[#allocation12 + $0xd50] sm:$0xff] }
 0x3de   :  { %2691 = vmatprep.subr.bf16.mxu1 %v2247_v29  ;;  %3035 = vmatprep.subr.bf16.mxu0 %v2249_v31  ;;  %v2299_v29 = vld [vmem:[#allocation12 + $0xd68] sm:$0xff]  ;;  %v2301_v31 = vld [vmem:[#allocation12 + $0xd78] sm:$0xff] }
 0x3e1   :  { %2692 = vmatpush1.bf16.msra.mxu1 %v2246_v32  ;;  %3036 = vmatpush1.bf16.msra.mxu0 %v2248_v33  ;;  %v2298_v32 = vld [vmem:[#allocation12 + $0xd60] sm:$0xff]  ;;  %v2300_v33 = vld [vmem:[#allocation12 + $0xd70] sm:$0xff] }
 0x3e2   :  { %2693 = vmatprep.subr.bf16.mxu1 %v2251_v34  ;;  %3037 = vmatprep.subr.bf16.mxu0 %v2253_v35  ;;  %v2303_v34 = vld [vmem:[#allocation12 + $0xd88] sm:$0xff]  ;;  %v2305_v35 = vld [vmem:[#allocation12 + $0xd98] sm:$0xff] }
 0x3e5   :  { %2694 = vmatpush1.bf16.msra.mxu1 %v2250_v36  ;;  %3038 = vmatpush1.bf16.msra.mxu0 %v2252_v37  ;;  %v2302_v36 = vld [vmem:[#allocation12 + $0xd80] sm:$0xff]  ;;  %v2304_v37 = vld [vmem:[#allocation12 + $0xd90] sm:$0xff] }
 0x3e6   :  { %2706 = vmatprep.subr.bf16.mxu1 %v2255_v38  ;;  %3050 = vmatprep.subr.bf16.mxu0 %v2257_v39  ;;  %v2307_v38 = vld [vmem:[#allocation12 + $0xda8] sm:$0xff]  ;;  %v2309_v39 = vld [vmem:[#allocation12 + $0xdb8] sm:$0xff] }
 0x3e8   :  { %2696 = vmatmul.mubr.bf16.vlgmr.msra.gmra.mrb[20].mxu1 %v7066_v28  ;;  %3040 = vmatmul.mubr.bf16.vlgmr.msra.gmra.mrb[8].mxu0 %v7066_v28  ;;  %v2306_v28 = vld [vmem:[#allocation12 + $0xda0] sm:$0xff] }
 0x3e9   :  { %2707 = vmatpush1.bf16.msra.mxu1 %v2254_v44  ;;  %3051 = vmatpush1.bf16.msra.mxu0 %v2256_v46  ;;  %v2308_v44 = vld [vmem:[#allocation12 + $0xdb0] sm:$0xff]  ;;  %v2311_v46 = vld [vmem:[#allocation12 + $0xdc8] sm:$0xff] }
 0x3ea   :  { %2708 = vmatprep.subr.bf16.mxu1 %v2259_v47  ;;  %3052 = vmatprep.subr.bf16.mxu0 %v2261_v49  ;;  %v2313_v47 = vld [vmem:[#allocation12 + $0xdd8] sm:$0xff]  ;;  %v2310_v49 = vld [vmem:[#allocation12 + $0xdc0] sm:$0xff] }
 0x3eb   :  { %2738 = vmatprep.mubr.bf16.mxu1 %v6130_v50  ;;  %3082 = vmatprep.mubr.bf16.mxu0 %v6130_v50  ;;  %v2312_v50 = vld [vmem:[#allocation12 + $0xdd0] sm:$0xff] }
 0x3ed   :  { %2709 = vmatpush1.bf16.msra.mxu1 %v2258_v51  ;;  %3053 = vmatpush1.bf16.msra.mxu0 %v2260_v52  ;;  %v2315_v51 = vld [vmem:[#allocation12 + $0xde8] sm:$0xff]  ;;  %v2317_v52 = vld [vmem:[#allocation12 + $0xdf8] sm:$0xff] }
 0x3ee   :  { %2710 = vmatprep.subr.bf16.mxu1 %v2263_v53  ;;  %3054 = vmatprep.subr.bf16.mxu0 %v2265_v54  ;;  %v2314_v53 = vld [vmem:[#allocation12 + $0xde0] sm:$0xff]  ;;  %v2316_v54 = vld [vmem:[#allocation12 + $0xdf0] sm:$0xff] }
 0x3f1   :  { %2711 = vmatpush1.bf16.msra.mxu1 %v2262_v55  ;;  %3055 = vmatpush1.bf16.msra.mxu0 %v2264_v56  ;;  %v2319_v55 = vld [vmem:[#allocation12 + $0xe08] sm:$0xff]  ;;  %v2321_v56 = vld [vmem:[#allocation12 + $0xe18] sm:$0xff] }
 0x3f2   :  { %2712 = vmatprep.subr.bf16.mxu1 %v2267_v57  ;;  %3056 = vmatprep.subr.bf16.mxu0 %v2269_v58  ;;  %v6129_v57 = vcombine.low %v7768_v23, %v7770_v40  ;;  %v2318_v58 = vld [vmem:[#allocation12 + $0xe00] sm:$0xff]  ;;  %v2328_v40 = vld [vmem:[#allocation12 + $0xe50] sm:$0xff] }
 0x3f3   :  { %v2326_v23 = vld [vmem:[#allocation12 + $0xe40] sm:$0xff] }
 0x3f5   :  { %2713 = vmatpush1.bf16.msra.mxu1 %v2266_v59  ;;  %3057 = vmatpush1.bf16.msra.mxu0 %v2268_v60  ;;  %v2320_v59 = vld [vmem:[#allocation12 + $0xe10] sm:$0xff]  ;;  %v2323_v60 = vld [vmem:[#allocation12 + $0xe28] sm:$0xff] }
 0x3f6   :  { %2714 = vmatprep.subr.bf16.mxu1 %v2271_v61  ;;  %3058 = vmatprep.subr.bf16.mxu0 %v2273_v62  ;;  %v2325_v61 = vld [vmem:[#allocation12 + $0xe38] sm:$0xff]  ;;  %v2322_v62 = vld [vmem:[#allocation12 + $0xe20] sm:$0xff] }
 0x3f9   :  { %2715 = vmatpush1.bf16.msra.mxu1 %v2270_v1  ;;  %3059 = vmatpush1.bf16.msra.mxu0 %v2272_v2  ;;  %v2324_v1 = vld [vmem:[#allocation12 + $0xe30] sm:$0xff]  ;;  %v2327_v2 = vld [vmem:[#allocation12 + $0xe48] sm:$0xff] }
 0x3fa   :  { %2716 = vmatprep.subr.bf16.mxu1 %v2275_v42  ;;  %3060 = vmatprep.subr.bf16.mxu0 %v2277_v3  ;;  %v2329_v42 = vld [vmem:[#allocation12 + $0xe58] sm:$0xff]  ;;  %v2331_v3 = vld [vmem:[#allocation12 + $0xe68] sm:$0xff] }
 0x3fd   :  { %2717 = vmatpush1.bf16.msra.mxu1 %v2274_v4  ;;  %3061 = vmatpush1.bf16.msra.mxu0 %v2276_v5  ;;  %v2333_v4 = vld [vmem:[#allocation12 + $0xe78] sm:$0xff]  ;;  %v2330_v5 = vld [vmem:[#allocation12 + $0xe60] sm:$0xff] }
 0x3fe   :  { %2718 = vmatprep.subr.bf16.mxu1 %v2279_v7  ;;  %3062 = vmatprep.subr.bf16.mxu0 %v2281_v8  ;;  %v2332_v7 = vld [vmem:[#allocation12 + $0xe70] sm:$0xff]  ;;  %v2335_v8 = vld [vmem:[#allocation12 + $0xe88] sm:$0xff] }
 0x401   :  { %2719 = vmatpush1.bf16.msra.mxu1 %v2278_v30  ;;  %3063 = vmatpush1.bf16.msra.mxu0 %v2280_v10  ;;  %v2337_v30 = vld [vmem:[#allocation12 + $0xe98] sm:$0xff]  ;;  %v2336_v10 = vld [vmem:[#allocation12 + $0xe90] sm:$0xff] }
 0x402   :  { %2720 = vmatprep.subr.bf16.mxu1 %v2283_v11  ;;  %3064 = vmatprep.subr.bf16.mxu0 %v2285_v12  ;;  %v2339_v11 = vld [vmem:[#allocation12 + $0xea8] sm:$0xff]  ;;  %v2341_v12 = vld [vmem:[#allocation12 + $0xeb8] sm:$0xff] }
 0x405   :  { %2721 = vmatpush1.bf16.msra.mxu1 %v2282_v13  ;;  %3065 = vmatpush1.bf16.msra.mxu0 %v2284_v14  ;;  %v2338_v13 = vld [vmem:[#allocation12 + $0xea0] sm:$0xff]  ;;  %v2340_v14 = vld [vmem:[#allocation12 + $0xeb0] sm:$0xff] }
 0x406   :  { %2722 = vmatprep.subr.bf16.mxu1 %v2287_v15  ;;  %3066 = vmatprep.subr.bf16.mxu0 %v2289_v16  ;;  %v2343_v15 = vld [vmem:[#allocation12 + $0xec8] sm:$0xff]  ;;  %v2345_v16 = vld [vmem:[#allocation12 + $0xed8] sm:$0xff] }
 0x409   :  { %2723 = vmatpush1.bf16.msra.mxu1 %v2286_v63  ;;  %3067 = vmatpush1.bf16.msra.mxu0 %v2288_v41  ;;  %v2342_v63 = vld [vmem:[#allocation12 + $0xec0] sm:$0xff]  ;;  %v2344_v41 = vld [vmem:[#allocation12 + $0xed0] sm:$0xff] }
 0x40a   :  { %2724 = vmatprep.subr.bf16.mxu1 %v2291_v17  ;;  %3068 = vmatprep.subr.bf16.mxu0 %v2293_v18  ;;  %v2347_v17 = vld [vmem:[#allocation12 + $0xee8] sm:$0xff]  ;;  %v2349_v18 = vld [vmem:[#allocation12 + $0xef8] sm:$0xff] }
 0x40d   :  { %2725 = vmatpush1.bf16.msra.mxu1 %v2290_v19  ;;  %3069 = vmatpush1.bf16.msra.mxu0 %v2292_v20  ;;  %v2346_v19 = vld [vmem:[#allocation12 + $0xee0] sm:$0xff]  ;;  %v2348_v20 = vld [vmem:[#allocation12 + $0xef0] sm:$0xff] }
 0x40e   :  { %2726 = vmatprep.subr.bf16.mxu1 %v2295_v24  ;;  %3070 = vmatprep.subr.bf16.mxu0 %v2297_v25  ;;  %v7069_v24 = vld [vmem:[#allocation8 + $0x38] ss:$60 sps:$4 sm:$0x7f]  }
 0x40f   :  { %v2350_v25 = vld [vmem:[#allocation21] sm:$0xf] }
 0x411   :  { %2727 = vmatpush1.bf16.msra.mxu1 %v2294_v26  ;;  %3071 = vmatpush1.bf16.msra.mxu0 %v2296_v6  ;;  %v2366_v26 = vsub.s32 3, %v7686_v43  ;;  %v2355_v6 = vrot.slane %v2350_v25, %v7695_v21 }
 0x412   :  { %2728 = vmatprep.subr.bf16.mxu1 %v2299_v29  ;;  %3072 = vmatprep.subr.bf16.mxu0 %v2301_v31  ;;  %v2363_v29 = vrot.slane %v2350_v25, %v7689_v45  ;;  %v2359_v31 = vrot.slane %v2350_v25, %v7698_v22 }
 0x415   :  { %2729 = vmatpush1.bf16.msra.mxu1 %v2298_v32  ;;  %3073 = vmatpush1.bf16.msra.mxu0 %v2300_v33  ;;  %v2367_v32 = vrot.slane %v2350_v25, %v2366_v26 }
 0x416   :  { %2730 = vmatprep.subr.bf16.mxu1 %v2303_v34  ;;  %3074 = vmatprep.subr.bf16.mxu0 %v2305_v35 }
 0x419   :  { %2731 = vmatpush1.bf16.msra.mxu1 %v2302_v36  ;;  %3075 = vmatpush1.bf16.msra.mxu0 %v2304_v37 }
 0x41a   :  { %2732 = vmatprep.subr.bf16.mxu1 %v2307_v38  ;;  %3076 = vmatprep.subr.bf16.mxu0 %v2309_v39 }
 0x41d   :  { %2733 = vmatpush1.bf16.msra.mxu1 %v2306_v28  ;;  %3077 = vmatpush1.bf16.msra.mxu0 %v2308_v44 }
 0x41e   :  { %2734 = vmatprep.subr.bf16.mxu1 %v2311_v46  ;;  %3078 = vmatprep.subr.bf16.mxu0 %v2313_v47 }
 0x421   :  { %2735 = vmatpush1.bf16.msra.mxu1 %v2310_v49  ;;  %3079 = vmatpush1.bf16.msra.mxu0 %v2312_v50 }
 0x422   :  { %2736 = vmatprep.subr.bf16.mxu1 %v2315_v51  ;;  %3080 = vmatprep.subr.bf16.mxu0 %v2317_v52 }
 0x425   :  { %2737 = vmatpush1.bf16.msra.mxu1 %v2314_v53  ;;  %3081 = vmatpush1.bf16.msra.mxu0 %v2316_v54 }
 0x426   :  { %2749 = vmatprep.subr.bf16.mxu1 %v2319_v55  ;;  %3093 = vmatprep.subr.bf16.mxu0 %v2321_v56 }
 0x428   :  { %2739 = vmatmul.mubr.bf16.vlgmr.msra.gmra.mrb[20].mxu1 %v6129_v57  ;;  %3083 = vmatmul.mubr.bf16.vlgmr.msra.gmra.mrb[8].mxu0 %v6129_v57 }
 0x429   :  { %2750 = vmatpush1.bf16.msra.mxu1 %v2318_v58  ;;  %3094 = vmatpush1.bf16.msra.mxu0 %v2320_v59 }
 0x42a   :  { %2751 = vmatprep.subr.bf16.mxu1 %v2323_v60  ;;  %3095 = vmatprep.subr.bf16.mxu0 %v2325_v61 }
 0x42b   :  { %2781 = vmatprep.mubr.bf16.mxu1 %v7363_v27  ;;  %3125 = vmatprep.mubr.bf16.mxu0 %v7363_v27  ;;  %v2334_v27 = vld [vmem:[#allocation12 + $0xe80] sm:$0xff] }
 0x42d   :  { %2752 = vmatpush1.bf16.msra.mxu1 %v2322_v62  ;;  %3096 = vmatpush1.bf16.msra.mxu0 %v2324_v1 }
 0x42e   :  { %2753 = vmatprep.subr.bf16.mxu1 %v2327_v2  ;;  %3097 = vmatprep.subr.bf16.mxu0 %v2329_v42 }
 0x431   :  { %2754 = vmatpush1.bf16.msra.mxu1 %v2326_v23  ;;  %3098 = vmatpush1.bf16.msra.mxu0 %v2328_v40 }
 0x432   :  { %2755 = vmatprep.subr.bf16.mxu1 %v2331_v3  ;;  %3099 = vmatprep.subr.bf16.mxu0 %v2333_v4 }
 0x435   :  { %2756 = vmatpush1.bf16.msra.mxu1 %v2330_v5  ;;  %3100 = vmatpush1.bf16.msra.mxu0 %v2332_v7 }
 0x436   :  { %2757 = vmatprep.subr.bf16.mxu1 %v2335_v8  ;;  %3101 = vmatprep.subr.bf16.mxu0 %v2337_v30 }
 0x439   :  { %2758 = vmatpush1.bf16.msra.mxu1 %v2334_v27  ;;  %3102 = vmatpush1.bf16.msra.mxu0 %v2336_v10 }
 0x43a   :  { %2759 = vmatprep.subr.bf16.mxu1 %v2339_v11  ;;  %3103 = vmatprep.subr.bf16.mxu0 %v2341_v12 }
 0x43d   :  { %2760 = vmatpush1.bf16.msra.mxu1 %v2338_v13  ;;  %3104 = vmatpush1.bf16.msra.mxu0 %v2340_v14 }
 0x43e   :  { %2761 = vmatprep.subr.bf16.mxu1 %v2343_v15  ;;  %3105 = vmatprep.subr.bf16.mxu0 %v2345_v16 }
 0x441   :  { %2762 = vmatpush1.bf16.msra.mxu1 %v2342_v63  ;;  %3106 = vmatpush1.bf16.msra.mxu0 %v2344_v41 }
 0x442   :  { %2763 = vmatprep.subr.bf16.mxu1 %v2347_v17  ;;  %3107 = vmatprep.subr.bf16.mxu0 %v2349_v18 }
 0x445   :  { %2764 = vmatpush1.bf16.msra.mxu1 %v2346_v19  ;;  %3108 = vmatpush1.bf16.msra.mxu0 %v2348_v20 }
 0x448   :  { %2782 = vmatmul.mubr.bf16.vlgmr.msra.gmra.mrb[20].mxu1 %v7069_v24  ;;  %3126 = vmatmul.mubr.bf16.vlgmr.msra.gmra.mrb[8].mxu0 %v7069_v24 }
 0x51b   :  { %v2783_v33 = vpop.f32.mrb[20].mxu1  ;;  %v3127_v34 = vpop.f32.mrb[8].mxu0 }
 0x51c   :  { %v6687_v35 = vadd.f32 %v2783_v33, %v2355_v6  ;;  %v6691_v36 = vadd.f32 %v3127_v34, %v2363_v29  ;;  %v2785_v37 = vpop.f32.mrb[21].mxu1  ;;  %v3129_v38 = vpop.f32.mrb[9].mxu0 }
 0x51d   :  { %v6688_v39 = vadd.f32 %v2785_v37, %v2359_v31  ;;  %v6692_v28 = vadd.f32 %v3129_v38, %v2367_v32  ;;  %v2787_v44 = vpop.f32.mrb[22].mxu1  ;;  %v3131_v46 = vpop.f32.mrb[10].mxu0 }
 0x51e   :  { %v3136_v47 = vmax.f32 %v6687_v35, 0.0  ;;  %v3138_v49 = vmax.f32 %v6691_v36, 0.0  ;;  %v6689_v50 = vadd.f32 %v2787_v44, %v2355_v6  ;;  %v6693_v51 = vadd.f32 %v3131_v46, %v2363_v29  ;;  %v2789_v52 = vpop.f32.mrb[23].mxu1  ;;  %v3133_v53 = vpop.f32.mrb[11].mxu0 }
 0x51f   :  { %v3137_v54 = vmax.f32 %v6688_v39, 0.0  ;;  %v3139_v55 = vmax.f32 %v6692_v28, 0.0  ;;  %v6690_v56 = vadd.f32 %v2789_v52, %v2359_v31  ;;  %v6694_v57 = vadd.f32 %v3133_v53, %v2367_v32 }
 0x520   :  { %3144 = vst [vmem:[#allocation3] sm:$0xff] %v3136_v47  ;;  %3146 = vst [vmem:[#allocation3 + $0x10] sm:$0xff] %v3138_v49  ;;  %v3140_v58 = vmax.f32 %v6689_v50, 0.0  ;;  %v3142_v59 = vmax.f32 %v6693_v51, 0.0 }
 0x521   :  { %3145 = vst [vmem:[#allocation3 + $0x8] sm:$0xff] %v3137_v54  ;;  %3147 = vst [vmem:[#allocation3 + $0x18] sm:$0xff] %v3139_v55  ;;  %v3141_v60 = vmax.f32 %v6690_v56, 0.0  ;;  %v3143_v61 = vmax.f32 %v6694_v57, 0.0 }
 0x522   :  { %3148 = vst [vmem:[#allocation3 + $0x20] sm:$0x3f] %v3140_v58  ;;  %3150 = vst [vmem:[#allocation3 + $0x30] sm:$0x3f] %v3142_v59 }
 0x523   :  { %3149 = vst [vmem:[#allocation3 + $0x28] sm:$0x3f] %v3141_v60  ;;  %3151 = vst [vmem:[#allocation3 + $0x38] sm:$0x3f] %v3143_v61 }
 0x524   :  { %7323 = dma.done.wait [#allocation16 + $0x1], 49152 }
 0x525   :  { %7324 = vsyncadd [#allocation16 + $0x1], 4294918144  ;;  %v3297_v62 = vld [vmem:[#allocation13 + $0x8] sm:$0xff]  ;;  %v3299_v1 = vld [vmem:[#allocation13 + $0x18] sm:$0xff] }
 0x526   :  { %v3296_v2 = vld [vmem:[#allocation13] sm:$0xff]  ;;  %3762 = vmatprep.subr.bf16.mxu1 %v3297_v62  ;;  %4020 = vmatprep.subr.bf16.mxu0 %v3299_v1  ;;  %v3298_v42 = vld [vmem:[#allocation13 + $0x10] sm:$0xff]  ;;  %v3301_v23 = vld [vmem:[#allocation13 + $0x28] sm:$0xff] }
 0x527   :  { %v3303_v40 = vld [vmem:[#allocation13 + $0x38] sm:$0xff]  ;;  %3763 = vmatpush1.bf16.msra.mxu1 %v3296_v2  ;;  %4021 = vmatpush1.bf16.msra.mxu0 %v3298_v42  ;;  %v3300_v3 = vld [vmem:[#allocation13 + $0x20] sm:$0xff]  ;;  %v3302_v4 = vld [vmem:[#allocation13 + $0x30] sm:$0xff] }
 0x528   :  { %3764 = vmatprep.subr.bf16.mxu1 %v3301_v23  ;;  %4022 = vmatprep.subr.bf16.mxu0 %v3303_v40  ;;  %v3305_v5 = vld [vmem:[#allocation13 + $0x48] sm:$0xff]  ;;  %v3307_v7 = vld [vmem:[#allocation13 + $0x58] sm:$0xff]  ;;  %v3304_v8 = vld [vmem:[#allocation13 + $0x40] sm:$0xff] }
 0x529   :  { %v3306_v30 = vld [vmem:[#allocation13 + $0x50] sm:$0xff]  ;;  %v3309_v27 = vld [vmem:[#allocation13 + $0x68] sm:$0xff]  ;;  %v3311_v10 = vld [vmem:[#allocation13 + $0x78] sm:$0xff] }
 0x52a   :  { %v3308_v11 = vld [vmem:[#allocation13 + $0x60] sm:$0xff]  ;;  %v3310_v12 = vld [vmem:[#allocation13 + $0x70] sm:$0xff]  ;;  %v3313_v13 = vld [vmem:[#allocation13 + $0x88] sm:$0xff] }
 0x52b   :  { %3765 = vmatpush1.bf16.msra.mxu1 %v3300_v3  ;;  %4023 = vmatpush1.bf16.msra.mxu0 %v3302_v4  ;;  %v3315_v14 = vld [vmem:[#allocation13 + $0x98] sm:$0xff]  ;;  %v3312_v15 = vld [vmem:[#allocation13 + $0x80] sm:$0xff]  ;;  %v3314_v16 = vld [vmem:[#allocation13 + $0x90] sm:$0xff] }
 0x52c   :  { %3766 = vmatprep.subr.bf16.mxu1 %v3305_v5  ;;  %4024 = vmatprep.subr.bf16.mxu0 %v3307_v7  ;;  %v3317_v63 = vld [vmem:[#allocation13 + $0xa8] sm:$0xff]  ;;  %v3319_v41 = vld [vmem:[#allocation13 + $0xb8] sm:$0xff]  ;;  %v3316_v17 = vld [vmem:[#allocation13 + $0xa0] sm:$0xff] }
 0x52d   :  { %v3318_v18 = vld [vmem:[#allocation13 + $0xb0] sm:$0xff]  ;;  %v3321_v19 = vld [vmem:[#allocation13 + $0xc8] sm:$0xff]  ;;  %v3323_v20 = vld [vmem:[#allocation13 + $0xd8] sm:$0xff] }
 0x52e   :  { %v3156_v24 = vld [vmem:[#allocation3] sm:$0xff]  ;;  %v3157_v25 = vld [vmem:[#allocation3 + $0x8] sm:$0xff]  ;;  %v3320_v32 = vld [vmem:[#allocation13 + $0xc0] sm:$0xff] }
 0x52f   :  { %3767 = vmatpush1.bf16.msra.mxu1 %v3304_v8  ;;  %4025 = vmatpush1.bf16.msra.mxu0 %v3306_v30  ;;  %v3160_v6 = vld [vmem:[#allocation3 + $0x20] sm:$0x3]  ;;  %v3161_v29 = vld [vmem:[#allocation3 + $0x28] sm:$0x3]  ;;  %v7784_v31 = vpack.c.bf16 %v3157_v25, %v3156_v24  ;;  %v3325_v35 = vld [vmem:[#allocation13 + $0xe8] sm:$0xff] }
 0x530   :  { %3768 = vmatprep.subr.bf16.mxu1 %v3309_v27  ;;  %4026 = vmatprep.subr.bf16.mxu0 %v3311_v10  ;;  %v3322_v33 = vld [vmem:[#allocation13 + $0xd0] sm:$0xff]  ;;  %v6235_v34 = vpack.c.bf16 %v3161_v29, %v3160_v6  ;;  %v3327_v36 = vld [vmem:[#allocation13 + $0xf8] sm:$0xff]  ;;  %v3324_v37 = vld [vmem:[#allocation13 + $0xe0] sm:$0xff] }
 0x531   :  { %v3326_v38 = vld [vmem:[#allocation13 + $0xf0] sm:$0xff]  ;;  %v3329_v39 = vld [vmem:[#allocation13 + $0x108] sm:$0xff]  ;;  %v3331_v28 = vld [vmem:[#allocation13 + $0x118] sm:$0xff] }
 0x532   :  { %3190 = vst [vmem:[#allocation9 + $0x30] sm:$0x11] %v6235_v34  ;;  %v3328_v44 = vld [vmem:[#allocation13 + $0x100] sm:$0xff]  ;;  %v3330_v46 = vld [vmem:[#allocation13 + $0x110] sm:$0xff]  ;;  %v3333_v47 = vld [vmem:[#allocation13 + $0x128] sm:$0xff] }
 0x533   :  { %3769 = vmatpush1.bf16.msra.mxu1 %v3308_v11  ;;  %4027 = vmatpush1.bf16.msra.mxu0 %v3310_v12  ;;  %v3335_v49 = vld [vmem:[#allocation13 + $0x138] sm:$0xff]  ;;  %v3332_v52 = vld [vmem:[#allocation13 + $0x120] sm:$0xff]  ;;  %v3334_v53 = vld [vmem:[#allocation13 + $0x130] sm:$0xff] }
 0x534   :  { %3770 = vmatprep.subr.bf16.mxu1 %v3313_v13  ;;  %4028 = vmatprep.subr.bf16.mxu0 %v3315_v14  ;;  %v3337_v54 = vld [vmem:[#allocation13 + $0x148] sm:$0xff]  ;;  %v3339_v55 = vld [vmem:[#allocation13 + $0x158] sm:$0xff]  ;;  %v3336_v56 = vld [vmem:[#allocation13 + $0x140] sm:$0xff] }
 0x535   :  { %v3338_v57 = vld [vmem:[#allocation13 + $0x150] sm:$0xff]  ;;  %v3341_v58 = vld [vmem:[#allocation13 + $0x168] sm:$0xff]  ;;  %v3343_v59 = vld [vmem:[#allocation13 + $0x178] sm:$0xff] }
 0x536   :  { %v3340_v60 = vld [vmem:[#allocation13 + $0x160] sm:$0xff]  ;;  %v3342_v61 = vld [vmem:[#allocation13 + $0x170] sm:$0xff]  ;;  %v3345_v62 = vld [vmem:[#allocation13 + $0x188] sm:$0xff] }
 0x537   :  { %3771 = vmatpush1.bf16.msra.mxu1 %v3312_v15  ;;  %4029 = vmatpush1.bf16.msra.mxu0 %v3314_v16  ;;  %v3347_v1 = vld [vmem:[#allocation13 + $0x198] sm:$0xff]  ;;  %v3158_v2 = vld [vmem:[#allocation3 + $0x10] sm:$0xff]  ;;  %v3159_v42 = vld [vmem:[#allocation3 + $0x18] sm:$0xff] }
 0x538   :  { %3772 = vmatprep.subr.bf16.mxu1 %v3317_v63  ;;  %4030 = vmatprep.subr.bf16.mxu0 %v3319_v41  ;;  %v3162_v23 = vld [vmem:[#allocation3 + $0x30] sm:$0x3]  ;;  %v3163_v40 = vld [vmem:[#allocation3 + $0x38] sm:$0x3]  ;;  %v7790_v3 = vpack.c.bf16 %v3159_v42, %v3158_v2  ;;  %v3346_v7 = vld [vmem:[#allocation13 + $0x190] sm:$0xff] }
 0x539   :  { %v7786_v50 = vld [vmem:[#allocation9 + $0x30] sm:$0x11]  ;;  %v6236_v4 = vpack.c.bf16 %v3163_v40, %v3162_v23  ;;  %v3344_v5 = vld [vmem:[#allocation13 + $0x180] sm:$0xff]  ;;  %v3349_v8 = vld [vmem:[#allocation13 + $0x1a8] sm:$0xff] }
 0x53a   :  { %v6149_v51 = vcombine.high %v7784_v31, %v7786_v50  ;;  %v3351_v30 = vld [vmem:[#allocation13 + $0x1b8] sm:$0xff]  ;;  %v3348_v27 = vld [vmem:[#allocation13 + $0x1a0] sm:$0xff]  ;;  %v3350_v10 = vld [vmem:[#allocation13 + $0x1b0] sm:$0xff] }
 0x53b   :  { %3773 = vmatpush1.bf16.msra.mxu1 %v3316_v17  ;;  %4031 = vmatpush1.bf16.msra.mxu0 %v3318_v18  ;;  %3191 = vst [vmem:[#allocation9 + $0x38] sm:$0x11] %v6236_v4  ;;  %v3353_v11 = vld [vmem:[#allocation13 + $0x1c8] sm:$0xff]  ;;  %v3355_v12 = vld [vmem:[#allocation13 + $0x1d8] sm:$0xff]  ;;  %v3352_v13 = vld [vmem:[#allocation13 + $0x1c0] sm:$0xff] }
 0x53c   :  { %3774 = vmatprep.subr.bf16.mxu1 %v3321_v19  ;;  %4032 = vmatprep.subr.bf16.mxu0 %v3323_v20  ;;  %v3354_v14 = vld [vmem:[#allocation13 + $0x1d0] sm:$0xff]  ;;  %v3357_v15 = vld [vmem:[#allocation13 + $0x1e8] sm:$0xff]  ;;  %v3359_v16 = vld [vmem:[#allocation13 + $0x1f8] sm:$0xff]  ;;  %v6148_v19 = vcombine.low %v7784_v31, %v7786_v50 }
 0x53d   :  { %3794 = vmatprep.mubr.bf16.mxu1 %v6149_v51  ;;  %4052 = vmatprep.mubr.bf16.mxu0 %v6149_v51  ;;  %v3356_v63 = vld [vmem:[#allocation13 + $0x1e0] sm:$0xff]  ;;  %v3358_v41 = vld [vmem:[#allocation13 + $0x1f0] sm:$0xff]  ;;  %v3361_v17 = vld [vmem:[#allocation13 + $0x208] sm:$0xff] }
 0x53e   :  { %v3363_v18 = vld [vmem:[#allocation13 + $0x218] sm:$0xff]  ;;  %v3360_v24 = vld [vmem:[#allocation13 + $0x200] sm:$0xff]  ;;  %v3362_v25 = vld [vmem:[#allocation13 + $0x210] sm:$0xff] }
 0x53f   :  { %3775 = vmatpush1.bf16.msra.mxu1 %v3320_v32  ;;  %4033 = vmatpush1.bf16.msra.mxu0 %v3322_v33  ;;  %v3365_v6 = vld [vmem:[#allocation13 + $0x228] sm:$0xff]  ;;  %v3367_v29 = vld [vmem:[#allocation13 + $0x238] sm:$0xff]  ;;  %v3364_v33 = vld [vmem:[#allocation13 + $0x220] sm:$0xff] }
 0x540   :  { %3776 = vmatprep.subr.bf16.mxu1 %v3325_v35  ;;  %4034 = vmatprep.subr.bf16.mxu0 %v3327_v36  ;;  %v3366_v34 = vld [vmem:[#allocation13 + $0x230] sm:$0xff]  ;;  %v3369_v31 = vld [vmem:[#allocation13 + $0x248] sm:$0xff]  ;;  %v3193_v36 = vld [vmem:[#allocation3 + $0x8] sm:$0xfc] }
 0x541   :  { %v3192_v35 = vld [vmem:[#allocation3] sm:$0xfc]  ;;  %v3373_v51 = vld [vmem:[#allocation13 + $0x268] sm:$0xff]  ;;  %v3387_v23 = vld [vmem:[#allocation13 + $0x2d8] sm:$0xff] }
 0x542   :  { %v7794_v20 = vld [vmem:[#allocation9 + $0x38] sm:$0x11]  ;;  %v3382_v2 = vld [vmem:[#allocation13 + $0x2b0] sm:$0xff]  ;;  %v3385_v42 = vld [vmem:[#allocation13 + $0x2c8] sm:$0xff] }
 0x543   :  { %3777 = vmatpush1.bf16.msra.mxu1 %v3324_v37  ;;  %4035 = vmatpush1.bf16.msra.mxu0 %v3326_v38  ;;  %v6151_v32 = vcombine.high %v7790_v3, %v7794_v20  ;;  %v3371_v37 = vld [vmem:[#allocation13 + $0x258] sm:$0xff]  ;;  %v3196_v38 = vld [vmem:[#allocation3 + $0x20] sm:$0xf]  ;;  %v3384_v40 = vld [vmem:[#allocation13 + $0x2c0] sm:$0xff] }
 0x544   :  { %3778 = vmatprep.subr.bf16.mxu1 %v3329_v39  ;;  %4036 = vmatprep.subr.bf16.mxu0 %v3331_v28  ;;  %v3197_v39 = vld [vmem:[#allocation3 + $0x28] sm:$0xf]  ;;  %v6237_v28 = vpack.c.bf16 %v3193_v36, %v3192_v35  ;;  %v3386_v4 = vld [vmem:[#allocation13 + $0x2d0] sm:$0xff]  ;;  %v3198_v36 = vld [vmem:[#allocation3 + $0x30] sm:$0xf] }
 0x545   :  { %v3415_v35 = vld [vmem:[#allocation13 + $0x3b8] sm:$0xff]  ;;  %v3433_v9 = vld [vmem:[#allocation13 + $0x448] sm:$0xff] }
 0x547   :  { %3779 = vmatpush1.bf16.msra.mxu1 %v3328_v44  ;;  %4037 = vmatpush1.bf16.msra.mxu0 %v3330_v46  ;;  %v6239_v44 = vpack.c.bf16 %v3197_v39, %v3196_v38  ;;  %v6140_v46 = vrot.slane %v6237_v28, 9  ;;  %v3412_v39 = vld [vmem:[#allocation13 + $0x3a0] sm:$0xff]  ;;  %v3414_v28 = vld [vmem:[#allocation13 + $0x3b0] sm:$0xff] }
 0x548   :  { %3780 = vmatprep.subr.bf16.mxu1 %v3333_v47  ;;  %4038 = vmatprep.subr.bf16.mxu0 %v3335_v49  ;;  %v3368_v47 = vld [vmem:[#allocation13 + $0x240] sm:$0xff]  ;;  %v3370_v49 = vld [vmem:[#allocation13 + $0x250] sm:$0xff] }
 0x549   :  { %v3222_v50 = vrot.slane %v6239_v44, 5 }
 0x54b   :  { %3781 = vmatpush1.bf16.msra.mxu1 %v3332_v52  ;;  %4039 = vmatpush1.bf16.msra.mxu0 %v3334_v53  ;;  %v3375_v52 = vld [vmem:[#allocation13 + $0x278] sm:$0xff]  ;;  %v7800_v53 = vsel %vm7715_vm3, %v6140_v46, %v3222_v50  ;;  %v3417_v46 = vld [vmem:[#allocation13 + $0x3c8] sm:$0xff] }
 0x54c   :  { %3782 = vmatprep.subr.bf16.mxu1 %v3337_v54  ;;  %4040 = vmatprep.subr.bf16.mxu0 %v3339_v55  ;;  %v3228_v54 = vrot.slane %v3222_v50, 4  ;;  %v3372_v55 = vld [vmem:[#allocation13 + $0x260] sm:$0xff] }
 0x54d   :  { %v3416_v50 = vld [vmem:[#allocation13 + $0x3c0] sm:$0xff] }
 0x54e   :  { %3236 = vst [vmem:[#allocation9 + $0x40] sm:$0x11] %v3228_v54  ;;  %v3423_v54 = vld [vmem:[#allocation13 + $0x3f8] sm:$0xff] }
 0x54f   :  { %3783 = vmatpush1.bf16.msra.mxu1 %v3336_v56  ;;  %4041 = vmatpush1.bf16.msra.mxu0 %v3338_v57  ;;  %v3374_v56 = vld [vmem:[#allocation13 + $0x270] sm:$0xff]  ;;  %v3377_v57 = vld [vmem:[#allocation13 + $0x288] sm:$0xff] }
 0x550   :  { %3784 = vmatprep.subr.bf16.mxu1 %v3341_v58  ;;  %4042 = vmatprep.subr.bf16.mxu0 %v3343_v59  ;;  %v3379_v58 = vld [vmem:[#allocation13 + $0x298] sm:$0xff]  ;;  %v3376_v59 = vld [vmem:[#allocation13 + $0x280] sm:$0xff] }
 0x553   :  { %3785 = vmatpush1.bf16.msra.mxu1 %v3340_v60  ;;  %4043 = vmatpush1.bf16.msra.mxu0 %v3342_v61  ;;  %v3378_v60 = vld [vmem:[#allocation13 + $0x290] sm:$0xff]  ;;  %v3381_v61 = vld [vmem:[#allocation13 + $0x2a8] sm:$0xff] }
 0x554   :  { %3786 = vmatprep.subr.bf16.mxu1 %v3345_v62  ;;  %4044 = vmatprep.subr.bf16.mxu0 %v3347_v1  ;;  %v3383_v62 = vld [vmem:[#allocation13 + $0x2b8] sm:$0xff]  ;;  %v3380_v1 = vld [vmem:[#allocation13 + $0x2a0] sm:$0xff] }
 0x557   :  { %3787 = vmatpush1.bf16.msra.mxu1 %v3344_v5  ;;  %4045 = vmatpush1.bf16.msra.mxu0 %v3346_v7  ;;  %v3389_v5 = vld [vmem:[#allocation13 + $0x2e8] sm:$0xff]  ;;  %v3391_v7 = vld [vmem:[#allocation13 + $0x2f8] sm:$0xff] }
 0x558   :  { %3788 = vmatprep.subr.bf16.mxu1 %v3349_v8  ;;  %4046 = vmatprep.subr.bf16.mxu0 %v3351_v30  ;;  %v3388_v8 = vld [vmem:[#allocation13 + $0x2e0] sm:$0xff]  ;;  %v3390_v30 = vld [vmem:[#allocation13 + $0x2f0] sm:$0xff] }
 0x55b   :  { %3789 = vmatpush1.bf16.msra.mxu1 %v3348_v27  ;;  %4047 = vmatpush1.bf16.msra.mxu0 %v3350_v10  ;;  %v3393_v27 = vld [vmem:[#allocation13 + $0x308] sm:$0xff]  ;;  %v3395_v10 = vld [vmem:[#allocation13 + $0x318] sm:$0xff] }
 0x55c   :  { %3790 = vmatprep.subr.bf16.mxu1 %v3353_v11  ;;  %4048 = vmatprep.subr.bf16.mxu0 %v3355_v12  ;;  %v3392_v11 = vld [vmem:[#allocation13 + $0x300] sm:$0xff]  ;;  %v3394_v12 = vld [vmem:[#allocation13 + $0x310] sm:$0xff] }
 0x55f   :  { %3791 = vmatpush1.bf16.msra.mxu1 %v3352_v13  ;;  %4049 = vmatpush1.bf16.msra.mxu0 %v3354_v14  ;;  %v3397_v13 = vld [vmem:[#allocation13 + $0x328] sm:$0xff]  ;;  %v3399_v14 = vld [vmem:[#allocation13 + $0x338] sm:$0xff] }
 0x560   :  { %3792 = vmatprep.subr.bf16.mxu1 %v3357_v15  ;;  %4050 = vmatprep.subr.bf16.mxu0 %v3359_v16  ;;  %v3396_v15 = vld [vmem:[#allocation13 + $0x320] sm:$0xff]  ;;  %v3398_v16 = vld [vmem:[#allocation13 + $0x330] sm:$0xff] }
 0x563   :  { %3793 = vmatpush1.bf16.msra.mxu1 %v3356_v63  ;;  %4051 = vmatpush1.bf16.msra.mxu0 %v3358_v41  ;;  %v3401_v63 = vld [vmem:[#allocation13 + $0x348] sm:$0xff]  ;;  %v3403_v41 = vld [vmem:[#allocation13 + $0x358] sm:$0xff] }
 0x564   :  { %3805 = vmatprep.subr.bf16.mxu1 %v3361_v17  ;;  %4063 = vmatprep.subr.bf16.mxu0 %v3363_v18  ;;  %v3400_v17 = vld [vmem:[#allocation13 + $0x340] sm:$0xff]  ;;  %v3402_v18 = vld [vmem:[#allocation13 + $0x350] sm:$0xff] }
 0x566   :  { %3795 = vmatmul.mubr.bf16.vlgmr.msra.gmra.mrb[24].mxu1 %v6148_v19  ;;  %4053 = vmatmul.mubr.bf16.vlgmr.msra.gmra.mrb[12].mxu0 %v6148_v19  ;;  %v3405_v19 = vld [vmem:[#allocation13 + $0x368] sm:$0xff] }
 0x567   :  { %3806 = vmatpush1.bf16.msra.mxu1 %v3360_v24  ;;  %4064 = vmatpush1.bf16.msra.mxu0 %v3362_v25  ;;  %v3407_v24 = vld [vmem:[#allocation13 + $0x378] sm:$0xff]  ;;  %v3404_v25 = vld [vmem:[#allocation13 + $0x360] sm:$0xff] }
 0x568   :  { %3807 = vmatprep.subr.bf16.mxu1 %v3365_v6  ;;  %4065 = vmatprep.subr.bf16.mxu0 %v3367_v29  ;;  %v3406_v6 = vld [vmem:[#allocation13 + $0x370] sm:$0xff]  ;;  %v3409_v29 = vld [vmem:[#allocation13 + $0x388] sm:$0xff] }
 0x569   :  { %3837 = vmatprep.mubr.bf16.mxu1 %v6151_v32  ;;  %4095 = vmatprep.mubr.bf16.mxu0 %v6151_v32  ;;  %v3411_v32 = vld [vmem:[#allocation13 + $0x398] sm:$0xff] }
 0x56b   :  { %3808 = vmatpush1.bf16.msra.mxu1 %v3364_v33  ;;  %4066 = vmatpush1.bf16.msra.mxu0 %v3366_v34  ;;  %v3408_v33 = vld [vmem:[#allocation13 + $0x380] sm:$0xff]  ;;  %v3410_v34 = vld [vmem:[#allocation13 + $0x390] sm:$0xff] }
 0x56c   :  { %3809 = vmatprep.subr.bf16.mxu1 %v3369_v31  ;;  %4067 = vmatprep.subr.bf16.mxu0 %v3371_v37  ;;  %v3413_v31 = vld [vmem:[#allocation13 + $0x3a8] sm:$0xff] }
 0x56d   :  { %v3199_v37 = vld [vmem:[#allocation3 + $0x38] sm:$0xf] }
 0x56e   :  { %v6240_v38 = vpack.c.bf16 %v3199_v37, %v3198_v36  ;;  %v3459_v36 = vld [vmem:[#allocation13 + $0x518] sm:$0xff]  ;;  %v3456_v37 = vld [vmem:[#allocation13 + $0x500] sm:$0xff] }
 0x56f   :  { %3810 = vmatpush1.bf16.msra.mxu1 %v3368_v47  ;;  %4068 = vmatpush1.bf16.msra.mxu0 %v3370_v49  ;;  %v3419_v47 = vld [vmem:[#allocation13 + $0x3d8] sm:$0xff] }
 0x570   :  { %3811 = vmatprep.subr.bf16.mxu1 %v3373_v51  ;;  %4069 = vmatprep.subr.bf16.mxu0 %v3375_v52  ;;  %v3226_v44 = vrot.slane %v6240_v38, 5  ;;  %v3418_v51 = vld [vmem:[#allocation13 + $0x3d0] sm:$0xff]  ;;  %v3421_v52 = vld [vmem:[#allocation13 + $0x3e8] sm:$0xff] }
 0x571   :  { %v3458_v38 = vld [vmem:[#allocation13 + $0x510] sm:$0xff] }
 0x572   :  { %v3229_v49 = vrot.slane %v3226_v44, 4 }
 0x573   :  { %3812 = vmatpush1.bf16.msra.mxu1 %v3372_v55  ;;  %4070 = vmatpush1.bf16.msra.mxu0 %v3374_v56  ;;  %v3194_v55 = vld [vmem:[#allocation3 + $0x10] sm:$0xfc]  ;;  %v3195_v56 = vld [vmem:[#allocation3 + $0x18] sm:$0xfc] }
 0x574   :  { %3813 = vmatprep.subr.bf16.mxu1 %v3377_v57  ;;  %4071 = vmatprep.subr.bf16.mxu0 %v3379_v58  ;;  %3237 = vst [vmem:[#allocation9 + $0x48] sm:$0x11] %v3229_v49  ;;  %v6238_v57 = vpack.c.bf16 %v3195_v56, %v3194_v55  ;;  %v3420_v58 = vld [vmem:[#allocation13 + $0x3e0] sm:$0xff]  ;;  %v3467_v49 = vld [vmem:[#allocation13 + $0x558] sm:$0xff]  ;;  %v3470_v56 = vld [vmem:[#allocation13 + $0x570] sm:$0xff] }
 0x575   :  { %v3468_v55 = vld [vmem:[#allocation13 + $0x560] sm:$0xff] }
 0x577   :  { %3814 = vmatpush1.bf16.msra.mxu1 %v3376_v59  ;;  %4072 = vmatpush1.bf16.msra.mxu0 %v3378_v60  ;;  %v3422_v59 = vld [vmem:[#allocation13 + $0x3f0] sm:$0xff]  ;;  %v3425_v60 = vld [vmem:[#allocation13 + $0x408] sm:$0xff] }
 0x578   :  { %3815 = vmatprep.subr.bf16.mxu1 %v3381_v61  ;;  %4073 = vmatprep.subr.bf16.mxu0 %v3383_v62  ;;  %v3427_v61 = vld [vmem:[#allocation13 + $0x418] sm:$0xff]  ;;  %v6141_v62 = vrot.slane %v6238_v57, 9  ;;  %v3473_v57 = vld [vmem:[#allocation13 + $0x588] sm:$0xff] }
 0x57b   :  { %3816 = vmatpush1.bf16.msra.mxu1 %v3380_v1  ;;  %4074 = vmatpush1.bf16.msra.mxu0 %v3382_v2  ;;  %v6150_v1 = vcombine.low %v7790_v3, %v7794_v20  ;;  %v7804_v2 = vld [vmem:[#allocation9 + $0x40] sm:$0x11]  ;;  %v3430_v20 = vld [vmem:[#allocation13 + $0x430] sm:$0xff] }
 0x57c   :  { %3817 = vmatprep.subr.bf16.mxu1 %v3385_v42  ;;  %4075 = vmatprep.subr.bf16.mxu0 %v3387_v23  ;;  %v7808_v42 = vsel %vm7715_vm3, %v6141_v62, %v3226_v44  ;;  %v3424_v23 = vld [vmem:[#allocation13 + $0x400] sm:$0xff]  ;;  %v3479_v62 = vld [vmem:[#allocation13 + $0x5b8] sm:$0xff] }
 0x57d   :  { %v3428_v3 = vld [vmem:[#allocation13 + $0x420] sm:$0xff] }
 0x57e   :  { %v3460_v44 = vld [vmem:[#allocation13 + $0x520] sm:$0xff] }
 0x57f   :  { %3818 = vmatpush1.bf16.msra.mxu1 %v3384_v40  ;;  %4076 = vmatpush1.bf16.msra.mxu0 %v3386_v4  ;;  %v3426_v40 = vld [vmem:[#allocation13 + $0x410] sm:$0xff]  ;;  %v3429_v4 = vld [vmem:[#allocation13 + $0x428] sm:$0xff] }
 0x580   :  { %3819 = vmatprep.subr.bf16.mxu1 %v3389_v5  ;;  %4077 = vmatprep.subr.bf16.mxu0 %v3391_v7  ;;  %v3431_v5 = vld [vmem:[#allocation13 + $0x438] sm:$0xff]  ;;  %v6153_v7 = vcombine.high %v7800_v53, %v7804_v2 }
 0x583   :  { %3820 = vmatpush1.bf16.msra.mxu1 %v3388_v8  ;;  %4078 = vmatpush1.bf16.msra.mxu0 %v3390_v30  ;;  %v3435_v8 = vld [vmem:[#allocation13 + $0x458] sm:$0xff]  ;;  %v3432_v30 = vld [vmem:[#allocation13 + $0x440] sm:$0xff] }
 0x584   :  { %3821 = vmatprep.subr.bf16.mxu1 %v3393_v27  ;;  %4079 = vmatprep.subr.bf16.mxu0 %v3395_v10  ;;  %v3434_v27 = vld [vmem:[#allocation13 + $0x450] sm:$0xff]  ;;  %v3437_v10 = vld [vmem:[#allocation13 + $0x468] sm:$0xff] }
 0x587   :  { %3822 = vmatpush1.bf16.msra.mxu1 %v3392_v11  ;;  %4080 = vmatpush1.bf16.msra.mxu0 %v3394_v12  ;;  %v3439_v11 = vld [vmem:[#allocation13 + $0x478] sm:$0xff]  ;;  %v3436_v12 = vld [vmem:[#allocation13 + $0x460] sm:$0xff] }
 0x588   :  { %3823 = vmatprep.subr.bf16.mxu1 %v3397_v13  ;;  %4081 = vmatprep.subr.bf16.mxu0 %v3399_v14  ;;  %v3438_v13 = vld [vmem:[#allocation13 + $0x470] sm:$0xff]  ;;  %v3441_v14 = vld [vmem:[#allocation13 + $0x488] sm:$0xff] }
 0x58b   :  { %3824 = vmatpush1.bf16.msra.mxu1 %v3396_v15  ;;  %4082 = vmatpush1.bf16.msra.mxu0 %v3398_v16  ;;  %v3443_v15 = vld [vmem:[#allocation13 + $0x498] sm:$0xff]  ;;  %v3440_v16 = vld [vmem:[#allocation13 + $0x480] sm:$0xff] }
 0x58c   :  { %3825 = vmatprep.subr.bf16.mxu1 %v3401_v63  ;;  %4083 = vmatprep.subr.bf16.mxu0 %v3403_v41  ;;  %v3442_v63 = vld [vmem:[#allocation13 + $0x490] sm:$0xff]  ;;  %v3445_v41 = vld [vmem:[#allocation13 + $0x4a8] sm:$0xff] }
 0x58f   :  { %3826 = vmatpush1.bf16.msra.mxu1 %v3400_v17  ;;  %4084 = vmatpush1.bf16.msra.mxu0 %v3402_v18  ;;  %v3447_v17 = vld [vmem:[#allocation13 + $0x4b8] sm:$0xff]  ;;  %v3444_v18 = vld [vmem:[#allocation13 + $0x4a0] sm:$0xff] }
 0x590   :  { %3827 = vmatprep.subr.bf16.mxu1 %v3405_v19  ;;  %4085 = vmatprep.subr.bf16.mxu0 %v3407_v24  ;;  %v3446_v19 = vld [vmem:[#allocation13 + $0x4b0] sm:$0xff]  ;;  %v3449_v24 = vld [vmem:[#allocation13 + $0x4c8] sm:$0xff] }
 0x593   :  { %3828 = vmatpush1.bf16.msra.mxu1 %v3404_v25  ;;  %4086 = vmatpush1.bf16.msra.mxu0 %v3406_v6  ;;  %v3451_v25 = vld [vmem:[#allocation13 + $0x4d8] sm:$0xff]  ;;  %v3448_v6 = vld [vmem:[#allocation13 + $0x4c0] sm:$0xff] }
 0x594   :  { %3829 = vmatprep.subr.bf16.mxu1 %v3409_v29  ;;  %4087 = vmatprep.subr.bf16.mxu0 %v3411_v32  ;;  %v3450_v29 = vld [vmem:[#allocation13 + $0x4d0] sm:$0xff]  ;;  %v3453_v32 = vld [vmem:[#allocation13 + $0x4e8] sm:$0xff] }
 0x597   :  { %3830 = vmatpush1.bf16.msra.mxu1 %v3408_v33  ;;  %4088 = vmatpush1.bf16.msra.mxu0 %v3410_v34  ;;  %v3455_v33 = vld [vmem:[#allocation13 + $0x4f8] sm:$0xff]  ;;  %v3452_v34 = vld [vmem:[#allocation13 + $0x4e0] sm:$0xff] }
 0x598   :  { %3831 = vmatprep.subr.bf16.mxu1 %v3413_v31  ;;  %4089 = vmatprep.subr.bf16.mxu0 %v3415_v35  ;;  %v3454_v31 = vld [vmem:[#allocation13 + $0x4f0] sm:$0xff]  ;;  %v3457_v35 = vld [vmem:[#allocation13 + $0x508] sm:$0xff] }
 0x59b   :  { %3832 = vmatpush1.bf16.msra.mxu1 %v3412_v39  ;;  %4090 = vmatpush1.bf16.msra.mxu0 %v3414_v28  ;;  %v3461_v39 = vld [vmem:[#allocation13 + $0x528] sm:$0xff]  ;;  %v3463_v28 = vld [vmem:[#allocation13 + $0x538] sm:$0xff] }
 0x59c   :  { %3833 = vmatprep.subr.bf16.mxu1 %v3417_v46  ;;  %4091 = vmatprep.subr.bf16.mxu0 %v3419_v47  ;;  %v3462_v46 = vld [vmem:[#allocation13 + $0x530] sm:$0xff]  ;;  %v3465_v47 = vld [vmem:[#allocation13 + $0x548] sm:$0xff] }
 0x59f   :  { %3834 = vmatpush1.bf16.msra.mxu1 %v3416_v50  ;;  %4092 = vmatpush1.bf16.msra.mxu0 %v3418_v51  ;;  %v3464_v50 = vld [vmem:[#allocation13 + $0x540] sm:$0xff]  ;;  %v3466_v51 = vld [vmem:[#allocation13 + $0x550] sm:$0xff] }
 0x5a0   :  { %3835 = vmatprep.subr.bf16.mxu1 %v3421_v52  ;;  %4093 = vmatprep.subr.bf16.mxu0 %v3423_v54  ;;  %v3469_v52 = vld [vmem:[#allocation13 + $0x568] sm:$0xff]  ;;  %v3471_v54 = vld [vmem:[#allocation13 + $0x578] sm:$0xff] }
 0x5a3   :  { %3836 = vmatpush1.bf16.msra.mxu1 %v3420_v58  ;;  %4094 = vmatpush1.bf16.msra.mxu0 %v3422_v59  ;;  %v3475_v58 = vld [vmem:[#allocation13 + $0x598] sm:$0xff]  ;;  %v3472_v59 = vld [vmem:[#allocation13 + $0x580] sm:$0xff] }
 0x5a4   :  { %3848 = vmatprep.subr.bf16.mxu1 %v3425_v60  ;;  %4106 = vmatprep.subr.bf16.mxu0 %v3427_v61  ;;  %v3474_v60 = vld [vmem:[#allocation13 + $0x590] sm:$0xff]  ;;  %v3477_v61 = vld [vmem:[#allocation13 + $0x5a8] sm:$0xff] }
 0x5a6   :  { %3838 = vmatmul.mubr.bf16.vlgmr.msra.gmra.mrb[24].mxu1 %v6150_v1  ;;  %4096 = vmatmul.mubr.bf16.vlgmr.msra.gmra.mrb[12].mxu0 %v6150_v1  ;;  %v3242_v1 = vld [vmem:[#allocation3 + $0x20] sm:$0x3f] }
 0x5a7   :  { %3849 = vmatpush1.bf16.msra.mxu1 %v3424_v23  ;;  %4107 = vmatpush1.bf16.msra.mxu0 %v3426_v40  ;;  %v3243_v23 = vld [vmem:[#allocation3 + $0x28] sm:$0x3f] }
 0x5a8   :  { %3850 = vmatprep.subr.bf16.mxu1 %v3429_v4  ;;  %4108 = vmatprep.subr.bf16.mxu0 %v3431_v5  ;;  %v6243_v40 = vpack.c.bf16 %v3243_v23, %v3242_v1  ;;  %v3476_v4 = vld [vmem:[#allocation13 + $0x5a0] sm:$0xff]  ;;  %v3478_v5 = vld [vmem:[#allocation13 + $0x5b0] sm:$0xff]  ;;  %v3523_v1 = vld [vmem:[#allocation13 + $0x718] sm:$0xff] }
 0x5a9   :  { %3880 = vmatprep.mubr.bf16.mxu1 %v6153_v7  ;;  %4138 = vmatprep.mubr.bf16.mxu0 %v6153_v7  ;;  %v3520_v23 = vld [vmem:[#allocation13 + $0x700] sm:$0xff] }
 0x5aa   :  { %v3268_v7 = vrot.slane %v6243_v40, 6  ;;  %v3522_v40 = vld [vmem:[#allocation13 + $0x710] sm:$0xff] }
 0x5ab   :  { %3851 = vmatpush1.bf16.msra.mxu1 %v3428_v3  ;;  %4109 = vmatpush1.bf16.msra.mxu0 %v3430_v20  ;;  %v3481_v3 = vld [vmem:[#allocation13 + $0x5c8] sm:$0xff]  ;;  %v3483_v20 = vld [vmem:[#allocation13 + $0x5d8] sm:$0xff] }
 0x5ac   :  { %3852 = vmatprep.subr.bf16.mxu1 %v3433_v9  ;;  %4110 = vmatprep.subr.bf16.mxu0 %v3435_v8  ;;  %v3274_v9 = vrot.slane %v3268_v7, 4  ;;  %v3480_v8 = vld [vmem:[#allocation13 + $0x5c0] sm:$0xff] }
 0x5ae   :  { %3282 = vst [vmem:[#allocation9 + $0x50] sm:$0x11] %v3274_v9  ;;  %v3531_v9 = vld [vmem:[#allocation13 + $0x758] sm:$0xff] }
 0x5af   :  { %3853 = vmatpush1.bf16.msra.mxu1 %v3432_v30  ;;  %4111 = vmatpush1.bf16.msra.mxu0 %v3434_v27  ;;  %v3482_v30 = vld [vmem:[#allocation13 + $0x5d0] sm:$0xff]  ;;  %v3485_v27 = vld [vmem:[#allocation13 + $0x5e8] sm:$0xff] }
 0x5b0   :  { %3854 = vmatprep.subr.bf16.mxu1 %v3437_v10  ;;  %4112 = vmatprep.subr.bf16.mxu0 %v3439_v11  ;;  %v3487_v10 = vld [vmem:[#allocation13 + $0x5f8] sm:$0xff]  ;;  %v3238_v11 = vld [vmem:[#allocation3] sm:$0xf0] }
 0x5b3   :  { %3855 = vmatpush1.bf16.msra.mxu1 %v3436_v12  ;;  %4113 = vmatpush1.bf16.msra.mxu0 %v3438_v13  ;;  %v3239_v12 = vld [vmem:[#allocation3 + $0x8] sm:$0xf0] }
 0x5b4   :  { %3856 = vmatprep.subr.bf16.mxu1 %v3441_v14  ;;  %4114 = vmatprep.subr.bf16.mxu0 %v3443_v15  ;;  %v6241_v13 = vpack.c.bf16 %v3239_v12, %v3238_v11  ;;  %v3484_v14 = vld [vmem:[#allocation13 + $0x5e0] sm:$0xff]  ;;  %v3486_v15 = vld [vmem:[#allocation13 + $0x5f0] sm:$0xff] }
 0x5b5   :  { %v3532_v11 = vld [vmem:[#allocation13 + $0x760] sm:$0xff]  ;;  %v3534_v12 = vld [vmem:[#allocation13 + $0x770] sm:$0xff] }
 0x5b7   :  { %3857 = vmatpush1.bf16.msra.mxu1 %v3440_v16  ;;  %4115 = vmatpush1.bf16.msra.mxu0 %v3442_v63  ;;  %v3489_v16 = vld [vmem:[#allocation13 + $0x608] sm:$0xff]  ;;  %v3491_v63 = vld [vmem:[#allocation13 + $0x618] sm:$0xff] }
 0x5b8   :  { %3858 = vmatprep.subr.bf16.mxu1 %v3445_v41  ;;  %4116 = vmatprep.subr.bf16.mxu0 %v3447_v17  ;;  %v6146_v41 = vrot.slane %v6241_v13, 10  ;;  %v6152_v17 = vcombine.low %v7800_v53, %v7804_v2  ;;  %v3492_v53 = vld [vmem:[#allocation13 + $0x620] sm:$0xff]  ;;  %v3494_v2 = vld [vmem:[#allocation13 + $0x630] sm:$0xff]  ;;  %v3537_v13 = vld [vmem:[#allocation13 + $0x788] sm:$0xff] }
 0x5bb   :  { %3859 = vmatpush1.bf16.msra.mxu1 %v3444_v18  ;;  %4117 = vmatpush1.bf16.msra.mxu0 %v3446_v19  ;;  %v7814_v18 = vld [vmem:[#allocation9 + $0x48] sm:$0x11]  ;;  %v7818_v19 = vsel %vm7731_vm5, %v6146_v41, %v3268_v7  ;;  %v3524_v7 = vld [vmem:[#allocation13 + $0x720] sm:$0xff] }
 0x5bc   :  { %3860 = vmatprep.subr.bf16.mxu1 %v3449_v24  ;;  %4118 = vmatprep.subr.bf16.mxu0 %v3451_v25  ;;  %v3488_v24 = vld [vmem:[#allocation13 + $0x600] sm:$0xff]  ;;  %v3490_v25 = vld [vmem:[#allocation13 + $0x610] sm:$0xff]  ;;  %v3541_v41 = vld [vmem:[#allocation13 + $0x7a8] sm:$0xff] }
 0x5bf   :  { %3861 = vmatpush1.bf16.msra.mxu1 %v3448_v6  ;;  %4119 = vmatpush1.bf16.msra.mxu0 %v3450_v29  ;;  %v3493_v6 = vld [vmem:[#allocation13 + $0x628] sm:$0xff]  ;;  %v3495_v29 = vld [vmem:[#allocation13 + $0x638] sm:$0xff] }
 0x5c0   :  { %3862 = vmatprep.subr.bf16.mxu1 %v3453_v32  ;;  %4120 = vmatprep.subr.bf16.mxu0 %v3455_v33  ;;  %v6155_v32 = vcombine.high %v7808_v42, %v7814_v18  ;;  %v3497_v33 = vld [vmem:[#allocation13 + $0x648] sm:$0xff] }
 0x5c3   :  { %3863 = vmatpush1.bf16.msra.mxu1 %v3452_v34  ;;  %4121 = vmatpush1.bf16.msra.mxu0 %v3454_v31  ;;  %v3499_v34 = vld [vmem:[#allocation13 + $0x658] sm:$0xff]  ;;  %v3496_v31 = vld [vmem:[#allocation13 + $0x640] sm:$0xff] }
 0x5c4   :  { %3864 = vmatprep.subr.bf16.mxu1 %v3457_v35  ;;  %4122 = vmatprep.subr.bf16.mxu0 %v3459_v36  ;;  %v3498_v35 = vld [vmem:[#allocation13 + $0x650] sm:$0xff]  ;;  %v3501_v36 = vld [vmem:[#allocation13 + $0x668] sm:$0xff] }
 0x5c7   :  { %3865 = vmatpush1.bf16.msra.mxu1 %v3456_v37  ;;  %4123 = vmatpush1.bf16.msra.mxu0 %v3458_v38  ;;  %v3503_v37 = vld [vmem:[#allocation13 + $0x678] sm:$0xff]  ;;  %v3500_v38 = vld [vmem:[#allocation13 + $0x660] sm:$0xff] }
 0x5c8   :  { %3866 = vmatprep.subr.bf16.mxu1 %v3461_v39  ;;  %4124 = vmatprep.subr.bf16.mxu0 %v3463_v28  ;;  %v3502_v39 = vld [vmem:[#allocation13 + $0x670] sm:$0xff]  ;;  %v3505_v28 = vld [vmem:[#allocation13 + $0x688] sm:$0xff] }
 0x5cb   :  { %3867 = vmatpush1.bf16.msra.mxu1 %v3460_v44  ;;  %4125 = vmatpush1.bf16.msra.mxu0 %v3462_v46  ;;  %v3507_v44 = vld [vmem:[#allocation13 + $0x698] sm:$0xff]  ;;  %v3504_v46 = vld [vmem:[#allocation13 + $0x680] sm:$0xff] }
 0x5cc   :  { %3868 = vmatprep.subr.bf16.mxu1 %v3465_v47  ;;  %4126 = vmatprep.subr.bf16.mxu0 %v3467_v49  ;;  %v3506_v47 = vld [vmem:[#allocation13 + $0x690] sm:$0xff]  ;;  %v3509_v49 = vld [vmem:[#allocation13 + $0x6a8] sm:$0xff] }
 0x5cf   :  { %3869 = vmatpush1.bf16.msra.mxu1 %v3464_v50  ;;  %4127 = vmatpush1.bf16.msra.mxu0 %v3466_v51  ;;  %v3511_v50 = vld [vmem:[#allocation13 + $0x6b8] sm:$0xff]  ;;  %v3508_v51 = vld [vmem:[#allocation13 + $0x6a0] sm:$0xff] }
 0x5d0   :  { %3870 = vmatprep.subr.bf16.mxu1 %v3469_v52  ;;  %4128 = vmatprep.subr.bf16.mxu0 %v3471_v54  ;;  %v3510_v52 = vld [vmem:[#allocation13 + $0x6b0] sm:$0xff]  ;;  %v3513_v54 = vld [vmem:[#allocation13 + $0x6c8] sm:$0xff] }
 0x5d3   :  { %3871 = vmatpush1.bf16.msra.mxu1 %v3468_v55  ;;  %4129 = vmatpush1.bf16.msra.mxu0 %v3470_v56  ;;  %v3515_v55 = vld [vmem:[#allocation13 + $0x6d8] sm:$0xff]  ;;  %v3512_v56 = vld [vmem:[#allocation13 + $0x6c0] sm:$0xff] }
 0x5d4   :  { %3872 = vmatprep.subr.bf16.mxu1 %v3473_v57  ;;  %4130 = vmatprep.subr.bf16.mxu0 %v3475_v58  ;;  %v3514_v57 = vld [vmem:[#allocation13 + $0x6d0] sm:$0xff]  ;;  %v3517_v58 = vld [vmem:[#allocation13 + $0x6e8] sm:$0xff] }
 0x5d7   :  { %3873 = vmatpush1.bf16.msra.mxu1 %v3472_v59  ;;  %4131 = vmatpush1.bf16.msra.mxu0 %v3474_v60  ;;  %v3519_v59 = vld [vmem:[#allocation13 + $0x6f8] sm:$0xff]  ;;  %v3516_v60 = vld [vmem:[#allocation13 + $0x6e0] sm:$0xff] }
 0x5d8   :  { %3874 = vmatprep.subr.bf16.mxu1 %v3477_v61  ;;  %4132 = vmatprep.subr.bf16.mxu0 %v3479_v62  ;;  %v3518_v61 = vld [vmem:[#allocation13 + $0x6f0] sm:$0xff]  ;;  %v3521_v62 = vld [vmem:[#allocation13 + $0x708] sm:$0xff] }
 0x5db   :  { %3875 = vmatpush1.bf16.msra.mxu1 %v3476_v4  ;;  %4133 = vmatpush1.bf16.msra.mxu0 %v3478_v5  ;;  %v3525_v4 = vld [vmem:[#allocation13 + $0x728] sm:$0xff]  ;;  %v3527_v5 = vld [vmem:[#allocation13 + $0x738] sm:$0xff] }
 0x5dc   :  { %3876 = vmatprep.subr.bf16.mxu1 %v3481_v3  ;;  %4134 = vmatprep.subr.bf16.mxu0 %v3483_v20  ;;  %v3526_v3 = vld [vmem:[#allocation13 + $0x730] sm:$0xff]  ;;  %v3529_v20 = vld [vmem:[#allocation13 + $0x748] sm:$0xff] }
 0x5df   :  { %3877 = vmatpush1.bf16.msra.mxu1 %v3480_v8  ;;  %4135 = vmatpush1.bf16.msra.mxu0 %v3482_v30  ;;  %v3528_v8 = vld [vmem:[#allocation13 + $0x740] sm:$0xff]  ;;  %v3530_v30 = vld [vmem:[#allocation13 + $0x750] sm:$0xff] }
 0x5e0   :  { %3878 = vmatprep.subr.bf16.mxu1 %v3485_v27  ;;  %4136 = vmatprep.subr.bf16.mxu0 %v3487_v10  ;;  %v3533_v27 = vld [vmem:[#allocation13 + $0x768] sm:$0xff]  ;;  %v3535_v10 = vld [vmem:[#allocation13 + $0x778] sm:$0xff] }
 0x5e3   :  { %3879 = vmatpush1.bf16.msra.mxu1 %v3484_v14  ;;  %4137 = vmatpush1.bf16.msra.mxu0 %v3486_v15  ;;  %v3539_v14 = vld [vmem:[#allocation13 + $0x798] sm:$0xff]  ;;  %v3536_v15 = vld [vmem:[#allocation13 + $0x780] sm:$0xff] }
 0x5e4   :  { %3891 = vmatprep.subr.bf16.mxu1 %v3489_v16  ;;  %4149 = vmatprep.subr.bf16.mxu0 %v3491_v63  ;;  %v3538_v16 = vld [vmem:[#allocation13 + $0x790] sm:$0xff]  ;;  %v3244_v63 = vld [vmem:[#allocation3 + $0x30] sm:$0x3f] }
 0x5e6   :  { %3881 = vmatmul.mubr.bf16.vlgmr.msra.gmra.mrb[24].mxu1 %v6152_v17  ;;  %4139 = vmatmul.mubr.bf16.vlgmr.msra.gmra.mrb[12].mxu0 %v6152_v17  ;;  %v3543_v17 = vld [vmem:[#allocation13 + $0x7b8] sm:$0xff] }
 0x5e7   :  { %3892 = vmatpush1.bf16.msra.mxu1 %v3488_v24  ;;  %4150 = vmatpush1.bf16.msra.mxu0 %v3490_v25  ;;  %v3245_v24 = vld [vmem:[#allocation3 + $0x38] sm:$0x3f] }
 0x5e8   :  { %3893 = vmatprep.subr.bf16.mxu1 %v3493_v6  ;;  %4151 = vmatprep.subr.bf16.mxu0 %v3495_v29  ;;  %v6244_v25 = vpack.c.bf16 %v3245_v24, %v3244_v63  ;;  %v3540_v6 = vld [vmem:[#allocation13 + $0x7a0] sm:$0xff]  ;;  %v3542_v29 = vld [vmem:[#allocation13 + $0x7b0] sm:$0xff] }
 0x5e9   :  { %3923 = vmatprep.mubr.bf16.mxu1 %v6155_v32  ;;  %4181 = vmatprep.mubr.bf16.mxu0 %v6155_v32  ;;  %v3582_v63 = vld [vmem:[#allocation13 + $0x8f0] sm:$0xff]  ;;  %v3584_v24 = vld [vmem:[#allocation13 + $0x900] sm:$0xff] }
 0x5ea   :  { %v3272_v32 = vrot.slane %v6244_v25, 6  ;;  %v3586_v25 = vld [vmem:[#allocation13 + $0x910] sm:$0xff] }
 0x5eb   :  { %3894 = vmatpush1.bf16.msra.mxu1 %v3492_v53  ;;  %4152 = vmatpush1.bf16.msra.mxu0 %v3494_v2  ;;  %v3545_v53 = vld [vmem:[#allocation13 + $0x7c8] sm:$0xff]  ;;  %v3547_v2 = vld [vmem:[#allocation13 + $0x7d8] sm:$0xff] }
 0x5ec   :  { %3895 = vmatprep.subr.bf16.mxu1 %v3497_v33  ;;  %4153 = vmatprep.subr.bf16.mxu0 %v3499_v34  ;;  %v3275_v33 = vrot.slane %v3272_v32, 4  ;;  %v3544_v34 = vld [vmem:[#allocation13 + $0x7c0] sm:$0xff] }
 0x5ee   :  { %3283 = vst [vmem:[#allocation9 + $0x58] sm:$0x11] %v3275_v33  ;;  %v3595_v33 = vld [vmem:[#allocation13 + $0x958] sm:$0xff] }
 0x5ef   :  { %3896 = vmatpush1.bf16.msra.mxu1 %v3496_v31  ;;  %4154 = vmatpush1.bf16.msra.mxu0 %v3498_v35  ;;  %v3546_v31 = vld [vmem:[#allocation13 + $0x7d0] sm:$0xff]  ;;  %v3549_v35 = vld [vmem:[#allocation13 + $0x7e8] sm:$0xff] }
 0x5f0   :  { %3897 = vmatprep.subr.bf16.mxu1 %v3501_v36  ;;  %4155 = vmatprep.subr.bf16.mxu0 %v3503_v37  ;;  %v3551_v36 = vld [vmem:[#allocation13 + $0x7f8] sm:$0xff]  ;;  %v3240_v37 = vld [vmem:[#allocation3 + $0x10] sm:$0xf0] }
 0x5f3   :  { %3898 = vmatpush1.bf16.msra.mxu1 %v3500_v38  ;;  %4156 = vmatpush1.bf16.msra.mxu0 %v3502_v39  ;;  %v3241_v38 = vld [vmem:[#allocation3 + $0x18] sm:$0xf0] }
 0x5f4   :  { %3899 = vmatprep.subr.bf16.mxu1 %v3505_v28  ;;  %4157 = vmatprep.subr.bf16.mxu0 %v3507_v44  ;;  %v6242_v39 = vpack.c.bf16 %v3241_v38, %v3240_v37  ;;  %v3548_v28 = vld [vmem:[#allocation13 + $0x7e0] sm:$0xff]  ;;  %v3550_v44 = vld [vmem:[#allocation13 + $0x7f0] sm:$0xff] }
 0x5f5   :  { %v3596_v37 = vld [vmem:[#allocation13 + $0x960] sm:$0xff]  ;;  %v3598_v38 = vld [vmem:[#allocation13 + $0x970] sm:$0xff] }
 0x5f7   :  { %3900 = vmatpush1.bf16.msra.mxu1 %v3504_v46  ;;  %4158 = vmatpush1.bf16.msra.mxu0 %v3506_v47  ;;  %v6147_v46 = vrot.slane %v6242_v39, 10  ;;  %v3553_v47 = vld [vmem:[#allocation13 + $0x808] sm:$0xff] }
 0x5f8   :  { %3901 = vmatprep.subr.bf16.mxu1 %v3509_v49  ;;  %4159 = vmatprep.subr.bf16.mxu0 %v3511_v50  ;;  %v3555_v49 = vld [vmem:[#allocation13 + $0x818] sm:$0xff]  ;;  %v6154_v50 = vcombine.low %v7808_v42, %v7814_v18  ;;  %v3556_v42 = vld [vmem:[#allocation13 + $0x820] sm:$0xff]  ;;  %v3558_v18 = vld [vmem:[#allocation13 + $0x830] sm:$0xff] }
 0x5f9   :  { %v3601_v39 = vld [vmem:[#allocation13 + $0x988] sm:$0xff] }
 0x5fb   :  { %3902 = vmatpush1.bf16.msra.mxu1 %v3508_v51  ;;  %4160 = vmatpush1.bf16.msra.mxu0 %v3510_v52  ;;  %v7824_v51 = vld [vmem:[#allocation9 + $0x50] sm:$0x11]  ;;  %v7828_v52 = vsel %vm7731_vm5, %v6147_v46, %v3272_v32  ;;  %v3588_v32 = vld [vmem:[#allocation13 + $0x920] sm:$0xff] }
 0x5fc   :  { %3903 = vmatprep.subr.bf16.mxu1 %v3513_v54  ;;  %4161 = vmatprep.subr.bf16.mxu0 %v3515_v55  ;;  %v3552_v54 = vld [vmem:[#allocation13 + $0x800] sm:$0xff]  ;;  %v3554_v55 = vld [vmem:[#allocation13 + $0x810] sm:$0xff] }
 0x5fd   :  { %v3602_v46 = vld [vmem:[#allocation13 + $0x990] sm:$0xff] }
 0x5ff   :  { %3904 = vmatpush1.bf16.msra.mxu1 %v3512_v56  ;;  %4162 = vmatpush1.bf16.msra.mxu0 %v3514_v57  ;;  %v3557_v56 = vld [vmem:[#allocation13 + $0x828] sm:$0xff]  ;;  %v3559_v57 = vld [vmem:[#allocation13 + $0x838] sm:$0xff] }
 0x600   :  { %3905 = vmatprep.subr.bf16.mxu1 %v3517_v58  ;;  %4163 = vmatprep.subr.bf16.mxu0 %v3519_v59  ;;  %v6157_v58 = vcombine.high %v7818_v19, %v7824_v51  ;;  %v3561_v59 = vld [vmem:[#allocation13 + $0x848] sm:$0xff] }
 0x603   :  { %3906 = vmatpush1.bf16.msra.mxu1 %v3516_v60  ;;  %4164 = vmatpush1.bf16.msra.mxu0 %v3518_v61  ;;  %v3563_v60 = vld [vmem:[#allocation13 + $0x858] sm:$0xff]  ;;  %v3560_v61 = vld [vmem:[#allocation13 + $0x840] sm:$0xff] }
 0x604   :  { %3907 = vmatprep.subr.bf16.mxu1 %v3521_v62  ;;  %4165 = vmatprep.subr.bf16.mxu0 %v3523_v1  ;;  %v3562_v62 = vld [vmem:[#allocation13 + $0x850] sm:$0xff]  ;;  %v3565_v1 = vld [vmem:[#allocation13 + $0x868] sm:$0xff] }
 0x607   :  { %3908 = vmatpush1.bf16.msra.mxu1 %v3520_v23  ;;  %4166 = vmatpush1.bf16.msra.mxu0 %v3522_v40  ;;  %v3567_v23 = vld [vmem:[#allocation13 + $0x878] sm:$0xff]  ;;  %v3564_v40 = vld [vmem:[#allocation13 + $0x860] sm:$0xff] }
 0x608   :  { %3909 = vmatprep.subr.bf16.mxu1 %v3525_v4  ;;  %4167 = vmatprep.subr.bf16.mxu0 %v3527_v5  ;;  %v3566_v4 = vld [vmem:[#allocation13 + $0x870] sm:$0xff]  ;;  %v3569_v5 = vld [vmem:[#allocation13 + $0x888] sm:$0xff] }
 0x60b   :  { %3910 = vmatpush1.bf16.msra.mxu1 %v3524_v7  ;;  %4168 = vmatpush1.bf16.msra.mxu0 %v3526_v3  ;;  %v3571_v7 = vld [vmem:[#allocation13 + $0x898] sm:$0xff]  ;;  %v3568_v3 = vld [vmem:[#allocation13 + $0x880] sm:$0xff] }
 0x60c   :  { %3911 = vmatprep.subr.bf16.mxu1 %v3529_v20  ;;  %4169 = vmatprep.subr.bf16.mxu0 %v3531_v9  ;;  %v3570_v20 = vld [vmem:[#allocation13 + $0x890] sm:$0xff]  ;;  %v3573_v9 = vld [vmem:[#allocation13 + $0x8a8] sm:$0xff] }
 0x60f   :  { %3912 = vmatpush1.bf16.msra.mxu1 %v3528_v8  ;;  %4170 = vmatpush1.bf16.msra.mxu0 %v3530_v30  ;;  %v3575_v8 = vld [vmem:[#allocation13 + $0x8b8] sm:$0xff]  ;;  %v3572_v30 = vld [vmem:[#allocation13 + $0x8a0] sm:$0xff] }
 0x610   :  { %3913 = vmatprep.subr.bf16.mxu1 %v3533_v27  ;;  %4171 = vmatprep.subr.bf16.mxu0 %v3535_v10  ;;  %v3574_v27 = vld [vmem:[#allocation13 + $0x8b0] sm:$0xff]  ;;  %v3577_v10 = vld [vmem:[#allocation13 + $0x8c8] sm:$0xff] }
 0x613   :  { %3914 = vmatpush1.bf16.msra.mxu1 %v3532_v11  ;;  %4172 = vmatpush1.bf16.msra.mxu0 %v3534_v12  ;;  %v3579_v11 = vld [vmem:[#allocation13 + $0x8d8] sm:$0xff]  ;;  %v3576_v12 = vld [vmem:[#allocation13 + $0x8c0] sm:$0xff] }
 0x614   :  { %3915 = vmatprep.subr.bf16.mxu1 %v3537_v13  ;;  %4173 = vmatprep.subr.bf16.mxu0 %v3539_v14  ;;  %v3578_v13 = vld [vmem:[#allocation13 + $0x8d0] sm:$0xff]  ;;  %v3581_v14 = vld [vmem:[#allocation13 + $0x8e8] sm:$0xff] }
 0x617   :  { %3916 = vmatpush1.bf16.msra.mxu1 %v3536_v15  ;;  %4174 = vmatpush1.bf16.msra.mxu0 %v3538_v16  ;;  %v3583_v15 = vld [vmem:[#allocation13 + $0x8f8] sm:$0xff]  ;;  %v3580_v16 = vld [vmem:[#allocation13 + $0x8e0] sm:$0xff] }
 0x618   :  { %3917 = vmatprep.subr.bf16.mxu1 %v3541_v41  ;;  %4175 = vmatprep.subr.bf16.mxu0 %v3543_v17  ;;  %v3585_v41 = vld [vmem:[#allocation13 + $0x908] sm:$0xff]  ;;  %v3587_v17 = vld [vmem:[#allocation13 + $0x918] sm:$0xff] }
 0x61b   :  { %3918 = vmatpush1.bf16.msra.mxu1 %v3540_v6  ;;  %4176 = vmatpush1.bf16.msra.mxu0 %v3542_v29  ;;  %v3589_v6 = vld [vmem:[#allocation13 + $0x928] sm:$0xff]  ;;  %v3591_v29 = vld [vmem:[#allocation13 + $0x938] sm:$0xff] }
 0x61c   :  { %3919 = vmatprep.subr.bf16.mxu1 %v3545_v53  ;;  %4177 = vmatprep.subr.bf16.mxu0 %v3547_v2  ;;  %v3590_v53 = vld [vmem:[#allocation13 + $0x930] sm:$0xff]  ;;  %v3593_v2 = vld [vmem:[#allocation13 + $0x948] sm:$0xff] }
 0x61f   :  { %3920 = vmatpush1.bf16.msra.mxu1 %v3544_v34  ;;  %4178 = vmatpush1.bf16.msra.mxu0 %v3546_v31  ;;  %v3592_v34 = vld [vmem:[#allocation13 + $0x940] sm:$0xff]  ;;  %v3594_v31 = vld [vmem:[#allocation13 + $0x950] sm:$0xff] }
 0x620   :  { %3921 = vmatprep.subr.bf16.mxu1 %v3549_v35  ;;  %4179 = vmatprep.subr.bf16.mxu0 %v3551_v36  ;;  %v3597_v35 = vld [vmem:[#allocation13 + $0x968] sm:$0xff]  ;;  %v3599_v36 = vld [vmem:[#allocation13 + $0x978] sm:$0xff] }
 0x623   :  { %3922 = vmatpush1.bf16.msra.mxu1 %v3548_v28  ;;  %4180 = vmatpush1.bf16.msra.mxu0 %v3550_v44  ;;  %v3603_v28 = vld [vmem:[#allocation13 + $0x998] sm:$0xff]  ;;  %v3600_v44 = vld [vmem:[#allocation13 + $0x980] sm:$0xff] }
 0x624   :  { %3934 = vmatprep.subr.bf16.mxu1 %v3553_v47  ;;  %4192 = vmatprep.subr.bf16.mxu0 %v3555_v49  ;;  %v3605_v47 = vld [vmem:[#allocation13 + $0x9a8] sm:$0xff]  ;;  %v3607_v49 = vld [vmem:[#allocation13 + $0x9b8] sm:$0xff] }
 0x626   :  { %3924 = vmatmul.mubr.bf16.vlgmr.msra.gmra.mrb[24].mxu1 %v6154_v50  ;;  %4182 = vmatmul.mubr.bf16.vlgmr.msra.gmra.mrb[12].mxu0 %v6154_v50  ;;  %v3604_v50 = vld [vmem:[#allocation13 + $0x9a0] sm:$0xff] }
 0x627   :  { %3935 = vmatpush1.bf16.msra.mxu1 %v3552_v54  ;;  %4193 = vmatpush1.bf16.msra.mxu0 %v3554_v55  ;;  %v3606_v54 = vld [vmem:[#allocation13 + $0x9b0] sm:$0xff]  ;;  %v3609_v55 = vld [vmem:[#allocation13 + $0x9c8] sm:$0xff] }
 0x628   :  { %3936 = vmatprep.subr.bf16.mxu1 %v3557_v56  ;;  %4194 = vmatprep.subr.bf16.mxu0 %v3559_v57  ;;  %v3611_v56 = vld [vmem:[#allocation13 + $0x9d8] sm:$0xff]  ;;  %v3608_v57 = vld [vmem:[#allocation13 + $0x9c0] sm:$0xff] }
 0x629   :  { %3966 = vmatprep.mubr.bf16.mxu1 %v6157_v58  ;;  %4224 = vmatprep.mubr.bf16.mxu0 %v6157_v58  ;;  %v3610_v58 = vld [vmem:[#allocation13 + $0x9d0] sm:$0xff] }
 0x62b   :  { %3937 = vmatpush1.bf16.msra.mxu1 %v3556_v42  ;;  %4195 = vmatpush1.bf16.msra.mxu0 %v3558_v18  ;;  %v3613_v42 = vld [vmem:[#allocation13 + $0x9e8] sm:$0xff]  ;;  %v3615_v18 = vld [vmem:[#allocation13 + $0x9f8] sm:$0xff] }
 0x62c   :  { %3938 = vmatprep.subr.bf16.mxu1 %v3561_v59  ;;  %4196 = vmatprep.subr.bf16.mxu0 %v3563_v60  ;;  %v3612_v59 = vld [vmem:[#allocation13 + $0x9e0] sm:$0xff]  ;;  %v3614_v60 = vld [vmem:[#allocation13 + $0x9f0] sm:$0xff] }
 0x62f   :  { %3939 = vmatpush1.bf16.msra.mxu1 %v3560_v61  ;;  %4197 = vmatpush1.bf16.msra.mxu0 %v3562_v62  ;;  %v3617_v61 = vld [vmem:[#allocation13 + $0xa08] sm:$0xff]  ;;  %v3619_v62 = vld [vmem:[#allocation13 + $0xa18] sm:$0xff] }
 0x630   :  { %3940 = vmatprep.subr.bf16.mxu1 %v3565_v1  ;;  %4198 = vmatprep.subr.bf16.mxu0 %v3567_v23  ;;  %v6156_v1 = vcombine.low %v7818_v19, %v7824_v51  ;;  %v7834_v23 = vld [vmem:[#allocation9 + $0x58] sm:$0x11]  ;;  %v3622_v51 = vld [vmem:[#allocation13 + $0xa30] sm:$0xff] }
 0x631   :  { %v3620_v19 = vld [vmem:[#allocation13 + $0xa20] sm:$0xff] }
 0x633   :  { %3941 = vmatpush1.bf16.msra.mxu1 %v3564_v40  ;;  %4199 = vmatpush1.bf16.msra.mxu0 %v3566_v4  ;;  %v3616_v40 = vld [vmem:[#allocation13 + $0xa00] sm:$0xff]  ;;  %v3618_v4 = vld [vmem:[#allocation13 + $0xa10] sm:$0xff] }
 0x634   :  { %3942 = vmatprep.subr.bf16.mxu1 %v3569_v5  ;;  %4200 = vmatprep.subr.bf16.mxu0 %v3571_v7  ;;  %v3621_v5 = vld [vmem:[#allocation13 + $0xa28] sm:$0xff]  ;;  %v3623_v7 = vld [vmem:[#allocation13 + $0xa38] sm:$0xff] }
 0x637   :  { %3943 = vmatpush1.bf16.msra.mxu1 %v3568_v3  ;;  %4201 = vmatpush1.bf16.msra.mxu0 %v3570_v20  ;;  %v6159_v3 = vcombine.high %v7828_v52, %v7834_v23  ;;  %v3625_v20 = vld [vmem:[#allocation13 + $0xa48] sm:$0xff] }
 0x638   :  { %3944 = vmatprep.subr.bf16.mxu1 %v3573_v9  ;;  %4202 = vmatprep.subr.bf16.mxu0 %v3575_v8  ;;  %v3627_v9 = vld [vmem:[#allocation13 + $0xa58] sm:$0xff]  ;;  %v3624_v8 = vld [vmem:[#allocation13 + $0xa40] sm:$0xff] }
 0x63b   :  { %3945 = vmatpush1.bf16.msra.mxu1 %v3572_v30  ;;  %4203 = vmatpush1.bf16.msra.mxu0 %v3574_v27  ;;  %v3626_v30 = vld [vmem:[#allocation13 + $0xa50] sm:$0xff]  ;;  %v3629_v27 = vld [vmem:[#allocation13 + $0xa68] sm:$0xff] }
 0x63c   :  { %3946 = vmatprep.subr.bf16.mxu1 %v3577_v10  ;;  %4204 = vmatprep.subr.bf16.mxu0 %v3579_v11  ;;  %v3631_v10 = vld [vmem:[#allocation13 + $0xa78] sm:$0xff]  ;;  %v3628_v11 = vld [vmem:[#allocation13 + $0xa60] sm:$0xff] }
 0x63f   :  { %3947 = vmatpush1.bf16.msra.mxu1 %v3576_v12  ;;  %4205 = vmatpush1.bf16.msra.mxu0 %v3578_v13  ;;  %v3630_v12 = vld [vmem:[#allocation13 + $0xa70] sm:$0xff]  ;;  %v3633_v13 = vld [vmem:[#allocation13 + $0xa88] sm:$0xff] }
 0x640   :  { %3948 = vmatprep.subr.bf16.mxu1 %v3581_v14  ;;  %4206 = vmatprep.subr.bf16.mxu0 %v3583_v15  ;;  %v3635_v14 = vld [vmem:[#allocation13 + $0xa98] sm:$0xff]  ;;  %v3632_v15 = vld [vmem:[#allocation13 + $0xa80] sm:$0xff] }
 0x643   :  { %3949 = vmatpush1.bf16.msra.mxu1 %v3580_v16  ;;  %4207 = vmatpush1.bf16.msra.mxu0 %v3582_v63  ;;  %v3634_v16 = vld [vmem:[#allocation13 + $0xa90] sm:$0xff]  ;;  %v3637_v63 = vld [vmem:[#allocation13 + $0xaa8] sm:$0xff] }
 0x644   :  { %3950 = vmatprep.subr.bf16.mxu1 %v3585_v41  ;;  %4208 = vmatprep.subr.bf16.mxu0 %v3587_v17  ;;  %v3639_v41 = vld [vmem:[#allocation13 + $0xab8] sm:$0xff]  ;;  %v3636_v17 = vld [vmem:[#allocation13 + $0xaa0] sm:$0xff] }
 0x647   :  { %3951 = vmatpush1.bf16.msra.mxu1 %v3584_v24  ;;  %4209 = vmatpush1.bf16.msra.mxu0 %v3586_v25  ;;  %v3638_v24 = vld [vmem:[#allocation13 + $0xab0] sm:$0xff]  ;;  %v3641_v25 = vld [vmem:[#allocation13 + $0xac8] sm:$0xff] }
 0x648   :  { %3952 = vmatprep.subr.bf16.mxu1 %v3589_v6  ;;  %4210 = vmatprep.subr.bf16.mxu0 %v3591_v29  ;;  %v3643_v6 = vld [vmem:[#allocation13 + $0xad8] sm:$0xff]  ;;  %v3640_v29 = vld [vmem:[#allocation13 + $0xac0] sm:$0xff] }
 0x64b   :  { %3953 = vmatpush1.bf16.msra.mxu1 %v3588_v32  ;;  %4211 = vmatpush1.bf16.msra.mxu0 %v3590_v53  ;;  %v3642_v32 = vld [vmem:[#allocation13 + $0xad0] sm:$0xff]  ;;  %v3645_v53 = vld [vmem:[#allocation13 + $0xae8] sm:$0xff] }
 0x64c   :  { %3954 = vmatprep.subr.bf16.mxu1 %v3593_v2  ;;  %4212 = vmatprep.subr.bf16.mxu0 %v3595_v33  ;;  %v3647_v2 = vld [vmem:[#allocation13 + $0xaf8] sm:$0xff]  ;;  %v3644_v33 = vld [vmem:[#allocation13 + $0xae0] sm:$0xff] }
 0x64f   :  { %3955 = vmatpush1.bf16.msra.mxu1 %v3592_v34  ;;  %4213 = vmatpush1.bf16.msra.mxu0 %v3594_v31  ;;  %v3646_v34 = vld [vmem:[#allocation13 + $0xaf0] sm:$0xff]  ;;  %v3649_v31 = vld [vmem:[#allocation13 + $0xb08] sm:$0xff] }
 0x650   :  { %3956 = vmatprep.subr.bf16.mxu1 %v3597_v35  ;;  %4214 = vmatprep.subr.bf16.mxu0 %v3599_v36  ;;  %v3651_v35 = vld [vmem:[#allocation13 + $0xb18] sm:$0xff]  ;;  %v3648_v36 = vld [vmem:[#allocation13 + $0xb00] sm:$0xff] }
 0x653   :  { %3957 = vmatpush1.bf16.msra.mxu1 %v3596_v37  ;;  %4215 = vmatpush1.bf16.msra.mxu0 %v3598_v38  ;;  %v3650_v37 = vld [vmem:[#allocation13 + $0xb10] sm:$0xff]  ;;  %v3653_v38 = vld [vmem:[#allocation13 + $0xb28] sm:$0xff] }
 0x654   :  { %3958 = vmatprep.subr.bf16.mxu1 %v3601_v39  ;;  %4216 = vmatprep.subr.bf16.mxu0 %v3603_v28  ;;  %v3655_v39 = vld [vmem:[#allocation13 + $0xb38] sm:$0xff]  ;;  %v3652_v28 = vld [vmem:[#allocation13 + $0xb20] sm:$0xff] }
 0x657   :  { %3959 = vmatpush1.bf16.msra.mxu1 %v3600_v44  ;;  %4217 = vmatpush1.bf16.msra.mxu0 %v3602_v46  ;;  %v3654_v44 = vld [vmem:[#allocation13 + $0xb30] sm:$0xff]  ;;  %v3657_v46 = vld [vmem:[#allocation13 + $0xb48] sm:$0xff] }
 0x658   :  { %3960 = vmatprep.subr.bf16.mxu1 %v3605_v47  ;;  %4218 = vmatprep.subr.bf16.mxu0 %v3607_v49  ;;  %v3659_v47 = vld [vmem:[#allocation13 + $0xb58] sm:$0xff]  ;;  %v3656_v49 = vld [vmem:[#allocation13 + $0xb40] sm:$0xff] }
 0x65b   :  { %3961 = vmatpush1.bf16.msra.mxu1 %v3604_v50  ;;  %4219 = vmatpush1.bf16.msra.mxu0 %v3606_v54  ;;  %v3658_v50 = vld [vmem:[#allocation13 + $0xb50] sm:$0xff]  ;;  %v3661_v54 = vld [vmem:[#allocation13 + $0xb68] sm:$0xff] }
 0x65c   :  { %3962 = vmatprep.subr.bf16.mxu1 %v3609_v55  ;;  %4220 = vmatprep.subr.bf16.mxu0 %v3611_v56  ;;  %v3663_v55 = vld [vmem:[#allocation13 + $0xb78] sm:$0xff]  ;;  %v3660_v56 = vld [vmem:[#allocation13 + $0xb60] sm:$0xff] }
 0x65f   :  { %3963 = vmatpush1.bf16.msra.mxu1 %v3608_v57  ;;  %4221 = vmatpush1.bf16.msra.mxu0 %v3610_v58  ;;  %v3662_v57 = vld [vmem:[#allocation13 + $0xb70] sm:$0xff]  ;;  %v3665_v58 = vld [vmem:[#allocation13 + $0xb88] sm:$0xff] }
 0x660   :  { %3964 = vmatprep.subr.bf16.mxu1 %v3613_v42  ;;  %4222 = vmatprep.subr.bf16.mxu0 %v3615_v18  ;;  %v3667_v42 = vld [vmem:[#allocation13 + $0xb98] sm:$0xff]  ;;  %v3664_v18 = vld [vmem:[#allocation13 + $0xb80] sm:$0xff] }
 0x663   :  { %3965 = vmatpush1.bf16.msra.mxu1 %v3612_v59  ;;  %4223 = vmatpush1.bf16.msra.mxu0 %v3614_v60  ;;  %v3666_v59 = vld [vmem:[#allocation13 + $0xb90] sm:$0xff]  ;;  %v3669_v60 = vld [vmem:[#allocation13 + $0xba8] sm:$0xff] }
 0x664   :  { %3977 = vmatprep.subr.bf16.mxu1 %v3617_v61  ;;  %4235 = vmatprep.subr.bf16.mxu0 %v3619_v62  ;;  %v3671_v61 = vld [vmem:[#allocation13 + $0xbb8] sm:$0xff]  ;;  %v3668_v62 = vld [vmem:[#allocation13 + $0xba0] sm:$0xff] }
 0x666   :  { %3967 = vmatmul.mubr.bf16.vlgmr.msra.gmra.mrb[24].mxu1 %v6156_v1  ;;  %4225 = vmatmul.mubr.bf16.vlgmr.msra.gmra.mrb[12].mxu0 %v6156_v1  ;;  %v3670_v1 = vld [vmem:[#allocation13 + $0xbb0] sm:$0xff] }
 0x667   :  { %3978 = vmatpush1.bf16.msra.mxu1 %v3616_v40  ;;  %4236 = vmatpush1.bf16.msra.mxu0 %v3618_v4  ;;  %v3673_v40 = vld [vmem:[#allocation13 + $0xbc8] sm:$0xff]  ;;  %v3675_v4 = vld [vmem:[#allocation13 + $0xbd8] sm:$0xff] }
 0x668   :  { %3979 = vmatprep.subr.bf16.mxu1 %v3621_v5  ;;  %4237 = vmatprep.subr.bf16.mxu0 %v3623_v7  ;;  %v3672_v5 = vld [vmem:[#allocation13 + $0xbc0] sm:$0xff]  ;;  %v3674_v7 = vld [vmem:[#allocation13 + $0xbd0] sm:$0xff] }
 0x669   :  { %4009 = vmatprep.mubr.bf16.mxu1 %v6159_v3  ;;  %4267 = vmatprep.mubr.bf16.mxu0 %v6159_v3  ;;  %v3677_v3 = vld [vmem:[#allocation13 + $0xbe8] sm:$0xff] }
 0x66b   :  { %3980 = vmatpush1.bf16.msra.mxu1 %v3620_v19  ;;  %4238 = vmatpush1.bf16.msra.mxu0 %v3622_v51  ;;  %v3679_v19 = vld [vmem:[#allocation13 + $0xbf8] sm:$0xff]  ;;  %v3676_v51 = vld [vmem:[#allocation13 + $0xbe0] sm:$0xff] }
 0x66c   :  { %3981 = vmatprep.subr.bf16.mxu1 %v3625_v20  ;;  %4239 = vmatprep.subr.bf16.mxu0 %v3627_v9  ;;  %v3678_v20 = vld [vmem:[#allocation13 + $0xbf0] sm:$0xff]  ;;  %v6158_v9 = vcombine.low %v7828_v52, %v7834_v23 }
 0x66f   :  { %3982 = vmatpush1.bf16.msra.mxu1 %v3624_v8  ;;  %4240 = vmatpush1.bf16.msra.mxu0 %v3626_v30  ;;  %v3680_v8 = vld [vmem:[#allocation22] sm:$0xf] }
 0x670   :  { %3983 = vmatprep.subr.bf16.mxu1 %v3629_v27  ;;  %4241 = vmatprep.subr.bf16.mxu0 %v3631_v10  ;;  %v3685_v30 = vrot.slane %v3680_v8, %v7695_v21  ;;  %v3693_v27 = vrot.slane %v3680_v8, %v7689_v45  ;;  %v3689_v10 = vrot.slane %v3680_v8, %v7698_v22 }
 0x673   :  { %3984 = vmatpush1.bf16.msra.mxu1 %v3628_v11  ;;  %4242 = vmatpush1.bf16.msra.mxu0 %v3630_v12  ;;  %v3697_v11 = vrot.slane %v3680_v8, %v2366_v26 }
 0x674   :  { %3985 = vmatprep.subr.bf16.mxu1 %v3633_v13  ;;  %4243 = vmatprep.subr.bf16.mxu0 %v3635_v14 }
 0x677   :  { %3986 = vmatpush1.bf16.msra.mxu1 %v3632_v15  ;;  %4244 = vmatpush1.bf16.msra.mxu0 %v3634_v16 }
 0x678   :  { %3987 = vmatprep.subr.bf16.mxu1 %v3637_v63  ;;  %4245 = vmatprep.subr.bf16.mxu0 %v3639_v41 }
 0x67b   :  { %3988 = vmatpush1.bf16.msra.mxu1 %v3636_v17  ;;  %4246 = vmatpush1.bf16.msra.mxu0 %v3638_v24 }
 0x67c   :  { %3989 = vmatprep.subr.bf16.mxu1 %v3641_v25  ;;  %4247 = vmatprep.subr.bf16.mxu0 %v3643_v6 }
 0x67f   :  { %3990 = vmatpush1.bf16.msra.mxu1 %v3640_v29  ;;  %4248 = vmatpush1.bf16.msra.mxu0 %v3642_v32 }
 0x680   :  { %3991 = vmatprep.subr.bf16.mxu1 %v3645_v53  ;;  %4249 = vmatprep.subr.bf16.mxu0 %v3647_v2 }
 0x683   :  { %3992 = vmatpush1.bf16.msra.mxu1 %v3644_v33  ;;  %4250 = vmatpush1.bf16.msra.mxu0 %v3646_v34 }
 0x684   :  { %3993 = vmatprep.subr.bf16.mxu1 %v3649_v31  ;;  %4251 = vmatprep.subr.bf16.mxu0 %v3651_v35 }
 0x687   :  { %3994 = vmatpush1.bf16.msra.mxu1 %v3648_v36  ;;  %4252 = vmatpush1.bf16.msra.mxu0 %v3650_v37 }
 0x688   :  { %3995 = vmatprep.subr.bf16.mxu1 %v3653_v38  ;;  %4253 = vmatprep.subr.bf16.mxu0 %v3655_v39 }
 0x68b   :  { %3996 = vmatpush1.bf16.msra.mxu1 %v3652_v28  ;;  %4254 = vmatpush1.bf16.msra.mxu0 %v3654_v44 }
 0x68c   :  { %3997 = vmatprep.subr.bf16.mxu1 %v3657_v46  ;;  %4255 = vmatprep.subr.bf16.mxu0 %v3659_v47 }
 0x68f   :  { %3998 = vmatpush1.bf16.msra.mxu1 %v3656_v49  ;;  %4256 = vmatpush1.bf16.msra.mxu0 %v3658_v50 }
 0x690   :  { %3999 = vmatprep.subr.bf16.mxu1 %v3661_v54  ;;  %4257 = vmatprep.subr.bf16.mxu0 %v3663_v55 }
 0x693   :  { %4000 = vmatpush1.bf16.msra.mxu1 %v3660_v56  ;;  %4258 = vmatpush1.bf16.msra.mxu0 %v3662_v57 }
 0x694   :  { %4001 = vmatprep.subr.bf16.mxu1 %v3665_v58  ;;  %4259 = vmatprep.subr.bf16.mxu0 %v3667_v42 }
 0x697   :  { %4002 = vmatpush1.bf16.msra.mxu1 %v3664_v18  ;;  %4260 = vmatpush1.bf16.msra.mxu0 %v3666_v59 }
 0x698   :  { %4003 = vmatprep.subr.bf16.mxu1 %v3669_v60  ;;  %4261 = vmatprep.subr.bf16.mxu0 %v3671_v61 }
 0x69b   :  { %4004 = vmatpush1.bf16.msra.mxu1 %v3668_v62  ;;  %4262 = vmatpush1.bf16.msra.mxu0 %v3670_v1 }
 0x69c   :  { %4005 = vmatprep.subr.bf16.mxu1 %v3673_v40  ;;  %4263 = vmatprep.subr.bf16.mxu0 %v3675_v4 }
 0x69f   :  { %4006 = vmatpush1.bf16.msra.mxu1 %v3672_v5  ;;  %4264 = vmatpush1.bf16.msra.mxu0 %v3674_v7 }
 0x6a0   :  { %4007 = vmatprep.subr.bf16.mxu1 %v3677_v3  ;;  %4265 = vmatprep.subr.bf16.mxu0 %v3679_v19 }
 0x6a3   :  { %4008 = vmatpush1.bf16.msra.mxu1 %v3676_v51  ;;  %4266 = vmatpush1.bf16.msra.mxu0 %v3678_v20 }
 0x6a6   :  { %4010 = vmatmul.mubr.bf16.vlgmr.msra.gmra.mrb[24].mxu1 %v6158_v9  ;;  %4268 = vmatmul.mubr.bf16.vlgmr.msra.gmra.mrb[12].mxu0 %v6158_v9 }
 0x779   :  { %v4011_v12 = vpop.f32.mrb[24].mxu1  ;;  %v4269_v13 = vpop.f32.mrb[12].mxu0 }
 0x77a   :  { %v6695_v14 = vadd.f32 %v4011_v12, %v3685_v30  ;;  %v6699_v15 = vadd.f32 %v4269_v13, %v3693_v27  ;;  %v4013_v16 = vpop.f32.mrb[25].mxu1  ;;  %v4271_v52 = vpop.f32.mrb[13].mxu0 }
 0x77b   :  { %v6696_v23 = vadd.f32 %v4013_v16, %v3689_v10  ;;  %v6700_v63 = vadd.f32 %v4271_v52, %v3697_v11  ;;  %v4015_v41 = vpop.f32.mrb[26].mxu1  ;;  %v4273_v17 = vpop.f32.mrb[14].mxu0 }
 0x77c   :  { %v4278_v24 = vmax.f32 %v6695_v14, 0.0  ;;  %v4280_v25 = vmax.f32 %v6699_v15, 0.0  ;;  %v6697_v6 = vadd.f32 %v4015_v41, %v3685_v30  ;;  %v6701_v29 = vadd.f32 %v4273_v17, %v3693_v27  ;;  %v4017_v32 = vpop.f32.mrb[27].mxu1  ;;  %v4275_v53 = vpop.f32.mrb[15].mxu0 }
 0x77d   :  { %v4279_v2 = vmax.f32 %v6696_v23, 0.0  ;;  %v4281_v33 = vmax.f32 %v6700_v63, 0.0  ;;  %v6698_v34 = vadd.f32 %v4017_v32, %v3689_v10  ;;  %v6702_v26 = vadd.f32 %v4275_v53, %v3697_v11 }
 0x77e   :  { %4286 = vst [vmem:[#allocation4] sm:$0xff] %v4278_v24  ;;  %4288 = vst [vmem:[#allocation4 + $0x10] sm:$0xff] %v4280_v25  ;;  %v4282_v31 = vmax.f32 %v6697_v6, 0.0  ;;  %v4284_v35 = vmax.f32 %v6701_v29, 0.0 }
 0x77f   :  { %4287 = vst [vmem:[#allocation4 + $0x8] sm:$0xff] %v4279_v2  ;;  %4289 = vst [vmem:[#allocation4 + $0x18] sm:$0xff] %v4281_v33  ;;  %v4283_v36 = vmax.f32 %v6698_v34, 0.0  ;;  %v4285_v37 = vmax.f32 %v6702_v26, 0.0 }
 0x780   :  { %4290 = vst [vmem:[#allocation4 + $0x20] sm:$0x3] %v4282_v31  ;;  %4292 = vst [vmem:[#allocation4 + $0x30] sm:$0x3] %v4284_v35 }
 0x781   :  { %4291 = vst [vmem:[#allocation4 + $0x28] sm:$0x3] %v4283_v36  ;;  %4293 = vst [vmem:[#allocation4 + $0x38] sm:$0x3] %v4285_v37 }
 0x782   :  { %7325 = dma.done.wait [#allocation16 + $0x2], 36864 }
 0x783   :  { %7326 = vsyncadd [#allocation16 + $0x2], 4294930432  ;;  %v4392_v38 = vld [vmem:[#allocation14 + $0x8] sm:$0xff]  ;;  %v4391_v39 = vld [vmem:[#allocation14] sm:$0xff] }
 0x784   :  { %v4395_v28 = vld [vmem:[#allocation14 + $0x20] sm:$0xff]  ;;  %4738 = vmatprep.subr.bf16.mxu1 %v4392_v38  ;;  %v4394_v44 = vld [vmem:[#allocation14 + $0x18] sm:$0xff]  ;;  %v4397_v47 = vld [vmem:[#allocation14 + $0x30] sm:$0xff] }
 0x785   :  { %4739 = vmatpush1.bf16.msra.mxu1 %v4391_v39  ;;  %v4398_v46 = vld [vmem:[#allocation14 + $0x38] sm:$0xff]  ;;  %v4417_v49 = vld [vmem:[#allocation14 + $0xd0] sm:$0xff]  ;;  %v4420_v55 = vld [vmem:[#allocation14 + $0xe8] sm:$0xff] }
 0x786   :  { %4740 = vmatprep.subr.bf16.mxu1 %v4395_v28  ;;  %v4393_v50 = vld [vmem:[#allocation14 + $0x10] sm:$0xff]  ;;  %6319 = vmatprep.subr.bf16.mxu0 %v4417_v49  ;;  %v4396_v56 = vld [vmem:[#allocation14 + $0x28] sm:$0xff]  ;;  %v4423_v58 = vld [vmem:[#allocation14 + $0x100] sm:$0xff] }
 0x787   :  { %v4401_v54 = vld [vmem:[#allocation14 + $0x50] sm:$0xff]  ;;  %6320 = vmatpush3.bf16.msra.mxu0 %v4393_v50  ;;  %v4400_v57 = vld [vmem:[#allocation14 + $0x48] sm:$0xff]  ;;  %v4399_v18 = vld [vmem:[#allocation14 + $0x40] sm:$0xff] }
 0x788   :  { %6321 = vmatprep.subr.bf16.mxu0 %v4420_v55  ;;  %v4404_v42 = vld [vmem:[#allocation14 + $0x68] sm:$0xff]  ;;  %v4297_v59 = vld [vmem:[#allocation4] sm:$0x3f]  ;;  %v4403_v60 = vld [vmem:[#allocation14 + $0x60] sm:$0xff] }
 0x789   :  { %4741 = vmatpush1.bf16.msra.mxu1 %v4394_v44  ;;  %v4426_v61 = vld [vmem:[#allocation14 + $0x118] sm:$0xff]  ;;  %v4407_v1 = vld [vmem:[#allocation14 + $0x80] sm:$0xff]  ;;  %v4429_v7 = vld [vmem:[#allocation14 + $0x130] sm:$0xff] }
 0x78a   :  { %4742 = vmatprep.subr.bf16.mxu1 %v4398_v46  ;;  %v4298_v62 = vld [vmem:[#allocation4 + $0x8] sm:$0x3f]  ;;  %v4405_v19 = vld [vmem:[#allocation14 + $0x70] sm:$0xff]  ;;  %v4432_v20 = vld [vmem:[#allocation14 + $0x148] sm:$0xff] }
 0x78b   :  { %6322 = vmatpush3.bf16.msra.mxu0 %v4396_v56  ;;  %v6245_v40 = vpack.c.bf16 %v4298_v62, %v4297_v59  ;;  %v4402_v4 = vld [vmem:[#allocation14 + $0x58] sm:$0xff]  ;;  %v4409_v51 = vld [vmem:[#allocation14 + $0x90] sm:$0xff]  ;;  %v4408_v30 = vld [vmem:[#allocation14 + $0x88] sm:$0xff] }
 0x78c   :  { %6323 = vmatprep.subr.bf16.mxu0 %v4423_v58  ;;  %v4406_v5 = vld [vmem:[#allocation14 + $0x78] sm:$0xff]  ;;  %v4413_v9 = vld [vmem:[#allocation14 + $0xb0] sm:$0xff]  ;;  %v4412_v10 = vld [vmem:[#allocation14 + $0xa8] sm:$0xff] }
 0x78d   :  { %4743 = vmatpush1.bf16.msra.mxu1 %v4397_v47  ;;  %4317 = vst [vmem:[#allocation10] sm:$0x77] %v6245_v40  ;;  %v4410_v3 = vld [vmem:[#allocation14 + $0x98] sm:$0xff]  ;;  %v4435_v11 = vld [vmem:[#allocation14 + $0x160] sm:$0xff]  ;;  %v4416_v12 = vld [vmem:[#allocation14 + $0xc8] sm:$0xff] }
 0x78e   :  { %4744 = vmatprep.subr.bf16.mxu1 %v4401_v54  ;;  %v4299_v13 = vld [vmem:[#allocation4 + $0x10] sm:$0x3f]  ;;  %v4300_v14 = vld [vmem:[#allocation4 + $0x18] sm:$0x3f]  ;;  %v4438_v23 = vld [vmem:[#allocation14 + $0x178] sm:$0xff] }
 0x78f   :  { %6324 = vmatpush3.bf16.msra.mxu0 %v4399_v18  ;;  %v4411_v15 = vld [vmem:[#allocation14 + $0xa0] sm:$0xff]  ;;  %v6246_v16 = vpack.c.bf16 %v4300_v14, %v4299_v13  ;;  %v4414_v41 = vld [vmem:[#allocation14 + $0xb8] sm:$0xff]  ;;  %v4465_v24 = vld [vmem:[#allocation14 + $0x250] sm:$0xff] }
 0x790   :  { %6325 = vmatprep.subr.bf16.mxu0 %v4426_v61  ;;  %v4415_v52 = vld [vmem:[#allocation14 + $0xc0] sm:$0xff]  ;;  %v4418_v17 = vld [vmem:[#allocation14 + $0xd8] sm:$0xff]  ;;  %v4441_v29 = vld [vmem:[#allocation14 + $0x190] sm:$0xff] }
 0x791   :  { %4745 = vmatpush1.bf16.msra.mxu1 %v4400_v57  ;;  %v4419_v63 = vld [vmem:[#allocation14 + $0xe0] sm:$0xff]  ;;  %4318 = vst [vmem:[#allocation10 + $0x8] sm:$0x77] %v6246_v16  ;;  %v4422_v25 = vld [vmem:[#allocation14 + $0xf8] sm:$0xff]  ;;  %v4421_v32 = vld [vmem:[#allocation14 + $0xf0] sm:$0xff] }
 0x792   :  { %4746 = vmatprep.subr.bf16.mxu1 %v4404_v42  ;;  %v4468_v53 = vld [vmem:[#allocation14 + $0x268] sm:$0xff]  ;;  %v4425_v33 = vld [vmem:[#allocation14 + $0x110] sm:$0xff]  ;;  %v4320_v31 = vld [vmem:[#allocation4 + $0x8] sm:$0xfc] }
 0x793   :  { %6326 = vmatpush3.bf16.msra.mxu0 %v4402_v4  ;;  %v4319_v26 = vld [vmem:[#allocation4] sm:$0xfc]  ;;  %v4444_v35 = vld [vmem:[#allocation14 + $0x1a8] sm:$0xff]  ;;  %v4471_v38 = vld [vmem:[#allocation14 + $0x280] sm:$0xff] }
 0x794   :  { %6327 = vmatprep.subr.bf16.mxu0 %v4429_v7  ;;  %v4385_v8 = vld [vmem:[#allocation10] sm:$0x77]  ;;  %v6247_v36 = vpack.c.bf16 %v4320_v31, %v4319_v26  ;;  %v4474_v47 = vld [vmem:[#allocation14 + $0x298] sm:$0xff]  ;;  %v4477_v55 = vld [vmem:[#allocation14 + $0x2b0] sm:$0xff] }
 0x795   :  { %4747 = vmatpush1.bf16.msra.mxu1 %v4403_v60  ;;  %v6173_v27 = vcombine.high %v4385_v8, %v4385_v8  ;;  %v7845_v6 = vcombine.low %v4385_v8, %v4385_v8  ;;  %v4424_v37 = vld [vmem:[#allocation14 + $0x108] sm:$0xff]  ;;  %v4447_v44 = vld [vmem:[#allocation14 + $0x1c0] sm:$0xff]  ;;  %v4450_v50 = vld [vmem:[#allocation14 + $0x1d8] sm:$0xff] }
 0x796   :  { %4748 = vmatprep.subr.bf16.mxu1 %v4407_v1  ;;  %v4428_v39 = vld [vmem:[#allocation14 + $0x128] sm:$0xff]  ;;  %v6164_v28 = vrot.slane %v6247_v36, 9  ;;  %v4427_v46 = vld [vmem:[#allocation14 + $0x120] sm:$0xff]  ;;  %v4430_v54 = vld [vmem:[#allocation14 + $0x138] sm:$0xff] }
 0x797   :  { %6328 = vmatpush3.bf16.msra.mxu0 %v4405_v19  ;;  %4770 = vmatprep.mubr.bf16.mxu1 %v6173_v27  ;;  %v4431_v49 = vld [vmem:[#allocation14 + $0x140] sm:$0xff]  ;;  %v4434_v56 = vld [vmem:[#allocation14 + $0x158] sm:$0xff]  ;;  %v4322_v58 = vld [vmem:[#allocation4 + $0x18] sm:$0xfc] }
 0x798   :  { %6329 = vmatprep.subr.bf16.mxu0 %v4432_v20  ;;  %5016 = vmatprep.mubr.bf16.mxu0 %v6173_v27  ;;  %v7847_v2 = vld [vmem:[#allocation10 + $0x8] sm:$0x77]  ;;  %4343 = vst [vmem:[#allocation10 + $0x10] sm:$0x77] %v6164_v28  ;;  %v4321_v57 = vld [vmem:[#allocation4 + $0x10] sm:$0xfc] }
 0x799   :  { %4749 = vmatpush1.bf16.msra.mxu1 %v4406_v5  ;;  %v7852_v34 = vcombine.high %v7847_v2, %v7847_v2  ;;  %v6248_v42 = vpack.c.bf16 %v4322_v58, %v4321_v57  ;;  %v4453_v18 = vld [vmem:[#allocation14 + $0x1f0] sm:$0xff]  ;;  %v4480_v60 = vld [vmem:[#allocation14 + $0x2c8] sm:$0xff]  ;;  %v4483_v4 = vld [vmem:[#allocation14 + $0x2e0] sm:$0xff] }
 0x79a   :  { %4750 = vmatprep.subr.bf16.mxu1 %v4410_v3  ;;  %v4433_v59 = vld [vmem:[#allocation14 + $0x150] sm:$0xff]  ;;  %v4456_v1 = vld [vmem:[#allocation14 + $0x208] sm:$0xff]  ;;  %v4346_v3 = vld [vmem:[#allocation4 + $0x8] sm:$0xf0] }
 0x79b   :  { %6330 = vmatpush3.bf16.msra.mxu0 %v4408_v30  ;;  %v6165_v61 = vrot.slane %v6248_v42, 9  ;;  %v4437_v62 = vld [vmem:[#allocation14 + $0x170] sm:$0xff]  ;;  %v4436_v40 = vld [vmem:[#allocation14 + $0x168] sm:$0xff]  ;;  %v4350_v20 = vld [vmem:[#allocation4 + $0x28] sm:$0x3] }
 0x79c   :  { %6331 = vmatprep.subr.bf16.mxu0 %v4435_v11  ;;  %v4440_v5 = vld [vmem:[#allocation14 + $0x188] sm:$0xff]  ;;  %v4345_v7 = vld [vmem:[#allocation4] sm:$0xf0]  ;;  %v4349_v19 = vld [vmem:[#allocation4 + $0x20] sm:$0x3] }
 0x79d   :  { %4751 = vmatpush1.bf16.msra.mxu1 %v4409_v51  ;;  %4344 = vst [vmem:[#allocation10 + $0x18] sm:$0x77] %v6165_v61  ;;  %v4459_v51 = vld [vmem:[#allocation14 + $0x220] sm:$0xff]  ;;  %v4486_v30 = vld [vmem:[#allocation14 + $0x2f8] sm:$0xff]  ;;  %v6251_v27 = vpack.c.bf16 %v4350_v20, %v4349_v19  ;;  %v4513_v16 = vld [vmem:[#allocation14 + $0x3d0] sm:$0xff] }
 0x79e   :  { %4752 = vmatprep.subr.bf16.mxu1 %v4413_v9  ;;  %v6249_v9 = vpack.c.bf16 %v4346_v3, %v4345_v7  ;;  %v4439_v8 = vld [vmem:[#allocation14 + $0x180] sm:$0xff]  ;;  %v4462_v13 = vld [vmem:[#allocation14 + $0x238] sm:$0xff]  ;;  %v4457_v28 = vld [vmem:[#allocation14 + $0x210] sm:$0xff] }
 0x79f   :  { %6332 = vmatpush3.bf16.msra.mxu0 %v4411_v15  ;;  %v7856_v14 = vld [vmem:[#allocation10 + $0x10] sm:$0x77]  ;;  %v4455_v31 = vld [vmem:[#allocation14 + $0x200] sm:$0xff]  ;;  %v4460_v58 = vld [vmem:[#allocation14 + $0x228] sm:$0xff] }
 0x7a0   :  { %6333 = vmatprep.subr.bf16.mxu0 %v4438_v23  ;;  %v6170_v11 = vrot.slane %v6249_v9, 10  ;;  %v4442_v15 = vld [vmem:[#allocation14 + $0x198] sm:$0xff]  ;;  %v4531_v42 = vld [vmem:[#allocation14 + $0x460] sm:$0xff]  ;;  %v4561_v19 = vld [vmem:[#allocation14 + $0x550] sm:$0xff]  ;;  %v7877_v20 = vcombine.low %v7856_v14, %v7856_v14 }
 0x7a1   :  { %4753 = vmatpush1.bf16.msra.mxu1 %v4412_v10  ;;  %v4443_v10 = vld [vmem:[#allocation14 + $0x1a0] sm:$0xff]  ;;  %v4446_v23 = vld [vmem:[#allocation14 + $0x1b8] sm:$0xff]  ;;  %v4537_v9 = vld [vmem:[#allocation14 + $0x490] sm:$0xff] }
 0x7a2   :  { %4754 = vmatprep.subr.bf16.mxu1 %v4416_v12  ;;  %v4375_v12 = vrot.slane %v6251_v27, 6  ;;  %v4522_v26 = vld [vmem:[#allocation14 + $0x418] sm:$0xff]  ;;  %v4507_v61 = vld [vmem:[#allocation14 + $0x3a0] sm:$0xff]  ;;  %v4473_v27 = vld [vmem:[#allocation14 + $0x290] sm:$0xff] }
 0x7a3   :  { %6334 = vmatpush3.bf16.msra.mxu0 %v4414_v41  ;;  %v7867_v41 = vcombine.high %v7856_v14, %v7856_v14  ;;  %v4454_v36 = vld [vmem:[#allocation14 + $0x1f8] sm:$0xff]  ;;  %v4543_v14 = vld [vmem:[#allocation14 + $0x4c0] sm:$0xff] }
 0x7a4   :  { %6341 = vmatprep.subr.bf16.mxu0 %v4465_v24  ;;  %v4445_v24 = vld [vmem:[#allocation14 + $0x1b0] sm:$0xff]  ;;  %v7873_v7 = vld [vmem:[#allocation10 + $0x18] sm:$0x77] }
 0x7a5   :  { %4755 = vmatpush1.bf16.msra.mxu1 %v4415_v52  ;;  %v4376_v52 = vsel %vm7731_vm5, %v6170_v11, %v4375_v12  ;;  %v4466_v3 = vld [vmem:[#allocation14 + $0x258] sm:$0xff]  ;;  %v7881_v48 = vcombine.high %v7873_v7, %v7873_v7  ;;  %v4472_v11 = vld [vmem:[#allocation14 + $0x288] sm:$0xff]  ;;  %v4567_v12 = vld [vmem:[#allocation14 + $0x580] sm:$0xff] }
 0x7a6   :  { %4756 = vmatprep.subr.bf16.mxu1 %v4419_v63  ;;  %5017 = vmatmul.mubr.bf16.vlgmr.msra.gmra.mrb[16].mxu0 %v7845_v6  ;;  %v7863_v63 = vcombine.low %v7847_v2, %v7847_v2  ;;  %4383 = vst [vmem:[#allocation10 + $0x20] sm:$0x77] %v4376_v52  ;;  %v4452_v2 = vld [vmem:[#allocation14 + $0x1e8] sm:$0xff]  ;;  %v4479_v52 = vld [vmem:[#allocation14 + $0x2c0] sm:$0xff] }
 0x7a7   :  { %6342 = vmatpush3.bf16.msra.mxu0 %v4441_v29  ;;  %5056 = vmatprep.mubr.bf16.mxu0 %v7852_v34  ;;  %v4492_v29 = vld [vmem:[#allocation14 + $0x328] sm:$0xff] }
 0x7a8   :  { %6343 = vmatprep.subr.bf16.mxu0 %v4468_v53  ;;  %v4519_v53 = vld [vmem:[#allocation14 + $0x400] sm:$0xff] }
 0x7a9   :  { %4757 = vmatpush1.bf16.msra.mxu1 %v4418_v17  ;;  %v4489_v17 = vld [vmem:[#allocation14 + $0x310] sm:$0xff] }
 0x7aa   :  { %4758 = vmatprep.subr.bf16.mxu1 %v4422_v25  ;;  %v4516_v25 = vld [vmem:[#allocation14 + $0x3e8] sm:$0xff] }
 0x7ab   :  { %6344 = vmatpush3.bf16.msra.mxu0 %v4444_v35  ;;  %v4498_v35 = vld [vmem:[#allocation14 + $0x358] sm:$0xff] }
 0x7ac   :  { %6345 = vmatprep.subr.bf16.mxu0 %v4471_v38  ;;  %v4458_v38 = vld [vmem:[#allocation14 + $0x218] sm:$0xff] }
 0x7ad   :  { %4759 = vmatpush1.bf16.msra.mxu1 %v4421_v32  ;;  %v4448_v32 = vld [vmem:[#allocation14 + $0x1c8] sm:$0xff] }
 0x7ae   :  { %4760 = vmatprep.subr.bf16.mxu1 %v4425_v33  ;;  %v4495_v33 = vld [vmem:[#allocation14 + $0x340] sm:$0xff] }
 0x7af   :  { %6346 = vmatpush3.bf16.msra.mxu0 %v4447_v44  ;;  %v4461_v44 = vld [vmem:[#allocation14 + $0x230] sm:$0xff] }
 0x7b0   :  { %6347 = vmatprep.subr.bf16.mxu0 %v4474_v47  ;;  %v4347_v47 = vld [vmem:[#allocation4 + $0x10] sm:$0xf0] }
 0x7b1   :  { %4761 = vmatpush1.bf16.msra.mxu1 %v4424_v37  ;;  %v4525_v37 = vld [vmem:[#allocation14 + $0x430] sm:$0xff] }
 0x7b2   :  { %4762 = vmatprep.subr.bf16.mxu1 %v4428_v39  ;;  %v4501_v39 = vld [vmem:[#allocation14 + $0x370] sm:$0xff] }
 0x7b3   :  { %6348 = vmatpush3.bf16.msra.mxu0 %v4450_v50  ;;  %v4351_v50 = vld [vmem:[#allocation4 + $0x30] sm:$0x3] }
 0x7b4   :  { %6349 = vmatprep.subr.bf16.mxu0 %v4477_v55 }
 0x7b5   :  { %4763 = vmatpush1.bf16.msra.mxu1 %v4427_v46  ;;  %v4528_v46 = vld [vmem:[#allocation14 + $0x448] sm:$0xff] }
 0x7b6   :  { %4764 = vmatprep.subr.bf16.mxu1 %v4431_v49  ;;  %v4348_v49 = vld [vmem:[#allocation4 + $0x18] sm:$0xf0] }
 0x7b7   :  { %6350 = vmatpush3.bf16.msra.mxu0 %v4453_v18  ;;  %v6250_v55 = vpack.c.bf16 %v4348_v49, %v4347_v47  ;;  %v7891_v47 = vcombine.low %v7873_v7, %v7873_v7  ;;  %v4585_v49 = vld [vmem:[#allocation14 + $0x610] sm:$0xff]  ;;  %v4624_v7 = vld [vmem:[#allocation14 + $0x748] sm:$0xff] }
 0x7b8   :  { %6351 = vmatprep.subr.bf16.mxu0 %v4480_v60 }
 0x7b9   :  { %4765 = vmatpush1.bf16.msra.mxu1 %v4430_v54  ;;  %v4352_v54 = vld [vmem:[#allocation4 + $0x38] sm:$0x3]  ;;  %v6171_v18 = vrot.slane %v6250_v55, 10  ;;  %v4497_v55 = vld [vmem:[#allocation14 + $0x350] sm:$0xff] }
 0x7ba   :  { %4766 = vmatprep.subr.bf16.mxu1 %v4434_v56  ;;  %v4504_v56 = vld [vmem:[#allocation14 + $0x388] sm:$0xff]  ;;  %v6252_v57 = vpack.c.bf16 %v4352_v54, %v4351_v50  ;;  %v4493_v50 = vld [vmem:[#allocation14 + $0x330] sm:$0xff] }
 0x7bb   :  { %6352 = vmatpush3.bf16.msra.mxu0 %v4456_v1  ;;  %v4463_v1 = vld [vmem:[#allocation14 + $0x240] sm:$0xff]  ;;  %v4612_v54 = vld [vmem:[#allocation14 + $0x6e8] sm:$0xff] }
 0x7bc   :  { %6353 = vmatprep.subr.bf16.mxu0 %v4483_v4  ;;  %v4379_v60 = vrot.slane %v6252_v57, 6  ;;  %v4467_v4 = vld [vmem:[#allocation14 + $0x260] sm:$0xff] }
 0x7bd   :  { %4767 = vmatpush1.bf16.msra.mxu1 %v4433_v59  ;;  %v4464_v59 = vld [vmem:[#allocation14 + $0x248] sm:$0xff]  ;;  %v4615_v57 = vld [vmem:[#allocation14 + $0x700] sm:$0xff] }
 0x7be   :  { %4768 = vmatprep.subr.bf16.mxu1 %v4437_v62  ;;  %v4380_v62 = vsel %vm7731_vm5, %v6171_v18, %v4379_v60  ;;  %v4499_v18 = vld [vmem:[#allocation14 + $0x360] sm:$0xff] }
 0x7bf   :  { %6354 = vmatpush3.bf16.msra.mxu0 %v4459_v51  ;;  %4384 = vst [vmem:[#allocation10 + $0x28] sm:$0x77] %v4380_v62  ;;  %v4470_v51 = vld [vmem:[#allocation14 + $0x278] sm:$0xff]  ;;  %v4503_v60 = vld [vmem:[#allocation14 + $0x380] sm:$0xff] }
 0x7c0   :  { %6355 = vmatprep.subr.bf16.mxu0 %v4486_v30  ;;  %v4564_v30 = vld [vmem:[#allocation14 + $0x568] sm:$0xff]  ;;  %v4502_v62 = vld [vmem:[#allocation14 + $0x378] sm:$0xff] }
 0x7c1   :  { %4769 = vmatpush1.bf16.msra.mxu1 %v4436_v40  ;;  %v4534_v40 = vld [vmem:[#allocation14 + $0x478] sm:$0xff] }
 0x7c2   :  { %4779 = vmatprep.subr.bf16.mxu1 %v4440_v5  ;;  %v4510_v5 = vld [vmem:[#allocation14 + $0x3b8] sm:$0xff] }
 0x7c3   :  { %6356 = vmatpush3.bf16.msra.mxu0 %v4462_v13  ;;  %v4476_v13 = vld [vmem:[#allocation14 + $0x2a8] sm:$0xff] }
 0x7c4   :  { %4771 = vmatmul.mubr.bf16.vlgmr.msra.gmra.mrb[28].mxu1 %v7845_v6  ;;  %6363 = vmatprep.subr.bf16.mxu0 %v4513_v16  ;;  %v4449_v6 = vld [vmem:[#allocation14 + $0x1d0] sm:$0xff]  ;;  %v4570_v16 = vld [vmem:[#allocation14 + $0x598] sm:$0xff] }
 0x7c5   :  { %4780 = vmatpush1.bf16.msra.mxu1 %v4439_v8  ;;  %4811 = vmatprep.mubr.bf16.mxu1 %v7852_v34  ;;  %v4451_v34 = vld [vmem:[#allocation14 + $0x1e0] sm:$0xff]  ;;  %v4469_v8 = vld [vmem:[#allocation14 + $0x270] sm:$0xff] }
 0x7c6   :  { %4781 = vmatprep.subr.bf16.mxu1 %v4443_v10  ;;  %5057 = vmatmul.mubr.bf16.vlgmr.msra.gmra.mrb[20].mxu0 %v7863_v63  ;;  %v4540_v10 = vld [vmem:[#allocation14 + $0x4a8] sm:$0xff] }
 0x7c7   :  { %6364 = vmatpush3.bf16.msra.mxu0 %v4489_v17  ;;  %5096 = vmatprep.mubr.bf16.mxu0 %v7867_v41  ;;  %v4478_v17 = vld [vmem:[#allocation14 + $0x2b8] sm:$0xff] }
 0x7c8   :  { %6365 = vmatprep.subr.bf16.mxu0 %v4516_v25  ;;  %v4482_v25 = vld [vmem:[#allocation14 + $0x2d8] sm:$0xff] }
 0x7c9   :  { %4782 = vmatpush1.bf16.msra.mxu1 %v4442_v15  ;;  %v4475_v15 = vld [vmem:[#allocation14 + $0x2a0] sm:$0xff] }
 0x7ca   :  { %4783 = vmatprep.subr.bf16.mxu1 %v4446_v23  ;;  %v4546_v23 = vld [vmem:[#allocation14 + $0x4d8] sm:$0xff] }
 0x7cb   :  { %6366 = vmatpush3.bf16.msra.mxu0 %v4492_v29  ;;  %v4481_v29 = vld [vmem:[#allocation14 + $0x2d0] sm:$0xff] }
 0x7cc   :  { %6367 = vmatprep.subr.bf16.mxu0 %v4519_v53  ;;  %v4485_v53 = vld [vmem:[#allocation14 + $0x2f0] sm:$0xff] }
 0x7cd   :  { %4784 = vmatpush1.bf16.msra.mxu1 %v4445_v24  ;;  %v4573_v24 = vld [vmem:[#allocation14 + $0x5b0] sm:$0xff] }
 0x7ce   :  { %4785 = vmatprep.subr.bf16.mxu1 %v4449_v6  ;;  %v4549_v6 = vld [vmem:[#allocation14 + $0x4f0] sm:$0xff] }
 0x7cf   :  { %6368 = vmatpush3.bf16.msra.mxu0 %v4495_v33  ;;  %v4484_v33 = vld [vmem:[#allocation14 + $0x2e8] sm:$0xff] }
 0x7d0   :  { %6369 = vmatprep.subr.bf16.mxu0 %v4522_v26  ;;  %v4488_v26 = vld [vmem:[#allocation14 + $0x308] sm:$0xff] }
 0x7d1   :  { %4786 = vmatpush1.bf16.msra.mxu1 %v4448_v32  ;;  %v4576_v32 = vld [vmem:[#allocation14 + $0x5c8] sm:$0xff] }
 0x7d2   :  { %4787 = vmatprep.subr.bf16.mxu1 %v4452_v2  ;;  %v4552_v2 = vld [vmem:[#allocation14 + $0x508] sm:$0xff] }
 0x7d3   :  { %6370 = vmatpush3.bf16.msra.mxu0 %v4498_v35  ;;  %v4487_v35 = vld [vmem:[#allocation14 + $0x300] sm:$0xff] }
 0x7d4   :  { %6371 = vmatprep.subr.bf16.mxu0 %v4525_v37  ;;  %v4491_v37 = vld [vmem:[#allocation14 + $0x320] sm:$0xff] }
 0x7d5   :  { %4788 = vmatpush1.bf16.msra.mxu1 %v4451_v34  ;;  %v4579_v34 = vld [vmem:[#allocation14 + $0x5e0] sm:$0xff] }
 0x7d6   :  { %4789 = vmatprep.subr.bf16.mxu1 %v4455_v31  ;;  %v4555_v31 = vld [vmem:[#allocation14 + $0x520] sm:$0xff] }
 0x7d7   :  { %6372 = vmatpush3.bf16.msra.mxu0 %v4501_v39  ;;  %v7886_v39 = vld [vmem:[#allocation10 + $0x20] sm:$0x77] }
 0x7d8   :  { %6373 = vmatprep.subr.bf16.mxu0 %v4528_v46  ;;  %v4494_v46 = vld [vmem:[#allocation14 + $0x338] sm:$0xff] }
 0x7d9   :  { %4790 = vmatpush1.bf16.msra.mxu1 %v4454_v36  ;;  %v4582_v36 = vld [vmem:[#allocation14 + $0x5f8] sm:$0xff] }
 0x7da   :  { %4791 = vmatprep.subr.bf16.mxu1 %v4458_v38  ;;  %v4558_v38 = vld [vmem:[#allocation14 + $0x538] sm:$0xff] }
 0x7db   :  { %6374 = vmatpush3.bf16.msra.mxu0 %v4504_v56  ;;  %v4496_v56 = vld [vmem:[#allocation14 + $0x348] sm:$0xff] }
 0x7dc   :  { %6375 = vmatprep.subr.bf16.mxu0 %v4531_v42  ;;  %v4591_v42 = vld [vmem:[#allocation14 + $0x640] sm:$0xff] }
 0x7dd   :  { %4792 = vmatpush1.bf16.msra.mxu1 %v4457_v28  ;;  %v4490_v28 = vld [vmem:[#allocation14 + $0x318] sm:$0xff] }
 0x7de   :  { %4793 = vmatprep.subr.bf16.mxu1 %v4461_v44  ;;  %v4609_v44 = vld [vmem:[#allocation14 + $0x6d0] sm:$0xff] }
 0x7df   :  { %6376 = vmatpush3.bf16.msra.mxu0 %v4507_v61  ;;  %v4594_v61 = vld [vmem:[#allocation14 + $0x658] sm:$0xff] }
 0x7e0   :  { %6377 = vmatprep.subr.bf16.mxu0 %v4534_v40  ;;  %v4506_v40 = vld [vmem:[#allocation14 + $0x398] sm:$0xff] }
 0x7e1   :  { %4794 = vmatpush1.bf16.msra.mxu1 %v4460_v58  ;;  %v4500_v58 = vld [vmem:[#allocation14 + $0x368] sm:$0xff] }
 0x7e2   :  { %4795 = vmatprep.subr.bf16.mxu1 %v4464_v59  ;;  %v4618_v59 = vld [vmem:[#allocation14 + $0x718] sm:$0xff] }
 0x7e3   :  { %6378 = vmatpush3.bf16.msra.mxu0 %v4510_v5  ;;  %v4505_v5 = vld [vmem:[#allocation14 + $0x390] sm:$0xff] }
 0x7e4   :  { %6385 = vmatprep.subr.bf16.mxu0 %v4561_v19  ;;  %v4600_v19 = vld [vmem:[#allocation14 + $0x688] sm:$0xff] }
 0x7e5   :  { %4796 = vmatpush1.bf16.msra.mxu1 %v4463_v1  ;;  %v4621_v1 = vld [vmem:[#allocation14 + $0x730] sm:$0xff] }
 0x7e6   :  { %4797 = vmatprep.subr.bf16.mxu1 %v4467_v4  ;;  %5097 = vmatmul.mubr.bf16.vlgmr.msra.gmra.mrb[24].mxu0 %v7877_v20  ;;  %v4597_v4 = vld [vmem:[#allocation14 + $0x670] sm:$0xff] }
 0x7e7   :  { %6386 = vmatpush3.bf16.msra.mxu0 %v4537_v9  ;;  %5136 = vmatprep.mubr.bf16.mxu0 %v7881_v48  ;;  %v4627_v9 = vld [vmem:[#allocation14 + $0x760] sm:$0xff] }
 0x7e8   :  { %6387 = vmatprep.subr.bf16.mxu0 %v4564_v30  ;;  %v4603_v30 = vld [vmem:[#allocation14 + $0x6a0] sm:$0xff] }
 0x7e9   :  { %4798 = vmatpush1.bf16.msra.mxu1 %v4466_v3  ;;  %v4509_v3 = vld [vmem:[#allocation14 + $0x3b0] sm:$0xff] }
 0x7ea   :  { %4799 = vmatprep.subr.bf16.mxu1 %v4470_v51  ;;  %v4508_v51 = vld [vmem:[#allocation14 + $0x3a8] sm:$0xff] }
 0x7eb   :  { %6388 = vmatpush3.bf16.msra.mxu0 %v4540_v10  ;;  %v4630_v10 = vld [vmem:[#allocation14 + $0x778] sm:$0xff] }
 0x7ec   :  { %6389 = vmatprep.subr.bf16.mxu0 %v4567_v12  ;;  %v4606_v12 = vld [vmem:[#allocation14 + $0x6b8] sm:$0xff] }
 0x7ed   :  { %4800 = vmatpush1.bf16.msra.mxu1 %v4469_v8  ;;  %v4512_v8 = vld [vmem:[#allocation14 + $0x3c8] sm:$0xff] }
 0x7ee   :  { %4801 = vmatprep.subr.bf16.mxu1 %v4473_v27  ;;  %v4511_v27 = vld [vmem:[#allocation14 + $0x3c0] sm:$0xff] }
 0x7ef   :  { %6390 = vmatpush3.bf16.msra.mxu0 %v4543_v14  ;;  %v4514_v14 = vld [vmem:[#allocation14 + $0x3d8] sm:$0xff] }
 0x7f0   :  { %6391 = vmatprep.subr.bf16.mxu0 %v4570_v16  ;;  %v4518_v16 = vld [vmem:[#allocation14 + $0x3f8] sm:$0xff] }
 0x7f1   :  { %4802 = vmatpush1.bf16.msra.mxu1 %v4472_v11  ;;  %v4515_v11 = vld [vmem:[#allocation14 + $0x3e0] sm:$0xff] }
 0x7f2   :  { %4803 = vmatprep.subr.bf16.mxu1 %v4476_v13  ;;  %v7899_v13 = vld [vmem:[#allocation10 + $0x28] sm:$0x77] }
 0x7f3   :  { %6392 = vmatpush3.bf16.msra.mxu0 %v4546_v23  ;;  %v7907_v23 = vcombine.high %v7899_v13, %v7899_v13 }
 0x7f4   :  { %6393 = vmatprep.subr.bf16.mxu0 %v4573_v24  ;;  %v4517_v24 = vld [vmem:[#allocation14 + $0x3f0] sm:$0xff] }
 0x7f5   :  { %4804 = vmatpush1.bf16.msra.mxu1 %v4475_v15  ;;  %v4657_v15 = vld [vmem:[#allocation14 + $0x850] sm:$0xff] }
 0x7f6   :  { %4805 = vmatprep.subr.bf16.mxu1 %v4479_v52  ;;  %v7903_v52 = vcombine.low %v7886_v39, %v7886_v39 }
 0x7f7   :  { %6394 = vmatpush3.bf16.msra.mxu0 %v4549_v6  ;;  %v4521_v6 = vld [vmem:[#allocation14 + $0x410] sm:$0xff] }
 0x7f8   :  { %6395 = vmatprep.subr.bf16.mxu0 %v4576_v32  ;;  %v4520_v32 = vld [vmem:[#allocation14 + $0x408] sm:$0xff] }
 0x7f9   :  { %4806 = vmatpush1.bf16.msra.mxu1 %v4478_v17  ;;  %v4633_v17 = vld [vmem:[#allocation14 + $0x790] sm:$0xff] }
 0x7fa   :  { %4807 = vmatprep.subr.bf16.mxu1 %v4482_v25  ;;  %v4660_v25 = vld [vmem:[#allocation14 + $0x868] sm:$0xff] }
 0x7fb   :  { %6396 = vmatpush3.bf16.msra.mxu0 %v4552_v2  ;;  %v4524_v2 = vld [vmem:[#allocation14 + $0x428] sm:$0xff] }
 0x7fc   :  { %6397 = vmatprep.subr.bf16.mxu0 %v4579_v34  ;;  %v4523_v34 = vld [vmem:[#allocation14 + $0x420] sm:$0xff] }
 0x7fd   :  { %4808 = vmatpush1.bf16.msra.mxu1 %v4481_v29  ;;  %v4636_v29 = vld [vmem:[#allocation14 + $0x7a8] sm:$0xff] }
 0x7fe   :  { %4809 = vmatprep.subr.bf16.mxu1 %v4485_v53  ;;  %v4663_v53 = vld [vmem:[#allocation14 + $0x880] sm:$0xff] }
 0x7ff   :  { %6398 = vmatpush3.bf16.msra.mxu0 %v4555_v31  ;;  %v4527_v31 = vld [vmem:[#allocation14 + $0x440] sm:$0xff] }
 0x800   :  { %6399 = vmatprep.subr.bf16.mxu0 %v4582_v36  ;;  %v4526_v36 = vld [vmem:[#allocation14 + $0x438] sm:$0xff] }
 0x801   :  { %4810 = vmatpush1.bf16.msra.mxu1 %v4484_v33  ;;  %v4639_v33 = vld [vmem:[#allocation14 + $0x7c0] sm:$0xff] }
 0x802   :  { %4820 = vmatprep.subr.bf16.mxu1 %v4488_v26  ;;  %v4666_v26 = vld [vmem:[#allocation14 + $0x898] sm:$0xff] }
 0x803   :  { %6400 = vmatpush3.bf16.msra.mxu0 %v4558_v38  ;;  %v4530_v38 = vld [vmem:[#allocation14 + $0x458] sm:$0xff] }
 0x804   :  { %4812 = vmatmul.mubr.bf16.vlgmr.msra.gmra.mrb[28].mxu1 %v7863_v63  ;;  %v7895_v63 = vcombine.high %v7886_v39, %v7886_v39  ;;  %6407 = vmatprep.subr.bf16.mxu0 %v4609_v44  ;;  %v4645_v39 = vld [vmem:[#allocation14 + $0x7f0] sm:$0xff]  ;;  %v4672_v44 = vld [vmem:[#allocation14 + $0x8c8] sm:$0xff] }
 0x805   :  { %4821 = vmatpush1.bf16.msra.mxu1 %v4487_v35  ;;  %4852 = vmatprep.mubr.bf16.mxu1 %v7867_v41  ;;  %v4588_v41 = vld [vmem:[#allocation14 + $0x628] sm:$0xff]  ;;  %v4642_v35 = vld [vmem:[#allocation14 + $0x7d8] sm:$0xff] }
 0x806   :  { %4822 = vmatprep.subr.bf16.mxu1 %v4491_v37  ;;  %5137 = vmatmul.mubr.bf16.vlgmr.msra.gmra.mrb[28].mxu0 %v7891_v47  ;;  %v4669_v37 = vld [vmem:[#allocation14 + $0x8b0] sm:$0xff] }
 0x807   :  { %6408 = vmatpush3.bf16.msra.mxu0 %v4585_v49  ;;  %5176 = vmatprep.mubr.bf16.mxu0 %v7895_v63  ;;  %v4648_v49 = vld [vmem:[#allocation14 + $0x808] sm:$0xff] }
 0x808   :  { %6409 = vmatprep.subr.bf16.mxu0 %v4612_v54  ;;  %v4675_v54 = vld [vmem:[#allocation14 + $0x8e0] sm:$0xff] }
 0x809   :  { %4823 = vmatpush1.bf16.msra.mxu1 %v4490_v28  ;;  %v4529_v28 = vld [vmem:[#allocation14 + $0x450] sm:$0xff] }
 0x80a   :  { %4824 = vmatprep.subr.bf16.mxu1 %v4494_v46  ;;  %v4533_v46 = vld [vmem:[#allocation14 + $0x470] sm:$0xff] }
 0x80b   :  { %6410 = vmatpush3.bf16.msra.mxu0 %v4588_v41  ;;  %v4651_v41 = vld [vmem:[#allocation14 + $0x820] sm:$0xff] }
 0x80c   :  { %6411 = vmatprep.subr.bf16.mxu0 %v4615_v57  ;;  %v4678_v57 = vld [vmem:[#allocation14 + $0x8f8] sm:$0xff] }
 0x80d   :  { %4825 = vmatpush1.bf16.msra.mxu1 %v4493_v50  ;;  %v4532_v50 = vld [vmem:[#allocation14 + $0x468] sm:$0xff] }
 0x80e   :  { %4826 = vmatprep.subr.bf16.mxu1 %v4497_v55  ;;  %v4536_v55 = vld [vmem:[#allocation14 + $0x488] sm:$0xff] }
 0x80f   :  { %6412 = vmatpush3.bf16.msra.mxu0 %v4591_v42  ;;  %v4654_v42 = vld [vmem:[#allocation14 + $0x838] sm:$0xff] }
 0x810   :  { %6413 = vmatprep.subr.bf16.mxu0 %v4618_v59  ;;  %v4542_v59 = vld [vmem:[#allocation14 + $0x4b8] sm:$0xff] }
 0x811   :  { %4827 = vmatpush1.bf16.msra.mxu1 %v4496_v56  ;;  %v4535_v56 = vld [vmem:[#allocation14 + $0x480] sm:$0xff] }
 0x812   :  { %4828 = vmatprep.subr.bf16.mxu1 %v4500_v58  ;;  %v4539_v58 = vld [vmem:[#allocation14 + $0x4a0] sm:$0xff] }
 0x813   :  { %6414 = vmatpush3.bf16.msra.mxu0 %v4594_v61  ;;  %v4541_v61 = vld [vmem:[#allocation14 + $0x4b0] sm:$0xff] }
 0x814   :  { %6415 = vmatprep.subr.bf16.mxu0 %v4621_v1  ;;  %v4548_v1 = vld [vmem:[#allocation14 + $0x4e8] sm:$0xff] }
 0x815   :  { %4829 = vmatpush1.bf16.msra.mxu1 %v4499_v18  ;;  %v4538_v18 = vld [vmem:[#allocation14 + $0x498] sm:$0xff] }
 0x816   :  { %4830 = vmatprep.subr.bf16.mxu1 %v4503_v60  ;;  %v7915_v60 = vcombine.low %v7899_v13, %v7899_v13  ;;  %v4572_v13 = vld [vmem:[#allocation14 + $0x5a8] sm:$0xff] }
 0x817   :  { %6416 = vmatpush3.bf16.msra.mxu0 %v4597_v4  ;;  %v4550_v4 = vld [vmem:[#allocation14 + $0x4f8] sm:$0xff] }
 0x818   :  { %6417 = vmatprep.subr.bf16.mxu0 %v4624_v7  ;;  %v4553_v7 = vld [vmem:[#allocation14 + $0x510] sm:$0xff] }
 0x819   :  { %4831 = vmatpush1.bf16.msra.mxu1 %v4502_v62  ;;  %v4545_v62 = vld [vmem:[#allocation14 + $0x4d0] sm:$0xff] }
 0x81a   :  { %4832 = vmatprep.subr.bf16.mxu1 %v4506_v40  ;;  %v4547_v40 = vld [vmem:[#allocation14 + $0x4e0] sm:$0xff] }
 0x81b   :  { %6418 = vmatpush3.bf16.msra.mxu0 %v4600_v19  ;;  %v4556_v19 = vld [vmem:[#allocation14 + $0x528] sm:$0xff] }
 0x81c   :  { %6419 = vmatprep.subr.bf16.mxu0 %v4627_v9  ;;  %v4559_v9 = vld [vmem:[#allocation14 + $0x540] sm:$0xff] }
 0x81d   :  { %4833 = vmatpush1.bf16.msra.mxu1 %v4505_v5  ;;  %v4554_v5 = vld [vmem:[#allocation14 + $0x518] sm:$0xff] }
 0x81e   :  { %4834 = vmatprep.subr.bf16.mxu1 %v4509_v3  ;;  %v4557_v3 = vld [vmem:[#allocation14 + $0x530] sm:$0xff] }
 0x81f   :  { %6420 = vmatpush3.bf16.msra.mxu0 %v4603_v30  ;;  %v4562_v30 = vld [vmem:[#allocation14 + $0x558] sm:$0xff] }
 0x820   :  { %6421 = vmatprep.subr.bf16.mxu0 %v4630_v10  ;;  %v4565_v10 = vld [vmem:[#allocation14 + $0x570] sm:$0xff] }
 0x821   :  { %4835 = vmatpush1.bf16.msra.mxu1 %v4508_v51  ;;  %v4560_v51 = vld [vmem:[#allocation14 + $0x548] sm:$0xff] }
 0x822   :  { %4836 = vmatprep.subr.bf16.mxu1 %v4512_v8  ;;  %v4563_v8 = vld [vmem:[#allocation14 + $0x560] sm:$0xff] }
 0x823   :  { %6422 = vmatpush3.bf16.msra.mxu0 %v4606_v12  ;;  %v4568_v12 = vld [vmem:[#allocation14 + $0x588] sm:$0xff] }
 0x824   :  { %6429 = vmatprep.subr.bf16.mxu0 %v4657_v15  ;;  %v4575_v15 = vld [vmem:[#allocation14 + $0x5c0] sm:$0xff] }
 0x825   :  { %4837 = vmatpush1.bf16.msra.mxu1 %v4511_v27  ;;  %v4566_v27 = vld [vmem:[#allocation14 + $0x578] sm:$0xff] }
 0x826   :  { %4838 = vmatprep.subr.bf16.mxu1 %v4515_v11  ;;  %5177 = vmatmul.mubr.bf16.vlgmr.msra.gmra.mrb[32].mxu0 %v7903_v52  ;;  %v4569_v11 = vld [vmem:[#allocation14 + $0x590] sm:$0xff] }
 0x827   :  { %6430 = vmatpush3.bf16.msra.mxu0 %v4633_v17  ;;  %5216 = vmatprep.mubr.bf16.mxu0 %v7907_v23  ;;  %v4578_v17 = vld [vmem:[#allocation14 + $0x5d8] sm:$0xff] }
 0x828   :  { %6431 = vmatprep.subr.bf16.mxu0 %v4660_v25  ;;  %v4581_v25 = vld [vmem:[#allocation14 + $0x5f0] sm:$0xff] }
 0x829   :  { %4839 = vmatpush1.bf16.msra.mxu1 %v4514_v14  ;;  %v4571_v14 = vld [vmem:[#allocation14 + $0x5a0] sm:$0xff] }
 0x82a   :  { %4840 = vmatprep.subr.bf16.mxu1 %v4518_v16  ;;  %v4574_v16 = vld [vmem:[#allocation14 + $0x5b8] sm:$0xff] }
 0x82b   :  { %6432 = vmatpush3.bf16.msra.mxu0 %v4636_v29  ;;  %v4584_v29 = vld [vmem:[#allocation14 + $0x608] sm:$0xff] }
 0x82c   :  { %6433 = vmatprep.subr.bf16.mxu0 %v4663_v53  ;;  %v4587_v53 = vld [vmem:[#allocation14 + $0x620] sm:$0xff] }
 0x82d   :  { %4841 = vmatpush1.bf16.msra.mxu1 %v4517_v24  ;;  %v4577_v24 = vld [vmem:[#allocation14 + $0x5d0] sm:$0xff] }
 0x82e   :  { %4842 = vmatprep.subr.bf16.mxu1 %v4521_v6  ;;  %v4580_v6 = vld [vmem:[#allocation14 + $0x5e8] sm:$0xff] }
 0x82f   :  { %6434 = vmatpush3.bf16.msra.mxu0 %v4639_v33 }
 0x830   :  { %6435 = vmatprep.subr.bf16.mxu0 %v4666_v26 }
 0x831   :  { %4843 = vmatpush1.bf16.msra.mxu1 %v4520_v32  ;;  %v4583_v32 = vld [vmem:[#allocation14 + $0x600] sm:$0xff] }
 0x832   :  { %4844 = vmatprep.subr.bf16.mxu1 %v4524_v2 }
 0x833   :  { %6436 = vmatpush3.bf16.msra.mxu0 %v4642_v35  ;;  %v4590_v35 = vld [vmem:[#allocation14 + $0x638] sm:$0xff] }
 0x834   :  { %6437 = vmatprep.subr.bf16.mxu0 %v4669_v37  ;;  %v4589_v37 = vld [vmem:[#allocation14 + $0x630] sm:$0xff] }
 0x835   :  { %4845 = vmatpush1.bf16.msra.mxu1 %v4523_v34  ;;  %v4586_v34 = vld [vmem:[#allocation14 + $0x618] sm:$0xff] }
 0x836   :  { %4846 = vmatprep.subr.bf16.mxu1 %v4527_v31 }
 0x837   :  { %6438 = vmatpush3.bf16.msra.mxu0 %v4645_v39  ;;  %v4592_v39 = vld [vmem:[#allocation14 + $0x648] sm:$0xff] }
 0x838   :  { %6439 = vmatprep.subr.bf16.mxu0 %v4672_v44  ;;  %v4599_v44 = vld [vmem:[#allocation14 + $0x680] sm:$0xff] }
 0x839   :  { %4847 = vmatpush1.bf16.msra.mxu1 %v4526_v36 }
 0x83a   :  { %4848 = vmatprep.subr.bf16.mxu1 %v4530_v38  ;;  %v4593_v38 = vld [vmem:[#allocation14 + $0x650] sm:$0xff] }
 0x83b   :  { %6440 = vmatpush3.bf16.msra.mxu0 %v4648_v49  ;;  %v7920_v49 = vld [vmem:[#allocation24] sm:$0x7] }
 0x83c   :  { %6441 = vmatprep.subr.bf16.mxu0 %v4675_v54  ;;  %v4692_v54 = vrot.slane %v7920_v49, %v7689_v45  ;;  %v4614_v45 = vld [vmem:[#allocation14 + $0x6f8] sm:$0xff] }
 0x83d   :  { %4849 = vmatpush1.bf16.msra.mxu1 %v4529_v28  ;;  %v4596_v28 = vld [vmem:[#allocation14 + $0x668] sm:$0xff] }
 0x83e   :  { %4850 = vmatprep.subr.bf16.mxu1 %v4533_v46  ;;  %v4602_v46 = vld [vmem:[#allocation14 + $0x698] sm:$0xff] }
 0x83f   :  { %6442 = vmatpush3.bf16.msra.mxu0 %v4651_v41  ;;  %v4604_v41 = vld [vmem:[#allocation14 + $0x6a8] sm:$0xff] }
 0x840   :  { %6443 = vmatprep.subr.bf16.mxu0 %v4678_v57 }
 0x841   :  { %4851 = vmatpush1.bf16.msra.mxu1 %v4532_v50  ;;  %v4601_v50 = vld [vmem:[#allocation14 + $0x690] sm:$0xff] }
 0x842   :  { %4861 = vmatprep.subr.bf16.mxu1 %v4536_v55  ;;  %v4605_v55 = vld [vmem:[#allocation14 + $0x6b0] sm:$0xff] }
 0x843   :  { %6444 = vmatpush3.bf16.msra.mxu0 %v4654_v42 }
 0x844   :  { %4853 = vmatmul.mubr.bf16.vlgmr.msra.gmra.mrb[28].mxu1 %v7877_v20  ;;  %v4544_v20 = vld [vmem:[#allocation14 + $0x4c8] sm:$0xff] }
 0x845   :  { %4862 = vmatpush1.bf16.msra.mxu1 %v4535_v56  ;;  %4893 = vmatprep.mubr.bf16.mxu1 %v7881_v48  ;;  %v4551_v48 = vld [vmem:[#allocation14 + $0x500] sm:$0xff] }
 0x846   :  { %4863 = vmatprep.subr.bf16.mxu1 %v4539_v58  ;;  %5217 = vmatmul.mubr.bf16.vlgmr.msra.gmra.mrb[36].mxu0 %v7915_v60  ;;  %v4608_v58 = vld [vmem:[#allocation14 + $0x6c8] sm:$0xff] }
 0x849   :  { %4864 = vmatpush1.bf16.msra.mxu1 %v4538_v18 }
 0x84a   :  { %4865 = vmatprep.subr.bf16.mxu1 %v4542_v59 }
 0x84d   :  { %4866 = vmatpush1.bf16.msra.mxu1 %v4541_v61 }
 0x84e   :  { %4867 = vmatprep.subr.bf16.mxu1 %v4545_v62  ;;  %v4607_v62 = vld [vmem:[#allocation14 + $0x6c0] sm:$0xff] }
 0x851   :  { %4868 = vmatpush1.bf16.msra.mxu1 %v4544_v20 }
 0x852   :  { %4869 = vmatprep.subr.bf16.mxu1 %v4548_v1  ;;  %v4611_v1 = vld [vmem:[#allocation14 + $0x6e0] sm:$0xff] }
 0x855   :  { %4870 = vmatpush1.bf16.msra.mxu1 %v4547_v40  ;;  %v4610_v40 = vld [vmem:[#allocation14 + $0x6d8] sm:$0xff] }
 0x856   :  { %4871 = vmatprep.subr.bf16.mxu1 %v4551_v48  ;;  %v4613_v48 = vld [vmem:[#allocation14 + $0x6f0] sm:$0xff] }
 0x859   :  { %4872 = vmatpush1.bf16.msra.mxu1 %v4550_v4  ;;  %v4617_v4 = vld [vmem:[#allocation14 + $0x710] sm:$0xff] }
 0x85a   :  { %4873 = vmatprep.subr.bf16.mxu1 %v4554_v5  ;;  %v4616_v5 = vld [vmem:[#allocation14 + $0x708] sm:$0xff] }
 0x85d   :  { %4874 = vmatpush1.bf16.msra.mxu1 %v4553_v7  ;;  %v4620_v7 = vld [vmem:[#allocation14 + $0x728] sm:$0xff] }
 0x85e   :  { %4875 = vmatprep.subr.bf16.mxu1 %v4557_v3  ;;  %v4619_v3 = vld [vmem:[#allocation14 + $0x720] sm:$0xff] }
 0x861   :  { %4876 = vmatpush1.bf16.msra.mxu1 %v4556_v19  ;;  %v4623_v19 = vld [vmem:[#allocation14 + $0x740] sm:$0xff] }
 0x862   :  { %4877 = vmatprep.subr.bf16.mxu1 %v4560_v51  ;;  %v4622_v51 = vld [vmem:[#allocation14 + $0x738] sm:$0xff] }
 0x865   :  { %4878 = vmatpush1.bf16.msra.mxu1 %v4559_v9  ;;  %v4626_v9 = vld [vmem:[#allocation14 + $0x758] sm:$0xff] }
 0x866   :  { %4879 = vmatprep.subr.bf16.mxu1 %v4563_v8  ;;  %v4625_v8 = vld [vmem:[#allocation14 + $0x750] sm:$0xff] }
 0x869   :  { %4880 = vmatpush1.bf16.msra.mxu1 %v4562_v30  ;;  %v4629_v30 = vld [vmem:[#allocation14 + $0x770] sm:$0xff] }
 0x86a   :  { %4881 = vmatprep.subr.bf16.mxu1 %v4566_v27  ;;  %v4628_v27 = vld [vmem:[#allocation14 + $0x768] sm:$0xff] }
 0x86d   :  { %4882 = vmatpush1.bf16.msra.mxu1 %v4565_v10 }
 0x86e   :  { %4883 = vmatprep.subr.bf16.mxu1 %v4569_v11  ;;  %v4632_v11 = vld [vmem:[#allocation14 + $0x788] sm:$0xff] }
 0x871   :  { %4884 = vmatpush1.bf16.msra.mxu1 %v4568_v12 }
 0x872   :  { %4885 = vmatprep.subr.bf16.mxu1 %v4572_v13 }
 0x875   :  { %4886 = vmatpush1.bf16.msra.mxu1 %v4571_v14 }
 0x876   :  { %4887 = vmatprep.subr.bf16.mxu1 %v4575_v15 }
 0x879   :  { %4888 = vmatpush1.bf16.msra.mxu1 %v4574_v16  ;;  %v6335_v2 = vpop.f32.mrb[16].mxu0  ;;  %v4631_v16 = vld [vmem:[#allocation14 + $0x780] sm:$0xff] }
 0x87a   :  { %4889 = vmatprep.subr.bf16.mxu1 %v4578_v17  ;;  %v6336_v33 = vpop.f32.mrb[17].mxu0 }
 0x87b   :  { %v6337_v26 = vadd.f32 %v6336_v33, %v6335_v2  ;;  %v6338_v31 = vpop.f32.mrb[18].mxu0  ;;  %v4644_v2 = vld [vmem:[#allocation14 + $0x7e8] sm:$0xff]  ;;  %v4643_v33 = vld [vmem:[#allocation14 + $0x7e0] sm:$0xff] }
 0x87c   :  { %v6339_v36 = vpop.f32.mrb[19].mxu0  ;;  %v4653_v31 = vld [vmem:[#allocation14 + $0x830] sm:$0xff] }
 0x87d   :  { %4890 = vmatpush1.bf16.msra.mxu1 %v4577_v24  ;;  %v5019_v56 = vadd.f32 %v6337_v26, %v4692_v54  ;;  %v4635_v24 = vld [vmem:[#allocation14 + $0x7a0] sm:$0xff]  ;;  %v4650_v26 = vld [vmem:[#allocation14 + $0x818] sm:$0xff] }
 0x87e   :  { %4891 = vmatprep.subr.bf16.mxu1 %v4581_v25  ;;  %v4634_v25 = vld [vmem:[#allocation14 + $0x798] sm:$0xff] }
 0x87f   :  { %v4662_v54 = vld [vmem:[#allocation14 + $0x878] sm:$0xff] }
 0x881   :  { %4892 = vmatpush1.bf16.msra.mxu1 %v4580_v6  ;;  %v4638_v6 = vld [vmem:[#allocation14 + $0x7b8] sm:$0xff] }
 0x882   :  { %4902 = vmatprep.subr.bf16.mxu1 %v4584_v29  ;;  %v4637_v29 = vld [vmem:[#allocation14 + $0x7b0] sm:$0xff] }
 0x884   :  { %4894 = vmatmul.mubr.bf16.vlgmr.msra.gmra.mrb[28].mxu1 %v7891_v47  ;;  %v4595_v47 = vld [vmem:[#allocation14 + $0x660] sm:$0xff] }
 0x885   :  { %4903 = vmatpush1.bf16.msra.mxu1 %v4583_v32  ;;  %4934 = vmatprep.mubr.bf16.mxu1 %v7895_v63  ;;  %v4598_v63 = vld [vmem:[#allocation14 + $0x678] sm:$0xff]  ;;  %v4641_v32 = vld [vmem:[#allocation14 + $0x7d0] sm:$0xff] }
 0x886   :  { %4904 = vmatprep.subr.bf16.mxu1 %v4587_v53  ;;  %v4640_v53 = vld [vmem:[#allocation14 + $0x7c8] sm:$0xff] }
 0x889   :  { %4905 = vmatpush1.bf16.msra.mxu1 %v4586_v34  ;;  %v4647_v34 = vld [vmem:[#allocation14 + $0x800] sm:$0xff] }
 0x88a   :  { %4906 = vmatprep.subr.bf16.mxu1 %v4590_v35  ;;  %v4652_v35 = vld [vmem:[#allocation14 + $0x828] sm:$0xff] }
 0x88d   :  { %4907 = vmatpush1.bf16.msra.mxu1 %v4589_v37  ;;  %v4656_v37 = vld [vmem:[#allocation14 + $0x848] sm:$0xff] }
 0x88e   :  { %4908 = vmatprep.subr.bf16.mxu1 %v4593_v38 }
 0x891   :  { %4909 = vmatpush1.bf16.msra.mxu1 %v4592_v39 }
 0x892   :  { %4910 = vmatprep.subr.bf16.mxu1 %v4596_v28 }
 0x895   :  { %4911 = vmatpush1.bf16.msra.mxu1 %v4595_v47 }
 0x896   :  { %4912 = vmatprep.subr.bf16.mxu1 %v4599_v44  ;;  %v4655_v44 = vld [vmem:[#allocation14 + $0x840] sm:$0xff] }
 0x899   :  { %4913 = vmatpush1.bf16.msra.mxu1 %v4598_v63  ;;  %v6357_v57 = vpop.f32.mrb[20].mxu0 }
 0x89a   :  { %4914 = vmatprep.subr.bf16.mxu1 %v4602_v46  ;;  %v6358_v42 = vpop.f32.mrb[21].mxu0  ;;  %v4659_v46 = vld [vmem:[#allocation14 + $0x860] sm:$0xff] }
 0x89b   :  { %v6359_v18 = vadd.f32 %v6358_v42, %v6357_v57  ;;  %v6360_v59 = vpop.f32.mrb[22].mxu0  ;;  %v4668_v57 = vld [vmem:[#allocation14 + $0x8a8] sm:$0xff]  ;;  %v4671_v42 = vld [vmem:[#allocation14 + $0x8c0] sm:$0xff] }
 0x89c   :  { %v6361_v61 = vpop.f32.mrb[23].mxu0  ;;  %v4674_v59 = vld [vmem:[#allocation14 + $0x8d8] sm:$0xff] }
 0x89d   :  { %4915 = vmatpush1.bf16.msra.mxu1 %v4601_v50  ;;  %v5059_v20 = vadd.f32 %v6359_v18, %v5019_v56  ;;  %v4658_v50 = vld [vmem:[#allocation14 + $0x858] sm:$0xff]  ;;  %v4664_v56 = vld [vmem:[#allocation14 + $0x888] sm:$0xff]  ;;  %v4673_v61 = vld [vmem:[#allocation14 + $0x8d0] sm:$0xff] }
 0x89e   :  { %4916 = vmatprep.subr.bf16.mxu1 %v4605_v55  ;;  %v4661_v55 = vld [vmem:[#allocation14 + $0x870] sm:$0xff]  ;;  %v4670_v18 = vld [vmem:[#allocation14 + $0x8b8] sm:$0xff] }
 0x8a1   :  { %4917 = vmatpush1.bf16.msra.mxu1 %v4604_v41  ;;  %v4665_v41 = vld [vmem:[#allocation14 + $0x890] sm:$0xff] }
 0x8a2   :  { %4918 = vmatprep.subr.bf16.mxu1 %v4608_v58  ;;  %v4667_v58 = vld [vmem:[#allocation14 + $0x8a0] sm:$0xff] }
 0x8a5   :  { %4919 = vmatpush1.bf16.msra.mxu1 %v4607_v62  ;;  %v4677_v62 = vld [vmem:[#allocation14 + $0x8f0] sm:$0xff] }
 0x8a6   :  { %4920 = vmatprep.subr.bf16.mxu1 %v4611_v1 }
 0x8a9   :  { %4921 = vmatpush1.bf16.msra.mxu1 %v4610_v40 }
 0x8aa   :  { %4922 = vmatprep.subr.bf16.mxu1 %v4614_v45 }
 0x8ad   :  { %4923 = vmatpush1.bf16.msra.mxu1 %v4613_v48 }
 0x8ae   :  { %4924 = vmatprep.subr.bf16.mxu1 %v4617_v4 }
 0x8b1   :  { %4925 = vmatpush1.bf16.msra.mxu1 %v4616_v5 }
 0x8b2   :  { %4926 = vmatprep.subr.bf16.mxu1 %v4620_v7 }
 0x8b5   :  { %4927 = vmatpush1.bf16.msra.mxu1 %v4619_v3 }
 0x8b6   :  { %4928 = vmatprep.subr.bf16.mxu1 %v4623_v19 }
 0x8b9   :  { %4929 = vmatpush1.bf16.msra.mxu1 %v4622_v51  ;;  %v6379_v10 = vpop.f32.mrb[24].mxu0 }
 0x8ba   :  { %4930 = vmatprep.subr.bf16.mxu1 %v4626_v9  ;;  %v6380_v12 = vpop.f32.mrb[25].mxu0 }
 0x8bb   :  { %v6381_v13 = vadd.f32 %v6380_v12, %v6379_v10  ;;  %v6382_v14 = vpop.f32.mrb[26].mxu0  ;;  %v4688_v10 = vrot.slane %v7920_v49, %v7698_v22 }
 0x8bc   :  { %v6383_v15 = vpop.f32.mrb[27].mxu0 }
 0x8bd   :  { %4931 = vmatpush1.bf16.msra.mxu1 %v4625_v8  ;;  %v5099_v17 = vadd.f32 %v6381_v13, %v5059_v20  ;;  %v4676_v20 = vld [vmem:[#allocation14 + $0x8e8] sm:$0xff] }
 0x8be   :  { %4932 = vmatprep.subr.bf16.mxu1 %v4629_v30 }
 0x8c1   :  { %4933 = vmatpush1.bf16.msra.mxu1 %v4628_v27  ;;  %v4684_v27 = vrot.slane %v7920_v49, %v7695_v21 }
 0x8c2   :  { %4943 = vmatprep.subr.bf16.mxu1 %v4632_v11 }
 0x8c4   :  { %4935 = vmatmul.mubr.bf16.vlgmr.msra.gmra.mrb[28].mxu1 %v7903_v52  ;;  %v4646_v52 = vld [vmem:[#allocation14 + $0x7f8] sm:$0xff] }
 0x8c5   :  { %4944 = vmatpush1.bf16.msra.mxu1 %v4631_v16  ;;  %4975 = vmatprep.mubr.bf16.mxu1 %v7907_v23  ;;  %v4649_v23 = vld [vmem:[#allocation14 + $0x810] sm:$0xff] }
 0x8c6   :  { %4945 = vmatprep.subr.bf16.mxu1 %v4635_v24 }
 0x8c9   :  { %4946 = vmatpush1.bf16.msra.mxu1 %v4634_v25 }
 0x8ca   :  { %4947 = vmatprep.subr.bf16.mxu1 %v4638_v6 }
 0x8cd   :  { %4948 = vmatpush1.bf16.msra.mxu1 %v4637_v29 }
 0x8ce   :  { %4949 = vmatprep.subr.bf16.mxu1 %v4641_v32 }
 0x8d1   :  { %4950 = vmatpush1.bf16.msra.mxu1 %v4640_v53 }
 0x8d2   :  { %4951 = vmatprep.subr.bf16.mxu1 %v4644_v2 }
 0x8d5   :  { %4952 = vmatpush1.bf16.msra.mxu1 %v4643_v33 }
 0x8d6   :  { %4953 = vmatprep.subr.bf16.mxu1 %v4647_v34 }
 0x8d9   :  { %4954 = vmatpush1.bf16.msra.mxu1 %v4646_v52  ;;  %v6401_v36 = vpop.f32.mrb[28].mxu0 }
 0x8da   :  { %4955 = vmatprep.subr.bf16.mxu1 %v4650_v26  ;;  %v6402_v38 = vpop.f32.mrb[29].mxu0 }
 0x8db   :  { %v6403_v39 = vadd.f32 %v6402_v38, %v6401_v36  ;;  %v6404_v28 = vpop.f32.mrb[30].mxu0 }
 0x8dc   :  { %v6405_v47 = vpop.f32.mrb[31].mxu0 }
 0x8dd   :  { %4956 = vmatpush1.bf16.msra.mxu1 %v4649_v23  ;;  %v5139_v63 = vadd.f32 %v6403_v39, %v5099_v17 }
 0x8de   :  { %4957 = vmatprep.subr.bf16.mxu1 %v4653_v31 }
 0x8e1   :  { %4958 = vmatpush1.bf16.msra.mxu1 %v4652_v35 }
 0x8e2   :  { %4959 = vmatprep.subr.bf16.mxu1 %v4656_v37 }
 0x8e5   :  { %4960 = vmatpush1.bf16.msra.mxu1 %v4655_v44 }
 0x8e6   :  { %4961 = vmatprep.subr.bf16.mxu1 %v4659_v46 }
 0x8e9   :  { %4962 = vmatpush1.bf16.msra.mxu1 %v4658_v50 }
 0x8ea   :  { %4963 = vmatprep.subr.bf16.mxu1 %v4662_v54 }
 0x8ed   :  { %4964 = vmatpush1.bf16.msra.mxu1 %v4661_v55 }
 0x8ee   :  { %4965 = vmatprep.subr.bf16.mxu1 %v4665_v41 }
 0x8f1   :  { %4966 = vmatpush1.bf16.msra.mxu1 %v4664_v56 }
 0x8f2   :  { %4967 = vmatprep.subr.bf16.mxu1 %v4668_v57 }
 0x8f5   :  { %4968 = vmatpush1.bf16.msra.mxu1 %v4667_v58 }
 0x8f6   :  { %4969 = vmatprep.subr.bf16.mxu1 %v4671_v42 }
 0x8f9   :  { %4970 = vmatpush1.bf16.msra.mxu1 %v4670_v18  ;;  %v6423_v1 = vpop.f32.mrb[32].mxu0 }
 0x8fa   :  { %4971 = vmatprep.subr.bf16.mxu1 %v4674_v59  ;;  %v6424_v40 = vpop.f32.mrb[33].mxu0 }
 0x8fb   :  { %v6425_v45 = vadd.f32 %v6424_v40, %v6423_v1  ;;  %v6426_v48 = vpop.f32.mrb[34].mxu0 }
 0x8fc   :  { %v6427_v4 = vpop.f32.mrb[35].mxu0 }
 0x8fd   :  { %4972 = vmatpush1.bf16.msra.mxu1 %v4673_v61  ;;  %v5179_v5 = vadd.f32 %v6425_v45, %v5139_v63 }
 0x8fe   :  { %4973 = vmatprep.subr.bf16.mxu1 %v4677_v62 }
 0x901   :  { %4974 = vmatpush1.bf16.msra.mxu1 %v4676_v20 }
 0x904   :  { %4976 = vmatmul.mubr.bf16.vlgmr.msra.gmra.mrb[28].mxu1 %v7915_v60 }
 0x919   :  { %v6445_v7 = vpop.f32.mrb[36].mxu0 }
 0x91a   :  { %v6446_v3 = vpop.f32.mrb[37].mxu0 }
 0x91b   :  { %v6447_v19 = vadd.f32 %v6446_v3, %v6445_v7  ;;  %v6448_v51 = vpop.f32.mrb[38].mxu0 }
 0x91c   :  { %v6449_v9 = vpop.f32.mrb[39].mxu0 }
 0x91d   :  { %v5219_v8 = vadd.f32 %v6447_v19, %v5179_v5 }
 0x91f   :  { %v5226_v30 = vmax.f32 %v5219_v8, 0.0 }
 0x921   :  { %5229 = vst [vmem:[#allocation5 + $0x10] sm:$0x3f] %v5226_v30 }
 0x9d7   :  { %v4977_v11 = vpop.f32.mrb[28].mxu1 }
 0x9d8   :  { %v6703_v12 = vadd.f32 %v4977_v11, %v4684_v27  ;;  %v4979_v13 = vpop.f32.mrb[29].mxu1 }
 0x9d9   :  { %v6704_v14 = vadd.f32 %v4979_v13, %v4688_v10  ;;  %v4981_v15 = vpop.f32.mrb[30].mxu1 }
 0x9da   :  { %v5224_v60 = vmax.f32 %v6703_v12, 0.0  ;;  %v4982_v16 = vpop.f32.mrb[31].mxu1 }
 0x9db   :  { %v5225_v17 = vmax.f32 %v6704_v14, 0.0 }
 0x9dc   :  { %5227 = vst [vmem:[#allocation5] sm:$0x3f] %v5224_v60 }
 0x9dd   :  { %5228 = vst [vmem:[#allocation5 + $0x8] sm:$0x3f] %v5225_v17 }
 0x9de   :  { %7327 = dma.done.wait [#allocation16 + $0x3], 12288 }
 0x9df   :  { %7328 = vsyncadd [#allocation16 + $0x3], 4294955008  ;;  %v5301_v24 = vld [vmem:[#allocation15 + $0x8] sm:$0xff]  ;;  %v5300_v25 = vld [vmem:[#allocation15] sm:$0xff]  ;;  %v7364_v49 = vmov 1983009808  }
 0x9e0   :  { %v5303_v6 = vld [vmem:[#allocation15 + $0x18] sm:$0xff]  ;;  %5441 = vmatprep.subr.bf16.mxu0 %v5301_v24  ;;  %v5302_v29 = vld [vmem:[#allocation15 + $0x10] sm:$0xff]  ;;  %v5245_v32 = vunpack.c.l.s4 %v7364_v49  ;;  %v5305_v53 = vld [vmem:[#allocation15 + $0x28] sm:$0xff]  ;;  %vm5287_vm9 = vcmask 1042434   ;;  %vm5290_vm12 = vcmask 1046534   ;;  %vm7366_vm14 = vmmov 0  }
 0x9e1   :  { %5442 = vmatpush1.bf16.msra.mxu0 %v5300_v25  ;;  %v5304_v2 = vld [vmem:[#allocation15 + $0x20] sm:$0xff]  ;;  %v5307_v34 = vld [vmem:[#allocation15 + $0x38] sm:$0xff]  ;;  %v5306_v52 = vld [vmem:[#allocation15 + $0x30] sm:$0xff] }
 0x9e2   :  { %5443 = vmatprep.subr.bf16.mxu0 %v5303_v6  ;;  %v5246_v33 = vunpack.c.0.s8 %v5245_v32  ;;  %vm7932_vm10 = vmor %vm1799_vm6, %vm5287_vm9  ;;  %v5236_v35 = vld [vmem:[#allocation5 + $0x10] sm:$0xf]  ;;  %v5309_v38 = vld [vmem:[#allocation15 + $0x48] sm:$0xff] }
 0x9e3   :  { %v5234_v26 = vld [vmem:[#allocation5] sm:$0xf]  ;;  %v5239_v39 = vpack.c.bf16 %v5236_v35, %v5236_v35  ;;  %v5263_v44 = vld [vmem:[#allocation5 + $0x10] sm:$0x3c]  ;;  %vm5289_vm11 = vmor %vm7932_vm10, %vm1800_vm7 }
 0x9e4   :  { %v5235_v31 = vld [vmem:[#allocation5 + $0x8] sm:$0xf]  ;;  %v7937_v36 = vsub.s32 %v5246_v33, %v7686_v43  ;;  %v5261_v37 = vld [vmem:[#allocation5] sm:$0x3c]  ;;  %v5266_v63 = vpack.c.bf16 %v5263_v44, %v5263_v44  ;;  %v5308_v55 = vld [vmem:[#allocation15 + $0x40] sm:$0xff] }
 0x9e5   :  { %5444 = vmatpush1.bf16.msra.mxu0 %v5302_v29  ;;  %v6184_v28 = vpack.c.bf16 %v5235_v31, %v5234_v26  ;;  %v5262_v47 = vld [vmem:[#allocation5 + $0x8] sm:$0x3c]  ;;  %vm5291_vm13 = vmor %vm5289_vm11, %vm5290_vm12  ;;  %v5310_v18 = vld [vmem:[#allocation15 + $0x50] sm:$0xff] }
 0x9e6   :  { %5445 = vmatprep.subr.bf16.mxu0 %v5305_v53  ;;  %v6185_v46 = vpack.c.bf16 %v5262_v47, %v5261_v37  ;;  %v5257_v54 = vrot.slane %v5239_v39, %v7937_v36  ;;  %v5284_v43 = vrot.slane %v5266_v63, %v7937_v36  ;;  %v5311_v56 = vld [vmem:[#allocation15 + $0x58] sm:$0xff]  ;;  %v5313_v62 = vld [vmem:[#allocation15 + $0x68] sm:$0xff]  ;;  %v5312_v1 = vld [vmem:[#allocation15 + $0x60] sm:$0xff] }
 0x9e7   :  { %v5250_v50 = vrot.slane %v6184_v28, %v7937_v36  ;;  %v5315_v40 = vld [vmem:[#allocation15 + $0x78] sm:$0xff]  ;;  %v5314_v45 = vld [vmem:[#allocation15 + $0x70] sm:$0xff]  ;;  %v5317_v48 = vld [vmem:[#allocation15 + $0x88] sm:$0xff] }
 0x9e8   :  { %v5277_v41 = vrot.slane %v6185_v46, %v7937_v36  ;;  %v5316_v7 = vld [vmem:[#allocation15 + $0x80] sm:$0xff]  ;;  %v5319_v3 = vld [vmem:[#allocation15 + $0x98] sm:$0xff]  ;;  %v5318_v51 = vld [vmem:[#allocation15 + $0x90] sm:$0xff] }
 0x9e9   :  { %5446 = vmatpush1.bf16.msra.mxu0 %v5304_v2  ;;  %v5258_v57 = vcombine.low %v5250_v50, %v5257_v54  ;;  %v5321_v9 = vld [vmem:[#allocation15 + $0xa8] sm:$0xff]  ;;  %v5320_v8 = vld [vmem:[#allocation15 + $0xa0] sm:$0xff]  ;;  %v5323_v30 = vld [vmem:[#allocation15 + $0xb8] sm:$0xff] }
 0x9ea   :  { %5447 = vmatprep.subr.bf16.mxu0 %v5307_v34  ;;  %v5285_v58 = vcombine.low %v5277_v41, %v5284_v43  ;;  %v5286_v42 = vcombine.high %v5277_v41, %v5284_v43  ;;  %v5322_v27 = vld [vmem:[#allocation15 + $0xb0] sm:$0xff]  ;;  %v5325_v10 = vld [vmem:[#allocation15 + $0xc8] sm:$0xff]  ;;  %v5324_v11 = vld [vmem:[#allocation15 + $0xc0] sm:$0xff] }
 0x9eb   :  { %5260 = vst [vmem:[#allocation11] sm:$0x3f] %v5258_v57  ;;  %v5327_v12 = vld [vmem:[#allocation15 + $0xd8] sm:$0xff]  ;;  %v5326_v13 = vld [vmem:[#allocation15 + $0xd0] sm:$0xff]  ;;  %v5329_v14 = vld [vmem:[#allocation15 + $0xe8] sm:$0xff] }
 0x9ec   :  { %v6186_v59 = vrot.slane %v5285_v58, 9  ;;  %v5294_v61 = vrot.slane %v5286_v42, 7  ;;  %v5328_v60 = vld [vmem:[#allocation15 + $0xe0] sm:$0xff]  ;;  %v5331_v16 = vld [vmem:[#allocation15 + $0xf8] sm:$0xff]  ;;  %v5330_v24 = vld [vmem:[#allocation15 + $0xf0] sm:$0xff] }
 0x9ed   :  { %5448 = vmatpush1.bf16.msra.mxu0 %v5306_v52  ;;  %v5333_v25 = vld [vmem:[#allocation15 + $0x108] sm:$0xff]  ;;  %v5332_v29 = vld [vmem:[#allocation15 + $0x100] sm:$0xff]  ;;  %v5335_v49 = vld [vmem:[#allocation15 + $0x118] sm:$0xff] }
 0x9ee   :  { %5449 = vmatprep.subr.bf16.mxu0 %v5309_v38  ;;  %v5295_v20 = vsel %vm5291_vm13, %v6186_v59, %v5294_v61  ;;  %v5334_v32 = vld [vmem:[#allocation15 + $0x110] sm:$0xff]  ;;  %v5590_v2 = vld [vmem:[#allocation27 + $0x88] sm:$0xff]  ;;  %v5591_v26 = vld [vmem:[#allocation27 + $0x90] sm:$0xff] }
 0x9ef   :  { %5297 = vst [vmem:[#allocation11 + $0x6] sm:$0x3f] %v5295_v20  ;;  %v5589_v53 = vld [vmem:[#allocation27 + $0x80] sm:$0xff]  ;;  %v5574_v52 = vld [vmem:[#allocation27 + $0x8] sm:$0xff]  ;;  %v5592_v23 = vld [vmem:[#allocation27 + $0x98] sm:$0xff] }
 0x9f0   :  { %v5573_v33 = vld [vmem:[#allocation27] sm:$0xff]  ;;  %v6593_v34 = vpack.c.bf16 %v5590_v2, %v5589_v53  ;;  %v6597_v35 = vpack.c.bf16 %v5592_v23, %v5591_v26  ;;  %v5576_v37 = vld [vmem:[#allocation27 + $0x18] sm:$0xff]  ;;  %v5594_v28 = vld [vmem:[#allocation27 + $0xa8] sm:$0xff] }
 0x9f1   :  { %5450 = vmatpush1.bf16.msra.mxu0 %v5308_v55  ;;  %v6595_v31 = vpack.c.bf16 %v5574_v52, %v5573_v33  ;;  %v5593_v38 = vld [vmem:[#allocation27 + $0xa0] sm:$0xff]  ;;  %v5337_v39 = vld [vmem:[#allocation15 + $0x128] sm:$0xff]  ;;  %v5578_v46 = vld [vmem:[#allocation27 + $0x28] sm:$0xff] }
 0x9f2   :  { %5451 = vmatprep.subr.bf16.mxu0 %v5311_v56  ;;  %6594 = vmatprep.subr.bf16.mxu1 %v6593_v34  ;;  %v6601_v44 = vpack.c.bf16 %v5594_v28, %v5593_v38  ;;  %v5577_v63 = vld [vmem:[#allocation27 + $0x20] sm:$0xff]  ;;  %v5336_v50 = vld [vmem:[#allocation15 + $0x120] sm:$0xff]  ;;  %v5596_v55 = vld [vmem:[#allocation27 + $0xb8] sm:$0xff] }
 0x9f3   :  { %6596 = vmatpush3.bf16.msra.mxu1 %v6595_v31  ;;  %v5595_v54 = vld [vmem:[#allocation27 + $0xb0] sm:$0xff]  ;;  %v5339_v41 = vld [vmem:[#allocation15 + $0x138] sm:$0xff]  ;;  %v6603_v43 = vpack.c.bf16 %v5578_v46, %v5577_v63  ;;  %v5580_v58 = vld [vmem:[#allocation27 + $0x38] sm:$0xff] }
 0x9f4   :  { %6598 = vmatprep.subr.bf16.mxu1 %v6597_v35  ;;  %v6605_v56 = vpack.c.bf16 %v5596_v55, %v5595_v54  ;;  %v5579_v57 = vld [vmem:[#allocation27 + $0x30] sm:$0xff]  ;;  %v5338_v42 = vld [vmem:[#allocation15 + $0x130] sm:$0xff]  ;;  %v5371_v53 = vld [vmem:[#allocation15 + $0x238] sm:$0xff] }
 0x9f5   :  { %5452 = vmatpush1.bf16.msra.mxu0 %v5310_v18  ;;  %v5341_v18 = vld [vmem:[#allocation15 + $0x148] sm:$0xff]  ;;  %v6607_v59 = vpack.c.bf16 %v5580_v58, %v5579_v57  ;;  %v5340_v61 = vld [vmem:[#allocation15 + $0x140] sm:$0xff]  ;;  %v5342_v20 = vld [vmem:[#allocation15 + $0x150] sm:$0xff] }
 0x9f6   :  { %5453 = vmatprep.subr.bf16.mxu0 %v5313_v62  ;;  %v5298_v4 = vld [vmem:[#allocation11] sm:$0xff]  ;;  %v5373_v33 = vld [vmem:[#allocation15 + $0x248] sm:$0xff]  ;;  %v5372_v34 = vld [vmem:[#allocation15 + $0x240] sm:$0xff] }
 0x9f7   :  { %v5417_v5 = vrot.slane %v5298_v4, %v7937_v36  ;;  %v5410_v15 = vcombine.high %v5298_v4, %v5298_v4  ;;  %v5343_v62 = vld [vmem:[#allocation15 + $0x158] sm:$0xff]  ;;  %v5349_v4 = vld [vmem:[#allocation15 + $0x188] sm:$0xff]  ;;  %v5370_v2 = vld [vmem:[#allocation15 + $0x230] sm:$0xff] }
 0x9f8   :  { %v5375_v52 = vld [vmem:[#allocation15 + $0x258] sm:$0xff]  ;;  %v5377_v26 = vld [vmem:[#allocation15 + $0x268] sm:$0xff]  ;;  %v5376_v23 = vld [vmem:[#allocation15 + $0x260] sm:$0xff] }
 0x9f9   :  { %5454 = vmatpush1.bf16.msra.mxu0 %v5312_v1  ;;  %v5425_v19 = vcombine.high %v5417_v5, %v5417_v5  ;;  %v7948_v17 = vrot.slane %v5410_v15, %v7937_v36  ;;  %v5575_v36 = vld [vmem:[#allocation27 + $0x10] sm:$0xff]  ;;  %v5362_v15 = vld [vmem:[#allocation15 + $0x1f0] sm:$0xff]  ;;  %v5379_v31 = vld [vmem:[#allocation15 + $0x278] sm:$0xff] }
 0x9fa   :  { %5455 = vmatprep.subr.bf16.mxu0 %v5315_v40  ;;  %v6599_v47 = vpack.c.bf16 %v5576_v37, %v5575_v36  ;;  %v5345_v1 = vld [vmem:[#allocation15 + $0x168] sm:$0xff]  ;;  %v5344_v40 = vld [vmem:[#allocation15 + $0x160] sm:$0xff]  ;;  %v5378_v35 = vld [vmem:[#allocation15 + $0x270] sm:$0xff] }
 0x9fb   :  { %5473 = vmatprep.mubr.bf16.mxu0 %v5425_v19  ;;  %v5426_v6 = vcombine.high %v7948_v17, %v7948_v17  ;;  %v5353_v19 = vld [vmem:[#allocation15 + $0x1a8] sm:$0xff]  ;;  %v5380_v37 = vld [vmem:[#allocation15 + $0x280] sm:$0xff]  ;;  %v5383_v38 = vld [vmem:[#allocation15 + $0x298] sm:$0xff] }
 0x9fc   :  { %6600 = vmatpush3.bf16.msra.mxu1 %v6599_v47  ;;  %v5381_v36 = vld [vmem:[#allocation15 + $0x288] sm:$0xff]  ;;  %v5384_v47 = vld [vmem:[#allocation15 + $0x2a0] sm:$0xff]  ;;  %v5386_v63 = vld [vmem:[#allocation15 + $0x2b0] sm:$0xff] }
 0x9fd   :  { %5456 = vmatpush1.bf16.msra.mxu0 %v5314_v45  ;;  %6602 = vmatprep.subr.bf16.mxu1 %v6601_v44  ;;  %v5347_v45 = vld [vmem:[#allocation15 + $0x178] sm:$0xff]  ;;  %v5385_v28 = vld [vmem:[#allocation15 + $0x2a8] sm:$0xff]  ;;  %v5390_v55 = vld [vmem:[#allocation15 + $0x2d0] sm:$0xff] }
 0x9fe   :  { %5457 = vmatprep.subr.bf16.mxu0 %v5317_v48  ;;  %v5346_v48 = vld [vmem:[#allocation15 + $0x170] sm:$0xff]  ;;  %v5387_v44 = vld [vmem:[#allocation15 + $0x2b8] sm:$0xff]  ;;  %v5389_v46 = vld [vmem:[#allocation15 + $0x2c8] sm:$0xff] }
 0x9ff   :  { %v5391_v54 = vld [vmem:[#allocation15 + $0x2d8] sm:$0xff]  ;;  %v5394_v57 = vld [vmem:[#allocation15 + $0x2f0] sm:$0xff] }
 0xa00   :  { %6604 = vmatpush3.bf16.msra.mxu1 %v6603_v43  ;;  %v5392_v43 = vld [vmem:[#allocation15 + $0x2e0] sm:$0xff]  ;;  %v5597_v58 = vld [vmem:[#allocation27 + $0xc0] sm:$0xff] }
 0xa01   :  { %5458 = vmatpush1.bf16.msra.mxu0 %v5316_v7  ;;  %6606 = vmatprep.subr.bf16.mxu1 %v6605_v56  ;;  %v5351_v7 = vld [vmem:[#allocation15 + $0x198] sm:$0xff] }
 0xa02   :  { %5459 = vmatprep.subr.bf16.mxu0 %v5319_v3  ;;  %v5350_v3 = vld [vmem:[#allocation15 + $0x190] sm:$0xff]  ;;  %v5395_v56 = vld [vmem:[#allocation15 + $0x2f8] sm:$0xff] }
 0xa04   :  { %6608 = vmatpush3.bf16.msra.mxu1 %v6607_v59  ;;  %v5581_v59 = vld [vmem:[#allocation27 + $0x40] sm:$0xff] }
 0xa05   :  { %5460 = vmatpush1.bf16.msra.mxu0 %v5318_v51  ;;  %v5352_v51 = vld [vmem:[#allocation15 + $0x1a0] sm:$0xff] }
 0xa06   :  { %5461 = vmatprep.subr.bf16.mxu0 %v5321_v9  ;;  %v5355_v9 = vld [vmem:[#allocation15 + $0x1b8] sm:$0xff] }
 0xa09   :  { %5462 = vmatpush1.bf16.msra.mxu0 %v5320_v8  ;;  %v5354_v8 = vld [vmem:[#allocation15 + $0x1b0] sm:$0xff] }
 0xa0a   :  { %5463 = vmatprep.subr.bf16.mxu0 %v5323_v30  ;;  %v5357_v30 = vld [vmem:[#allocation15 + $0x1c8] sm:$0xff] }
 0xa0d   :  { %5464 = vmatpush1.bf16.msra.mxu0 %v5322_v27  ;;  %v5356_v27 = vld [vmem:[#allocation15 + $0x1c0] sm:$0xff] }
 0xa0e   :  { %5465 = vmatprep.subr.bf16.mxu0 %v5325_v10  ;;  %v5359_v10 = vld [vmem:[#allocation15 + $0x1d8] sm:$0xff] }
 0xa11   :  { %5466 = vmatpush1.bf16.msra.mxu0 %v5324_v11  ;;  %v5358_v11 = vld [vmem:[#allocation15 + $0x1d0] sm:$0xff] }
 0xa12   :  { %5467 = vmatprep.subr.bf16.mxu0 %v5327_v12  ;;  %v5361_v12 = vld [vmem:[#allocation15 + $0x1e8] sm:$0xff] }
 0xa15   :  { %5468 = vmatpush1.bf16.msra.mxu0 %v5326_v13  ;;  %v5360_v13 = vld [vmem:[#allocation15 + $0x1e0] sm:$0xff] }
 0xa16   :  { %5469 = vmatprep.subr.bf16.mxu0 %v5329_v14  ;;  %v5363_v14 = vld [vmem:[#allocation15 + $0x1f8] sm:$0xff] }
 0xa19   :  { %5470 = vmatpush1.bf16.msra.mxu0 %v5328_v60  ;;  %v7952_v60 = vld.sshfl [vmem:[#allocation11 + $0x8] sm:$0x33 pattern:$0x76325410] }
 0xa1a   :  { %5471 = vmatprep.subr.bf16.mxu0 %v5331_v16  ;;  %v5365_v16 = vld [vmem:[#allocation15 + $0x208] sm:$0xff] }
 0xa1d   :  { %5472 = vmatpush1.bf16.msra.mxu0 %v5330_v24  ;;  %v5434_v24 = vcombine.high %v7952_v60, %v7952_v60 }
 0xa1e   :  { %5482 = vmatprep.subr.bf16.mxu0 %v5333_v25  ;;  %v5364_v25 = vld [vmem:[#allocation15 + $0x200] sm:$0xff] }
 0xa20   :  { %5474 = vmatmul.mubr.bf16.vlgmr.msra.gmra.mrb[40].mxu0 %v5417_v5  ;;  %v5348_v5 = vld [vmem:[#allocation15 + $0x180] sm:$0xff] }
 0xa21   :  { %5483 = vmatpush1.bf16.msra.mxu0 %v5332_v29  ;;  %5514 = vmatprep.mubr.bf16.mxu0 %v5426_v6  ;;  %v5367_v6 = vld [vmem:[#allocation15 + $0x218] sm:$0xff]  ;;  %v5366_v29 = vld [vmem:[#allocation15 + $0x210] sm:$0xff] }
 0xa22   :  { %5484 = vmatprep.subr.bf16.mxu0 %v5335_v49  ;;  %v5369_v49 = vld [vmem:[#allocation15 + $0x228] sm:$0xff] }
 0xa25   :  { %5485 = vmatpush1.bf16.msra.mxu0 %v5334_v32  ;;  %v5368_v32 = vld [vmem:[#allocation15 + $0x220] sm:$0xff] }
 0xa26   :  { %5486 = vmatprep.subr.bf16.mxu0 %v5337_v39  ;;  %v5382_v39 = vld [vmem:[#allocation15 + $0x290] sm:$0xff] }
 0xa29   :  { %5487 = vmatpush1.bf16.msra.mxu0 %v5336_v50  ;;  %v5388_v50 = vld [vmem:[#allocation15 + $0x2c0] sm:$0xff] }
 0xa2a   :  { %5488 = vmatprep.subr.bf16.mxu0 %v5339_v41  ;;  %v5393_v41 = vld [vmem:[#allocation15 + $0x2e8] sm:$0xff] }
 0xa2d   :  { %5489 = vmatpush1.bf16.msra.mxu0 %v5338_v42  ;;  %v5598_v42 = vld [vmem:[#allocation27 + $0xc8] sm:$0xff] }
 0xa2e   :  { %5490 = vmatprep.subr.bf16.mxu0 %v5341_v18  ;;  %v6609_v18 = vpack.c.bf16 %v5598_v42, %v5597_v58  ;;  %v5694_v58 = vld [vmem:[#allocation27 + $0x138] sm:$0xff]  ;;  %v5711_v42 = vld [vmem:[#allocation27 + $0x1c0] sm:$0xff] }
 0xa30   :  { %6610 = vmatprep.subr.bf16.mxu1 %v6609_v18  ;;  %v5712_v18 = vld [vmem:[#allocation27 + $0x1c8] sm:$0xff] }
 0xa31   :  { %5491 = vmatpush1.bf16.msra.mxu0 %v5340_v61  ;;  %v5582_v61 = vld [vmem:[#allocation27 + $0x48] sm:$0xff] }
 0xa32   :  { %5492 = vmatprep.subr.bf16.mxu0 %v5343_v62  ;;  %v6611_v62 = vpack.c.bf16 %v5582_v61, %v5581_v59  ;;  %v6641_v61 = vpack.c.bf16 %v5712_v18, %v5711_v42 }
 0xa34   :  { %6612 = vmatpush3.bf16.msra.mxu1 %v6611_v62  ;;  %v5695_v62 = vld [vmem:[#allocation27 + $0x140] sm:$0xff] }
 0xa35   :  { %5493 = vmatpush1.bf16.msra.mxu0 %v5342_v20  ;;  %v5599_v20 = vld [vmem:[#allocation27 + $0xd0] sm:$0xff] }
 0xa36   :  { %5494 = vmatprep.subr.bf16.mxu0 %v5345_v1  ;;  %v5600_v1 = vld [vmem:[#allocation27 + $0xd8] sm:$0xff] }
 0xa39   :  { %5495 = vmatpush1.bf16.msra.mxu0 %v5344_v40  ;;  %v6613_v40 = vpack.c.bf16 %v5600_v1, %v5599_v20  ;;  %v5696_v20 = vld [vmem:[#allocation27 + $0x148] sm:$0xff]  ;;  %v5713_v1 = vld [vmem:[#allocation27 + $0x1d0] sm:$0xff] }
 0xa3a   :  { %5496 = vmatprep.subr.bf16.mxu0 %v5347_v45  ;;  %v5583_v45 = vld [vmem:[#allocation27 + $0x50] sm:$0xff] }
 0xa3b   :  { %6614 = vmatprep.subr.bf16.mxu1 %v6613_v40  ;;  %v5714_v40 = vld [vmem:[#allocation27 + $0x1d8] sm:$0xff] }
 0xa3d   :  { %5497 = vmatpush1.bf16.msra.mxu0 %v5346_v48  ;;  %v5584_v48 = vld [vmem:[#allocation27 + $0x58] sm:$0xff] }
 0xa3e   :  { %5498 = vmatprep.subr.bf16.mxu0 %v5349_v4  ;;  %v6615_v4 = vpack.c.bf16 %v5584_v48, %v5583_v45  ;;  %v6643_v45 = vpack.c.bf16 %v5696_v20, %v5695_v62  ;;  %v6645_v48 = vpack.c.bf16 %v5714_v40, %v5713_v1 }
 0xa40   :  { %6616 = vmatpush3.bf16.msra.mxu1 %v6615_v4  ;;  %v5697_v4 = vld [vmem:[#allocation27 + $0x150] sm:$0xff] }
 0xa41   :  { %5499 = vmatpush1.bf16.msra.mxu0 %v5348_v5  ;;  %v5601_v5 = vld [vmem:[#allocation27 + $0xe0] sm:$0xff] }
 0xa42   :  { %5500 = vmatprep.subr.bf16.mxu0 %v5351_v7  ;;  %v5602_v7 = vld [vmem:[#allocation27 + $0xe8] sm:$0xff] }
 0xa45   :  { %5501 = vmatpush1.bf16.msra.mxu0 %v5350_v3  ;;  %v6617_v3 = vpack.c.bf16 %v5602_v7, %v5601_v5  ;;  %v5698_v5 = vld [vmem:[#allocation27 + $0x158] sm:$0xff]  ;;  %v5715_v7 = vld [vmem:[#allocation27 + $0x1e0] sm:$0xff] }
 0xa46   :  { %5502 = vmatprep.subr.bf16.mxu0 %v5353_v19  ;;  %v5585_v19 = vld [vmem:[#allocation27 + $0x60] sm:$0xff] }
 0xa47   :  { %6618 = vmatprep.subr.bf16.mxu1 %v6617_v3  ;;  %v5716_v3 = vld [vmem:[#allocation27 + $0x1e8] sm:$0xff] }
 0xa49   :  { %5503 = vmatpush1.bf16.msra.mxu0 %v5352_v51  ;;  %v5586_v51 = vld [vmem:[#allocation27 + $0x68] sm:$0xff] }
 0xa4a   :  { %5504 = vmatprep.subr.bf16.mxu0 %v5355_v9  ;;  %v5603_v9 = vld [vmem:[#allocation27 + $0xf0] sm:$0xff] }
 0xa4d   :  { %5505 = vmatpush1.bf16.msra.mxu0 %v5354_v8  ;;  %v6619_v8 = vpack.c.bf16 %v5586_v51, %v5585_v19  ;;  %v6647_v19 = vpack.c.bf16 %v5698_v5, %v5697_v4  ;;  %v6649_v51 = vpack.c.bf16 %v5716_v3, %v5715_v7 }
 0xa4e   :  { %5506 = vmatprep.subr.bf16.mxu0 %v5357_v30  ;;  %v5604_v30 = vld [vmem:[#allocation27 + $0xf8] sm:$0xff] }
 0xa4f   :  { %6620 = vmatpush3.bf16.msra.mxu1 %v6619_v8  ;;  %v5700_v8 = vld [vmem:[#allocation27 + $0x168] sm:$0xff] }
 0xa51   :  { %5507 = vmatpush1.bf16.msra.mxu0 %v5356_v27  ;;  %v5587_v27 = vld [vmem:[#allocation27 + $0x70] sm:$0xff] }
 0xa52   :  { %5508 = vmatprep.subr.bf16.mxu0 %v5359_v10  ;;  %v5588_v10 = vld [vmem:[#allocation27 + $0x78] sm:$0xff] }
 0xa55   :  { %5509 = vmatpush1.bf16.msra.mxu0 %v5358_v11  ;;  %v6621_v11 = vpack.c.bf16 %v5604_v30, %v5603_v9  ;;  %v5699_v9 = vld [vmem:[#allocation27 + $0x160] sm:$0xff]  ;;  %v5717_v30 = vld [vmem:[#allocation27 + $0x1f0] sm:$0xff] }
 0xa56   :  { %5510 = vmatprep.subr.bf16.mxu0 %v5361_v12  ;;  %v6623_v12 = vpack.c.bf16 %v5588_v10, %v5587_v27  ;;  %v5718_v27 = vld [vmem:[#allocation27 + $0x1f8] sm:$0xff]  ;;  %v6651_v10 = vpack.c.bf16 %v5700_v8, %v5699_v9 }
 0xa57   :  { %6622 = vmatprep.subr.bf16.mxu1 %v6621_v11  ;;  %v6653_v11 = vpack.c.bf16 %v5718_v27, %v5717_v30 }
 0xa58   :  { %6624 = vmatpush3.bf16.msra.mxu1 %v6623_v12  ;;  %v5701_v12 = vld [vmem:[#allocation27 + $0x170] sm:$0xff] }
 0xa59   :  { %5511 = vmatpush1.bf16.msra.mxu0 %v5360_v13  ;;  %v5703_v13 = vld [vmem:[#allocation27 + $0x180] sm:$0xff] }
 0xa5a   :  { %5512 = vmatprep.subr.bf16.mxu0 %v5363_v14  ;;  %v5704_v14 = vld [vmem:[#allocation27 + $0x188] sm:$0xff] }
 0xa5d   :  { %5513 = vmatpush1.bf16.msra.mxu0 %v5362_v15  ;;  %v6625_v15 = vpack.c.bf16 %v5704_v14, %v5703_v13  ;;  %v5702_v13 = vld [vmem:[#allocation27 + $0x178] sm:$0xff] }
 0xa5e   :  { %5523 = vmatprep.subr.bf16.mxu0 %v5365_v16  ;;  %v6655_v14 = vpack.c.bf16 %v5702_v13, %v5701_v12 }
 0xa5f   :  { %6626 = vmatprep.subr.bf16.mxu1 %v6625_v15 }
 0xa60   :  { %5515 = vmatmul.mubr.bf16.vlgmr.msra.gmra.mrb[40].mxu0 %v7948_v17  ;;  %v5374_v17 = vld [vmem:[#allocation15 + $0x250] sm:$0xff] }
 0xa61   :  { %5524 = vmatpush1.bf16.msra.mxu0 %v5364_v25  ;;  %5555 = vmatprep.mubr.bf16.mxu0 %v5434_v24 }
 0xa62   :  { %5525 = vmatprep.subr.bf16.mxu0 %v5367_v6 }
 0xa65   :  { %5526 = vmatpush1.bf16.msra.mxu0 %v5366_v29 }
 0xa66   :  { %5527 = vmatprep.subr.bf16.mxu0 %v5369_v49 }
 0xa69   :  { %5528 = vmatpush1.bf16.msra.mxu0 %v5368_v32 }
 0xa6a   :  { %5529 = vmatprep.subr.bf16.mxu0 %v5371_v53 }
 0xa6d   :  { %5530 = vmatpush1.bf16.msra.mxu0 %v5370_v2 }
 0xa6e   :  { %5531 = vmatprep.subr.bf16.mxu0 %v5373_v33 }
 0xa71   :  { %5532 = vmatpush1.bf16.msra.mxu0 %v5372_v34 }
 0xa72   :  { %5533 = vmatprep.subr.bf16.mxu0 %v5375_v52  ;;  %v5687_v52 = vld [vmem:[#allocation27 + $0x100] sm:$0xff] }
 0xa75   :  { %5534 = vmatpush1.bf16.msra.mxu0 %v5374_v17  ;;  %v5688_v17 = vld [vmem:[#allocation27 + $0x108] sm:$0xff] }
 0xa76   :  { %5535 = vmatprep.subr.bf16.mxu0 %v5377_v26  ;;  %v5705_v26 = vld [vmem:[#allocation27 + $0x190] sm:$0xff] }
 0xa79   :  { %5536 = vmatpush1.bf16.msra.mxu0 %v5376_v23  ;;  %v5706_v23 = vld [vmem:[#allocation27 + $0x198] sm:$0xff] }
 0xa7a   :  { %5537 = vmatprep.subr.bf16.mxu0 %v5379_v31 }
 0xa7d   :  { %5538 = vmatpush1.bf16.msra.mxu0 %v5378_v35 }
 0xa7e   :  { %5539 = vmatprep.subr.bf16.mxu0 %v5381_v36  ;;  %v6627_v36 = vpack.c.bf16 %v5688_v17, %v5687_v52  ;;  %v5805_v17 = vld [vmem:[#allocation30 + $0x40] sm:$0xff] }
 0xa81   :  { %5540 = vmatpush1.bf16.msra.mxu0 %v5380_v37  ;;  %v6629_v37 = vpack.c.bf16 %v5706_v23, %v5705_v26  ;;  %v5806_v26 = vld [vmem:[#allocation30 + $0x48] sm:$0xff] }
 0xa82   :  { %5541 = vmatprep.subr.bf16.mxu0 %v5383_v38  ;;  %v5689_v38 = vld [vmem:[#allocation27 + $0x110] sm:$0xff]  ;;  %v6670_v23 = vpack.c.bf16 %v5806_v26, %v5805_v17 }
 0xa85   :  { %5542 = vmatpush1.bf16.msra.mxu0 %v5382_v39  ;;  %v5690_v39 = vld [vmem:[#allocation27 + $0x118] sm:$0xff] }
 0xa86   :  { %5543 = vmatprep.subr.bf16.mxu0 %v5385_v28 }
 0xa89   :  { %5544 = vmatpush1.bf16.msra.mxu0 %v5384_v47  ;;  %v5707_v47 = vld [vmem:[#allocation27 + $0x1a0] sm:$0xff] }
 0xa8a   :  { %5545 = vmatprep.subr.bf16.mxu0 %v5387_v44  ;;  %v5708_v44 = vld [vmem:[#allocation27 + $0x1a8] sm:$0xff] }
 0xa8d   :  { %5546 = vmatpush1.bf16.msra.mxu0 %v5386_v63  ;;  %v6631_v63 = vpack.c.bf16 %v5690_v39, %v5689_v38  ;;  %v5811_v38 = vld [vmem:[#allocation30 + $0x70] sm:$0xff]  ;;  %v5812_v39 = vld [vmem:[#allocation30 + $0x78] sm:$0xff] }
 0xa8e   :  { %5547 = vmatprep.subr.bf16.mxu0 %v5389_v46  ;;  %v6633_v46 = vpack.c.bf16 %v5708_v44, %v5707_v47 }
 0xa91   :  { %5548 = vmatpush1.bf16.msra.mxu0 %v5388_v50  ;;  %v5691_v50 = vld [vmem:[#allocation27 + $0x120] sm:$0xff] }
 0xa92   :  { %5549 = vmatprep.subr.bf16.mxu0 %v5391_v54  ;;  %v5692_v54 = vld [vmem:[#allocation27 + $0x128] sm:$0xff] }
 0xa95   :  { %5550 = vmatpush1.bf16.msra.mxu0 %v5390_v55  ;;  %v5709_v55 = vld [vmem:[#allocation27 + $0x1b0] sm:$0xff] }
 0xa96   :  { %5551 = vmatprep.subr.bf16.mxu0 %v5393_v41  ;;  %v5710_v41 = vld [vmem:[#allocation27 + $0x1b8] sm:$0xff] }
 0xa99   :  { %5552 = vmatpush1.bf16.msra.mxu0 %v5392_v43  ;;  %v6635_v43 = vpack.c.bf16 %v5692_v54, %v5691_v50 }
 0xa9a   :  { %5553 = vmatprep.subr.bf16.mxu0 %v5395_v56  ;;  %v6637_v56 = vpack.c.bf16 %v5710_v41, %v5709_v55 }
 0xa9d   :  { %5554 = vmatpush1.bf16.msra.mxu0 %v5394_v57  ;;  %v5693_v57 = vld [vmem:[#allocation27 + $0x130] sm:$0xff] }
 0xa9e   :  { %v6639_v59 = vpack.c.bf16 %v5694_v58, %v5693_v57  ;;  %v6189_v57 = vld [vmem:[#allocation31] ss:$0 sm:$0xff] }
 0xaa0   :  { %5556 = vmatmul.mubr.bf16.vlgmr.msra.gmra.mrb[40].mxu0 %v7952_v60  ;;  %v5396_v60 = vld [vmem:[#allocation25] sm:$0x3] }
 0xaa1   :  { %v5401_v16 = vrot.slane %v5396_v60, %v7695_v21  ;;  %v5405_v24 = vrot.slane %v5396_v60, %v7698_v22  ;;  %v5797_v60 = vld [vmem:[#allocation30] sm:$0xff]  ;;  %6590 = vmatprep.mubr.msk.f32.mxu0 %vm7366_vm14, %v7362_v0 }
 0xb73   :  { %v5557_v25 = vpop.f32.mrb[40].mxu0 }
 0xb74   :  { %v6705_v6 = vadd.f32 %v5557_v25, %v5401_v16  ;;  %v5559_v29 = vpop.f32.mrb[41].mxu0  ;;  %v5798_v16 = vld [vmem:[#allocation30 + $0x8] sm:$0xff]  ;;  %v7365_v25 = vmov 0.0|0.0  }
 0xb75   :  { %v6706_v49 = vadd.f32 %v5559_v29, %v5405_v24  ;;  %v5561_v32 = vpop.f32.mrb[42].mxu0  ;;  %v5799_v24 = vld [vmem:[#allocation30 + $0x10] sm:$0xff]  ;;  %6657 = vmatprep.subr.bf16.mxu0 %v7365_v25  ;;  %v5800_v29 = vld [vmem:[#allocation30 + $0x18] sm:$0xff] }
 0xb76   :  { %v5564_v53 = vmax.f32 %v6705_v6, 0.0  ;;  %v5562_v2 = vpop.f32.mrb[43].mxu0  ;;  %v6658_v6 = vpack.c.bf16 %v5798_v16, %v5797_v60  ;;  %v5801_v32 = vld [vmem:[#allocation30 + $0x20] sm:$0xff] }
 0xb77   :  { %v5565_v33 = vmax.f32 %v6706_v49, 0.0  ;;  %v6661_v49 = vpack.c.bf16 %v5800_v29, %v5799_v24 }
 0xb78   :  { %6659 = vmatpush3.bf16.msra.mxu0 %v6658_v6 }
 0xb79   :  { %v5568_v34 = vcombine.low %v5564_v53, %v5565_v33  ;;  %6660 = vmatprep.subr.bf16.mxu0 %v7365_v25  ;;  %v5802_v53 = vld [vmem:[#allocation30 + $0x28] sm:$0xff]  ;;  %v5803_v33 = vld [vmem:[#allocation30 + $0x30] sm:$0xff] }
 0xb7a   :  { %v6664_v2 = vpack.c.bf16 %v5802_v53, %v5801_v32 }
 0xb7b   :  { %5570 = vst [vmem:[#allocation6] sm:$0xff] %v5568_v34  ;;  %v5804_v34 = vld [vmem:[#allocation30 + $0x38] sm:$0xff] }
 0xb7c   :  { %6662 = vmatpush3.bf16.msra.mxu0 %v6661_v49  ;;  %v6667_v52 = vpack.c.bf16 %v5804_v34, %v5803_v33 }
 0xb7d   :  { %6663 = vmatprep.subr.bf16.mxu0 %v7365_v25 }
 0xb80   :  { %6665 = vmatpush3.bf16.msra.mxu0 %v6664_v2 }
 0xb81   :  { %6666 = vmatprep.subr.bf16.mxu0 %v7365_v25 }
 0xb82   :  { %v5572_v31 = vld [vmem:[#allocation6] sm:$0x33]  ;;  %v7960_v35 = vld [vmem:[#allocation6] sm:$0xcc] }
 0xb83   :  { %v5606_v21 = vcombine.high %v5572_v31, %v5572_v31  ;;  %v5720_v22 = vcombine.high %v7960_v35, %v7960_v35  ;;  %v5721_v15 = vrot.slane %v7960_v35, 2  ;;  %v5808_v35 = vld [vmem:[#allocation30 + $0x58] sm:$0xff] }
 0xb84   :  { %6668 = vmatpush3.bf16.msra.mxu0 %v6667_v52 }
 0xb85   :  { %5672 = vmatprep.mubr.f32.mxu1 %v5606_v21  ;;  %v5722_v28 = vrot.slane %v5720_v22, 2  ;;  %6669 = vmatprep.subr.bf16.mxu0 %v7365_v25  ;;  %v5810_v22 = vld [vmem:[#allocation30 + $0x68] sm:$0xff] }
 0xb86   :  { %5673 = vmatmul.mubr.f32.vlgmr.msra.gmra.mrb[32].mxu1 %v5572_v31  ;;  %v5807_v31 = vld [vmem:[#allocation30 + $0x50] sm:$0xff] }
 0xb87   :  { %6628 = vmatpush3.bf16.msra.mxu1 %v6627_v36  ;;  %5789 = vmatprep.mubr.f32.mxu1 %v5722_v28  ;;  %v6673_v21 = vpack.c.bf16 %v5808_v35, %v5807_v31  ;;  %v5809_v36 = vld [vmem:[#allocation30 + $0x60] sm:$0xff]  ;;  %v6679_v28 = vpack.c.bf16 %v5812_v39, %v5811_v38 }
 0xb88   :  { %6630 = vmatprep.subr.bf16.mxu1 %v6629_v37  ;;  %6671 = vmatpush3.bf16.msra.mxu0 %v6670_v23  ;;  %v6676_v37 = vpack.c.bf16 %v5810_v22, %v5809_v36 }
 0xb89   :  { %6672 = vmatprep.subr.bf16.mxu0 %v7365_v25 }
 0xb8b   :  { %6632 = vmatpush3.bf16.msra.mxu1 %v6631_v63 }
 0xb8c   :  { %6634 = vmatprep.subr.bf16.mxu1 %v6633_v46  ;;  %6674 = vmatpush3.bf16.msra.mxu0 %v6673_v21  ;;  %v6188_v46 = vld [vmem:[#allocation28] ss:$0 sm:$0xff] }
 0xb8d   :  { %6675 = vmatprep.subr.bf16.mxu0 %v7365_v25 }
 0xb8f   :  { %6636 = vmatpush3.bf16.msra.mxu1 %v6635_v43 }
 0xb90   :  { %6638 = vmatprep.subr.bf16.mxu1 %v6637_v56  ;;  %6677 = vmatpush3.bf16.msra.mxu0 %v6676_v37 }
 0xb91   :  { %6678 = vmatprep.subr.bf16.mxu0 %v7365_v25 }
 0xb93   :  { %6640 = vmatpush3.bf16.msra.mxu1 %v6639_v59 }
 0xb94   :  { %6642 = vmatprep.subr.bf16.mxu1 %v6641_v61  ;;  %6680 = vmatpush3.bf16.msra.mxu0 %v6679_v28 }
 0xb97   :  { %6644 = vmatpush3.bf16.msra.mxu1 %v6643_v45 }
 0xb98   :  { %6646 = vmatprep.subr.bf16.mxu1 %v6645_v48 }
 0xb9b   :  { %6648 = vmatpush3.bf16.msra.mxu1 %v6647_v19 }
 0xb9c   :  { %6650 = vmatprep.subr.bf16.mxu1 %v6649_v51 }
 0xb9f   :  { %6652 = vmatpush3.bf16.msra.mxu1 %v6651_v10 }
 0xba0   :  { %6654 = vmatprep.subr.bf16.mxu1 %v6653_v11 }
 0xba3   :  { %6656 = vmatpush3.bf16.msra.mxu1 %v6655_v14 }
 0xba6   :  { %5790 = vmatmul.mubr.f32.vlgmr.msra.gmra.mrb[34].mxu1 %v5721_v15 }
 0xc59   :  { %v6483_v47 = vpop.f32.mrb[32].mxu1 }
 0xc5a   :  { %v6484_v44 = vpop.f32.mrb[33].mxu1 }
 0xc5b   :  { %v6485_v63 = vadd.f32 %v6484_v44, %v6483_v47 }
 0xc5d   :  { %v5684_v55 = vadd.f32 %v6485_v63, %v6188_v46 }
 0xc79   :  { %v6518_v50 = vpop.f32.mrb[34].mxu1 }
 0xc7a   :  { %v6519_v54 = vpop.f32.mrb[35].mxu1 }
 0xc7b   :  { %v6520_v41 = vadd.f32 %v6519_v54, %v6518_v50 }
 0xc7d   :  { %v5795_v43 = vadd.f32 %v6520_v41, %v5684_v55 }
 0xc7f   :  { %v5796_v56 = vmax.f32 %v5795_v43, 0.0 }
 0xc81   :  { %6591 = vmatmul.mubr.f32.vlgmr.msra.gmra.mrb[44].mxu0 %v5796_v56 }
 0xd54   :  { %v5886_v58 = vpop.f32.mrb[44].mxu0 }
 0xd55   :  { %v5887_v42 = vadd.f32 %v6189_v57, %v5886_v58  ;;  %v6592_v18 = vpop.f32.mrb[45].mxu0 }
 0xd57   :  { %v5890_v59 = vsub.f32 0.0, %v5887_v42 }
 0xd59   :  { %v5891_v61 = vmul.f32 1.442695, %v5890_v59 }
 0xd5b   :  { %7085 = vpow2.f32 %v5891_v61 }
 0xd65   :  { %v7086_v62 = vpop.eup %7085 }
 0xd66   :  { %v5893_v0 = vadd.f32 1.0, %v7086_v62 }
 0xd68   :  { %7087 = vrcp.f32 %v5893_v0 }
 0xd72   :  { %v7088_v20 = vpop.eup %7087 }
 0xd73   :  { %5896 = vst [vmem:[%s7984_s15] sm:$0x3] %v7088_v20 }
 0xd74   :  { %5901 = vsyncpa [#allocation18], 1 }
 0xd75   :  { %5902 = vsyncpa [#allocation20], 1 }
 0xd76   :  { %5903 = vsyncpa [#allocation23], 1 }
 0xd77   :  { %5904 = vsyncpa [#allocation26], 1 }
 0xd78   :  { %5905 = vsyncpa [#allocation29], 1 }
 0xd79   :  { %5906 = vsyncpa [#allocation32], 1 }
 0xd7a   :  { %5907 = vsyncmov [#allocation16] }
 0xd7d   :  { %s5908_s5 = vpop.sfrf %5907 }
 0xd7e   :  { %p6190_p10 = scmp.ne.s32.totalorder %s5908_s5, 0 }
 0xd80   :  { %5912 = shalt.err (%p6190_p10)  }
 0xd81   :  { %5914 = vsyncmov [#allocation16 + $0x1] }
 0xd84   :  { %s5915_s9 = vpop.sfrf %5914 }
 0xd85   :  { %p6191_p11 = scmp.ne.s32.totalorder %s5915_s9, 0 }
 0xd87   :  { %5919 = shalt.err (%p6191_p11)  }
 0xd88   :  { %5921 = vsyncmov [#allocation16 + $0x2] }
 0xd8b   :  { %s5922_s7 = vpop.sfrf %5921 }
 0xd8c   :  { %p6192_p12 = scmp.ne.s32.totalorder %s5922_s7, 0 }
 0xd8e   :  { %5926 = shalt.err (%p6192_p12)  }
 0xd8f   :  { %5928 = vsyncmov [#allocation16 + $0x3] }
 0xd92   :  { %s5929_s15 = vpop.sfrf %5928 }
 0xd93   :  { %p6193_p13 = scmp.ne.s32.totalorder %s5929_s15, 0 }
 0xd95   :  { %5933 = shalt.err (%p6193_p13)  }

</bundles_post_ra>
